<compile_context>
chip_gen: v7x
topology: tpu7x:2x2x1
jax: 0.10.0
libtpu: 0.0.40
codegen_flags: <defaults>
</compile_context>

<pallas_src>
import math

import jax
import jax.numpy as jnp
from jax.experimental import pallas as pl
from jax.experimental.pallas import tpu as pltpu


_INV_SQRT2 = 1.0 / math.sqrt(2.0)
_PARALLEL = pltpu.CompilerParams(dimension_semantics=("parallel",))


def _gelu(x):
    """Exact (erf) GELU, matching torch.nn.GELU / HF ACT2FN['gelu']."""
    return 0.5 * x * (1.0 + jax.lax.erf(x * _INV_SQRT2))


def _dw3x3_layernorm(tap_fn, w2, gamma, beta, mask_l, mask_r, C, HW):
    """9-tap depthwise 3x3 accumulation + LayerNorm2d on flattened (C, H*W) data.

    tap_fn(dy, dx) -> (tap_value of shape (C, HW), coarse column shift dj).
    Taps whose column shift walks off a row edge are masked (the row direction
    is handled by the zero halo of the flattened source buffer).
    """
    acc = jnp.zeros((C, HW), jnp.float32)
    for dy in range(3):
        for dx in range(3):
            tap, dj = tap_fn(dy, dx)
            term = tap * w2[:, 3 * dy + dx:3 * dy + dx + 1]
            if dj == -1:
                term = term * mask_l
            elif dj == 1:
                term = term * mask_r
            acc = acc + term
    # timm.layers.LayerNorm2d: per-pixel LayerNorm over channels (biased var, eps=1e-6).
    # Channels live on the sublane axis (C == 8) -> cheap sublane reduce.
    mean = jnp.mean(acc, axis=0, keepdims=True)
    var = jnp.mean(jnp.square(acc - mean), axis=0, keepdims=True)
    normed = (acc - mean) * jax.lax.rsqrt(var + 1e-6)
    return normed * gamma + beta


# ----------------------------------------------------------------------------
# Fused ScaleBlock kernels
# ----------------------------------------------------------------------------

def _make_upscale_kernel(C, H, W, halo):
    """ConvTranspose2d(k=2,s=2) -> GELU -> depthwise 3x3 (pad=1) -> LayerNorm2d."""
    HW = H * W

    def kernel(x_ref, w1_ref, b1_ref, w2_ref, gamma_ref, beta_ref, o_ref, gpad_ref):
        # x_ref     : (C, H*W)            channel-major input
        # w1_ref    : (4C, C)             w1_ref[(2a+b)*C + co, ci] == torch w1[ci, co, a, b]
        # b1_ref    : (4C, 1)             ConvTranspose bias, tiled over the 4 positions
        # w2_ref    : (C, 9)              depthwise weights, [c, 3*dy+dx]
        # gamma/beta: (C, 1)              LayerNorm2d affine
        # o_ref     : (4, C, H*W)         o_ref[2a+b] = output on parity sub-lattice (a, b)
        # gpad_ref  : (4C, HW + 2*halo)   zero-haloed, GELU'd ConvTranspose output (scratch)

        # ConvTranspose2d(k=2, s=2): single fused channel matmul for all 4 kernel
        # positions, then exact GELU applied exactly once per element.
        y = jnp.dot(w1_ref[...], x_ref[...],
                    preferred_element_type=jnp.float32) + b1_ref[...]
        g = _gelu(y)                                      # (4C, HW)
        gpad_ref[...] = jnp.zeros_like(gpad_ref)          # gelu(0) == 0, so the zero
        gpad_ref[:, halo:halo + HW] = g                   # halo is the conv zero-pad

        w2 = w2_ref[...]
        gamma = gamma_ref[...]
        beta = beta_ref[...]
        col = jax.lax.broadcasted_iota(jnp.int32, (1, HW), 1) % W
        mask_l = (col != 0).astype(jnp.float32)
        mask_r = (col != W - 1).astype(jnp.float32)

        # Depthwise 3x3 on the (2H, 2W) grid, decomposed by the parity (a, b) of
        # the output pixel: each of its 9 taps lands on one of the 4 ConvTranspose
        # sub-lattice images, shifted by (di, dj) in {-1, 0, 1} coarse pixels.
        for a in (0, 1):
            for b in (0, 1):
                def tap_fn(dy, dx, a=a, b=b):
                    u, v = a + dy - 1, b + dx - 1
                    ap, di = u % 2, u // 2
                    bp, dj = v % 2, v // 2
                    ksrc = 2 * ap + bp
                    start = halo + di * W + dj
                    tap = gpad_ref[ksrc * C:(ksrc + 1) * C, start:start + HW]
                    return tap, dj

                out = _dw3x3_layernorm(tap_fn, w2, gamma, beta,
                                       mask_l, mask_r, C, HW)
                o_ref[2 * a + b] = out.astype(o_ref.dtype)

    return kernel


def _make_downscale_kernel(C, H, W, halo):
    """MaxPool2d(k=2,s=2) -> GELU -> depthwise 3x3 (pad=1) -> LayerNorm2d.

    H, W are the *pooled* spatial dims.
    """
    HW = H * W

    def kernel(xs_ref, w2_ref, gamma_ref, beta_ref, o_ref, gpad_ref):
        # xs_ref    : (4, C, H*W)        the four 2x2-window sub-lattices of the input
        # gpad_ref  : (C, HW + 2*halo)   zero-haloed, GELU'd pooled activation (scratch)
        m = jnp.maximum(jnp.maximum(xs_ref[0], xs_ref[1]),
                        jnp.maximum(xs_ref[2], xs_ref[3]))   # MaxPool2d(k=2, s=2)
        g = _gelu(m)                                         # GELU once, after pooling
        gpad_ref[...] = jnp.zeros_like(gpad_ref)
        gpad_ref[:, halo:halo + HW] = g

        w2 = w2_ref[...]
        gamma = gamma_ref[...]
        beta = beta_ref[...]
        col = jax.lax.broadcasted_iota(jnp.int32, (1, HW), 1) % W
        mask_l = (col != 0).astype(jnp.float32)
        mask_r = (col != W - 1).astype(jnp.float32)

        def tap_fn(dy, dx):
            di, dj = dy - 1, dx - 1
            start = halo + di * W + dj
            return gpad_ref[:, start:start + HW], dj

        out = _dw3x3_layernorm(tap_fn, w2, gamma, beta, mask_l, mask_r, C, HW)
        o_ref[...] = out.astype(o_ref.dtype)

    return kernel


# ----------------------------------------------------------------------------
# Wrappers (one pallas_call per ScaleBlock)
# ----------------------------------------------------------------------------

def _halo_for(W):
    return -(-(W + 1) // 128) * 128          # lane-aligned halo, >= W + 1


def upscale_block(x, p):
    """ScaleBlock with ConvTranspose2d(k=2,s=2).  x: (N, C, H, W) -> (N, C, 2H, 2W)."""
    N, C, H, W = x.shape
    HW = H * W
    halo = _halo_for(W)
    # Pack torch-layout params into kernel layout (tiny, one-time glue).
    w1cat = p["w1"].transpose(2, 3, 1, 0).reshape(4 * C, C)   # [(2a+b)*C + co, ci]
    b1cat = jnp.tile(p["b1"], 4).reshape(4 * C, 1)
    w2 = p["w2"].reshape(C, 9)
    gamma = p["gamma"].reshape(C, 1)
    beta = p["beta"].reshape(C, 1)

    raw = pl.pallas_call(
        _make_upscale_kernel(C, H, W, halo),
        out_shape=jax.ShapeDtypeStruct((N, 4, C, HW), jnp.float32),
        grid=(N,),
        in_specs=[
            pl.BlockSpec((None, C, HW), lambda n: (n, 0, 0)),
            pl.BlockSpec((4 * C, C), lambda n: (0, 0)),
            pl.BlockSpec((4 * C, 1), lambda n: (0, 0)),
            pl.BlockSpec((C, 9), lambda n: (0, 0)),
            pl.BlockSpec((C, 1), lambda n: (0, 0)),
            pl.BlockSpec((C, 1), lambda n: (0, 0)),
        ],
        out_specs=pl.BlockSpec((None, 4, C, HW), lambda n: (n, 0, 0, 0)),
        scratch_shapes=[pltpu.VMEM((4 * C, HW + 2 * halo), jnp.float32)],
        compiler_params=_PARALLEL,
    )(x.reshape(N, C, HW), w1cat, b1cat, w2, gamma, beta)

    # Re-interleave the 4 parity sub-lattices into the full-res output (layout glue only).
    full = raw.reshape(N, 2, 2, C, H, W).transpose(0, 3, 4, 1, 5, 2)
    return full.reshape(N, C, 2 * H, 2 * W)


def downscale_block(x, p):
    """ScaleBlock with MaxPool2d(k=2,s=2).  x: (N, C, H, W) -> (N, C, H/2, W/2)."""
    N, C, H, W = x.shape
    Ho, Wo = H // 2, W // 2
    HW = Ho * Wo
    halo = _halo_for(Wo)
    w2 = p["w2"].reshape(C, 9)
    gamma = p["gamma"].reshape(C, 1)
    beta = p["beta"].reshape(C, 1)
    # The four 2x2-window sub-lattices (together just a permutation of x).
    xs = jnp.stack([x[:, :, 0::2, 0::2], x[:, :, 0::2, 1::2],
                    x[:, :, 1::2, 0::2], x[:, :, 1::2, 1::2]], axis=1)
    xs = xs.reshape(N, 4, C, HW)

    out = pl.pallas_call(
        _make_downscale_kernel(C, Ho, Wo, halo),
        out_shape=jax.ShapeDtypeStruct((N, C, HW), jnp.float32),
        grid=(N,),
        in_specs=[
            pl.BlockSpec((None, 4, C, HW), lambda n: (n, 0, 0, 0)),
            pl.BlockSpec((C, 9), lambda n: (0, 0)),
            pl.BlockSpec((C, 1), lambda n: (0, 0)),
            pl.BlockSpec((C, 1), lambda n: (0, 0)),
        ],
        out_specs=pl.BlockSpec((None, C, HW), lambda n: (n, 0, 0)),
        scratch_shapes=[pltpu.VMEM((C, HW + 2 * halo), jnp.float32)],
        compiler_params=_PARALLEL,
    )(xs, w2, gamma, beta)
    return out.reshape(N, C, Ho, Wo)


def feature_pyramid(x, params):
    """Returns outputs for scales sorted descending: [4, 2, 1, 1/2].  NCHW in/out."""
    h = x
    for p in params["scale4"]:               # two chained upscale ScaleBlocks
        h = upscale_block(h, p)
    return [
        h,
        upscale_block(x, params["scale2"][0]),
        x,                                    # scale 1 -> nn.Identity
        downscale_block(x, params["scale_half"][0]),
    ]


# ----------------------------------------------------------------------------
# Deterministic parameter init (torch layouts) + pure-JAX reference
# ----------------------------------------------------------------------------

def _init_block(key, C, with_convt):
    k1, k2, k3, k4, k5 = jax.random.split(key, 5)
    p = {
        "w2": 0.1 * jax.random.normal(k3, (C, 3, 3), jnp.float32),        # Conv2d groups=C, no bias
        "gamma": 1.0 + 0.05 * jax.random.normal(k4, (C,), jnp.float32),   # LayerNorm2d weight
        "beta": 0.05 * jax.random.normal(k5, (C,), jnp.float32),          # LayerNorm2d bias
    }
    if with_convt:  # ConvTranspose2d(C, C, k=2, s=2): weight (Cin, Cout, 2, 2), bias (Cout,)
        p["w1"] = 0.1 * jax.random.normal(k1, (C, C, 2, 2), jnp.float32)
        p["b1"] = 0.1 * jax.random.normal(k2, (C,), jnp.float32)
    return p


def init_feature_pyramid(key, C):
    k0, k1, k2, k3 = jax.random.split(key, 4)
    return {
        "scale4": [_init_block(k0, C, True), _init_block(k1, C, True)],
        "scale2": [_init_block(k2, C, True)],
        "scale_half": [_init_block(k3, C, False)],   # conv1 is MaxPool2d (no params)
    }


def _ref_scale_block(x, p, pool):
    if pool:
        N, C, H, W = x.shape
        y = x.reshape(N, C, H // 2, 2, W // 2, 2).max(axis=(3, 5))
    else:
        y = jnp.einsum("ncij,cdab->ndiajb", x, p["w1"],
                       precision=jax.lax.Precision.HIGHEST)
        N, C, H, _, W, _ = y.shape
        y = y.reshape(N, C, 2 * H, 2 * W) + p["b1"][None, :, None, None]
    g = _gelu(y)
    N, C, Hf, Wf = g.shape
    gp = jnp.pad(g, ((0, 0), (0, 0), (1, 1), (1, 1)))
    acc = jnp.zeros_like(g)
    for dy in range(3):
        for dx in range(3):
            acc = acc + p["w2"][None, :, dy, dx, None, None] * gp[:, :, dy:dy + Hf, dx:dx + Wf]
    mean = acc.mean(axis=1, keepdims=True)
    var = jnp.square(acc - mean).mean(axis=1, keepdims=True)
    normed = (acc - mean) * jax.lax.rsqrt(var + 1e-6)
    return normed * p["gamma"][None, :, None, None] + p["beta"][None, :, None, None]


def feature_pyramid_ref(x, params):
    h = x
    for p in params["scale4"]:
        h = _ref_scale_block(h, p, pool=False)
    return [h,
            _ref_scale_block(x, params["scale2"][0], pool=False),
            x,
            _ref_scale_block(x, params["scale_half"][0], pool=True)]


# ----------------------------------------------------------------------------

if __name__ == "__main__":
    key = jax.random.PRNGKey(0)
    N, C, H, W = 2, 8, 16, 16
    kx, kp = jax.random.split(key)
    x = jax.random.normal(kx, (N, C, H, W), jnp.float32)     # NCHW, as in PyTorch
    params = init_feature_pyramid(kp, C)

    outs = jax.jit(feature_pyramid)(x, params)
    outs = [jax.block_until_ready(o) for o in outs]

    assert outs[0].shape == (N, C, 4 * H, 4 * W)
    assert outs[1].shape == (N, C, 2 * H, 2 * W)
    assert outs[2].shape == (N, C, H, W)
    assert outs[3].shape == (N, C, H // 2, W // 2)
    assert all(bool(jnp.isfinite(o).all()) for o in outs)

    # Numerical check against a pure-JAX reference of the PyTorch forward pass.
    refs = feature_pyramid_ref(x, params)
    for o, r in zip(outs, refs):
        err = float(jnp.max(jnp.abs(o - r)))
        assert err < 2e-3, f"mismatch vs reference: {err}"

    print("KERNEL_OK")
</pallas_src>

<mosaic_0001>
module attributes {stable_mosaic.version = 11 : i64} {
  func.func @kernel(%arg0: i32, %arg1: memref<1x8x256xf32, #tpu.memory_space<vmem>>, %arg2: memref<32x8xf32, #tpu.memory_space<vmem>>, %arg3: memref<32x1xf32, #tpu.memory_space<vmem>>, %arg4: memref<8x9xf32, #tpu.memory_space<vmem>>, %arg5: memref<8x1xf32, #tpu.memory_space<vmem>>, %arg6: memref<8x1xf32, #tpu.memory_space<vmem>>, %arg7: memref<1x4x8x256xf32, #tpu.memory_space<vmem>>, %arg8: memref<32x512xf32, #tpu.memory_space<vmem>>) attributes {dimension_semantics = [#tpu.dimension_semantics<parallel>], iteration_bounds = array<i64: 2>, scalar_prefetch = 0 : i64, scratch_operands = 1 : i64, tpu.core_type = #tpu.core_type<tc>, window_params = [{transform_indices = @transform_0, window_bounds = array<i64: 1, 8, 256>}, {pipeline_mode = #tpu.pipeline_mode<synchronous>, transform_indices = @transform_1, window_bounds = array<i64: 32, 8>}, {pipeline_mode = #tpu.pipeline_mode<synchronous>, transform_indices = @transform_2, window_bounds = array<i64: 32, 1>}, {pipeline_mode = #tpu.pipeline_mode<synchronous>, transform_indices = @transform_3, window_bounds = array<i64: 8, 9>}, {pipeline_mode = #tpu.pipeline_mode<synchronous>, transform_indices = @transform_4, window_bounds = array<i64: 8, 1>}, {pipeline_mode = #tpu.pipeline_mode<synchronous>, transform_indices = @transform_5, window_bounds = array<i64: 8, 1>}, {transform_indices = @transform_6, window_bounds = array<i64: 1, 4, 8, 256>}]} {
    %c0 = arith.constant 0 : index
    %c0_0 = arith.constant 0 : index
    %0 = vector.load %arg2[%c0, %c0_0] : memref<32x8xf32, #tpu.memory_space<vmem>>, vector<32x8xf32>
    %c0_1 = arith.constant 0 : index
    %c0_2 = arith.constant 0 : index
    %c0_3 = arith.constant 0 : index
    %1 = vector.load %arg1[%c0_1, %c0_2, %c0_3] : memref<1x8x256xf32, #tpu.memory_space<vmem>>, vector<1x8x256xf32>
    %2 = vector.shape_cast %1 : vector<1x8x256xf32> to vector<8x256xf32>
    %cst = arith.constant dense<0.000000e+00> : vector<32x256xf32>
    %3 = tpu.matmul %0, %2, %cst {dimension_numbers = #tpu.dot_dimension_numbers<[1], [0], [0], [1], [0, 0, 1, 1], [], []>} : vector<32x8xf32>, vector<8x256xf32>, vector<32x256xf32> -> vector<32x256xf32>
    %c0_4 = arith.constant 0 : index
    %c0_5 = arith.constant 0 : index
    %4 = vector.load %arg3[%c0_4, %c0_5] : memref<32x1xf32, #tpu.memory_space<vmem>>, vector<32x1xf32>
    %5 = vector.broadcast %4 : vector<32x1xf32> to vector<32x256xf32>
    %6 = arith.addf %3, %5 : vector<32x256xf32>
    %cst_6 = arith.constant 5.000000e-01 : f32
    %7 = vector.broadcast %cst_6 : f32 to vector<32x256xf32>
    %8 = arith.mulf %7, %6 : vector<32x256xf32>
    %cst_7 = arith.constant 0.707106769 : f32
    %9 = vector.broadcast %cst_7 : f32 to vector<32x256xf32>
    %10 = arith.mulf %6, %9 : vector<32x256xf32>
    %11 = math.erf %10 : vector<32x256xf32>
    %cst_8 = arith.constant 1.000000e+00 : f32
    %12 = vector.broadcast %cst_8 : f32 to vector<32x256xf32>
    %13 = arith.addf %12, %11 : vector<32x256xf32>
    %14 = arith.mulf %8, %13 : vector<32x256xf32>
    %cst_9 = arith.constant 0.000000e+00 : f32
    %15 = vector.broadcast %cst_9 : f32 to vector<32x512xf32>
    %c0_10 = arith.constant 0 : index
    %c0_11 = arith.constant 0 : index
    %16 = vector.load %arg8[%c0_10, %c0_11] : memref<32x512xf32, #tpu.memory_space<vmem>>, vector<32x512xf32>
    tpu.vector_store %arg8[%c0_10, %c0_11], %15 {strides = array<i32>} : memref<32x512xf32, #tpu.memory_space<vmem>>, vector<32x512xf32>,
    %c0_12 = arith.constant 0 : index
    %c128 = arith.constant 128 : index
    %17 = vector.load %arg8[%c0_12, %c128] : memref<32x512xf32, #tpu.memory_space<vmem>>, vector<32x256xf32>
    tpu.vector_store %arg8[%c0_12, %c128], %14 {strides = array<i32>} : memref<32x512xf32, #tpu.memory_space<vmem>>, vector<32x256xf32>,
    %c0_13 = arith.constant 0 : index
    %c0_14 = arith.constant 0 : index
    %18 = vector.load %arg4[%c0_13, %c0_14] : memref<8x9xf32, #tpu.memory_space<vmem>>, vector<8x9xf32>
    %c0_15 = arith.constant 0 : index
    %c0_16 = arith.constant 0 : index
    %19 = vector.load %arg5[%c0_15, %c0_16] : memref<8x1xf32, #tpu.memory_space<vmem>>, vector<8x1xf32>
    %c0_17 = arith.constant 0 : index
    %c0_18 = arith.constant 0 : index
    %20 = vector.load %arg6[%c0_17, %c0_18] : memref<8x1xf32, #tpu.memory_space<vmem>>, vector<8x1xf32>
    %21 = tpu.iota {dimensions = array<i32: 1>} : vector<1x256xi32>
    %c16_i32 = arith.constant 16 : i32
    %c0_i32 = arith.constant 0 : i32
    %22 = arith.cmpi eq, %c16_i32, %c0_i32 : i32
    %c1_i32 = arith.constant 1 : i32
    %23 = arith.select %22, %c1_i32, %c16_i32 : i32
    %24 = vector.broadcast %23 : i32 to vector<1x256xi32>
    %25 = arith.remsi %21, %24 : vector<1x256xi32>
    %c0_i32_19 = arith.constant 0 : i32
    %26 = vector.broadcast %c0_i32_19 : i32 to vector<1x256xi32>
    %27 = arith.cmpi ne, %25, %26 : vector<1x256xi32>
    %c0_i32_20 = arith.constant 0 : i32
    %28 = vector.broadcast %c0_i32_20 : i32 to vector<1x256xi32>
    %29 = arith.cmpi slt, %25, %28 : vector<1x256xi32>
    %c0_i32_21 = arith.constant 0 : i32
    %30 = arith.cmpi slt, %23, %c0_i32_21 : i32
    %31 = vector.broadcast %30 : i1 to vector<1x256xi1>
    %32 = vector.broadcast %31 : vector<1x256xi1> to vector<1x256xi1>
    %33 = arith.xori %29, %32 : vector<1x256xi1>
    %34 = arith.andi %33, %27 : vector<1x256xi1>
    %35 = vector.broadcast %23 : i32 to vector<1x256xi32>
    %36 = arith.addi %25, %35 : vector<1x256xi32>
    %37 = arith.select %34, %36, %25 : vector<1x256xi1>, vector<1x256xi32>
    %c0_i32_22 = arith.constant 0 : i32
    %38 = vector.broadcast %c0_i32_22 : i32 to vector<1x256xi32>
    %39 = arith.cmpi ne, %37, %38 : vector<1x256xi32>
    %40 = arith.extui %39 : vector<1x256xi1> to vector<1x256xi32>
    %41 = arith.sitofp %40 : vector<1x256xi32> to vector<1x256xf32>
    %c15_i32 = arith.constant 15 : i32
    %42 = vector.broadcast %c15_i32 : i32 to vector<1x256xi32>
    %43 = arith.cmpi ne, %37, %42 : vector<1x256xi32>
    %44 = arith.extui %43 : vector<1x256xi1> to vector<1x256xi32>
    %45 = arith.sitofp %44 : vector<1x256xi32> to vector<1x256xf32>
    %cst_23 = arith.constant 0.000000e+00 : f32
    %46 = vector.broadcast %cst_23 : f32 to vector<8x256xf32>
    %c24 = arith.constant 24 : index
    %c111 = arith.constant 111 : index
    %47 = vector.load %arg8[%c24, %c111] : memref<32x512xf32, #tpu.memory_space<vmem>>, vector<8x256xf32>
    %48 = vector.extract_strided_slice %18 {offsets = [0, 0], sizes = [8, 1], strides = [1, 1]} : vector<8x9xf32> to vector<8x1xf32>
    %49 = vector.broadcast %48 : vector<8x1xf32> to vector<8x256xf32>
    %50 = arith.mulf %47, %49 : vector<8x256xf32>
    %51 = vector.broadcast %41 : vector<1x256xf32> to vector<8x256xf32>
    %52 = arith.mulf %50, %51 : vector<8x256xf32>
    %53 = arith.addf %46, %52 : vector<8x256xf32>
    %c16 = arith.constant 16 : index
    %c112 = arith.constant 112 : index
    %54 = vector.load %arg8[%c16, %c112] : memref<32x512xf32, #tpu.memory_space<vmem>>, vector<8x256xf32>
    %55 = vector.extract_strided_slice %18 {offsets = [0, 1], sizes = [8, 1], strides = [1, 1]} : vector<8x9xf32> to vector<8x1xf32>
    %56 = vector.broadcast %55 : vector<8x1xf32> to vector<8x256xf32>
    %57 = arith.mulf %54, %56 : vector<8x256xf32>
    %58 = arith.addf %53, %57 : vector<8x256xf32>
    %c24_24 = arith.constant 24 : index
    %c112_25 = arith.constant 112 : index
    %59 = vector.load %arg8[%c24_24, %c112_25] : memref<32x512xf32, #tpu.memory_space<vmem>>, vector<8x256xf32>
    %60 = vector.extract_strided_slice %18 {offsets = [0, 2], sizes = [8, 1], strides = [1, 1]} : vector<8x9xf32> to vector<8x1xf32>
    %61 = vector.broadcast %60 : vector<8x1xf32> to vector<8x256xf32>
    %62 = arith.mulf %59, %61 : vector<8x256xf32>
    %63 = arith.addf %58, %62 : vector<8x256xf32>
    %c8 = arith.constant 8 : index
    %c127 = arith.constant 127 : index
    %64 = vector.load %arg8[%c8, %c127] : memref<32x512xf32, #tpu.memory_space<vmem>>, vector<8x256xf32>
    %65 = vector.extract_strided_slice %18 {offsets = [0, 3], sizes = [8, 1], strides = [1, 1]} : vector<8x9xf32> to vector<8x1xf32>
    %66 = vector.broadcast %65 : vector<8x1xf32> to vector<8x256xf32>
    %67 = arith.mulf %64, %66 : vector<8x256xf32>
    %68 = vector.broadcast %41 : vector<1x256xf32> to vector<8x256xf32>
    %69 = arith.mulf %67, %68 : vector<8x256xf32>
    %70 = arith.addf %63, %69 : vector<8x256xf32>
    %c0_26 = arith.constant 0 : index
    %c128_27 = arith.constant 128 : index
    %71 = vector.load %arg8[%c0_26, %c128_27] : memref<32x512xf32, #tpu.memory_space<vmem>>, vector<8x256xf32>
    %72 = vector.extract_strided_slice %18 {offsets = [0, 4], sizes = [8, 1], strides = [1, 1]} : vector<8x9xf32> to vector<8x1xf32>
    %73 = vector.broadcast %72 : vector<8x1xf32> to vector<8x256xf32>
    %74 = arith.mulf %71, %73 : vector<8x256xf32>
    %75 = arith.addf %70, %74 : vector<8x256xf32>
    %c8_28 = arith.constant 8 : index
    %c128_29 = arith.constant 128 : index
    %76 = vector.load %arg8[%c8_28, %c128_29] : memref<32x512xf32, #tpu.memory_space<vmem>>, vector<8x256xf32>
    %77 = vector.extract_strided_slice %18 {offsets = [0, 5], sizes = [8, 1], strides = [1, 1]} : vector<8x9xf32> to vector<8x1xf32>
    %78 = vector.broadcast %77 : vector<8x1xf32> to vector<8x256xf32>
    %79 = arith.mulf %76, %78 : vector<8x256xf32>
    %80 = arith.addf %75, %79 : vector<8x256xf32>
    %c24_30 = arith.constant 24 : index
    %c127_31 = arith.constant 127 : index
    %81 = vector.load %arg8[%c24_30, %c127_31] : memref<32x512xf32, #tpu.memory_space<vmem>>, vector<8x256xf32>
    %82 = vector.extract_strided_slice %18 {offsets = [0, 6], sizes = [8, 1], strides = [1, 1]} : vector<8x9xf32> to vector<8x1xf32>
    %83 = vector.broadcast %82 : vector<8x1xf32> to vector<8x256xf32>
    %84 = arith.mulf %81, %83 : vector<8x256xf32>
    %85 = vector.broadcast %41 : vector<1x256xf32> to vector<8x256xf32>
    %86 = arith.mulf %84, %85 : vector<8x256xf32>
    %87 = arith.addf %80, %86 : vector<8x256xf32>
    %c16_32 = arith.constant 16 : index
    %c128_33 = arith.constant 128 : index
    %88 = vector.load %arg8[%c16_32, %c128_33] : memref<32x512xf32, #tpu.memory_space<vmem>>, vector<8x256xf32>
    %89 = vector.extract_strided_slice %18 {offsets = [0, 7], sizes = [8, 1], strides = [1, 1]} : vector<8x9xf32> to vector<8x1xf32>
    %90 = vector.broadcast %89 : vector<8x1xf32> to vector<8x256xf32>
    %91 = arith.mulf %88, %90 : vector<8x256xf32>
    %92 = arith.addf %87, %91 : vector<8x256xf32>
    %c24_34 = arith.constant 24 : index
    %c128_35 = arith.constant 128 : index
    %93 = vector.load %arg8[%c24_34, %c128_35] : memref<32x512xf32, #tpu.memory_space<vmem>>, vector<8x256xf32>
    %94 = vector.extract_strided_slice %18 {offsets = [0, 8], sizes = [8, 1], strides = [1, 1]} : vector<8x9xf32> to vector<8x1xf32>
    %95 = vector.broadcast %94 : vector<8x1xf32> to vector<8x256xf32>
    %96 = arith.mulf %93, %95 : vector<8x256xf32>
    %97 = arith.addf %92, %96 : vector<8x256xf32>
    %cst_36 = arith.constant dense<0.000000e+00> : vector<256xf32>
    %98 = vector.multi_reduction <add>, %97, %cst_36 [0] : vector<8x256xf32> to vector<256xf32>
    %99 = vector.shape_cast %98 : vector<256xf32> to vector<1x256xf32>
    %cst_37 = arith.constant 8.000000e+00 : f32
    %100 = vector.broadcast %cst_37 : f32 to vector<1x256xf32>
    %101 = arith.divf %99, %100 : vector<1x256xf32>
    %102 = vector.broadcast %101 : vector<1x256xf32> to vector<8x256xf32>
    %103 = arith.subf %97, %102 : vector<8x256xf32>
    %104 = arith.mulf %103, %103 : vector<8x256xf32>
    %cst_38 = arith.constant dense<0.000000e+00> : vector<256xf32>
    %105 = vector.multi_reduction <add>, %104, %cst_38 [0] : vector<8x256xf32> to vector<256xf32>
    %106 = vector.shape_cast %105 : vector<256xf32> to vector<1x256xf32>
    %cst_39 = arith.constant 8.000000e+00 : f32
    %107 = vector.broadcast %cst_39 : f32 to vector<1x256xf32>
    %108 = arith.divf %106, %107 : vector<1x256xf32>
    %109 = vector.broadcast %101 : vector<1x256xf32> to vector<8x256xf32>
    %110 = arith.subf %97, %109 : vector<8x256xf32>
    %cst_40 = arith.constant 9.99999997E-7 : f32
    %111 = vector.broadcast %cst_40 : f32 to vector<1x256xf32>
    %112 = arith.addf %108, %111 : vector<1x256xf32>
    %113 = math.rsqrt %112 : vector<1x256xf32>
    %114 = vector.broadcast %113 : vector<1x256xf32> to vector<8x256xf32>
    %115 = arith.mulf %110, %114 : vector<8x256xf32>
    %116 = vector.broadcast %19 : vector<8x1xf32> to vector<8x256xf32>
    %117 = arith.mulf %115, %116 : vector<8x256xf32>
    %118 = vector.broadcast %20 : vector<8x1xf32> to vector<8x256xf32>
    %119 = arith.addf %117, %118 : vector<8x256xf32>
    %c0_41 = arith.constant 0 : index
    %c0_42 = arith.constant 0 : index
    %c0_43 = arith.constant 0 : index
    %c0_44 = arith.constant 0 : index
    %120 = vector.load %arg7[%c0_41, %c0_42, %c0_43, %c0_44] : memref<1x4x8x256xf32, #tpu.memory_space<vmem>>, vector<1x1x8x256xf32>
    %121 = vector.shape_cast %120 : vector<1x1x8x256xf32> to vector<8x256xf32>
    %122 = vector.shape_cast %119 : vector<8x256xf32> to vector<1x1x8x256xf32>
    tpu.vector_store %arg7[%c0_41, %c0_42, %c0_43, %c0_44], %122 {strides = array<i32>} : memref<1x4x8x256xf32, #tpu.memory_space<vmem>>, vector<1x1x8x256xf32>,
    %cst_45 = arith.constant 0.000000e+00 : f32
    %123 = vector.broadcast %cst_45 : f32 to vector<8x256xf32>
    %c16_46 = arith.constant 16 : index
    %c112_47 = arith.constant 112 : index
    %124 = vector.load %arg8[%c16_46, %c112_47] : memref<32x512xf32, #tpu.memory_space<vmem>>, vector<8x256xf32>
    %125 = vector.extract_strided_slice %18 {offsets = [0, 0], sizes = [8, 1], strides = [1, 1]} : vector<8x9xf32> to vector<8x1xf32>
    %126 = vector.broadcast %125 : vector<8x1xf32> to vector<8x256xf32>
    %127 = arith.mulf %124, %126 : vector<8x256xf32>
    %128 = arith.addf %123, %127 : vector<8x256xf32>
    %c24_48 = arith.constant 24 : index
    %c112_49 = arith.constant 112 : index
    %129 = vector.load %arg8[%c24_48, %c112_49] : memref<32x512xf32, #tpu.memory_space<vmem>>, vector<8x256xf32>
    %130 = vector.extract_strided_slice %18 {offsets = [0, 1], sizes = [8, 1], strides = [1, 1]} : vector<8x9xf32> to vector<8x1xf32>
    %131 = vector.broadcast %130 : vector<8x1xf32> to vector<8x256xf32>
    %132 = arith.mulf %129, %131 : vector<8x256xf32>
    %133 = arith.addf %128, %132 : vector<8x256xf32>
    %c16_50 = arith.constant 16 : index
    %c113 = arith.constant 113 : index
    %134 = vector.load %arg8[%c16_50, %c113] : memref<32x512xf32, #tpu.memory_space<vmem>>, vector<8x256xf32>
    %135 = vector.extract_strided_slice %18 {offsets = [0, 2], sizes = [8, 1], strides = [1, 1]} : vector<8x9xf32> to vector<8x1xf32>
    %136 = vector.broadcast %135 : vector<8x1xf32> to vector<8x256xf32>
    %137 = arith.mulf %134, %136 : vector<8x256xf32>
    %138 = vector.broadcast %45 : vector<1x256xf32> to vector<8x256xf32>
    %139 = arith.mulf %137, %138 : vector<8x256xf32>
    %140 = arith.addf %133, %139 : vector<8x256xf32>
    %c0_51 = arith.constant 0 : index
    %c128_52 = arith.constant 128 : index
    %141 = vector.load %arg8[%c0_51, %c128_52] : memref<32x512xf32, #tpu.memory_space<vmem>>, vector<8x256xf32>
    %142 = vector.extract_strided_slice %18 {offsets = [0, 3], sizes = [8, 1], strides = [1, 1]} : vector<8x9xf32> to vector<8x1xf32>
    %143 = vector.broadcast %142 : vector<8x1xf32> to vector<8x256xf32>
    %144 = arith.mulf %141, %143 : vector<8x256xf32>
    %145 = arith.addf %140, %144 : vector<8x256xf32>
    %c8_53 = arith.constant 8 : index
    %c128_54 = arith.constant 128 : index
    %146 = vector.load %arg8[%c8_53, %c128_54] : memref<32x512xf32, #tpu.memory_space<vmem>>, vector<8x256xf32>
    %147 = vector.extract_strided_slice %18 {offsets = [0, 4], sizes = [8, 1], strides = [1, 1]} : vector<8x9xf32> to vector<8x1xf32>
    %148 = vector.broadcast %147 : vector<8x1xf32> to vector<8x256xf32>
    %149 = arith.mulf %146, %148 : vector<8x256xf32>
    %150 = arith.addf %145, %149 : vector<8x256xf32>
    %c0_55 = arith.constant 0 : index
    %c129 = arith.constant 129 : index
    %151 = vector.load %arg8[%c0_55, %c129] : memref<32x512xf32, #tpu.memory_space<vmem>>, vector<8x256xf32>
    %152 = vector.extract_strided_slice %18 {offsets = [0, 5], sizes = [8, 1], strides = [1, 1]} : vector<8x9xf32> to vector<8x1xf32>
    %153 = vector.broadcast %152 : vector<8x1xf32> to vector<8x256xf32>
    %154 = arith.mulf %151, %153 : vector<8x256xf32>
    %155 = vector.broadcast %45 : vector<1x256xf32> to vector<8x256xf32>
    %156 = arith.mulf %154, %155 : vector<8x256xf32>
    %157 = arith.addf %150, %156 : vector<8x256xf32>
    %c16_56 = arith.constant 16 : index
    %c128_57 = arith.constant 128 : index
    %158 = vector.load %arg8[%c16_56, %c128_57] : memref<32x512xf32, #tpu.memory_space<vmem>>, vector<8x256xf32>
    %159 = vector.extract_strided_slice %18 {offsets = [0, 6], sizes = [8, 1], strides = [1, 1]} : vector<8x9xf32> to vector<8x1xf32>
    %160 = vector.broadcast %159 : vector<8x1xf32> to vector<8x256xf32>
    %161 = arith.mulf %158, %160 : vector<8x256xf32>
    %162 = arith.addf %157, %161 : vector<8x256xf32>
    %c24_58 = arith.constant 24 : index
    %c128_59 = arith.constant 128 : index
    %163 = vector.load %arg8[%c24_58, %c128_59] : memref<32x512xf32, #tpu.memory_space<vmem>>, vector<8x256xf32>
    %164 = vector.extract_strided_slice %18 {offsets = [0, 7], sizes = [8, 1], strides = [1, 1]} : vector<8x9xf32> to vector<8x1xf32>
    %165 = vector.broadcast %164 : vector<8x1xf32> to vector<8x256xf32>
    %166 = arith.mulf %163, %165 : vector<8x256xf32>
    %167 = arith.addf %162, %166 : vector<8x256xf32>
    %c16_60 = arith.constant 16 : index
    %c129_61 = arith.constant 129 : index
    %168 = vector.load %arg8[%c16_60, %c129_61] : memref<32x512xf32, #tpu.memory_space<vmem>>, vector<8x256xf32>
    %169 = vector.extract_strided_slice %18 {offsets = [0, 8], sizes = [8, 1], strides = [1, 1]} : vector<8x9xf32> to vector<8x1xf32>
    %170 = vector.broadcast %169 : vector<8x1xf32> to vector<8x256xf32>
    %171 = arith.mulf %168, %170 : vector<8x256xf32>
    %172 = vector.broadcast %45 : vector<1x256xf32> to vector<8x256xf32>
    %173 = arith.mulf %171, %172 : vector<8x256xf32>
    %174 = arith.addf %167, %173 : vector<8x256xf32>
    %cst_62 = arith.constant dense<0.000000e+00> : vector<256xf32>
    %175 = vector.multi_reduction <add>, %174, %cst_62 [0] : vector<8x256xf32> to vector<256xf32>
    %176 = vector.shape_cast %175 : vector<256xf32> to vector<1x256xf32>
    %cst_63 = arith.constant 8.000000e+00 : f32
    %177 = vector.broadcast %cst_63 : f32 to vector<1x256xf32>
    %178 = arith.divf %176, %177 : vector<1x256xf32>
    %179 = vector.broadcast %178 : vector<1x256xf32> to vector<8x256xf32>
    %180 = arith.subf %174, %179 : vector<8x256xf32>
    %181 = arith.mulf %180, %180 : vector<8x256xf32>
    %cst_64 = arith.constant dense<0.000000e+00> : vector<256xf32>
    %182 = vector.multi_reduction <add>, %181, %cst_64 [0] : vector<8x256xf32> to vector<256xf32>
    %183 = vector.shape_cast %182 : vector<256xf32> to vector<1x256xf32>
    %cst_65 = arith.constant 8.000000e+00 : f32
    %184 = vector.broadcast %cst_65 : f32 to vector<1x256xf32>
    %185 = arith.divf %183, %184 : vector<1x256xf32>
    %186 = vector.broadcast %178 : vector<1x256xf32> to vector<8x256xf32>
    %187 = arith.subf %174, %186 : vector<8x256xf32>
    %cst_66 = arith.constant 9.99999997E-7 : f32
    %188 = vector.broadcast %cst_66 : f32 to vector<1x256xf32>
    %189 = arith.addf %185, %188 : vector<1x256xf32>
    %190 = math.rsqrt %189 : vector<1x256xf32>
    %191 = vector.broadcast %190 : vector<1x256xf32> to vector<8x256xf32>
    %192 = arith.mulf %187, %191 : vector<8x256xf32>
    %193 = vector.broadcast %19 : vector<8x1xf32> to vector<8x256xf32>
    %194 = arith.mulf %192, %193 : vector<8x256xf32>
    %195 = vector.broadcast %20 : vector<8x1xf32> to vector<8x256xf32>
    %196 = arith.addf %194, %195 : vector<8x256xf32>
    %c0_67 = arith.constant 0 : index
    %c1 = arith.constant 1 : index
    %c0_68 = arith.constant 0 : index
    %c0_69 = arith.constant 0 : index
    %197 = vector.load %arg7[%c0_67, %c1, %c0_68, %c0_69] : memref<1x4x8x256xf32, #tpu.memory_space<vmem>>, vector<1x1x8x256xf32>
    %198 = vector.shape_cast %197 : vector<1x1x8x256xf32> to vector<8x256xf32>
    %199 = vector.shape_cast %196 : vector<8x256xf32> to vector<1x1x8x256xf32>
    tpu.vector_store %arg7[%c0_67, %c1, %c0_68, %c0_69], %199 {strides = array<i32>} : memref<1x4x8x256xf32, #tpu.memory_space<vmem>>, vector<1x1x8x256xf32>,
    %cst_70 = arith.constant 0.000000e+00 : f32
    %200 = vector.broadcast %cst_70 : f32 to vector<8x256xf32>
    %c8_71 = arith.constant 8 : index
    %c127_72 = arith.constant 127 : index
    %201 = vector.load %arg8[%c8_71, %c127_72] : memref<32x512xf32, #tpu.memory_space<vmem>>, vector<8x256xf32>
    %202 = vector.extract_strided_slice %18 {offsets = [0, 0], sizes = [8, 1], strides = [1, 1]} : vector<8x9xf32> to vector<8x1xf32>
    %203 = vector.broadcast %202 : vector<8x1xf32> to vector<8x256xf32>
    %204 = arith.mulf %201, %203 : vector<8x256xf32>
    %205 = vector.broadcast %41 : vector<1x256xf32> to vector<8x256xf32>
    %206 = arith.mulf %204, %205 : vector<8x256xf32>
    %207 = arith.addf %200, %206 : vector<8x256xf32>
    %c0_73 = arith.constant 0 : index
    %c128_74 = arith.constant 128 : index
    %208 = vector.load %arg8[%c0_73, %c128_74] : memref<32x512xf32, #tpu.memory_space<vmem>>, vector<8x256xf32>
    %209 = vector.extract_strided_slice %18 {offsets = [0, 1], sizes = [8, 1], strides = [1, 1]} : vector<8x9xf32> to vector<8x1xf32>
    %210 = vector.broadcast %209 : vector<8x1xf32> to vector<8x256xf32>
    %211 = arith.mulf %208, %210 : vector<8x256xf32>
    %212 = arith.addf %207, %211 : vector<8x256xf32>
    %c8_75 = arith.constant 8 : index
    %c128_76 = arith.constant 128 : index
    %213 = vector.load %arg8[%c8_75, %c128_76] : memref<32x512xf32, #tpu.memory_space<vmem>>, vector<8x256xf32>
    %214 = vector.extract_strided_slice %18 {offsets = [0, 2], sizes = [8, 1], strides = [1, 1]} : vector<8x9xf32> to vector<8x1xf32>
    %215 = vector.broadcast %214 : vector<8x1xf32> to vector<8x256xf32>
    %216 = arith.mulf %213, %215 : vector<8x256xf32>
    %217 = arith.addf %212, %216 : vector<8x256xf32>
    %c24_77 = arith.constant 24 : index
    %c127_78 = arith.constant 127 : index
    %218 = vector.load %arg8[%c24_77, %c127_78] : memref<32x512xf32, #tpu.memory_space<vmem>>, vector<8x256xf32>
    %219 = vector.extract_strided_slice %18 {offsets = [0, 3], sizes = [8, 1], strides = [1, 1]} : vector<8x9xf32> to vector<8x1xf32>
    %220 = vector.broadcast %219 : vector<8x1xf32> to vector<8x256xf32>
    %221 = arith.mulf %218, %220 : vector<8x256xf32>
    %222 = vector.broadcast %41 : vector<1x256xf32> to vector<8x256xf32>
    %223 = arith.mulf %221, %222 : vector<8x256xf32>
    %224 = arith.addf %217, %223 : vector<8x256xf32>
    %c16_79 = arith.constant 16 : index
    %c128_80 = arith.constant 128 : index
    %225 = vector.load %arg8[%c16_79, %c128_80] : memref<32x512xf32, #tpu.memory_space<vmem>>, vector<8x256xf32>
    %226 = vector.extract_strided_slice %18 {offsets = [0, 4], sizes = [8, 1], strides = [1, 1]} : vector<8x9xf32> to vector<8x1xf32>
    %227 = vector.broadcast %226 : vector<8x1xf32> to vector<8x256xf32>
    %228 = arith.mulf %225, %227 : vector<8x256xf32>
    %229 = arith.addf %224, %228 : vector<8x256xf32>
    %c24_81 = arith.constant 24 : index
    %c128_82 = arith.constant 128 : index
    %230 = vector.load %arg8[%c24_81, %c128_82] : memref<32x512xf32, #tpu.memory_space<vmem>>, vector<8x256xf32>
    %231 = vector.extract_strided_slice %18 {offsets = [0, 5], sizes = [8, 1], strides = [1, 1]} : vector<8x9xf32> to vector<8x1xf32>
    %232 = vector.broadcast %231 : vector<8x1xf32> to vector<8x256xf32>
    %233 = arith.mulf %230, %232 : vector<8x256xf32>
    %234 = arith.addf %229, %233 : vector<8x256xf32>
    %c8_83 = arith.constant 8 : index
    %c143 = arith.constant 143 : index
    %235 = vector.load %arg8[%c8_83, %c143] : memref<32x512xf32, #tpu.memory_space<vmem>>, vector<8x256xf32>
    %236 = vector.extract_strided_slice %18 {offsets = [0, 6], sizes = [8, 1], strides = [1, 1]} : vector<8x9xf32> to vector<8x1xf32>
    %237 = vector.broadcast %236 : vector<8x1xf32> to vector<8x256xf32>
    %238 = arith.mulf %235, %237 : vector<8x256xf32>
    %239 = vector.broadcast %41 : vector<1x256xf32> to vector<8x256xf32>
    %240 = arith.mulf %238, %239 : vector<8x256xf32>
    %241 = arith.addf %234, %240 : vector<8x256xf32>
    %c0_84 = arith.constant 0 : index
    %c144 = arith.constant 144 : index
    %242 = vector.load %arg8[%c0_84, %c144] : memref<32x512xf32, #tpu.memory_space<vmem>>, vector<8x256xf32>
    %243 = vector.extract_strided_slice %18 {offsets = [0, 7], sizes = [8, 1], strides = [1, 1]} : vector<8x9xf32> to vector<8x1xf32>
    %244 = vector.broadcast %243 : vector<8x1xf32> to vector<8x256xf32>
    %245 = arith.mulf %242, %244 : vector<8x256xf32>
    %246 = arith.addf %241, %245 : vector<8x256xf32>
    %c8_85 = arith.constant 8 : index
    %c144_86 = arith.constant 144 : index
    %247 = vector.load %arg8[%c8_85, %c144_86] : memref<32x512xf32, #tpu.memory_space<vmem>>, vector<8x256xf32>
    %248 = vector.extract_strided_slice %18 {offsets = [0, 8], sizes = [8, 1], strides = [1, 1]} : vector<8x9xf32> to vector<8x1xf32>
    %249 = vector.broadcast %248 : vector<8x1xf32> to vector<8x256xf32>
    %250 = arith.mulf %247, %249 : vector<8x256xf32>
    %251 = arith.addf %246, %250 : vector<8x256xf32>
    %cst_87 = arith.constant dense<0.000000e+00> : vector<256xf32>
    %252 = vector.multi_reduction <add>, %251, %cst_87 [0] : vector<8x256xf32> to vector<256xf32>
    %253 = vector.shape_cast %252 : vector<256xf32> to vector<1x256xf32>
    %cst_88 = arith.constant 8.000000e+00 : f32
    %254 = vector.broadcast %cst_88 : f32 to vector<1x256xf32>
    %255 = arith.divf %253, %254 : vector<1x256xf32>
    %256 = vector.broadcast %255 : vector<1x256xf32> to vector<8x256xf32>
    %257 = arith.subf %251, %256 : vector<8x256xf32>
    %258 = arith.mulf %257, %257 : vector<8x256xf32>
    %cst_89 = arith.constant dense<0.000000e+00> : vector<256xf32>
    %259 = vector.multi_reduction <add>, %258, %cst_89 [0] : vector<8x256xf32> to vector<256xf32>
    %260 = vector.shape_cast %259 : vector<256xf32> to vector<1x256xf32>
    %cst_90 = arith.constant 8.000000e+00 : f32
    %261 = vector.broadcast %cst_90 : f32 to vector<1x256xf32>
    %262 = arith.divf %260, %261 : vector<1x256xf32>
    %263 = vector.broadcast %255 : vector<1x256xf32> to vector<8x256xf32>
    %264 = arith.subf %251, %263 : vector<8x256xf32>
    %cst_91 = arith.constant 9.99999997E-7 : f32
    %265 = vector.broadcast %cst_91 : f32 to vector<1x256xf32>
    %266 = arith.addf %262, %265 : vector<1x256xf32>
    %267 = math.rsqrt %266 : vector<1x256xf32>
    %268 = vector.broadcast %267 : vector<1x256xf32> to vector<8x256xf32>
    %269 = arith.mulf %264, %268 : vector<8x256xf32>
    %270 = vector.broadcast %19 : vector<8x1xf32> to vector<8x256xf32>
    %271 = arith.mulf %269, %270 : vector<8x256xf32>
    %272 = vector.broadcast %20 : vector<8x1xf32> to vector<8x256xf32>
    %273 = arith.addf %271, %272 : vector<8x256xf32>
    %c0_92 = arith.constant 0 : index
    %c2 = arith.constant 2 : index
    %c0_93 = arith.constant 0 : index
    %c0_94 = arith.constant 0 : index
    %274 = vector.load %arg7[%c0_92, %c2, %c0_93, %c0_94] : memref<1x4x8x256xf32, #tpu.memory_space<vmem>>, vector<1x1x8x256xf32>
    %275 = vector.shape_cast %274 : vector<1x1x8x256xf32> to vector<8x256xf32>
    %276 = vector.shape_cast %273 : vector<8x256xf32> to vector<1x1x8x256xf32>
    tpu.vector_store %arg7[%c0_92, %c2, %c0_93, %c0_94], %276 {strides = array<i32>} : memref<1x4x8x256xf32, #tpu.memory_space<vmem>>, vector<1x1x8x256xf32>,
    %cst_95 = arith.constant 0.000000e+00 : f32
    %277 = vector.broadcast %cst_95 : f32 to vector<8x256xf32>
    %c0_96 = arith.constant 0 : index
    %c128_97 = arith.constant 128 : index
    %278 = vector.load %arg8[%c0_96, %c128_97] : memref<32x512xf32, #tpu.memory_space<vmem>>, vector<8x256xf32>
    %279 = vector.extract_strided_slice %18 {offsets = [0, 0], sizes = [8, 1], strides = [1, 1]} : vector<8x9xf32> to vector<8x1xf32>
    %280 = vector.broadcast %279 : vector<8x1xf32> to vector<8x256xf32>
    %281 = arith.mulf %278, %280 : vector<8x256xf32>
    %282 = arith.addf %277, %281 : vector<8x256xf32>
    %c8_98 = arith.constant 8 : index
    %c128_99 = arith.constant 128 : index
    %283 = vector.load %arg8[%c8_98, %c128_99] : memref<32x512xf32, #tpu.memory_space<vmem>>, vector<8x256xf32>
    %284 = vector.extract_strided_slice %18 {offsets = [0, 1], sizes = [8, 1], strides = [1, 1]} : vector<8x9xf32> to vector<8x1xf32>
    %285 = vector.broadcast %284 : vector<8x1xf32> to vector<8x256xf32>
    %286 = arith.mulf %283, %285 : vector<8x256xf32>
    %287 = arith.addf %282, %286 : vector<8x256xf32>
    %c0_100 = arith.constant 0 : index
    %c129_101 = arith.constant 129 : index
    %288 = vector.load %arg8[%c0_100, %c129_101] : memref<32x512xf32, #tpu.memory_space<vmem>>, vector<8x256xf32>
    %289 = vector.extract_strided_slice %18 {offsets = [0, 2], sizes = [8, 1], strides = [1, 1]} : vector<8x9xf32> to vector<8x1xf32>
    %290 = vector.broadcast %289 : vector<8x1xf32> to vector<8x256xf32>
    %291 = arith.mulf %288, %290 : vector<8x256xf32>
    %292 = vector.broadcast %45 : vector<1x256xf32> to vector<8x256xf32>
    %293 = arith.mulf %291, %292 : vector<8x256xf32>
    %294 = arith.addf %287, %293 : vector<8x256xf32>
    %c16_102 = arith.constant 16 : index
    %c128_103 = arith.constant 128 : index
    %295 = vector.load %arg8[%c16_102, %c128_103] : memref<32x512xf32, #tpu.memory_space<vmem>>, vector<8x256xf32>
    %296 = vector.extract_strided_slice %18 {offsets = [0, 3], sizes = [8, 1], strides = [1, 1]} : vector<8x9xf32> to vector<8x1xf32>
    %297 = vector.broadcast %296 : vector<8x1xf32> to vector<8x256xf32>
    %298 = arith.mulf %295, %297 : vector<8x256xf32>
    %299 = arith.addf %294, %298 : vector<8x256xf32>
    %c24_104 = arith.constant 24 : index
    %c128_105 = arith.constant 128 : index
    %300 = vector.load %arg8[%c24_104, %c128_105] : memref<32x512xf32, #tpu.memory_space<vmem>>, vector<8x256xf32>
    %301 = vector.extract_strided_slice %18 {offsets = [0, 4], sizes = [8, 1], strides = [1, 1]} : vector<8x9xf32> to vector<8x1xf32>
    %302 = vector.broadcast %301 : vector<8x1xf32> to vector<8x256xf32>
    %303 = arith.mulf %300, %302 : vector<8x256xf32>
    %304 = arith.addf %299, %303 : vector<8x256xf32>
    %c16_106 = arith.constant 16 : index
    %c129_107 = arith.constant 129 : index
    %305 = vector.load %arg8[%c16_106, %c129_107] : memref<32x512xf32, #tpu.memory_space<vmem>>, vector<8x256xf32>
    %306 = vector.extract_strided_slice %18 {offsets = [0, 5], sizes = [8, 1], strides = [1, 1]} : vector<8x9xf32> to vector<8x1xf32>
    %307 = vector.broadcast %306 : vector<8x1xf32> to vector<8x256xf32>
    %308 = arith.mulf %305, %307 : vector<8x256xf32>
    %309 = vector.broadcast %45 : vector<1x256xf32> to vector<8x256xf32>
    %310 = arith.mulf %308, %309 : vector<8x256xf32>
    %311 = arith.addf %304, %310 : vector<8x256xf32>
    %c0_108 = arith.constant 0 : index
    %c144_109 = arith.constant 144 : index
    %312 = vector.load %arg8[%c0_108, %c144_109] : memref<32x512xf32, #tpu.memory_space<vmem>>, vector<8x256xf32>
    %313 = vector.extract_strided_slice %18 {offsets = [0, 6], sizes = [8, 1], strides = [1, 1]} : vector<8x9xf32> to vector<8x1xf32>
    %314 = vector.broadcast %313 : vector<8x1xf32> to vector<8x256xf32>
    %315 = arith.mulf %312, %314 : vector<8x256xf32>
    %316 = arith.addf %311, %315 : vector<8x256xf32>
    %c8_110 = arith.constant 8 : index
    %c144_111 = arith.constant 144 : index
    %317 = vector.load %arg8[%c8_110, %c144_111] : memref<32x512xf32, #tpu.memory_space<vmem>>, vector<8x256xf32>
    %318 = vector.extract_strided_slice %18 {offsets = [0, 7], sizes = [8, 1], strides = [1, 1]} : vector<8x9xf32> to vector<8x1xf32>
    %319 = vector.broadcast %318 : vector<8x1xf32> to vector<8x256xf32>
    %320 = arith.mulf %317, %319 : vector<8x256xf32>
    %321 = arith.addf %316, %320 : vector<8x256xf32>
    %c0_112 = arith.constant 0 : index
    %c145 = arith.constant 145 : index
    %322 = vector.load %arg8[%c0_112, %c145] : memref<32x512xf32, #tpu.memory_space<vmem>>, vector<8x256xf32>
    %323 = vector.extract_strided_slice %18 {offsets = [0, 8], sizes = [8, 1], strides = [1, 1]} : vector<8x9xf32> to vector<8x1xf32>
    %324 = vector.broadcast %323 : vector<8x1xf32> to vector<8x256xf32>
    %325 = arith.mulf %322, %324 : vector<8x256xf32>
    %326 = vector.broadcast %45 : vector<1x256xf32> to vector<8x256xf32>
    %327 = arith.mulf %325, %326 : vector<8x256xf32>
    %328 = arith.addf %321, %327 : vector<8x256xf32>
    %cst_113 = arith.constant dense<0.000000e+00> : vector<256xf32>
    %329 = vector.multi_reduction <add>, %328, %cst_113 [0] : vector<8x256xf32> to vector<256xf32>
    %330 = vector.shape_cast %329 : vector<256xf32> to vector<1x256xf32>
    %cst_114 = arith.constant 8.000000e+00 : f32
    %331 = vector.broadcast %cst_114 : f32 to vector<1x256xf32>
    %332 = arith.divf %330, %331 : vector<1x256xf32>
    %333 = vector.broadcast %332 : vector<1x256xf32> to vector<8x256xf32>
    %334 = arith.subf %328, %333 : vector<8x256xf32>
    %335 = arith.mulf %334, %334 : vector<8x256xf32>
    %cst_115 = arith.constant dense<0.000000e+00> : vector<256xf32>
    %336 = vector.multi_reduction <add>, %335, %cst_115 [0] : vector<8x256xf32> to vector<256xf32>
    %337 = vector.shape_cast %336 : vector<256xf32> to vector<1x256xf32>
    %cst_116 = arith.constant 8.000000e+00 : f32
    %338 = vector.broadcast %cst_116 : f32 to vector<1x256xf32>
    %339 = arith.divf %337, %338 : vector<1x256xf32>
    %340 = vector.broadcast %332 : vector<1x256xf32> to vector<8x256xf32>
    %341 = arith.subf %328, %340 : vector<8x256xf32>
    %cst_117 = arith.constant 9.99999997E-7 : f32
    %342 = vector.broadcast %cst_117 : f32 to vector<1x256xf32>
    %343 = arith.addf %339, %342 : vector<1x256xf32>
    %344 = math.rsqrt %343 : vector<1x256xf32>
    %345 = vector.broadcast %344 : vector<1x256xf32> to vector<8x256xf32>
    %346 = arith.mulf %341, %345 : vector<8x256xf32>
    %347 = vector.broadcast %19 : vector<8x1xf32> to vector<8x256xf32>
    %348 = arith.mulf %346, %347 : vector<8x256xf32>
    %349 = vector.broadcast %20 : vector<8x1xf32> to vector<8x256xf32>
    %350 = arith.addf %348, %349 : vector<8x256xf32>
    %c0_118 = arith.constant 0 : index
    %c3 = arith.constant 3 : index
    %c0_119 = arith.constant 0 : index
    %c0_120 = arith.constant 0 : index
    %351 = vector.load %arg7[%c0_118, %c3, %c0_119, %c0_120] : memref<1x4x8x256xf32, #tpu.memory_space<vmem>>, vector<1x1x8x256xf32>
    %352 = vector.shape_cast %351 : vector<1x1x8x256xf32> to vector<8x256xf32>
    %353 = vector.shape_cast %350 : vector<8x256xf32> to vector<1x1x8x256xf32>
    tpu.vector_store %arg7[%c0_118, %c3, %c0_119, %c0_120], %353 {strides = array<i32>} : memref<1x4x8x256xf32, #tpu.memory_space<vmem>>, vector<1x1x8x256xf32>,
    return
  }
  func.func @transform_0(%arg0: i32) -> (i32, i32, i32) {
    %c0_i32 = arith.constant 0 : i32
    %c0_i32_0 = arith.constant 0 : i32
    %c0_i32_1 = arith.constant 0 : i32
    return %arg0, %c0_i32, %c0_i32_0 : i32, i32, i32
  }
  func.func @transform_1(%arg0: i32) -> (i32, i32) {
    %c0_i32 = arith.constant 0 : i32
    %c0_i32_0 = arith.constant 0 : i32
    %c0_i32_1 = arith.constant 0 : i32
    return %c0_i32, %c0_i32_0 : i32, i32
  }
  func.func @transform_2(%arg0: i32) -> (i32, i32) {
    %c0_i32 = arith.constant 0 : i32
    %c0_i32_0 = arith.constant 0 : i32
    %c0_i32_1 = arith.constant 0 : i32
    return %c0_i32, %c0_i32_0 : i32, i32
  }
  func.func @transform_3(%arg0: i32) -> (i32, i32) {
    %c0_i32 = arith.constant 0 : i32
    %c0_i32_0 = arith.constant 0 : i32
    %c0_i32_1 = arith.constant 0 : i32
    return %c0_i32, %c0_i32_0 : i32, i32
  }
  func.func @transform_4(%arg0: i32) -> (i32, i32) {
    %c0_i32 = arith.constant 0 : i32
    %c0_i32_0 = arith.constant 0 : i32
    %c0_i32_1 = arith.constant 0 : i32
    return %c0_i32, %c0_i32_0 : i32, i32
  }
  func.func @transform_5(%arg0: i32) -> (i32, i32) {
    %c0_i32 = arith.constant 0 : i32
    %c0_i32_0 = arith.constant 0 : i32
    %c0_i32_1 = arith.constant 0 : i32
    return %c0_i32, %c0_i32_0 : i32, i32
  }
  func.func @transform_6(%arg0: i32) -> (i32, i32, i32, i32) {
    %c0_i32 = arith.constant 0 : i32
    %c0_i32_0 = arith.constant 0 : i32
    %c0_i32_1 = arith.constant 0 : i32
    %c0_i32_2 = arith.constant 0 : i32
    return %arg0, %c0_i32, %c0_i32_0, %c0_i32_1 : i32, i32, i32, i32
  }
}

module attributes {stable_mosaic.version = 11 : i64} {
  func.func @kernel(%arg0: i32, %arg1: memref<1x8x1024xf32, #tpu.memory_space<vmem>>, %arg2: memref<32x8xf32, #tpu.memory_space<vmem>>, %arg3: memref<32x1xf32, #tpu.memory_space<vmem>>, %arg4: memref<8x9xf32, #tpu.memory_space<vmem>>, %arg5: memref<8x1xf32, #tpu.memory_space<vmem>>, %arg6: memref<8x1xf32, #tpu.memory_space<vmem>>, %arg7: memref<1x4x8x1024xf32, #tpu.memory_space<vmem>>, %arg8: memref<32x1280xf32, #tpu.memory_space<vmem>>) attributes {dimension_semantics = [#tpu.dimension_semantics<parallel>], iteration_bounds = array<i64: 2>, scalar_prefetch = 0 : i64, scratch_operands = 1 : i64, tpu.core_type = #tpu.core_type<tc>, window_params = [{transform_indices = @transform_0, window_bounds = array<i64: 1, 8, 1024>}, {pipeline_mode = #tpu.pipeline_mode<synchronous>, transform_indices = @transform_1, window_bounds = array<i64: 32, 8>}, {pipeline_mode = #tpu.pipeline_mode<synchronous>, transform_indices = @transform_2, window_bounds = array<i64: 32, 1>}, {pipeline_mode = #tpu.pipeline_mode<synchronous>, transform_indices = @transform_3, window_bounds = array<i64: 8, 9>}, {pipeline_mode = #tpu.pipeline_mode<synchronous>, transform_indices = @transform_4, window_bounds = array<i64: 8, 1>}, {pipeline_mode = #tpu.pipeline_mode<synchronous>, transform_indices = @transform_5, window_bounds = array<i64: 8, 1>}, {transform_indices = @transform_6, window_bounds = array<i64: 1, 4, 8, 1024>}]} {
    %c0 = arith.constant 0 : index
    %c0_0 = arith.constant 0 : index
    %0 = vector.load %arg2[%c0, %c0_0] : memref<32x8xf32, #tpu.memory_space<vmem>>, vector<32x8xf32>
    %c0_1 = arith.constant 0 : index
    %c0_2 = arith.constant 0 : index
    %c0_3 = arith.constant 0 : index
    %1 = vector.load %arg1[%c0_1, %c0_2, %c0_3] : memref<1x8x1024xf32, #tpu.memory_space<vmem>>, vector<1x8x1024xf32>
    %2 = vector.shape_cast %1 : vector<1x8x1024xf32> to vector<8x1024xf32>
    %cst = arith.constant dense<0.000000e+00> : vector<32x1024xf32>
    %3 = tpu.matmul %0, %2, %cst {dimension_numbers = #tpu.dot_dimension_numbers<[1], [0], [0], [1], [0, 0, 1, 1], [], []>} : vector<32x8xf32>, vector<8x1024xf32>, vector<32x1024xf32> -> vector<32x1024xf32>
    %c0_4 = arith.constant 0 : index
    %c0_5 = arith.constant 0 : index
    %4 = vector.load %arg3[%c0_4, %c0_5] : memref<32x1xf32, #tpu.memory_space<vmem>>, vector<32x1xf32>
    %5 = vector.broadcast %4 : vector<32x1xf32> to vector<32x1024xf32>
    %6 = arith.addf %3, %5 : vector<32x1024xf32>
    %cst_6 = arith.constant 5.000000e-01 : f32
    %7 = vector.broadcast %cst_6 : f32 to vector<32x1024xf32>
    %8 = arith.mulf %7, %6 : vector<32x1024xf32>
    %cst_7 = arith.constant 0.707106769 : f32
    %9 = vector.broadcast %cst_7 : f32 to vector<32x1024xf32>
    %10 = arith.mulf %6, %9 : vector<32x1024xf32>
    %11 = math.erf %10 : vector<32x1024xf32>
    %cst_8 = arith.constant 1.000000e+00 : f32
    %12 = vector.broadcast %cst_8 : f32 to vector<32x1024xf32>
    %13 = arith.addf %12, %11 : vector<32x1024xf32>
    %14 = arith.mulf %8, %13 : vector<32x1024xf32>
    %cst_9 = arith.constant 0.000000e+00 : f32
    %15 = vector.broadcast %cst_9 : f32 to vector<32x1280xf32>
    %c0_10 = arith.constant 0 : index
    %c0_11 = arith.constant 0 : index
    %16 = vector.load %arg8[%c0_10, %c0_11] : memref<32x1280xf32, #tpu.memory_space<vmem>>, vector<32x1280xf32>
    tpu.vector_store %arg8[%c0_10, %c0_11], %15 {strides = array<i32>} : memref<32x1280xf32, #tpu.memory_space<vmem>>, vector<32x1280xf32>,
    %c0_12 = arith.constant 0 : index
    %c128 = arith.constant 128 : index
    %17 = vector.load %arg8[%c0_12, %c128] : memref<32x1280xf32, #tpu.memory_space<vmem>>, vector<32x1024xf32>
    tpu.vector_store %arg8[%c0_12, %c128], %14 {strides = array<i32>} : memref<32x1280xf32, #tpu.memory_space<vmem>>, vector<32x1024xf32>,
    %c0_13 = arith.constant 0 : index
    %c0_14 = arith.constant 0 : index
    %18 = vector.load %arg4[%c0_13, %c0_14] : memref<8x9xf32, #tpu.memory_space<vmem>>, vector<8x9xf32>
    %c0_15 = arith.constant 0 : index
    %c0_16 = arith.constant 0 : index
    %19 = vector.load %arg5[%c0_15, %c0_16] : memref<8x1xf32, #tpu.memory_space<vmem>>, vector<8x1xf32>
    %c0_17 = arith.constant 0 : index
    %c0_18 = arith.constant 0 : index
    %20 = vector.load %arg6[%c0_17, %c0_18] : memref<8x1xf32, #tpu.memory_space<vmem>>, vector<8x1xf32>
    %21 = tpu.iota {dimensions = array<i32: 1>} : vector<1x1024xi32>
    %c32_i32 = arith.constant 32 : i32
    %c0_i32 = arith.constant 0 : i32
    %22 = arith.cmpi eq, %c32_i32, %c0_i32 : i32
    %c1_i32 = arith.constant 1 : i32
    %23 = arith.select %22, %c1_i32, %c32_i32 : i32
    %24 = vector.broadcast %23 : i32 to vector<1x1024xi32>
    %25 = arith.remsi %21, %24 : vector<1x1024xi32>
    %c0_i32_19 = arith.constant 0 : i32
    %26 = vector.broadcast %c0_i32_19 : i32 to vector<1x1024xi32>
    %27 = arith.cmpi ne, %25, %26 : vector<1x1024xi32>
    %c0_i32_20 = arith.constant 0 : i32
    %28 = vector.broadcast %c0_i32_20 : i32 to vector<1x1024xi32>
    %29 = arith.cmpi slt, %25, %28 : vector<1x1024xi32>
    %c0_i32_21 = arith.constant 0 : i32
    %30 = arith.cmpi slt, %23, %c0_i32_21 : i32
    %31 = vector.broadcast %30 : i1 to vector<1x1024xi1>
    %32 = vector.broadcast %31 : vector<1x1024xi1> to vector<1x1024xi1>
    %33 = arith.xori %29, %32 : vector<1x1024xi1>
    %34 = arith.andi %33, %27 : vector<1x1024xi1>
    %35 = vector.broadcast %23 : i32 to vector<1x1024xi32>
    %36 = arith.addi %25, %35 : vector<1x1024xi32>
    %37 = arith.select %34, %36, %25 : vector<1x1024xi1>, vector<1x1024xi32>
    %c0_i32_22 = arith.constant 0 : i32
    %38 = vector.broadcast %c0_i32_22 : i32 to vector<1x1024xi32>
    %39 = arith.cmpi ne, %37, %38 : vector<1x1024xi32>
    %40 = arith.extui %39 : vector<1x1024xi1> to vector<1x1024xi32>
    %41 = arith.sitofp %40 : vector<1x1024xi32> to vector<1x1024xf32>
    %c31_i32 = arith.constant 31 : i32
    %42 = vector.broadcast %c31_i32 : i32 to vector<1x1024xi32>
    %43 = arith.cmpi ne, %37, %42 : vector<1x1024xi32>
    %44 = arith.extui %43 : vector<1x1024xi1> to vector<1x1024xi32>
    %45 = arith.sitofp %44 : vector<1x1024xi32> to vector<1x1024xf32>
    %cst_23 = arith.constant 0.000000e+00 : f32
    %46 = vector.broadcast %cst_23 : f32 to vector<8x1024xf32>
    %c24 = arith.constant 24 : index
    %c95 = arith.constant 95 : index
    %47 = vector.load %arg8[%c24, %c95] : memref<32x1280xf32, #tpu.memory_space<vmem>>, vector<8x1024xf32>
    %48 = vector.extract_strided_slice %18 {offsets = [0, 0], sizes = [8, 1], strides = [1, 1]} : vector<8x9xf32> to vector<8x1xf32>
    %49 = vector.broadcast %48 : vector<8x1xf32> to vector<8x1024xf32>
    %50 = arith.mulf %47, %49 : vector<8x1024xf32>
    %51 = vector.broadcast %41 : vector<1x1024xf32> to vector<8x1024xf32>
    %52 = arith.mulf %50, %51 : vector<8x1024xf32>
    %53 = arith.addf %46, %52 : vector<8x1024xf32>
    %c16 = arith.constant 16 : index
    %c96 = arith.constant 96 : index
    %54 = vector.load %arg8[%c16, %c96] : memref<32x1280xf32, #tpu.memory_space<vmem>>, vector<8x1024xf32>
    %55 = vector.extract_strided_slice %18 {offsets = [0, 1], sizes = [8, 1], strides = [1, 1]} : vector<8x9xf32> to vector<8x1xf32>
    %56 = vector.broadcast %55 : vector<8x1xf32> to vector<8x1024xf32>
    %57 = arith.mulf %54, %56 : vector<8x1024xf32>
    %58 = arith.addf %53, %57 : vector<8x1024xf32>
    %c24_24 = arith.constant 24 : index
    %c96_25 = arith.constant 96 : index
    %59 = vector.load %arg8[%c24_24, %c96_25] : memref<32x1280xf32, #tpu.memory_space<vmem>>, vector<8x1024xf32>
    %60 = vector.extract_strided_slice %18 {offsets = [0, 2], sizes = [8, 1], strides = [1, 1]} : vector<8x9xf32> to vector<8x1xf32>
    %61 = vector.broadcast %60 : vector<8x1xf32> to vector<8x1024xf32>
    %62 = arith.mulf %59, %61 : vector<8x1024xf32>
    %63 = arith.addf %58, %62 : vector<8x1024xf32>
    %c8 = arith.constant 8 : index
    %c127 = arith.constant 127 : index
    %64 = vector.load %arg8[%c8, %c127] : memref<32x1280xf32, #tpu.memory_space<vmem>>, vector<8x1024xf32>
    %65 = vector.extract_strided_slice %18 {offsets = [0, 3], sizes = [8, 1], strides = [1, 1]} : vector<8x9xf32> to vector<8x1xf32>
    %66 = vector.broadcast %65 : vector<8x1xf32> to vector<8x1024xf32>
    %67 = arith.mulf %64, %66 : vector<8x1024xf32>
    %68 = vector.broadcast %41 : vector<1x1024xf32> to vector<8x1024xf32>
    %69 = arith.mulf %67, %68 : vector<8x1024xf32>
    %70 = arith.addf %63, %69 : vector<8x1024xf32>
    %c0_26 = arith.constant 0 : index
    %c128_27 = arith.constant 128 : index
    %71 = vector.load %arg8[%c0_26, %c128_27] : memref<32x1280xf32, #tpu.memory_space<vmem>>, vector<8x1024xf32>
    %72 = vector.extract_strided_slice %18 {offsets = [0, 4], sizes = [8, 1], strides = [1, 1]} : vector<8x9xf32> to vector<8x1xf32>
    %73 = vector.broadcast %72 : vector<8x1xf32> to vector<8x1024xf32>
    %74 = arith.mulf %71, %73 : vector<8x1024xf32>
    %75 = arith.addf %70, %74 : vector<8x1024xf32>
    %c8_28 = arith.constant 8 : index
    %c128_29 = arith.constant 128 : index
    %76 = vector.load %arg8[%c8_28, %c128_29] : memref<32x1280xf32, #tpu.memory_space<vmem>>, vector<8x1024xf32>
    %77 = vector.extract_strided_slice %18 {offsets = [0, 5], sizes = [8, 1], strides = [1, 1]} : vector<8x9xf32> to vector<8x1xf32>
    %78 = vector.broadcast %77 : vector<8x1xf32> to vector<8x1024xf32>
    %79 = arith.mulf %76, %78 : vector<8x1024xf32>
    %80 = arith.addf %75, %79 : vector<8x1024xf32>
    %c24_30 = arith.constant 24 : index
    %c127_31 = arith.constant 127 : index
    %81 = vector.load %arg8[%c24_30, %c127_31] : memref<32x1280xf32, #tpu.memory_space<vmem>>, vector<8x1024xf32>
    %82 = vector.extract_strided_slice %18 {offsets = [0, 6], sizes = [8, 1], strides = [1, 1]} : vector<8x9xf32> to vector<8x1xf32>
    %83 = vector.broadcast %82 : vector<8x1xf32> to vector<8x1024xf32>
    %84 = arith.mulf %81, %83 : vector<8x1024xf32>
    %85 = vector.broadcast %41 : vector<1x1024xf32> to vector<8x1024xf32>
    %86 = arith.mulf %84, %85 : vector<8x1024xf32>
    %87 = arith.addf %80, %86 : vector<8x1024xf32>
    %c16_32 = arith.constant 16 : index
    %c128_33 = arith.constant 128 : index
    %88 = vector.load %arg8[%c16_32, %c128_33] : memref<32x1280xf32, #tpu.memory_space<vmem>>, vector<8x1024xf32>
    %89 = vector.extract_strided_slice %18 {offsets = [0, 7], sizes = [8, 1], strides = [1, 1]} : vector<8x9xf32> to vector<8x1xf32>
    %90 = vector.broadcast %89 : vector<8x1xf32> to vector<8x1024xf32>
    %91 = arith.mulf %88, %90 : vector<8x1024xf32>
    %92 = arith.addf %87, %91 : vector<8x1024xf32>
    %c24_34 = arith.constant 24 : index
    %c128_35 = arith.constant 128 : index
    %93 = vector.load %arg8[%c24_34, %c128_35] : memref<32x1280xf32, #tpu.memory_space<vmem>>, vector<8x1024xf32>
    %94 = vector.extract_strided_slice %18 {offsets = [0, 8], sizes = [8, 1], strides = [1, 1]} : vector<8x9xf32> to vector<8x1xf32>
    %95 = vector.broadcast %94 : vector<8x1xf32> to vector<8x1024xf32>
    %96 = arith.mulf %93, %95 : vector<8x1024xf32>
    %97 = arith.addf %92, %96 : vector<8x1024xf32>
    %cst_36 = arith.constant dense<0.000000e+00> : vector<1024xf32>
    %98 = vector.multi_reduction <add>, %97, %cst_36 [0] : vector<8x1024xf32> to vector<1024xf32>
    %99 = vector.shape_cast %98 : vector<1024xf32> to vector<1x1024xf32>
    %cst_37 = arith.constant 8.000000e+00 : f32
    %100 = vector.broadcast %cst_37 : f32 to vector<1x1024xf32>
    %101 = arith.divf %99, %100 : vector<1x1024xf32>
    %102 = vector.broadcast %101 : vector<1x1024xf32> to vector<8x1024xf32>
    %103 = arith.subf %97, %102 : vector<8x1024xf32>
    %104 = arith.mulf %103, %103 : vector<8x1024xf32>
    %cst_38 = arith.constant dense<0.000000e+00> : vector<1024xf32>
    %105 = vector.multi_reduction <add>, %104, %cst_38 [0] : vector<8x1024xf32> to vector<1024xf32>
    %106 = vector.shape_cast %105 : vector<1024xf32> to vector<1x1024xf32>
    %cst_39 = arith.constant 8.000000e+00 : f32
    %107 = vector.broadcast %cst_39 : f32 to vector<1x1024xf32>
    %108 = arith.divf %106, %107 : vector<1x1024xf32>
    %109 = vector.broadcast %101 : vector<1x1024xf32> to vector<8x1024xf32>
    %110 = arith.subf %97, %109 : vector<8x1024xf32>
    %cst_40 = arith.constant 9.99999997E-7 : f32
    %111 = vector.broadcast %cst_40 : f32 to vector<1x1024xf32>
    %112 = arith.addf %108, %111 : vector<1x1024xf32>
    %113 = math.rsqrt %112 : vector<1x1024xf32>
    %114 = vector.broadcast %113 : vector<1x1024xf32> to vector<8x1024xf32>
    %115 = arith.mulf %110, %114 : vector<8x1024xf32>
    %116 = vector.broadcast %19 : vector<8x1xf32> to vector<8x1024xf32>
    %117 = arith.mulf %115, %116 : vector<8x1024xf32>
    %118 = vector.broadcast %20 : vector<8x1xf32> to vector<8x1024xf32>
    %119 = arith.addf %117, %118 : vector<8x1024xf32>
    %c0_41 = arith.constant 0 : index
    %c0_42 = arith.constant 0 : index
    %c0_43 = arith.constant 0 : index
    %c0_44 = arith.constant 0 : index
    %120 = vector.load %arg7[%c0_41, %c0_42, %c0_43, %c0_44] : memref<1x4x8x1024xf32, #tpu.memory_space<vmem>>, vector<1x1x8x1024xf32>
    %121 = vector.shape_cast %120 : vector<1x1x8x1024xf32> to vector<8x1024xf32>
    %122 = vector.shape_cast %119 : vector<8x1024xf32> to vector<1x1x8x1024xf32>
    tpu.vector_store %arg7[%c0_41, %c0_42, %c0_43, %c0_44], %122 {strides = array<i32>} : memref<1x4x8x1024xf32, #tpu.memory_space<vmem>>, vector<1x1x8x1024xf32>,
    %cst_45 = arith.constant 0.000000e+00 : f32
    %123 = vector.broadcast %cst_45 : f32 to vector<8x1024xf32>
    %c16_46 = arith.constant 16 : index
    %c96_47 = arith.constant 96 : index
    %124 = vector.load %arg8[%c16_46, %c96_47] : memref<32x1280xf32, #tpu.memory_space<vmem>>, vector<8x1024xf32>
    %125 = vector.extract_strided_slice %18 {offsets = [0, 0], sizes = [8, 1], strides = [1, 1]} : vector<8x9xf32> to vector<8x1xf32>
    %126 = vector.broadcast %125 : vector<8x1xf32> to vector<8x1024xf32>
    %127 = arith.mulf %124, %126 : vector<8x1024xf32>
    %128 = arith.addf %123, %127 : vector<8x1024xf32>
    %c24_48 = arith.constant 24 : index
    %c96_49 = arith.constant 96 : index
    %129 = vector.load %arg8[%c24_48, %c96_49] : memref<32x1280xf32, #tpu.memory_space<vmem>>, vector<8x1024xf32>
    %130 = vector.extract_strided_slice %18 {offsets = [0, 1], sizes = [8, 1], strides = [1, 1]} : vector<8x9xf32> to vector<8x1xf32>
    %131 = vector.broadcast %130 : vector<8x1xf32> to vector<8x1024xf32>
    %132 = arith.mulf %129, %131 : vector<8x1024xf32>
    %133 = arith.addf %128, %132 : vector<8x1024xf32>
    %c16_50 = arith.constant 16 : index
    %c97 = arith.constant 97 : index
    %134 = vector.load %arg8[%c16_50, %c97] : memref<32x1280xf32, #tpu.memory_space<vmem>>, vector<8x1024xf32>
    %135 = vector.extract_strided_slice %18 {offsets = [0, 2], sizes = [8, 1], strides = [1, 1]} : vector<8x9xf32> to vector<8x1xf32>
    %136 = vector.broadcast %135 : vector<8x1xf32> to vector<8x1024xf32>
    %137 = arith.mulf %134, %136 : vector<8x1024xf32>
    %138 = vector.broadcast %45 : vector<1x1024xf32> to vector<8x1024xf32>
    %139 = arith.mulf %137, %138 : vector<8x1024xf32>
    %140 = arith.addf %133, %139 : vector<8x1024xf32>
    %c0_51 = arith.constant 0 : index
    %c128_52 = arith.constant 128 : index
    %141 = vector.load %arg8[%c0_51, %c128_52] : memref<32x1280xf32, #tpu.memory_space<vmem>>, vector<8x1024xf32>
    %142 = vector.extract_strided_slice %18 {offsets = [0, 3], sizes = [8, 1], strides = [1, 1]} : vector<8x9xf32> to vector<8x1xf32>
    %143 = vector.broadcast %142 : vector<8x1xf32> to vector<8x1024xf32>
    %144 = arith.mulf %141, %143 : vector<8x1024xf32>
    %145 = arith.addf %140, %144 : vector<8x1024xf32>
    %c8_53 = arith.constant 8 : index
    %c128_54 = arith.constant 128 : index
    %146 = vector.load %arg8[%c8_53, %c128_54] : memref<32x1280xf32, #tpu.memory_space<vmem>>, vector<8x1024xf32>
    %147 = vector.extract_strided_slice %18 {offsets = [0, 4], sizes = [8, 1], strides = [1, 1]} : vector<8x9xf32> to vector<8x1xf32>
    %148 = vector.broadcast %147 : vector<8x1xf32> to vector<8x1024xf32>
    %149 = arith.mulf %146, %148 : vector<8x1024xf32>
    %150 = arith.addf %145, %149 : vector<8x1024xf32>
    %c0_55 = arith.constant 0 : index
    %c129 = arith.constant 129 : index
    %151 = vector.load %arg8[%c0_55, %c129] : memref<32x1280xf32, #tpu.memory_space<vmem>>, vector<8x1024xf32>
    %152 = vector.extract_strided_slice %18 {offsets = [0, 5], sizes = [8, 1], strides = [1, 1]} : vector<8x9xf32> to vector<8x1xf32>
    %153 = vector.broadcast %152 : vector<8x1xf32> to vector<8x1024xf32>
    %154 = arith.mulf %151, %153 : vector<8x1024xf32>
    %155 = vector.broadcast %45 : vector<1x1024xf32> to vector<8x1024xf32>
    %156 = arith.mulf %154, %155 : vector<8x1024xf32>
    %157 = arith.addf %150, %156 : vector<8x1024xf32>
    %c16_56 = arith.constant 16 : index
    %c128_57 = arith.constant 128 : index
    %158 = vector.load %arg8[%c16_56, %c128_57] : memref<32x1280xf32, #tpu.memory_space<vmem>>, vector<8x1024xf32>
    %159 = vector.extract_strided_slice %18 {offsets = [0, 6], sizes = [8, 1], strides = [1, 1]} : vector<8x9xf32> to vector<8x1xf32>
    %160 = vector.broadcast %159 : vector<8x1xf32> to vector<8x1024xf32>
    %161 = arith.mulf %158, %160 : vector<8x1024xf32>
    %162 = arith.addf %157, %161 : vector<8x1024xf32>
    %c24_58 = arith.constant 24 : index
    %c128_59 = arith.constant 128 : index
    %163 = vector.load %arg8[%c24_58, %c128_59] : memref<32x1280xf32, #tpu.memory_space<vmem>>, vector<8x1024xf32>
    %164 = vector.extract_strided_slice %18 {offsets = [0, 7], sizes = [8, 1], strides = [1, 1]} : vector<8x9xf32> to vector<8x1xf32>
    %165 = vector.broadcast %164 : vector<8x1xf32> to vector<8x1024xf32>
    %166 = arith.mulf %163, %165 : vector<8x1024xf32>
    %167 = arith.addf %162, %166 : vector<8x1024xf32>
    %c16_60 = arith.constant 16 : index
    %c129_61 = arith.constant 129 : index
    %168 = vector.load %arg8[%c16_60, %c129_61] : memref<32x1280xf32, #tpu.memory_space<vmem>>, vector<8x1024xf32>
    %169 = vector.extract_strided_slice %18 {offsets = [0, 8], sizes = [8, 1], strides = [1, 1]} : vector<8x9xf32> to vector<8x1xf32>
    %170 = vector.broadcast %169 : vector<8x1xf32> to vector<8x1024xf32>
    %171 = arith.mulf %168, %170 : vector<8x1024xf32>
    %172 = vector.broadcast %45 : vector<1x1024xf32> to vector<8x1024xf32>
    %173 = arith.mulf %171, %172 : vector<8x1024xf32>
    %174 = arith.addf %167, %173 : vector<8x1024xf32>
    %cst_62 = arith.constant dense<0.000000e+00> : vector<1024xf32>
    %175 = vector.multi_reduction <add>, %174, %cst_62 [0] : vector<8x1024xf32> to vector<1024xf32>
    %176 = vector.shape_cast %175 : vector<1024xf32> to vector<1x1024xf32>
    %cst_63 = arith.constant 8.000000e+00 : f32
    %177 = vector.broadcast %cst_63 : f32 to vector<1x1024xf32>
    %178 = arith.divf %176, %177 : vector<1x1024xf32>
    %179 = vector.broadcast %178 : vector<1x1024xf32> to vector<8x1024xf32>
    %180 = arith.subf %174, %179 : vector<8x1024xf32>
    %181 = arith.mulf %180, %180 : vector<8x1024xf32>
    %cst_64 = arith.constant dense<0.000000e+00> : vector<1024xf32>
    %182 = vector.multi_reduction <add>, %181, %cst_64 [0] : vector<8x1024xf32> to vector<1024xf32>
    %183 = vector.shape_cast %182 : vector<1024xf32> to vector<1x1024xf32>
    %cst_65 = arith.constant 8.000000e+00 : f32
    %184 = vector.broadcast %cst_65 : f32 to vector<1x1024xf32>
    %185 = arith.divf %183, %184 : vector<1x1024xf32>
    %186 = vector.broadcast %178 : vector<1x1024xf32> to vector<8x1024xf32>
    %187 = arith.subf %174, %186 : vector<8x1024xf32>
    %cst_66 = arith.constant 9.99999997E-7 : f32
    %188 = vector.broadcast %cst_66 : f32 to vector<1x1024xf32>
    %189 = arith.addf %185, %188 : vector<1x1024xf32>
    %190 = math.rsqrt %189 : vector<1x1024xf32>
    %191 = vector.broadcast %190 : vector<1x1024xf32> to vector<8x1024xf32>
    %192 = arith.mulf %187, %191 : vector<8x1024xf32>
    %193 = vector.broadcast %19 : vector<8x1xf32> to vector<8x1024xf32>
    %194 = arith.mulf %192, %193 : vector<8x1024xf32>
    %195 = vector.broadcast %20 : vector<8x1xf32> to vector<8x1024xf32>
    %196 = arith.addf %194, %195 : vector<8x1024xf32>
    %c0_67 = arith.constant 0 : index
    %c1 = arith.constant 1 : index
    %c0_68 = arith.constant 0 : index
    %c0_69 = arith.constant 0 : index
    %197 = vector.load %arg7[%c0_67, %c1, %c0_68, %c0_69] : memref<1x4x8x1024xf32, #tpu.memory_space<vmem>>, vector<1x1x8x1024xf32>
    %198 = vector.shape_cast %197 : vector<1x1x8x1024xf32> to vector<8x1024xf32>
    %199 = vector.shape_cast %196 : vector<8x1024xf32> to vector<1x1x8x1024xf32>
    tpu.vector_store %arg7[%c0_67, %c1, %c0_68, %c0_69], %199 {strides = array<i32>} : memref<1x4x8x1024xf32, #tpu.memory_space<vmem>>, vector<1x1x8x1024xf32>,
    %cst_70 = arith.constant 0.000000e+00 : f32
    %200 = vector.broadcast %cst_70 : f32 to vector<8x1024xf32>
    %c8_71 = arith.constant 8 : index
    %c127_72 = arith.constant 127 : index
    %201 = vector.load %arg8[%c8_71, %c127_72] : memref<32x1280xf32, #tpu.memory_space<vmem>>, vector<8x1024xf32>
    %202 = vector.extract_strided_slice %18 {offsets = [0, 0], sizes = [8, 1], strides = [1, 1]} : vector<8x9xf32> to vector<8x1xf32>
    %203 = vector.broadcast %202 : vector<8x1xf32> to vector<8x1024xf32>
    %204 = arith.mulf %201, %203 : vector<8x1024xf32>
    %205 = vector.broadcast %41 : vector<1x1024xf32> to vector<8x1024xf32>
    %206 = arith.mulf %204, %205 : vector<8x1024xf32>
    %207 = arith.addf %200, %206 : vector<8x1024xf32>
    %c0_73 = arith.constant 0 : index
    %c128_74 = arith.constant 128 : index
    %208 = vector.load %arg8[%c0_73, %c128_74] : memref<32x1280xf32, #tpu.memory_space<vmem>>, vector<8x1024xf32>
    %209 = vector.extract_strided_slice %18 {offsets = [0, 1], sizes = [8, 1], strides = [1, 1]} : vector<8x9xf32> to vector<8x1xf32>
    %210 = vector.broadcast %209 : vector<8x1xf32> to vector<8x1024xf32>
    %211 = arith.mulf %208, %210 : vector<8x1024xf32>
    %212 = arith.addf %207, %211 : vector<8x1024xf32>
    %c8_75 = arith.constant 8 : index
    %c128_76 = arith.constant 128 : index
    %213 = vector.load %arg8[%c8_75, %c128_76] : memref<32x1280xf32, #tpu.memory_space<vmem>>, vector<8x1024xf32>
    %214 = vector.extract_strided_slice %18 {offsets = [0, 2], sizes = [8, 1], strides = [1, 1]} : vector<8x9xf32> to vector<8x1xf32>
    %215 = vector.broadcast %214 : vector<8x1xf32> to vector<8x1024xf32>
    %216 = arith.mulf %213, %215 : vector<8x1024xf32>
    %217 = arith.addf %212, %216 : vector<8x1024xf32>
    %c24_77 = arith.constant 24 : index
    %c127_78 = arith.constant 127 : index
    %218 = vector.load %arg8[%c24_77, %c127_78] : memref<32x1280xf32, #tpu.memory_space<vmem>>, vector<8x1024xf32>
    %219 = vector.extract_strided_slice %18 {offsets = [0, 3], sizes = [8, 1], strides = [1, 1]} : vector<8x9xf32> to vector<8x1xf32>
    %220 = vector.broadcast %219 : vector<8x1xf32> to vector<8x1024xf32>
    %221 = arith.mulf %218, %220 : vector<8x1024xf32>
    %222 = vector.broadcast %41 : vector<1x1024xf32> to vector<8x1024xf32>
    %223 = arith.mulf %221, %222 : vector<8x1024xf32>
    %224 = arith.addf %217, %223 : vector<8x1024xf32>
    %c16_79 = arith.constant 16 : index
    %c128_80 = arith.constant 128 : index
    %225 = vector.load %arg8[%c16_79, %c128_80] : memref<32x1280xf32, #tpu.memory_space<vmem>>, vector<8x1024xf32>
    %226 = vector.extract_strided_slice %18 {offsets = [0, 4], sizes = [8, 1], strides = [1, 1]} : vector<8x9xf32> to vector<8x1xf32>
    %227 = vector.broadcast %226 : vector<8x1xf32> to vector<8x1024xf32>
    %228 = arith.mulf %225, %227 : vector<8x1024xf32>
    %229 = arith.addf %224, %228 : vector<8x1024xf32>
    %c24_81 = arith.constant 24 : index
    %c128_82 = arith.constant 128 : index
    %230 = vector.load %arg8[%c24_81, %c128_82] : memref<32x1280xf32, #tpu.memory_space<vmem>>, vector<8x1024xf32>
    %231 = vector.extract_strided_slice %18 {offsets = [0, 5], sizes = [8, 1], strides = [1, 1]} : vector<8x9xf32> to vector<8x1xf32>
    %232 = vector.broadcast %231 : vector<8x1xf32> to vector<8x1024xf32>
    %233 = arith.mulf %230, %232 : vector<8x1024xf32>
    %234 = arith.addf %229, %233 : vector<8x1024xf32>
    %c8_83 = arith.constant 8 : index
    %c159 = arith.constant 159 : index
    %235 = vector.load %arg8[%c8_83, %c159] : memref<32x1280xf32, #tpu.memory_space<vmem>>, vector<8x1024xf32>
    %236 = vector.extract_strided_slice %18 {offsets = [0, 6], sizes = [8, 1], strides = [1, 1]} : vector<8x9xf32> to vector<8x1xf32>
    %237 = vector.broadcast %236 : vector<8x1xf32> to vector<8x1024xf32>
    %238 = arith.mulf %235, %237 : vector<8x1024xf32>
    %239 = vector.broadcast %41 : vector<1x1024xf32> to vector<8x1024xf32>
    %240 = arith.mulf %238, %239 : vector<8x1024xf32>
    %241 = arith.addf %234, %240 : vector<8x1024xf32>
    %c0_84 = arith.constant 0 : index
    %c160 = arith.constant 160 : index
    %242 = vector.load %arg8[%c0_84, %c160] : memref<32x1280xf32, #tpu.memory_space<vmem>>, vector<8x1024xf32>
    %243 = vector.extract_strided_slice %18 {offsets = [0, 7], sizes = [8, 1], strides = [1, 1]} : vector<8x9xf32> to vector<8x1xf32>
    %244 = vector.broadcast %243 : vector<8x1xf32> to vector<8x1024xf32>
    %245 = arith.mulf %242, %244 : vector<8x1024xf32>
    %246 = arith.addf %241, %245 : vector<8x1024xf32>
    %c8_85 = arith.constant 8 : index
    %c160_86 = arith.constant 160 : index
    %247 = vector.load %arg8[%c8_85, %c160_86] : memref<32x1280xf32, #tpu.memory_space<vmem>>, vector<8x1024xf32>
    %248 = vector.extract_strided_slice %18 {offsets = [0, 8], sizes = [8, 1], strides = [1, 1]} : vector<8x9xf32> to vector<8x1xf32>
    %249 = vector.broadcast %248 : vector<8x1xf32> to vector<8x1024xf32>
    %250 = arith.mulf %247, %249 : vector<8x1024xf32>
    %251 = arith.addf %246, %250 : vector<8x1024xf32>
    %cst_87 = arith.constant dense<0.000000e+00> : vector<1024xf32>
    %252 = vector.multi_reduction <add>, %251, %cst_87 [0] : vector<8x1024xf32> to vector<1024xf32>
    %253 = vector.shape_cast %252 : vector<1024xf32> to vector<1x1024xf32>
    %cst_88 = arith.constant 8.000000e+00 : f32
    %254 = vector.broadcast %cst_88 : f32 to vector<1x1024xf32>
    %255 = arith.divf %253, %254 : vector<1x1024xf32>
    %256 = vector.broadcast %255 : vector<1x1024xf32> to vector<8x1024xf32>
    %257 = arith.subf %251, %256 : vector<8x1024xf32>
    %258 = arith.mulf %257, %257 : vector<8x1024xf32>
    %cst_89 = arith.constant dense<0.000000e+00> : vector<1024xf32>
    %259 = vector.multi_reduction <add>, %258, %cst_89 [0] : vector<8x1024xf32> to vector<1024xf32>
    %260 = vector.shape_cast %259 : vector<1024xf32> to vector<1x1024xf32>
    %cst_90 = arith.constant 8.000000e+00 : f32
    %261 = vector.broadcast %cst_90 : f32 to vector<1x1024xf32>
    %262 = arith.divf %260, %261 : vector<1x1024xf32>
    %263 = vector.broadcast %255 : vector<1x1024xf32> to vector<8x1024xf32>
    %264 = arith.subf %251, %263 : vector<8x1024xf32>
    %cst_91 = arith.constant 9.99999997E-7 : f32
    %265 = vector.broadcast %cst_91 : f32 to vector<1x1024xf32>
    %266 = arith.addf %262, %265 : vector<1x1024xf32>
    %267 = math.rsqrt %266 : vector<1x1024xf32>
    %268 = vector.broadcast %267 : vector<1x1024xf32> to vector<8x1024xf32>
    %269 = arith.mulf %264, %268 : vector<8x1024xf32>
    %270 = vector.broadcast %19 : vector<8x1xf32> to vector<8x1024xf32>
    %271 = arith.mulf %269, %270 : vector<8x1024xf32>
    %272 = vector.broadcast %20 : vector<8x1xf32> to vector<8x1024xf32>
    %273 = arith.addf %271, %272 : vector<8x1024xf32>
    %c0_92 = arith.constant 0 : index
    %c2 = arith.constant 2 : index
    %c0_93 = arith.constant 0 : index
    %c0_94 = arith.constant 0 : index
    %274 = vector.load %arg7[%c0_92, %c2, %c0_93, %c0_94] : memref<1x4x8x1024xf32, #tpu.memory_space<vmem>>, vector<1x1x8x1024xf32>
    %275 = vector.shape_cast %274 : vector<1x1x8x1024xf32> to vector<8x1024xf32>
    %276 = vector.shape_cast %273 : vector<8x1024xf32> to vector<1x1x8x1024xf32>
    tpu.vector_store %arg7[%c0_92, %c2, %c0_93, %c0_94], %276 {strides = array<i32>} : memref<1x4x8x1024xf32, #tpu.memory_space<vmem>>, vector<1x1x8x1024xf32>,
    %cst_95 = arith.constant 0.000000e+00 : f32
    %277 = vector.broadcast %cst_95 : f32 to vector<8x1024xf32>
    %c0_96 = arith.constant 0 : index
    %c128_97 = arith.constant 128 : index
    %278 = vector.load %arg8[%c0_96, %c128_97] : memref<32x1280xf32, #tpu.memory_space<vmem>>, vector<8x1024xf32>
    %279 = vector.extract_strided_slice %18 {offsets = [0, 0], sizes = [8, 1], strides = [1, 1]} : vector<8x9xf32> to vector<8x1xf32>
    %280 = vector.broadcast %279 : vector<8x1xf32> to vector<8x1024xf32>
    %281 = arith.mulf %278, %280 : vector<8x1024xf32>
    %282 = arith.addf %277, %281 : vector<8x1024xf32>
    %c8_98 = arith.constant 8 : index
    %c128_99 = arith.constant 128 : index
    %283 = vector.load %arg8[%c8_98, %c128_99] : memref<32x1280xf32, #tpu.memory_space<vmem>>, vector<8x1024xf32>
    %284 = vector.extract_strided_slice %18 {offsets = [0, 1], sizes = [8, 1], strides = [1, 1]} : vector<8x9xf32> to vector<8x1xf32>
    %285 = vector.broadcast %284 : vector<8x1xf32> to vector<8x1024xf32>
    %286 = arith.mulf %283, %285 : vector<8x1024xf32>
    %287 = arith.addf %282, %286 : vector<8x1024xf32>
    %c0_100 = arith.constant 0 : index
    %c129_101 = arith.constant 129 : index
    %288 = vector.load %arg8[%c0_100, %c129_101] : memref<32x1280xf32, #tpu.memory_space<vmem>>, vector<8x1024xf32>
    %289 = vector.extract_strided_slice %18 {offsets = [0, 2], sizes = [8, 1], strides = [1, 1]} : vector<8x9xf32> to vector<8x1xf32>
    %290 = vector.broadcast %289 : vector<8x1xf32> to vector<8x1024xf32>
    %291 = arith.mulf %288, %290 : vector<8x1024xf32>
    %292 = vector.broadcast %45 : vector<1x1024xf32> to vector<8x1024xf32>
    %293 = arith.mulf %291, %292 : vector<8x1024xf32>
    %294 = arith.addf %287, %293 : vector<8x1024xf32>
    %c16_102 = arith.constant 16 : index
    %c128_103 = arith.constant 128 : index
    %295 = vector.load %arg8[%c16_102, %c128_103] : memref<32x1280xf32, #tpu.memory_space<vmem>>, vector<8x1024xf32>
    %296 = vector.extract_strided_slice %18 {offsets = [0, 3], sizes = [8, 1], strides = [1, 1]} : vector<8x9xf32> to vector<8x1xf32>
    %297 = vector.broadcast %296 : vector<8x1xf32> to vector<8x1024xf32>
    %298 = arith.mulf %295, %297 : vector<8x1024xf32>
    %299 = arith.addf %294, %298 : vector<8x1024xf32>
    %c24_104 = arith.constant 24 : index
    %c128_105 = arith.constant 128 : index
    %300 = vector.load %arg8[%c24_104, %c128_105] : memref<32x1280xf32, #tpu.memory_space<vmem>>, vector<8x1024xf32>
    %301 = vector.extract_strided_slice %18 {offsets = [0, 4], sizes = [8, 1], strides = [1, 1]} : vector<8x9xf32> to vector<8x1xf32>
    %302 = vector.broadcast %301 : vector<8x1xf32> to vector<8x1024xf32>
    %303 = arith.mulf %300, %302 : vector<8x1024xf32>
    %304 = arith.addf %299, %303 : vector<8x1024xf32>
    %c16_106 = arith.constant 16 : index
    %c129_107 = arith.constant 129 : index
    %305 = vector.load %arg8[%c16_106, %c129_107] : memref<32x1280xf32, #tpu.memory_space<vmem>>, vector<8x1024xf32>
    %306 = vector.extract_strided_slice %18 {offsets = [0, 5], sizes = [8, 1], strides = [1, 1]} : vector<8x9xf32> to vector<8x1xf32>
    %307 = vector.broadcast %306 : vector<8x1xf32> to vector<8x1024xf32>
    %308 = arith.mulf %305, %307 : vector<8x1024xf32>
    %309 = vector.broadcast %45 : vector<1x1024xf32> to vector<8x1024xf32>
    %310 = arith.mulf %308, %309 : vector<8x1024xf32>
    %311 = arith.addf %304, %310 : vector<8x1024xf32>
    %c0_108 = arith.constant 0 : index
    %c160_109 = arith.constant 160 : index
    %312 = vector.load %arg8[%c0_108, %c160_109] : memref<32x1280xf32, #tpu.memory_space<vmem>>, vector<8x1024xf32>
    %313 = vector.extract_strided_slice %18 {offsets = [0, 6], sizes = [8, 1], strides = [1, 1]} : vector<8x9xf32> to vector<8x1xf32>
    %314 = vector.broadcast %313 : vector<8x1xf32> to vector<8x1024xf32>
    %315 = arith.mulf %312, %314 : vector<8x1024xf32>
    %316 = arith.addf %311, %315 : vector<8x1024xf32>
    %c8_110 = arith.constant 8 : index
    %c160_111 = arith.constant 160 : index
    %317 = vector.load %arg8[%c8_110, %c160_111] : memref<32x1280xf32, #tpu.memory_space<vmem>>, vector<8x1024xf32>
    %318 = vector.extract_strided_slice %18 {offsets = [0, 7], sizes = [8, 1], strides = [1, 1]} : vector<8x9xf32> to vector<8x1xf32>
    %319 = vector.broadcast %318 : vector<8x1xf32> to vector<8x1024xf32>
    %320 = arith.mulf %317, %319 : vector<8x1024xf32>
    %321 = arith.addf %316, %320 : vector<8x1024xf32>
    %c0_112 = arith.constant 0 : index
    %c161 = arith.constant 161 : index
    %322 = vector.load %arg8[%c0_112, %c161] : memref<32x1280xf32, #tpu.memory_space<vmem>>, vector<8x1024xf32>
    %323 = vector.extract_strided_slice %18 {offsets = [0, 8], sizes = [8, 1], strides = [1, 1]} : vector<8x9xf32> to vector<8x1xf32>
    %324 = vector.broadcast %323 : vector<8x1xf32> to vector<8x1024xf32>
    %325 = arith.mulf %322, %324 : vector<8x1024xf32>
    %326 = vector.broadcast %45 : vector<1x1024xf32> to vector<8x1024xf32>
    %327 = arith.mulf %325, %326 : vector<8x1024xf32>
    %328 = arith.addf %321, %327 : vector<8x1024xf32>
    %cst_113 = arith.constant dense<0.000000e+00> : vector<1024xf32>
    %329 = vector.multi_reduction <add>, %328, %cst_113 [0] : vector<8x1024xf32> to vector<1024xf32>
    %330 = vector.shape_cast %329 : vector<1024xf32> to vector<1x1024xf32>
    %cst_114 = arith.constant 8.000000e+00 : f32
    %331 = vector.broadcast %cst_114 : f32 to vector<1x1024xf32>
    %332 = arith.divf %330, %331 : vector<1x1024xf32>
    %333 = vector.broadcast %332 : vector<1x1024xf32> to vector<8x1024xf32>
    %334 = arith.subf %328, %333 : vector<8x1024xf32>
    %335 = arith.mulf %334, %334 : vector<8x1024xf32>
    %cst_115 = arith.constant dense<0.000000e+00> : vector<1024xf32>
    %336 = vector.multi_reduction <add>, %335, %cst_115 [0] : vector<8x1024xf32> to vector<1024xf32>
    %337 = vector.shape_cast %336 : vector<1024xf32> to vector<1x1024xf32>
    %cst_116 = arith.constant 8.000000e+00 : f32
    %338 = vector.broadcast %cst_116 : f32 to vector<1x1024xf32>
    %339 = arith.divf %337, %338 : vector<1x1024xf32>
    %340 = vector.broadcast %332 : vector<1x1024xf32> to vector<8x1024xf32>
    %341 = arith.subf %328, %340 : vector<8x1024xf32>
    %cst_117 = arith.constant 9.99999997E-7 : f32
    %342 = vector.broadcast %cst_117 : f32 to vector<1x1024xf32>
    %343 = arith.addf %339, %342 : vector<1x1024xf32>
    %344 = math.rsqrt %343 : vector<1x1024xf32>
    %345 = vector.broadcast %344 : vector<1x1024xf32> to vector<8x1024xf32>
    %346 = arith.mulf %341, %345 : vector<8x1024xf32>
    %347 = vector.broadcast %19 : vector<8x1xf32> to vector<8x1024xf32>
    %348 = arith.mulf %346, %347 : vector<8x1024xf32>
    %349 = vector.broadcast %20 : vector<8x1xf32> to vector<8x1024xf32>
    %350 = arith.addf %348, %349 : vector<8x1024xf32>
    %c0_118 = arith.constant 0 : index
    %c3 = arith.constant 3 : index
    %c0_119 = arith.constant 0 : index
    %c0_120 = arith.constant 0 : index
    %351 = vector.load %arg7[%c0_118, %c3, %c0_119, %c0_120] : memref<1x4x8x1024xf32, #tpu.memory_space<vmem>>, vector<1x1x8x1024xf32>
    %352 = vector.shape_cast %351 : vector<1x1x8x1024xf32> to vector<8x1024xf32>
    %353 = vector.shape_cast %350 : vector<8x1024xf32> to vector<1x1x8x1024xf32>
    tpu.vector_store %arg7[%c0_118, %c3, %c0_119, %c0_120], %353 {strides = array<i32>} : memref<1x4x8x1024xf32, #tpu.memory_space<vmem>>, vector<1x1x8x1024xf32>,
    return
  }
  func.func @transform_0(%arg0: i32) -> (i32, i32, i32) {
    %c0_i32 = arith.constant 0 : i32
    %c0_i32_0 = arith.constant 0 : i32
    %c0_i32_1 = arith.constant 0 : i32
    return %arg0, %c0_i32, %c0_i32_0 : i32, i32, i32
  }
  func.func @transform_1(%arg0: i32) -> (i32, i32) {
    %c0_i32 = arith.constant 0 : i32
    %c0_i32_0 = arith.constant 0 : i32
    %c0_i32_1 = arith.constant 0 : i32
    return %c0_i32, %c0_i32_0 : i32, i32
  }
  func.func @transform_2(%arg0: i32) -> (i32, i32) {
    %c0_i32 = arith.constant 0 : i32
    %c0_i32_0 = arith.constant 0 : i32
    %c0_i32_1 = arith.constant 0 : i32
    return %c0_i32, %c0_i32_0 : i32, i32
  }
  func.func @transform_3(%arg0: i32) -> (i32, i32) {
    %c0_i32 = arith.constant 0 : i32
    %c0_i32_0 = arith.constant 0 : i32
    %c0_i32_1 = arith.constant 0 : i32
    return %c0_i32, %c0_i32_0 : i32, i32
  }
  func.func @transform_4(%arg0: i32) -> (i32, i32) {
    %c0_i32 = arith.constant 0 : i32
    %c0_i32_0 = arith.constant 0 : i32
    %c0_i32_1 = arith.constant 0 : i32
    return %c0_i32, %c0_i32_0 : i32, i32
  }
  func.func @transform_5(%arg0: i32) -> (i32, i32) {
    %c0_i32 = arith.constant 0 : i32
    %c0_i32_0 = arith.constant 0 : i32
    %c0_i32_1 = arith.constant 0 : i32
    return %c0_i32, %c0_i32_0 : i32, i32
  }
  func.func @transform_6(%arg0: i32) -> (i32, i32, i32, i32) {
    %c0_i32 = arith.constant 0 : i32
    %c0_i32_0 = arith.constant 0 : i32
    %c0_i32_1 = arith.constant 0 : i32
    %c0_i32_2 = arith.constant 0 : i32
    return %arg0, %c0_i32, %c0_i32_0, %c0_i32_1 : i32, i32, i32, i32
  }
}

module attributes {stable_mosaic.version = 11 : i64} {
  func.func @kernel(%arg0: i32, %arg1: memref<1x4x8x64xf32, #tpu.memory_space<vmem>>, %arg2: memref<8x9xf32, #tpu.memory_space<vmem>>, %arg3: memref<8x1xf32, #tpu.memory_space<vmem>>, %arg4: memref<8x1xf32, #tpu.memory_space<vmem>>, %arg5: memref<1x8x64xf32, #tpu.memory_space<vmem>>, %arg6: memref<8x320xf32, #tpu.memory_space<vmem>>) attributes {dimension_semantics = [#tpu.dimension_semantics<parallel>], iteration_bounds = array<i64: 2>, scalar_prefetch = 0 : i64, scratch_operands = 1 : i64, tpu.core_type = #tpu.core_type<tc>, window_params = [{transform_indices = @transform_0, window_bounds = array<i64: 1, 4, 8, 64>}, {pipeline_mode = #tpu.pipeline_mode<synchronous>, transform_indices = @transform_1, window_bounds = array<i64: 8, 9>}, {pipeline_mode = #tpu.pipeline_mode<synchronous>, transform_indices = @transform_2, window_bounds = array<i64: 8, 1>}, {pipeline_mode = #tpu.pipeline_mode<synchronous>, transform_indices = @transform_3, window_bounds = array<i64: 8, 1>}, {transform_indices = @transform_4, window_bounds = array<i64: 1, 8, 64>}]} {
    %c0 = arith.constant 0 : index
    %c0_0 = arith.constant 0 : index
    %c0_1 = arith.constant 0 : index
    %c0_2 = arith.constant 0 : index
    %0 = vector.load %arg1[%c0, %c0_0, %c0_1, %c0_2] : memref<1x4x8x64xf32, #tpu.memory_space<vmem>>, vector<1x1x8x64xf32>
    %1 = vector.shape_cast %0 : vector<1x1x8x64xf32> to vector<8x64xf32>
    %c0_3 = arith.constant 0 : index
    %c1 = arith.constant 1 : index
    %c0_4 = arith.constant 0 : index
    %c0_5 = arith.constant 0 : index
    %2 = vector.load %arg1[%c0_3, %c1, %c0_4, %c0_5] : memref<1x4x8x64xf32, #tpu.memory_space<vmem>>, vector<1x1x8x64xf32>
    %3 = vector.shape_cast %2 : vector<1x1x8x64xf32> to vector<8x64xf32>
    %4 = arith.maximumf %1, %3 : vector<8x64xf32>
    %c0_6 = arith.constant 0 : index
    %c2 = arith.constant 2 : index
    %c0_7 = arith.constant 0 : index
    %c0_8 = arith.constant 0 : index
    %5 = vector.load %arg1[%c0_6, %c2, %c0_7, %c0_8] : memref<1x4x8x64xf32, #tpu.memory_space<vmem>>, vector<1x1x8x64xf32>
    %6 = vector.shape_cast %5 : vector<1x1x8x64xf32> to vector<8x64xf32>
    %c0_9 = arith.constant 0 : index
    %c3 = arith.constant 3 : index
    %c0_10 = arith.constant 0 : index
    %c0_11 = arith.constant 0 : index
    %7 = vector.load %arg1[%c0_9, %c3, %c0_10, %c0_11] : memref<1x4x8x64xf32, #tpu.memory_space<vmem>>, vector<1x1x8x64xf32>
    %8 = vector.shape_cast %7 : vector<1x1x8x64xf32> to vector<8x64xf32>
    %9 = arith.maximumf %6, %8 : vector<8x64xf32>
    %10 = arith.maximumf %4, %9 : vector<8x64xf32>
    %cst = arith.constant 5.000000e-01 : f32
    %11 = vector.broadcast %cst : f32 to vector<8x64xf32>
    %12 = arith.mulf %11, %10 : vector<8x64xf32>
    %cst_12 = arith.constant 0.707106769 : f32
    %13 = vector.broadcast %cst_12 : f32 to vector<8x64xf32>
    %14 = arith.mulf %10, %13 : vector<8x64xf32>
    %15 = math.erf %14 : vector<8x64xf32>
    %cst_13 = arith.constant 1.000000e+00 : f32
    %16 = vector.broadcast %cst_13 : f32 to vector<8x64xf32>
    %17 = arith.addf %16, %15 : vector<8x64xf32>
    %18 = arith.mulf %12, %17 : vector<8x64xf32>
    %cst_14 = arith.constant 0.000000e+00 : f32
    %19 = vector.broadcast %cst_14 : f32 to vector<8x320xf32>
    %c0_15 = arith.constant 0 : index
    %c0_16 = arith.constant 0 : index
    %20 = vector.load %arg6[%c0_15, %c0_16] : memref<8x320xf32, #tpu.memory_space<vmem>>, vector<8x320xf32>
    tpu.vector_store %arg6[%c0_15, %c0_16], %19 {strides = array<i32>} : memref<8x320xf32, #tpu.memory_space<vmem>>, vector<8x320xf32>,
    %c0_17 = arith.constant 0 : index
    %c128 = arith.constant 128 : index
    %21 = vector.load %arg6[%c0_17, %c128] : memref<8x320xf32, #tpu.memory_space<vmem>>, vector<8x64xf32>
    tpu.vector_store %arg6[%c0_17, %c128], %18 {strides = array<i32>} : memref<8x320xf32, #tpu.memory_space<vmem>>, vector<8x64xf32>,
    %c0_18 = arith.constant 0 : index
    %c0_19 = arith.constant 0 : index
    %22 = vector.load %arg2[%c0_18, %c0_19] : memref<8x9xf32, #tpu.memory_space<vmem>>, vector<8x9xf32>
    %c0_20 = arith.constant 0 : index
    %c0_21 = arith.constant 0 : index
    %23 = vector.load %arg3[%c0_20, %c0_21] : memref<8x1xf32, #tpu.memory_space<vmem>>, vector<8x1xf32>
    %c0_22 = arith.constant 0 : index
    %c0_23 = arith.constant 0 : index
    %24 = vector.load %arg4[%c0_22, %c0_23] : memref<8x1xf32, #tpu.memory_space<vmem>>, vector<8x1xf32>
    %25 = tpu.iota {dimensions = array<i32: 1>} : vector<1x64xi32>
    %c8_i32 = arith.constant 8 : i32
    %c0_i32 = arith.constant 0 : i32
    %26 = arith.cmpi eq, %c8_i32, %c0_i32 : i32
    %c1_i32 = arith.constant 1 : i32
    %27 = arith.select %26, %c1_i32, %c8_i32 : i32
    %28 = vector.broadcast %27 : i32 to vector<1x64xi32>
    %29 = arith.remsi %25, %28 : vector<1x64xi32>
    %c0_i32_24 = arith.constant 0 : i32
    %30 = vector.broadcast %c0_i32_24 : i32 to vector<1x64xi32>
    %31 = arith.cmpi ne, %29, %30 : vector<1x64xi32>
    %c0_i32_25 = arith.constant 0 : i32
    %32 = vector.broadcast %c0_i32_25 : i32 to vector<1x64xi32>
    %33 = arith.cmpi slt, %29, %32 : vector<1x64xi32>
    %c0_i32_26 = arith.constant 0 : i32
    %34 = arith.cmpi slt, %27, %c0_i32_26 : i32
    %35 = vector.broadcast %34 : i1 to vector<1x64xi1>
    %36 = vector.broadcast %35 : vector<1x64xi1> to vector<1x64xi1>
    %37 = arith.xori %33, %36 : vector<1x64xi1>
    %38 = arith.andi %37, %31 : vector<1x64xi1>
    %39 = vector.broadcast %27 : i32 to vector<1x64xi32>
    %40 = arith.addi %29, %39 : vector<1x64xi32>
    %41 = arith.select %38, %40, %29 : vector<1x64xi1>, vector<1x64xi32>
    %c0_i32_27 = arith.constant 0 : i32
    %42 = vector.broadcast %c0_i32_27 : i32 to vector<1x64xi32>
    %43 = arith.cmpi ne, %41, %42 : vector<1x64xi32>
    %44 = arith.extui %43 : vector<1x64xi1> to vector<1x64xi32>
    %45 = arith.sitofp %44 : vector<1x64xi32> to vector<1x64xf32>
    %c7_i32 = arith.constant 7 : i32
    %46 = vector.broadcast %c7_i32 : i32 to vector<1x64xi32>
    %47 = arith.cmpi ne, %41, %46 : vector<1x64xi32>
    %48 = arith.extui %47 : vector<1x64xi1> to vector<1x64xi32>
    %49 = arith.sitofp %48 : vector<1x64xi32> to vector<1x64xf32>
    %cst_28 = arith.constant 0.000000e+00 : f32
    %50 = vector.broadcast %cst_28 : f32 to vector<8x64xf32>
    %c0_29 = arith.constant 0 : index
    %c119 = arith.constant 119 : index
    %51 = vector.load %arg6[%c0_29, %c119] : memref<8x320xf32, #tpu.memory_space<vmem>>, vector<8x64xf32>
    %52 = vector.extract_strided_slice %22 {offsets = [0, 0], sizes = [8, 1], strides = [1, 1]} : vector<8x9xf32> to vector<8x1xf32>
    %53 = vector.broadcast %52 : vector<8x1xf32> to vector<8x64xf32>
    %54 = arith.mulf %51, %53 : vector<8x64xf32>
    %55 = vector.broadcast %45 : vector<1x64xf32> to vector<8x64xf32>
    %56 = arith.mulf %54, %55 : vector<8x64xf32>
    %57 = arith.addf %50, %56 : vector<8x64xf32>
    %c0_30 = arith.constant 0 : index
    %c120 = arith.constant 120 : index
    %58 = vector.load %arg6[%c0_30, %c120] : memref<8x320xf32, #tpu.memory_space<vmem>>, vector<8x64xf32>
    %59 = vector.extract_strided_slice %22 {offsets = [0, 1], sizes = [8, 1], strides = [1, 1]} : vector<8x9xf32> to vector<8x1xf32>
    %60 = vector.broadcast %59 : vector<8x1xf32> to vector<8x64xf32>
    %61 = arith.mulf %58, %60 : vector<8x64xf32>
    %62 = arith.addf %57, %61 : vector<8x64xf32>
    %c0_31 = arith.constant 0 : index
    %c121 = arith.constant 121 : index
    %63 = vector.load %arg6[%c0_31, %c121] : memref<8x320xf32, #tpu.memory_space<vmem>>, vector<8x64xf32>
    %64 = vector.extract_strided_slice %22 {offsets = [0, 2], sizes = [8, 1], strides = [1, 1]} : vector<8x9xf32> to vector<8x1xf32>
    %65 = vector.broadcast %64 : vector<8x1xf32> to vector<8x64xf32>
    %66 = arith.mulf %63, %65 : vector<8x64xf32>
    %67 = vector.broadcast %49 : vector<1x64xf32> to vector<8x64xf32>
    %68 = arith.mulf %66, %67 : vector<8x64xf32>
    %69 = arith.addf %62, %68 : vector<8x64xf32>
    %c0_32 = arith.constant 0 : index
    %c127 = arith.constant 127 : index
    %70 = vector.load %arg6[%c0_32, %c127] : memref<8x320xf32, #tpu.memory_space<vmem>>, vector<8x64xf32>
    %71 = vector.extract_strided_slice %22 {offsets = [0, 3], sizes = [8, 1], strides = [1, 1]} : vector<8x9xf32> to vector<8x1xf32>
    %72 = vector.broadcast %71 : vector<8x1xf32> to vector<8x64xf32>
    %73 = arith.mulf %70, %72 : vector<8x64xf32>
    %74 = vector.broadcast %45 : vector<1x64xf32> to vector<8x64xf32>
    %75 = arith.mulf %73, %74 : vector<8x64xf32>
    %76 = arith.addf %69, %75 : vector<8x64xf32>
    %c0_33 = arith.constant 0 : index
    %c128_34 = arith.constant 128 : index
    %77 = vector.load %arg6[%c0_33, %c128_34] : memref<8x320xf32, #tpu.memory_space<vmem>>, vector<8x64xf32>
    %78 = vector.extract_strided_slice %22 {offsets = [0, 4], sizes = [8, 1], strides = [1, 1]} : vector<8x9xf32> to vector<8x1xf32>
    %79 = vector.broadcast %78 : vector<8x1xf32> to vector<8x64xf32>
    %80 = arith.mulf %77, %79 : vector<8x64xf32>
    %81 = arith.addf %76, %80 : vector<8x64xf32>
    %c0_35 = arith.constant 0 : index
    %c129 = arith.constant 129 : index
    %82 = vector.load %arg6[%c0_35, %c129] : memref<8x320xf32, #tpu.memory_space<vmem>>, vector<8x64xf32>
    %83 = vector.extract_strided_slice %22 {offsets = [0, 5], sizes = [8, 1], strides = [1, 1]} : vector<8x9xf32> to vector<8x1xf32>
    %84 = vector.broadcast %83 : vector<8x1xf32> to vector<8x64xf32>
    %85 = arith.mulf %82, %84 : vector<8x64xf32>
    %86 = vector.broadcast %49 : vector<1x64xf32> to vector<8x64xf32>
    %87 = arith.mulf %85, %86 : vector<8x64xf32>
    %88 = arith.addf %81, %87 : vector<8x64xf32>
    %c0_36 = arith.constant 0 : index
    %c135 = arith.constant 135 : index
    %89 = vector.load %arg6[%c0_36, %c135] : memref<8x320xf32, #tpu.memory_space<vmem>>, vector<8x64xf32>
    %90 = vector.extract_strided_slice %22 {offsets = [0, 6], sizes = [8, 1], strides = [1, 1]} : vector<8x9xf32> to vector<8x1xf32>
    %91 = vector.broadcast %90 : vector<8x1xf32> to vector<8x64xf32>
    %92 = arith.mulf %89, %91 : vector<8x64xf32>
    %93 = vector.broadcast %45 : vector<1x64xf32> to vector<8x64xf32>
    %94 = arith.mulf %92, %93 : vector<8x64xf32>
    %95 = arith.addf %88, %94 : vector<8x64xf32>
    %c0_37 = arith.constant 0 : index
    %c136 = arith.constant 136 : index
    %96 = vector.load %arg6[%c0_37, %c136] : memref<8x320xf32, #tpu.memory_space<vmem>>, vector<8x64xf32>
    %97 = vector.extract_strided_slice %22 {offsets = [0, 7], sizes = [8, 1], strides = [1, 1]} : vector<8x9xf32> to vector<8x1xf32>
    %98 = vector.broadcast %97 : vector<8x1xf32> to vector<8x64xf32>
    %99 = arith.mulf %96, %98 : vector<8x64xf32>
    %100 = arith.addf %95, %99 : vector<8x64xf32>
    %c0_38 = arith.constant 0 : index
    %c137 = arith.constant 137 : index
    %101 = vector.load %arg6[%c0_38, %c137] : memref<8x320xf32, #tpu.memory_space<vmem>>, vector<8x64xf32>
    %102 = vector.extract_strided_slice %22 {offsets = [0, 8], sizes = [8, 1], strides = [1, 1]} : vector<8x9xf32> to vector<8x1xf32>
    %103 = vector.broadcast %102 : vector<8x1xf32> to vector<8x64xf32>
    %104 = arith.mulf %101, %103 : vector<8x64xf32>
    %105 = vector.broadcast %49 : vector<1x64xf32> to vector<8x64xf32>
    %106 = arith.mulf %104, %105 : vector<8x64xf32>
    %107 = arith.addf %100, %106 : vector<8x64xf32>
    %cst_39 = arith.constant dense<0.000000e+00> : vector<64xf32>
    %108 = vector.multi_reduction <add>, %107, %cst_39 [0] : vector<8x64xf32> to vector<64xf32>
    %109 = vector.shape_cast %108 : vector<64xf32> to vector<1x64xf32>
    %cst_40 = arith.constant 8.000000e+00 : f32
    %110 = vector.broadcast %cst_40 : f32 to vector<1x64xf32>
    %111 = arith.divf %109, %110 : vector<1x64xf32>
    %112 = vector.broadcast %111 : vector<1x64xf32> to vector<8x64xf32>
    %113 = arith.subf %107, %112 : vector<8x64xf32>
    %114 = arith.mulf %113, %113 : vector<8x64xf32>
    %cst_41 = arith.constant dense<0.000000e+00> : vector<64xf32>
    %115 = vector.multi_reduction <add>, %114, %cst_41 [0] : vector<8x64xf32> to vector<64xf32>
    %116 = vector.shape_cast %115 : vector<64xf32> to vector<1x64xf32>
    %cst_42 = arith.constant 8.000000e+00 : f32
    %117 = vector.broadcast %cst_42 : f32 to vector<1x64xf32>
    %118 = arith.divf %116, %117 : vector<1x64xf32>
    %119 = vector.broadcast %111 : vector<1x64xf32> to vector<8x64xf32>
    %120 = arith.subf %107, %119 : vector<8x64xf32>
    %cst_43 = arith.constant 9.99999997E-7 : f32
    %121 = vector.broadcast %cst_43 : f32 to vector<1x64xf32>
    %122 = arith.addf %118, %121 : vector<1x64xf32>
    %123 = math.rsqrt %122 : vector<1x64xf32>
    %124 = vector.broadcast %123 : vector<1x64xf32> to vector<8x64xf32>
    %125 = arith.mulf %120, %124 : vector<8x64xf32>
    %126 = vector.broadcast %23 : vector<8x1xf32> to vector<8x64xf32>
    %127 = arith.mulf %125, %126 : vector<8x64xf32>
    %128 = vector.broadcast %24 : vector<8x1xf32> to vector<8x64xf32>
    %129 = arith.addf %127, %128 : vector<8x64xf32>
    %c0_44 = arith.constant 0 : index
    %c0_45 = arith.constant 0 : index
    %c0_46 = arith.constant 0 : index
    %130 = vector.load %arg5[%c0_44, %c0_45, %c0_46] : memref<1x8x64xf32, #tpu.memory_space<vmem>>, vector<1x8x64xf32>
    %131 = vector.shape_cast %130 : vector<1x8x64xf32> to vector<8x64xf32>
    %132 = vector.shape_cast %129 : vector<8x64xf32> to vector<1x8x64xf32>
    tpu.vector_store %arg5[%c0_44, %c0_45, %c0_46], %132 {strides = array<i32>} : memref<1x8x64xf32, #tpu.memory_space<vmem>>, vector<1x8x64xf32>,
    return
  }
  func.func @transform_0(%arg0: i32) -> (i32, i32, i32, i32) {
    %c0_i32 = arith.constant 0 : i32
    %c0_i32_0 = arith.constant 0 : i32
    %c0_i32_1 = arith.constant 0 : i32
    %c0_i32_2 = arith.constant 0 : i32
    return %arg0, %c0_i32, %c0_i32_0, %c0_i32_1 : i32, i32, i32, i32
  }
  func.func @transform_1(%arg0: i32) -> (i32, i32) {
    %c0_i32 = arith.constant 0 : i32
    %c0_i32_0 = arith.constant 0 : i32
    %c0_i32_1 = arith.constant 0 : i32
    return %c0_i32, %c0_i32_0 : i32, i32
  }
  func.func @transform_2(%arg0: i32) -> (i32, i32) {
    %c0_i32 = arith.constant 0 : i32
    %c0_i32_0 = arith.constant 0 : i32
    %c0_i32_1 = arith.constant 0 : i32
    return %c0_i32, %c0_i32_0 : i32, i32
  }
  func.func @transform_3(%arg0: i32) -> (i32, i32) {
    %c0_i32 = arith.constant 0 : i32
    %c0_i32_0 = arith.constant 0 : i32
    %c0_i32_1 = arith.constant 0 : i32
    return %c0_i32, %c0_i32_0 : i32, i32
  }
  func.func @transform_4(%arg0: i32) -> (i32, i32, i32) {
    %c0_i32 = arith.constant 0 : i32
    %c0_i32_0 = arith.constant 0 : i32
    %c0_i32_1 = arith.constant 0 : i32
    return %arg0, %c0_i32, %c0_i32_0 : i32, i32, i32
  }
}

</mosaic_0001>

<bundles_post_ra>
// kernel: tile.18
= control target key start
LH: loop header
LB: loop body
LE: loop exit
PB: predicated region body
PF: predicated region fallthrough
CT: control target
= control target key end

     0   :  { %2 = vsyncpa [#allocation1], 0  ;;  %s44_s6 = smov [#allocation0]   ;;  %s70_s0 = inlined_call_operand.hbm [shape: f32[8], index: 0, kind: input, shape index: {}]   ;;  %s71_s1 = inlined_call_operand.vmem [shape: f32[4,8], index: 1, kind: output, shape index: {}]  }
   0x1   :  { %s9_s7 = sshll.u32 %s44_s6, 4  ;;  %s20_s10 = scalar_lea.hbm %s70_s0, 16  ;;  %s10_s7 = int_to_ptr.vmem [resolvable:$true] %s9_s7 }
   0x2   :  { %p21_p0 = scmp.ne.s32.totalorder %s70_s0, %s20_s10  ;;  %p24_p1 = scmp.lt.u32.totalorder %s20_s10, %s70_s0 }
   0x4   :  { %p26_p2 = pnand %p24_p1, %p21_p0 }
   0x6   :  { %29 = shalt.err (!%p26_p2)
}
   0x7   :  { %s30_s15 = scalar_lea.vmem %s10_s7, 16  ;;  %s34_s16 = scalar_lea.vmem %s10_s7, 32 }
   0x8   :  { %p31_p3 = scmp.ne.s32.totalorder %s10_s7, %s30_s15  ;;  %p35_p4 = scmp.lt.s32.totalorder %s10_s7, %s10_s7 }
   0x9   :  { %p36_p5 = scmp.lt.s32.totalorder %s34_s16, %s30_s15 }
   0xb   :  { %p37_p6 = por %p36_p5, %p35_p4 }
   0xd   :  { %p38_p7 = pnand %p37_p6, %p31_p3 }
   0xf   :  { %41 = shalt.err (!%p38_p7)
}
  0x10   :  { %12 = dma.hbm_to_vmem [thread:$0]  %s70_s0, 16, %s10_s7, [#allocation1]  }
  0x11   :  { %42 = dma.done.wait [#allocation1], 16  }
  0x12   :  { %43 = vsyncadd [#allocation1], 4294967280  ;;  %v16_v0 = vld [vmem:[#allocation0] ss:$0 sm:$0xff] }
  0x13   :  { %17 = vst [vmem:[%s71_s1] sm:$0xf] %v16_v0 }
  0x14   :  { %18 = vsyncpa [#allocation1], 1 }

// kernel: tile.0
= control target key start
LH: loop header
LB: loop body
LE: loop exit
PB: predicated region body
PF: predicated region fallthrough
CT: control target
= control target key end

     0   :  { %s66_s8 = smov 125   ;;  %vm7_vm0 = vcmask 7168   ;;  %s67_s11 = smov 126   ;;  %s117_s0 = inlined_call_operand.vmem [shape: f32[4,8], index: 0, kind: input, shape index: {}]   ;;  %s118_s1 = inlined_call_operand.vmem [shape: f32[32,1], index: 1, kind: output, shape index: {}]  }
   0x1   :  { %v4_v0 = vld [vmem:[%s117_s0] sm:$0xf]  ;;  %s65_s0 = smov 127   ;;  %s68_s12 = smov 124  }
   0x2   :  { %5 = vst [vmem:[#allocation0] sm:$0xf] %v4_v0  ;;  %s69_s13 = smov 123   ;;  %s70_s14 = smov 122  }
   0x3   :  { %s71_s15 = smov 121  }
   0x9   :  { %v9_v1 = vld [vmem:[#allocation0] sm:$0xf]  }
   0xa   :  { %v21_v2 = vld [vmem:[#allocation0] sm:$0xf]   ;;  %10 = vrot.lane.b32.xlu0 %v9_v1, %s65_s0 }
   0xb   :  { %22 = vrot.lane.b32.xlu1 %v21_v2, %s66_s8  ;;  %v15_v3 = vld [vmem:[#allocation0] sm:$0xf]  }
   0xc   :  { %v27_v4 = vld [vmem:[#allocation0] sm:$0xf]  }
   0xd   :  { %v6_v5 = vld [vmem:[#allocation0] sm:$0xf]  }
   0xe   :  { %8 = vst.msk [vmem:[%s118_s1] ss:$8 sm:$0xf] %vm7_vm0, %v6_v5   ;;  %16 = vrot.lane.b32.xlu0 %v15_v3, %s67_s11  ;;  %v33_v6 = vld [vmem:[#allocation0] sm:$0xf]  }
   0xf   :  { %28 = vrot.lane.b32.xlu1 %v27_v4, %s68_s12  ;;  %v39_v7 = vld [vmem:[#allocation0] sm:$0xf]  }
  0x10   :  { %v45_v8 = vld [vmem:[#allocation0] sm:$0xf]  }
  0x12   :  { %34 = vrot.lane.b32.xlu0 %v33_v6, %s69_s13 }
  0x13   :  { %40 = vrot.lane.b32.xlu1 %v39_v7, %s70_s14 }
  0x16   :  { %46 = vrot.lane.b32.xlu0 %v45_v8, %s71_s15 }
  0x7c   :  { %v11_v9 = vpop.permute.xlu0 %10  }
  0x7d   :  { %v23_v10 = vpop.permute.xlu1 %22   ;;  %51 = vst.msk [vmem:[%s118_s1 + $0x1] ss:$8 sm:$0xf] %vm7_vm0, %v11_v9  }
  0x7e   :  { %53 = vst.msk [vmem:[%s118_s1 + $0x3] ss:$8 sm:$0xf] %vm7_vm0, %v23_v10  }
  0x80   :  { %v17_v11 = vpop.permute.xlu0 %16  }
  0x81   :  { %v29_v12 = vpop.permute.xlu1 %28   ;;  %52 = vst.msk [vmem:[%s118_s1 + $0x2] ss:$8 sm:$0xf] %vm7_vm0, %v17_v11  }
  0x82   :  { %54 = vst.msk [vmem:[%s118_s1 + $0x4] ss:$8 sm:$0xf] %vm7_vm0, %v29_v12  }
  0x84   :  { %v35_v13 = vpop.permute.xlu0 %34  }
  0x85   :  { %v41_v14 = vpop.permute.xlu1 %40   ;;  %55 = vst.msk [vmem:[%s118_s1 + $0x5] ss:$8 sm:$0xf] %vm7_vm0, %v35_v13  }
  0x86   :  { %56 = vst.msk [vmem:[%s118_s1 + $0x6] ss:$8 sm:$0xf] %vm7_vm0, %v41_v14  }
  0x88   :  { %v47_v15 = vpop.permute.xlu0 %46  }
  0x89   :  { %57 = vst.msk [vmem:[%s118_s1 + $0x7] ss:$8 sm:$0xf] %vm7_vm0, %v47_v15  }

// kernel: feature_pyramid.4
= control target key start
LH: loop header
LB: loop body
LE: loop exit
PB: predicated region body
PF: predicated region fallthrough
CT: control target
= control target key end

     0   :  { %s1742_s21 = smov 0   ;;  %s2554_s0 = inlined_call_operand.vmem [shape: f32[2,8,256], index: 0, kind: input, shape index: {}]   ;;  %s2555_s1 = inlined_call_operand.vmem [shape: f32[32,8], index: 1, kind: input, shape index: {}]   ;;  %s2556_s2 = inlined_call_operand.vmem [shape: f32[32,1], index: 2, kind: input, shape index: {}]   ;;  %s2557_s3 = inlined_call_operand.vmem [shape: f32[8,9], index: 3, kind: input, shape index: {}]   ;;  %s2558_s4 = inlined_call_operand.vmem [shape: f32[8,1], index: 4, kind: input, shape index: {}]   ;;  %s2559_s5 = inlined_call_operand.vmem [shape: f32[8,1], index: 5, kind: input, shape index: {}]   ;;  %s2560_s6 = inlined_call_operand.vmem [shape: f32[2,4,8,256], index: 6, kind: output, shape index: {}]  }
   0x1 LB: > { %s1547_s22 = sadd.s32 4294967295, %s1687_s21   ;;  %p1551_p0 = scmp.ge.s32.totalorder %s1687_s21, 1  ;;  %s1687_s21 = sphi %s1742_s21, %s16_s21  }
   0x2   : > { %p212_p1 = scmp.lt.s32.totalorder %s1687_s21, 3 }
   0x4   : > { %p213_p2 = pnand %p1551_p0, %p212_p1 }
   0x6   : > { %216 = sbr.rel (%p213_p2) target bundleno = 656 (0x290), region = 44 }
   0xd   : > { %p242_p3 = scmp.lt.s32.totalorder %s1547_s22, 1  ;;  %v451_v0 = vlaneseq  ;;  %v1689_v1 = vmov 0.0   ;;  %v259_v2 = vld [vmem:[%s2556_s2 + $0x8] sm:$0xff]  ;;  %v1690_v3 = vmov 0   ;;  %v1761_v5 = vld [vmem:[%s2557_s3] sm:$0xff]  ;;  %v1691_v6 = vmov 1  }
   0xe   : > { %359 = vmatprep.mubr.f32.mxu0 %v1689_v1  ;;  %371 = vmatprep.mubr.f32.mxu1 %v1689_v1  ;;  %v252_v8 = vld [vmem:[%s2555_s1] sm:$0xff]  ;;  %vm282_vm0 = vcmask 64512   ;;  %v254_v11 = vld [vmem:[%s2555_s1 + $0x10] sm:$0xff]  ;;  %v261_v14 = vld [vmem:[%s2556_s2 + $0x18] sm:$0xff]  ;;  %v1692_v17 = vmov 5   ;;  %v1693_v21 = vmov 2  }
   0xf   : > { %s2576_s22 = smov (!%p242_p3, %s1547_s22), 1  ;;  %1602 = vset.pattern.permute.xlu1 %v1690_v3  ;;  %v452_v4 = vand.u32 127, %v451_v0  ;;  %1603 = vset.pattern.permute.xlu0 %v1691_v6  ;;  %v253_v15 = vld [vmem:[%s2555_s1 + $0x8] sm:$0xff]  ;;  %v255_v16 = vld [vmem:[%s2555_s1 + $0x18] sm:$0xff]  ;;  %s1694_s17 = smov 113   ;;  %v1695_v22 = vmov 7  }
  0x10   : > { %269 = vperm.xlu1 %1602, %v259_v2   ;;  %s1572_s27 = sshll.u32 %s2576_s22, 4  ;;  %522 = vperm.xlu0 %1603, %v1761_v5   ;;  %v1696_v23 = vmov 3   ;;  %v260_v24 = vld [vmem:[%s2556_s2 + $0x10] sm:$0xff]  ;;  %v1697_v25 = vmov 4   ;;  %v258_v26 = vld [vmem:[%s2556_s2] sm:$0xff]  ;;  %v1698_v30 = vmov 6  }
  0x11   : > { %v453_v7 = vadd.s32 128, %v452_v4  ;;  %s246_s30 = scalar_lea.vmem %s2554_s0, %s1572_s27  ;;  %v458_v12 = vand.u32 15, %v452_v4  ;;  %s1699_s24 = smov 15   ;;  %v1701_v31 = vmov 8   ;;  %vm836_vm5 = vcmask 924672  }
  0x12   : > { %v257_v9 = vld [vmem:[%s246_s30 + $0x8] sm:$0xff]  ;;  %v256_v10 = vld [vmem:[%s246_s30] sm:$0xff]  ;;  %s1700_s25 = smov 127   ;;  %s1702_s26 = smov 111   ;;  %vm1163_vm6 = vcmask 121856   ;;  %vm903_vm7 = vcmask 7168  }
  0x13   : > { %v465_v13 = vand.u32 15, %v453_v7  ;;  %295 = vmatprep.subr.mxu0 %v257_v9  ;;  %1574 = vmatprep.subr.mxu1 %v257_v9  ;;  %vm484_vm1 = vcmp.ne.s32.totalorder %v458_v12, 15  ;;  %vm478_vm3 = vcmp.ne.s32.totalorder %v458_v12, 0  ;;  %s1703_s27 = smov 1   ;;  %s1704_s28 = smov 17   ;;  %vm537_vm8 = vcmask 1039360  }
  0x14   : > { %296 = vmatpush1.msra.mxu0 %v256_v10  ;;  %1575 = vmatpush1.msra.mxu1 %v256_v10  ;;  %v1562_v18 = vsel %vm484_vm1, 1.0, %v1689_v1  ;;  %v1560_v27 = vsel %vm478_vm3, 1.0, %v1689_v1  ;;  %s1705_s29 = smov 112   ;;  %vm802_vm9 = vcmask 138240   ;;  %vm507_vm10 = vcmask 908288   ;;  %s1706_s10 = smov 16  }
  0x15   : > { %vm485_vm2 = vcmp.ne.s32.totalorder %v465_v13, 15  ;;  %1556 = vmatmul.mubr.msk.f32.vlgmr.msra.gmra.mrb[0].mxu0 %vm282_vm0, %v252_v8  ;;  %1558 = vmatmul.mubr.msk.f32.vlgmr.msra.gmra.mrb[0].mxu1 %vm282_vm0, %v254_v11  ;;  %vm479_vm4 = vcmp.ne.s32.totalorder %v465_v13, 0  ;;  %vm600_vm11 = vcmask 916480   ;;  %vm982_vm12 = vcmask 1048448   ;;  %s1573_s11 = sshll.u32 %s2576_s22, 6 }
  0x16   : > { %365 = vmatprep.mubr.f32.mxu0 %v1689_v1  ;;  %377 = vmatprep.mubr.f32.mxu1 %v1689_v1  ;;  %v1563_v19 = vsel %vm485_vm2, 1.0, %v1689_v1  ;;  %v1561_v28 = vsel %vm479_vm4, 1.0, %v1689_v1  ;;  %vm714_vm13 = vcmask 1048440   ;;  %vm1229_vm14 = vcmask 1048568   ;;  %s251_s14 = scalar_lea.vmem %s2560_s6, %s1573_s11 }
  0x17   : > { %279 = vperm.xlu1 %1602, %v261_v14   ;;  %1606 = vset.pattern.permute.xlu0 %v1692_v17  ;;  %v1609_v20 = vpack.i.bf16 %v1563_v19, %v1562_v18  ;;  %v1627_v29 = vpack.i.bf16 %v1561_v28, %v1560_v27  ;;  %vm1059_vm15 = vcmask 130048  }
  0x18   : > { %631 = vperm.xlu0 %1606, %v1761_v5  }
  0x19   : > { %1557 = vmatmul.mubr.msk.f32.gmra.mrb[2].mxu0 %vm282_vm0, %v253_v15  ;;  %1559 = vmatmul.mubr.msk.f32.gmra.mrb[2].mxu1 %vm282_vm0, %v255_v16 }
  0x1b   : > { %1604 = vset.pattern.permute.xlu1 %v1693_v21 }
  0x1c   : > { %547 = vperm.xlu1 %1604, %v1761_v5   ;;  %1610 = vrot.lane.b32.xlu0 %v1609_v20, %s1694_s17 }
  0x1d   : > { %1619 = vset.pattern.permute.xlu0 %v1695_v22 }
  0x20   : > { %1605 = vset.pattern.permute.xlu1 %v1696_v23  ;;  %677 = vperm.xlu0 %1619, %v1761_v5  }
  0x21   : > { %574 = vperm.xlu1 %1605, %v1761_v5  }
  0x24   : > { %1620 = vset.pattern.permute.xlu0 %v1690_v3 }
  0x25   : > { %1607 = vset.pattern.permute.xlu1 %v1697_v25  ;;  %274 = vperm.xlu0 %1620, %v260_v24  }
  0x26   : > { %612 = vperm.xlu1 %1607, %v1761_v5  }
  0x29   : > { %264 = vperm.xlu0 %1620, %v258_v26  }
  0x2a   : > { %1608 = vset.pattern.permute.xlu1 %v1698_v30 }
  0x2b   : > { %650 = vperm.xlu1 %1608, %v1761_v5  }
  0x2d   : > { %1628 = vrot.lane.b32.xlu0 %v1627_v29, %s1699_s24 }
  0x2f   : > { %1615 = vrot.lane.b32.xlu1 %v1627_v29, %s1700_s25 }
  0x30   : > { %1621 = vset.pattern.permute.xlu1 %v1701_v31 }
  0x31   : > { %1634 = vrot.lane.b32.xlu0 %v1627_v29, %s1702_s26 }
  0x33   : > { %696 = vperm.xlu1 %1621, %v1761_v5  }
  0x37   : > { %1623 = vrot.lane.b32.xlu1 %v1609_v20, %s1703_s27 }
  0x38   : > { %1632 = vset.pattern.permute.xlu1 %v1690_v3 }
  0x3b   : > { %495 = vperm.xlu1 %1632, %v1761_v5  }
  0x3f   : > { %1639 = vrot.lane.b32.xlu1 %v1609_v20, %s1704_s28 }
  0x8f   : > { %v1813_v32 = vpop.permute.xlu0 %522  ;;  %v1815_v33 = vpop.permute.xlu1 %269 }
  0x90   : > { %v1818_v34 = vmul.f32 0.0, %v1813_v32 }
  0x92   : > { %531 = vrot.lane.b32.xlu1 %v1818_v34, %s1700_s25 }
  0x96   : > { %v1822_v35 = vpop.permute.xlu1 %279 }
  0x97   : > { %v1824_v36 = vpop.permute.xlu0 %631 }
  0x98   : > { %v898_v1 = vmul.f32 0.0, %v1824_v36 }
  0x9b   : > { %v1826_v37 = vpop.permute.xlu1 %547  ;;  %v1828_v38 = vpop.permute.xlu0 %1610 }
  0x9c   : > { %v550_v39 = vmul.f32 0.0, %v1826_v37  ;;  %v1613_v40 = vunpack.i.h.bf16 %v1828_v38  ;;  %v1612_v41 = vunpack.i.l.bf16 %v1828_v38 }
  0x9e   : > { %556 = vrot.lane.b32.xlu0 %v550_v39, %s1700_s25  ;;  %v1836_v42 = vsel %vm836_vm5, %v1612_v41, %v1613_v40  ;;  %v841_v60 = vmul.f32 %v1612_v41, %v550_v39 }
  0x9f   : > { %v1838_v43 = vpop.permute.xlu0 %677 }
  0xa0   : > { %v1840_v44 = vpop.permute.xlu1 %574  ;;  %v1843_v45 = vmul.f32 0.0, %v1838_v43 }
  0xa1   : > { %v577_v61 = vmul.f32 0.0, %v1840_v44 }
  0xa2   : > { %1199 = vrot.lane.b32.xlu1 %v1843_v45, %s1702_s26 }
  0xa4   : > { %v275_v46 = vpop.permute.xlu0 %274 }
  0xa5   : > { %v1847_v47 = vpop.permute.xlu1 %612 }
  0xa6   : > { %2566 = vst [vmem:[#allocation3_spill] sm:$0xff] %v1847_v47 }
  0xa8   : > { %v265_v48 = vpop.permute.xlu0 %264 }
  0xaa   : > { %v1849_v49 = vpop.permute.xlu1 %650 }
  0xab   : > { %v1854_v51 = vmul.f32 0.0, %v1849_v49 }
  0xac   : > { %v1851_v50 = vpop.permute.xlu0 %1628 }
  0xad   : > { %v1631_v52 = vunpack.i.h.bf16 %v1851_v50  ;;  %v1630_v53 = vunpack.i.l.bf16 %v1851_v50 }
  0xae   : > { %v1858_v54 = vpop.permute.xlu1 %1615 }
  0xaf   : > { %v1170_v55 = vmul.f32 %v1631_v52, %v1854_v51  ;;  %v1863_v56 = vsel %vm1163_vm6, %v1630_v53, %v1631_v52  ;;  %v1872_v59 = vunpack.i.l.bf16 %v1858_v54 }
  0xb1   : > { %1178 = vrot.lane.b32.xlu1 %v1170_v55, %s1705_s29  ;;  %v1884_v0 = vmul.f32 %v1872_v59, %v577_v61  ;;  %v656_v4 = vmul.f32 %v1872_v59, %v1854_v51 }
  0xb2   : > { %v1866_v57 = vpop.permute.xlu1 %696 }
  0xb3   : > { %v1869_v58 = vmul.f32 0.0, %v1866_v57 }
  0xb5   : > { %1219 = vrot.lane.b32.xlu0 %v1869_v58, %s1702_s26 }
  0xb6   : > { %v1877_v62 = vpop.permute.xlu1 %1623 }
  0xb7   : > { %v1880_v63 = vunpack.i.h.bf16 %v1877_v62 }
  0xb9   : > { %847 = vrot.lane.b32.xlu0 %v841_v60, %s1700_s25  ;;  %v1888_v2 = vmul.f32 %v1880_v63, %v550_v39  ;;  %v1893_v3 = vmul.f32 %v1880_v63, %v898_v1  ;;  %v964_v5 = vmul.f32 %v1880_v63, %v1869_v58 }
  0xbd   : > { %594 = vrot.lane.b32.xlu0 %v1884_v0, %s1705_s29 }
  0xc1   : > { %918 = vrot.lane.b32.xlu0 %v1893_v3, %s1702_s26 }
  0xc5   : > { %662 = vrot.lane.b32.xlu0 %v656_v4, %s1705_s29 }
  0xc9   : > { %972 = vrot.lane.b32.xlu0 %v964_v5, %s1702_s26 }
  0xe8   : > { %v361_v6 = vpop.f32.mrb[0].mxu0  ;;  %v373_v7 = vpop.f32.mrb[0].mxu1 }
  0xe9   : > { %v362_v8 = vadd.f32 %v361_v6, %v265_v48  ;;  %v374_v9 = vadd.f32 %v373_v7, %v275_v46  ;;  %v363_v10 = vpop.f32.mrb[1].mxu0  ;;  %v375_v11 = vpop.f32.mrb[1].mxu1 }
  0xea   : > { %v364_v12 = vadd.f32 %v363_v10, %v265_v48  ;;  %v376_v13 = vadd.f32 %v375_v11, %v275_v46 }
  0xeb   : > { %v392_v14 = vmul.f32 0.70710677, %v362_v8  ;;  %v396_v15 = vmul.f32 0.70710677, %v374_v9  ;;  %v384_v31 = vmul.f32 0.5, %v362_v8  ;;  %v388_v46 = vmul.f32 0.5, %v374_v9 }
  0xec   : > { %v393_v16 = vmul.f32 0.70710677, %v364_v12  ;;  %v397_v17 = vmul.f32 0.70710677, %v376_v13  ;;  %v367_v18 = vpop.f32.mrb[2].mxu0  ;;  %v379_v19 = vpop.f32.mrb[2].mxu1  ;;  %v1920_v9 = vunpack.i.l.bf16 %v1877_v62 }
  0xed   : > { %1643 = verf.f32 %v392_v14  ;;  %v368_v20 = vadd.f32 %v367_v18, %v1815_v33  ;;  %v380_v21 = vadd.f32 %v379_v19, %v1822_v35  ;;  %v369_v22 = vpop.f32.mrb[3].mxu0  ;;  %v381_v23 = vpop.f32.mrb[3].mxu1  ;;  %v389_v4 = vmul.f32 0.5, %v376_v13 }
  0xee   : > { %1645 = verf.f32 %v396_v15  ;;  %v370_v24 = vadd.f32 %v369_v22, %v1815_v33  ;;  %v1907_v28 = vadd.f32 %v381_v23, %v1822_v35  ;;  %v385_v7 = vmul.f32 0.5, %v364_v12 }
  0xef   : > { %1647 = verf.f32 %v393_v16  ;;  %v394_v25 = vmul.f32 0.70710677, %v368_v20  ;;  %v398_v27 = vmul.f32 0.70710677, %v380_v21  ;;  %v386_v18 = vmul.f32 0.5, %v368_v20 }
  0xf0   : > { %1649 = verf.f32 %v397_v17  ;;  %v395_v26 = vmul.f32 0.70710677, %v370_v24  ;;  %v399_v33 = vmul.f32 0.70710677, %v1907_v28  ;;  %v387_v17 = vmul.f32 0.5, %v370_v24 }
  0xf1   : > { %v904_v23 = vsel %vm903_vm7, %v1920_v9, %v1880_v63 }
  0xf2   : > { %1651 = verf.f32 %v395_v26 }
  0xf3   : > { %1653 = verf.f32 %v394_v25 }
  0xf4   : > { %1655 = verf.f32 %v398_v27  ;;  %v390_v27 = vmul.f32 0.5, %v380_v21 }
  0xf5   : > { %1657 = verf.f32 %v399_v33 }
  0xf7   : > { %v1644_v29 = vpop.eup %1643 }
  0xf8   : > { %v1646_v30 = vpop.eup %1645  ;;  %v408_v39 = vadd.f32 1.0, %v1644_v29 }
  0xf9   : > { %v1648_v41 = vpop.eup %1647  ;;  %v412_v48 = vadd.f32 1.0, %v1646_v30 }
  0xfa   : > { %v1650_v52 = vpop.eup %1649  ;;  %v1909_v55 = vmul.f32 %v408_v39, %v384_v31  ;;  %v409_v1 = vadd.f32 1.0, %v1648_v41  ;;  %v1963_v39 = vunpack.i.h.bf16 %v1858_v54 }
  0xfb   : > { %v1912_v60 = vmul.f32 %v412_v48, %v388_v46  ;;  %v413_v61 = vadd.f32 1.0, %v1650_v52 }
  0xfc   : > { %v863_v35 = vmul.f32 %v1840_v44, %v1909_v55  ;;  %v1652_v6 = vpop.eup %1651  ;;  %v1925_v14 = vmul.f32 %v409_v1, %v385_v7  ;;  %v615_v15 = vmul.f32 %v1847_v47, %v1909_v55  ;;  %v1081_v12 = vmul.f32 %v1813_v32, %v1909_v55 }
  0xfd   : > { %v526_v5 = vmul.f32 %v1813_v32, %v1912_v60  ;;  %v1654_v8 = vpop.eup %1653  ;;  %v1922_v10 = vmul.f32 %v413_v61, %v389_v4  ;;  %v411_v13 = vadd.f32 1.0, %v1652_v6  ;;  %v828_v62 = vmul.f32 %v1826_v37, %v1912_v60 }
  0xfe   : > { %867 = vrot.lane.b32.xlu1 %v863_v35, %s1705_s29  ;;  %v1656_v11 = vpop.eup %1655  ;;  %v410_v16 = vadd.f32 1.0, %v1654_v8  ;;  %v1125_v24 = vmul.f32 %v1847_v47, %v1912_v60  ;;  %v897_v20 = vmul.f32 %v1824_v36, %v1925_v14  ;;  %v680_v29 = vmul.f32 %v1838_v43, %v1912_v60 }
  0xff   : > { %533 = vrot.lane.b32.xlu0 %v526_v5, %s1700_s25  ;;  %v414_v19 = vadd.f32 1.0, %v1656_v11  ;;  %v829_v22 = vmul.f32 %v1826_v37, %v1922_v10  ;;  %v1940_v25 = vmul.f32 %v411_v13, %v387_v17  ;;  %v1945_v26 = vmul.f32 %v1836_v42, %v828_v62  ;;  %v1658_v38 = vpop.eup %1657 }
 0x100   : > { %v960_v63 = vmul.f32 %v1866_v57, %v1922_v10  ;;  %v1957_v31 = vmul.f32 %v410_v16, %v386_v18  ;;  %v1960_v42 = vmul.f32 %v904_v23, %v897_v20  ;;  %v1189_v48 = vmul.f32 %v1838_v43, %v1909_v55 }
 0x101   : > { %v1953_v30 = vmul.f32 %v1613_v40, %v829_v22  ;;  %v1965_v21 = vmul.f32 %v414_v19, %v390_v27  ;;  %v928_v40 = vmul.f32 %v1849_v49, %v1912_v60  ;;  %v1157_v46 = vmul.f32 %v1849_v49, %v1940_v25 }
 0x102   : > { %619 = vrot.lane.b32.xlu1 %v615_v15, %s1702_s26  ;;  %v1968_v41 = vmul.f32 %v960_v63, %v904_v23  ;;  %v578_v52 = vmul.f32 %v1840_v44, %v1957_v31  ;;  %v415_v33 = vadd.f32 1.0, %v1658_v38  ;;  %v584_v61 = vsel %vm537_vm8, %v1872_v59, %v1963_v39 }
 0x103   : > { %1085 = vrot.lane.b32.xlu0 %v1081_v12, %s1700_s25  ;;  %2567 = vst [vmem:[#allocation4_spill] sm:$0xff] %v1965_v21  ;;  %v1978_v54 = vmul.f32 %v1863_v56, %v1157_v46  ;;  %v1327_v1 = vmul.f32 %v1826_v37, %v1925_v14  ;;  %v654_v35 = vmul.f32 %v1849_v49, %v1965_v21  ;;  %v391_v6 = vmul.f32 0.5, %v1907_v28  ;;  %v2013_v12 = vpop.permute.xlu1 %495 }
 0x104   : > { %v527_v56 = vmul.f32 %v1813_v32, %v1922_v10  ;;  %v1992_v4 = vmul.f32 %v584_v61, %v578_v52  ;;  %v1156_v5 = vmul.f32 %v1849_v49, %v1957_v31  ;;  %v864_v7 = vmul.f32 %v1840_v44, %v1925_v14 }
 0x105   : > { %v1999_v8 = vmul.f32 %v1327_v1, %v904_v23  ;;  %v2001_v11 = vmul.f32 %v654_v35, %v584_v61  ;;  %v2008_v15 = vmul.f32 %v415_v33, %v391_v6  ;;  %v1361_v28 = vmul.f32 %v1824_v36, %v1922_v10 }
 0x106   : > { %1129 = vrot.lane.b32.xlu1 %v1125_v24, %s1700_s25  ;;  %v2006_v13 = vmul.f32 %v1630_v53, %v1156_v5  ;;  %v1082_v16 = vmul.f32 %v1813_v32, %v1925_v14  ;;  %v616_v17 = vmul.f32 %v1847_v47, %v1925_v14  ;;  %v1071_v50 = vmul.f32 %v2013_v12, %v1957_v31 }
 0x107   : > { %684 = vrot.lane.b32.xlu0 %v680_v29, %s1702_s26  ;;  %2568 = vst [vmem:[#allocation5_spill] sm:$0xff] %v2008_v15  ;;  %v2019_v62 = vmul.f32 %v1361_v28, %v904_v23  ;;  %v813_v53 = vmul.f32 %v2013_v12, %v1912_v60  ;;  %v822_v18 = vmul.f32 %v1813_v32, %v1965_v21 }
 0x108   : > { %v2029_v19 = vmul.f32 %v1071_v50, %v584_v61  ;;  %v814_v22 = vmul.f32 %v2013_v12, %v1922_v10  ;;  %v823_v23 = vmul.f32 %v1813_v32, %v2008_v15  ;;  %v1115_v24 = vmul.f32 %v1840_v44, %v1965_v21 }
 0x109   : > { %v681_v20 = vmul.f32 %v1838_v43, %v1922_v10  ;;  %v2039_v27 = vadd.f32 %v822_v18, %v813_v53  ;;  %v1315_v29 = vmul.f32 %v2013_v12, %v1909_v55  ;;  %v1321_v63 = vmul.f32 %v1813_v32, %v1957_v31 }
 0x10a   : > { %932 = vrot.lane.b32.xlu1 %v928_v40, %s1705_s29  ;;  %v1126_v38 = vmul.f32 %v1847_v47, %v1922_v10  ;;  %v2047_v40 = vadd.f32 %v823_v23, %v814_v22  ;;  %v2049_v46 = vmul.f32 %v1115_v24, %v584_v61  ;;  %v1316_v52 = vmul.f32 %v2013_v12, %v1925_v14 }
 0x10b   : > { %1195 = vrot.lane.b32.xlu0 %v1189_v48, %s1702_s26  ;;  %v2052_v48 = vadd.f32 %v1321_v63, %v1315_v29  ;;  %v1322_v33 = vmul.f32 %v1813_v32, %v1940_v25  ;;  %v896_v1 = vmul.f32 %v1824_v36, %v1909_v55  ;;  %v929_v61 = vmul.f32 %v1849_v49, %v1922_v10 }
 0x10c   : > { %v1190_v32 = vmul.f32 %v1838_v43, %v1925_v14  ;;  %v1096_v5 = vmul.f32 %v1826_v37, %v1957_v31  ;;  %v943_v6 = vmul.f32 %v1838_v43, %v1965_v21  ;;  %v552_v28 = vmul.f32 %v1826_v37, %v2008_v15 }
 0x10d   : > { %v2061_v35 = vadd.f32 %v1322_v33, %v1316_v52  ;;  %v635_v50 = vmul.f32 %v1824_v36, %v1940_v25  ;;  %v579_v53 = vmul.f32 %v1840_v44, %v1940_v25  ;;  %v1141_v18 = vmul.f32 %v1824_v36, %v2008_v15  ;;  %v2135_v52 = vpop.permute.xlu0 %1634 }
 0x10e   : > { %535 = vrot.lane.b32.xlu1 %v527_v56, %s1700_s25  ;;  %v908_v56 = vmul.f32 %v1920_v9, %v896_v1  ;;  %v944_v23 = vmul.f32 %v1838_v43, %v2008_v15  ;;  %v655_v24 = vmul.f32 %v1849_v49, %v2008_v15  ;;  %v959_v63 = vmul.f32 %v1866_v57, %v1912_v60 }
 0x10f   : > { %869 = vrot.lane.b32.xlu0 %v864_v7, %s1705_s29  ;;  %2569 = vst [vmem:[#allocation6_spill] sm:$0xff] %v2061_v35  ;;  %v699_v7 = vmul.f32 %v1866_v57, %v1965_v21  ;;  %v590_v22 = vmul.f32 %v1963_v39, %v579_v53  ;;  %v2209_v53 = vmul.f32 0.0, %v2013_v12 }
 0x110   : > { %v658_v29 = vmul.f32 %v1963_v39, %v655_v24  ;;  %v962_v33 = vmul.f32 %v1920_v9, %v959_v63  ;;  %v1637_v63 = vunpack.i.h.bf16 %v2135_v52 }
 0x111   : > { %v2143_v1 = vpop.permute.xlu0 %556 }
 0x112   : > { %1087 = vrot.lane.b32.xlu1 %v1082_v16, %s1700_s25  ;;  %v881_v16 = vmul.f32 %v1847_v47, %v1940_v25 }
 0x113   : > { %621 = vrot.lane.b32.xlu0 %v616_v17, %s1702_s26  ;;  %v1097_v17 = vmul.f32 %v1826_v37, %v1940_v25 }
 0x116   : > { %686 = vrot.lane.b32.xlu1 %v681_v20, %s1702_s26  ;;  %v1210_v20 = vmul.f32 %v1866_v57, %v1940_v25 }
 0x117   : > { %1131 = vrot.lane.b32.xlu0 %v1126_v38, %s1700_s25  ;;  %v700_v38 = vmul.f32 %v1866_v57, %v2008_v15 }
 0x11a   : > { %849 = vrot.lane.b32.xlu1 %v1945_v26, %s1700_s25  ;;  %v1140_v26 = vmul.f32 %v1824_v36, %v1965_v21 }
 0x11b   : > { %934 = vrot.lane.b32.xlu0 %v929_v61, %s1705_s29  ;;  %v1360_v61 = vmul.f32 %v1824_v36, %v1912_v60 }
 0x11e   : > { %914 = vrot.lane.b32.xlu1 %v908_v56, %s1702_s26 }
 0x11f   : > { %1197 = vrot.lane.b32.xlu0 %v1190_v32, %s1702_s26  ;;  %v1363_v32 = vmul.f32 %v1920_v9, %v1360_v61 }
 0x122   : > { %851 = vrot.lane.b32.xlu1 %v1953_v30, %s1700_s25  ;;  %v551_v30 = vmul.f32 %v1826_v37, %v1965_v21 }
 0x123   : > { %1100 = vrot.lane.b32.xlu0 %v1096_v5, %s1700_s25 }
 0x126   : > { %916 = vrot.lane.b32.xlu1 %v1960_v42, %s1702_s26  ;;  %v880_v42 = vmul.f32 %v1847_v47, %v1957_v31 }
 0x127   : > { %1144 = vrot.lane.b32.xlu0 %v1140_v26, %s1700_s25  ;;  %v2151_v56 = vpop.permute.xlu0 %1219  ;;  %v1640_v26 = vpop.permute.xlu1 %1639 }
 0x12a   : > { %970 = vrot.lane.b32.xlu1 %v1968_v41, %s1702_s26  ;;  %v634_v41 = vmul.f32 %v1824_v36, %v1957_v31  ;;  %v450_v36 = vld [vmem:[%s2559_s5] sm:$0xff] }
 0x12b   : > { %947 = vrot.lane.b32.xlu0 %v943_v6, %s1705_s29  ;;  %v2161_v5 = vpop.permute.xlu0 %847 }
 0x12e   : > { %558 = vrot.lane.b32.xlu1 %v551_v30, %s1700_s25  ;;  %v1641_v30 = vunpack.i.l.bf16 %v1640_v26 }
 0x12f   : > { %703 = vrot.lane.b32.xlu0 %v699_v7, %s1702_s26  ;;  %v2181_v7 = vpop.permute.xlu1 %531 }
 0x132   : > { %884 = vrot.lane.b32.xlu1 %v880_v42, %s1705_s29 }
 0x133   : > { %560 = vrot.lane.b32.xlu0 %v552_v28, %s1700_s25  ;;  %v1419_v28 = vmul.f32 %v1866_v57, %v1925_v14 }
 0x136   : > { %638 = vrot.lane.b32.xlu1 %v634_v41, %s1702_s26 }
 0x137   : > { %886 = vrot.lane.b32.xlu0 %v881_v16, %s1705_s29 }
 0x13a   : > { %1102 = vrot.lane.b32.xlu1 %v1097_v17, %s1700_s25 }
 0x13b   : > { %640 = vrot.lane.b32.xlu0 %v635_v50, %s1702_s26 }
 0x13e   : > { %1146 = vrot.lane.b32.xlu1 %v1141_v18, %s1700_s25  ;;  %v1073_v18 = vmul.f32 %v1872_v59, %v2209_v53 }
 0x13f   : > { %598 = vrot.lane.b32.xlu0 %v590_v22, %s1705_s29  ;;  %v1401_v22 = vmul.f32 %v1838_v43, %v1940_v25 }
 0x142   : > { %949 = vrot.lane.b32.xlu1 %v944_v23, %s1705_s29 }
 0x143   : > { %1176 = vrot.lane.b32.xlu0 %v1978_v54, %s1705_s29  ;;  %v449_v54 = vld [vmem:[%s2558_s4] sm:$0xff] }
 0x146   : > { %1217 = vrot.lane.b32.xlu1 %v1210_v20, %s1702_s26 }
 0x147   : > { %666 = vrot.lane.b32.xlu0 %v658_v29, %s1705_s29 }
 0x14a   : > { %705 = vrot.lane.b32.xlu1 %v700_v38, %s1702_s26 }
 0x14b   : > { %968 = vrot.lane.b32.xlu0 %v962_v33, %s1702_s26 }
 0x14e   : > { %596 = vrot.lane.b32.xlu1 %v1992_v4, %s1705_s29  ;;  %v1209_v4 = vmul.f32 %v1866_v57, %v1957_v31 }
 0x14f   : > { %779 = vperm.xlu0 %1620, %v449_v54  }
 0x152   : > { %664 = vrot.lane.b32.xlu1 %v2001_v11, %s1705_s29  ;;  %v1382_v11 = vmul.f32 %v1849_v49, %v1925_v14 }
 0x153   : > { %1337 = vrot.lane.b32.xlu0 %v1999_v8, %s1700_s25  ;;  %v1326_v8 = vmul.f32 %v1826_v37, %v1909_v55  ;;  %v1642_v37 = vunpack.i.h.bf16 %v1640_v26 }
 0x155   : > { %v1329_v6 = vmul.f32 %v1920_v9, %v1326_v8  ;;  %v1425_v9 = vsel %vm802_vm9, %v1641_v30, %v1642_v37 }
 0x156   : > { %1174 = vrot.lane.b32.xlu1 %v2006_v13, %s1705_s29  ;;  %v2173_v13 = vpop.permute.xlu0 %594  ;;  %v1430_v16 = vmul.f32 %v1425_v9, %v1419_v28 }
 0x157   : > { %1369 = vrot.lane.b32.xlu0 %v1363_v32, %s1700_s25  ;;  %v1072_v32 = vmul.f32 %v2013_v12, %v1940_v25 }
 0x15a   : > { %1215 = vrot.lane.b32.xlu1 %v1209_v4, %s1702_s26  ;;  %v2183_v42 = vpop.permute.xlu0 %918 }
 0x15b   : > { %1373 = vrot.lane.b32.xlu0 %v1893_v3, %s1700_s25  ;;  %v1400_v3 = vmul.f32 %v1838_v43, %v1957_v31  ;;  %v2192_v31 = vpop.permute.xlu1 %1199  ;;  %v1431_v43 = vmul.f32 %v1642_v37, %v1869_v58 }
 0x15e   : > { %787 = vperm.xlu1 %1632, %v450_v36   ;;  %v2194_v41 = vpop.permute.xlu0 %662 }
 0x15f   : > { %1389 = vrot.lane.b32.xlu0 %v1382_v11, %s1705_s29  ;;  %v2199_v17 = vpop.permute.xlu1 %1178 }
 0x162   : > { %1335 = vrot.lane.b32.xlu1 %v1329_v6, %s1700_s25  ;;  %v2203_v14 = vpop.permute.xlu0 %972  ;;  %v1075_v6 = vmul.f32 %v1963_v39, %v1072_v32 }
 0x163   : > { %1406 = vrot.lane.b32.xlu0 %v1400_v3, %s1705_s29 }
 0x166   : > { %1339 = vrot.lane.b32.xlu1 %v1888_v2, %s1700_s25  ;;  %v1381_v2 = vmul.f32 %v1849_v49, %v1909_v55 }
 0x167   : > { %1410 = vrot.lane.b32.xlu0 %v1843_v45, %s1705_s29 }
 0x16a   : > { %1371 = vrot.lane.b32.xlu1 %v2019_v62, %s1700_s25  ;;  %v1418_v62 = vmul.f32 %v1866_v57, %v1909_v55  ;;  %v500_v57 = vmul.f32 %v2013_v12, %v2008_v15  ;;  %v499_v55 = vmul.f32 %v2013_v12, %v1965_v21 }
 0x16b   : > { %1437 = vrot.lane.b32.xlu0 %v1430_v16, %s1702_s26 }
 0x16c   : > { %v1429_v20 = vmul.f32 %v1641_v30, %v1418_v62  ;;  %v514_v61 = vmul.f32 %v1637_v63, %v500_v57 }
 0x16e   : > { %1387 = vrot.lane.b32.xlu1 %v1381_v2, %s1705_s29  ;;  %v824_v2 = vadd.f32 %v1818_v34, %v2209_v53 }
 0x170   : > { %v868_v45 = vpop.permute.xlu1 %867 }
 0x171   : > { %v2206_v50 = vpop.permute.xlu0 %533 }
 0x172   : > { %1391 = vrot.lane.b32.xlu1 %v1854_v51, %s1705_s29  ;;  %v2561_v51 = vunpack.i.l.bf16 %v2135_v52 }
 0x174   : > { %v2217_v49 = vpop.permute.xlu1 %619  ;;  %v508_v54 = vsel %vm507_vm10, %v2561_v51, %v1637_v63 }
 0x175   : > { %v1086_v23 = vpop.permute.xlu0 %1085  ;;  %v513_v4 = vmul.f32 %v508_v54, %v499_v55 }
 0x176   : > { %v1093_v24 = vadd.f32 %v1086_v23, %v1073_v18  ;;  %1408 = vrot.lane.b32.xlu1 %v1401_v22, %s1705_s29 }
 0x178   : > { %v1130_v29 = vpop.permute.xlu1 %1129 }
 0x179   : > { %v2224_v38 = vpop.permute.xlu0 %684 }
 0x17a   : > { %1435 = vrot.lane.b32.xlu1 %v1429_v20, %s1702_s26 }
 0x17c   : > { %v2230_v59 = vpop.permute.xlu1 %932 }
 0x17d   : > { %v2234_v33 = vpop.permute.xlu0 %1195 }
 0x17e   : > { %1439 = vrot.lane.b32.xlu1 %v1431_v43, %s1702_s26 }
 0x180   : > { %v536_v36 = vpop.permute.xlu1 %535 }
 0x181   : > { %v870_v58 = vpop.permute.xlu0 %869  ;;  %v539_v8 = vsel %vm537_vm8, %v2206_v50, %v536_v36  ;;  %v545_v11 = vadd.f32 %v536_v36, %v514_v61 }
 0x182   : > { %v2244_v26 = vadd.f32 %v539_v8, %v513_v4  ;;  %v871_v34 = vsel %vm600_vm11, %v868_v45, %v870_v58 }
 0x184   : > { %v1088_v3 = vpop.permute.xlu1 %1087 }
 0x185   : > { %v2247_v30 = vpop.permute.xlu0 %621  ;;  %v1089_v37 = vsel %vm537_vm8, %v1086_v23, %v1088_v3  ;;  %v1095_v28 = vadd.f32 %v1088_v3, %v1075_v6 }
 0x186   : > { %v1094_v9 = vadd.f32 %v1089_v37, %v2029_v19 }
 0x188   : > { %v2251_v25 = vpop.permute.xlu1 %686 }
 0x189   : > { %v1132_v12 = vpop.permute.xlu0 %1131 }
 0x18a   : > { %v1133_v16 = vsel %vm537_vm8, %v1130_v29, %v1132_v12 }
 0x18c   : > { %v850_v62 = vpop.permute.xlu1 %849 }
 0x18d   : > { %v2256_v18 = vpop.permute.xlu0 %934  ;;  %v853_v22 = vsel %vm537_vm8, %v2161_v5, %v850_v62 }
 0x18e   : > { %v858_v20 = vadd.f32 %v853_v22, %v824_v2 }
 0x190   : > { %v915_v63 = vpop.permute.xlu1 %914  ;;  %v875_v23 = vadd.f32 %v868_v45, %v858_v20  ;;  %v1116_v20 = vmul.f32 %v1840_v44, %v2008_v15 }
 0x191   : > { %v2260_v57 = vpop.permute.xlu0 %1197 }
 0x194   : > { %v852_v19 = vpop.permute.xlu1 %851 }
 0x195   : > { %v1101_v43 = vpop.permute.xlu0 %1100  ;;  %v854_v55 = vsel %vm537_vm8, %v850_v62, %v852_v19 }
 0x196   : > { %v1108_v54 = vadd.f32 %v1101_v43, %v1093_v24  ;;  %v859_v61 = vadd.f32 %v854_v55, %v2039_v27  ;;  %v860_v27 = vadd.f32 %v852_v19, %v2047_v40 }
 0x198   : > { %v1120_v32 = vadd.f32 %v1108_v54, %v1884_v0  ;;  %v917_v4 = vpop.permute.xlu1 %916  ;;  %v876_v36 = vadd.f32 %v871_v34, %v859_v61  ;;  %v877_v22 = vadd.f32 %v870_v58, %v860_v27  ;;  %v1119_v61 = vmul.f32 %v1963_v39, %v1116_v20 }
 0x199   : > { %v2266_v5 = vpop.permute.xlu0 %1144  ;;  %v921_v40 = vsel %vm507_vm10, %v917_v4, %v2183_v42 }
 0x19a   : > { %v2268_v8 = vadd.f32 %v1130_v29, %v1120_v32 }
 0x19c   : > { %v2270_v6 = vpop.permute.xlu1 %970 }
 0x19d   : > { %v948_v3 = vpop.permute.xlu0 %947 }
 0x1a0   : > { %v2272_v37 = vpop.permute.xlu1 %558 }
 0x1a1   : > { %v2274_v2 = vpop.permute.xlu0 %703 }
 0x1a4   : > { %v885_v24 = vpop.permute.xlu1 %884 }
 0x1a5   : > { %v561_v62 = vpop.permute.xlu0 %560  ;;  %v892_v58 = vadd.f32 %v885_v24, %v875_v23 }
 0x1a6   : > { %v569_v47 = vadd.f32 %v561_v62, %v545_v11 }
 0x1a7   : > { %v925_v11 = vadd.f32 %v915_v63, %v892_v58 }
 0x1a8   : > { %v2277_v45 = vpop.permute.xlu1 %638 }
 0x1a9   : > { %v887_v0 = vpop.permute.xlu0 %886 }
 0x1aa   : > { %v894_v29 = vadd.f32 %v887_v0, %v877_v22  ;;  %v888_v27 = vsel %vm600_vm11, %v885_v24, %v887_v0 }
 0x1ab   : > { %v893_v20 = vadd.f32 %v888_v27, %v876_v36  ;;  %v2570_v36 = vunpack.i.l.bf16 %v2135_v52 }
 0x1ac   : > { %v1103_v55 = vpop.permute.xlu1 %1102  ;;  %v927_v51 = vadd.f32 %v921_v40, %v894_v29  ;;  %v920_v29 = vsel %vm507_vm10, %v915_v63, %v917_v4  ;;  %v1202_v63 = vsel %vm507_vm10, %v2260_v57, %v2192_v31 }
 0x1ad   : > { %v2281_v54 = vpop.permute.xlu0 %640  ;;  %v1104_v34 = vsel %vm537_vm8, %v1101_v43, %v1103_v55  ;;  %v1110_v32 = vadd.f32 %v1103_v55, %v1095_v28  ;;  %v512_v55 = vmul.f32 %v2570_v36, %v2209_v53  ;;  %v936_v53 = vsel %vm600_vm11, %v2230_v59, %v2256_v18 }
 0x1ae   : > { %v1109_v19 = vadd.f32 %v1104_v34, %v1094_v9  ;;  %v942_v9 = vadd.f32 %v2256_v18, %v927_v51 }
 0x1af   : > { %v1122_v35 = vadd.f32 %v1119_v61, %v1110_v32 }
 0x1b0   : > { %v1121_v22 = vadd.f32 %v2049_v46, %v1109_v19  ;;  %v2289_v15 = vpop.permute.xlu1 %1146 }
 0x1b1   : > { %v2291_v21 = vpop.permute.xlu0 %598  ;;  %v1139_v39 = vadd.f32 %v1132_v12, %v1122_v35  ;;  %v926_v12 = vadd.f32 %v920_v29, %v893_v20 }
 0x1b2   : > { %v608_v43 = vadd.f32 %v2291_v21, %v569_v47  ;;  %v2294_v28 = vadd.f32 %v1133_v16, %v1121_v22  ;;  %v975_v47 = vsel %vm507_vm10, %v2270_v6, %v2203_v14  ;;  %v940_v14 = vadd.f32 %v2230_v59, %v925_v11 }
 0x1b3   : > { %v1154_v42 = vadd.f32 %v2289_v15, %v1139_v39  ;;  %v563_v59 = vsel %vm537_vm8, %v2272_v37, %v561_v62 }
 0x1b4   : > { %v629_v23 = vadd.f32 %v2247_v30, %v608_v43  ;;  %v950_v24 = vpop.permute.xlu1 %949  ;;  %v955_v39 = vadd.f32 %v948_v3, %v940_v14 }
 0x1b5   : > { %v2299_v0 = vpop.permute.xlu0 %1176  ;;  %v957_v46 = vadd.f32 %v950_v24, %v942_v9  ;;  %v951_v40 = vsel %vm600_vm11, %v948_v3, %v950_v24 }
 0x1b6   : > { %v1181_v35 = vsel %vm600_vm11, %v2299_v0, %v2199_v17  ;;  %v648_v4 = vadd.f32 %v2281_v54, %v629_v23  ;;  %v538_v17 = vsel %vm537_vm8, %v2181_v7, %v2206_v50  ;;  %v941_v7 = vadd.f32 %v936_v53, %v926_v12 }
 0x1b7   : > { %v1187_v16 = vadd.f32 %v1181_v35, %v1154_v42  ;;  %v2308_v51 = vadd.f32 %v975_v47, %v957_v46  ;;  %v543_v27 = vadd.f32 %v538_v17, %v512_v55 }
 0x1b8   : > { %v2317_v61 = vpop.permute.xlu1 %1217  ;;  %v956_v18 = vadd.f32 %v951_v40, %v941_v7 }
 0x1b9   : > { %v996_v34 = vsel %vm600_vm11, %v2308_v51, 0.0  ;;  %v2325_v32 = vpop.permute.xlu0 %666  ;;  %v1208_v52 = vadd.f32 %v1202_v63, %v1187_v16  ;;  %v1222_v31 = vsel %vm507_vm10, %v2317_v61, %v2151_v56  ;;  %v562_v56 = vsel %vm537_vm8, %v2143_v1, %v2272_v37 }
 0x1ba   : > { %v997_v19 = vrot.slane %v996_v34, 4  ;;  %v675_v58 = vadd.f32 %v2325_v32, %v648_v4  ;;  %v567_v1 = vadd.f32 %v562_v56, %v543_v27  ;;  %v568_v37 = vadd.f32 %v563_v59, %v2244_v26 }
 0x1bb   : > { %v2335_v50 = vadd.f32 %v1222_v31, %v1208_v52  ;;  %v623_v31 = vsel %vm507_vm10, %v2217_v49, %v2247_v30 }
 0x1bc   : > { %v998_v22 = vadd.f32 %v997_v19, %v996_v34  ;;  %v694_v43 = vadd.f32 %v2251_v25, %v675_v58  ;;  %v2338_v20 = vpop.permute.xlu1 %705 }
 0x1bd   : > { %v1243_v42 = vsel %vm537_vm8, %v2335_v50, 0.0  ;;  %v969_v9 = vpop.permute.xlu0 %968 }
 0x1be   : > { %v999_v11 = vrot.slane %v998_v22, 2  ;;  %v1244_v23 = vrot.slane %v1243_v42, 4  ;;  %v974_v3 = vsel %vm507_vm10, %v969_v9, %v2270_v6  ;;  %v2349_v24 = vadd.f32 %v969_v9, %v955_v39 }
 0x1bf   : > { %v2351_v46 = vadd.f32 %v974_v3, %v956_v18  ;;  %v2354_v29 = vadd.f32 %v2338_v20, %v694_v43 }
 0x1c0   : > { %v1000_v62 = vadd.f32 %v999_v11, %v998_v22  ;;  %v983_v47 = vsel %vm982_vm12, %v2349_v24, 0.0  ;;  %v597_v35 = vpop.permute.xlu1 %596  ;;  %v1245_v63 = vadd.f32 %v1244_v23, %v1243_v42 }
 0x1c1   : > { %v984_v12 = vrot.slane %v983_v47, 4  ;;  %v990_v16 = vrot.slane %v2351_v46, 4  ;;  %v728_v6 = vsel %vm507_vm10, %v2354_v29, 0.0  ;;  %v601_v36 = vsel %vm600_vm11, %v2173_v13, %v597_v35 }
 0x1c2   : > { %v1001_v55 = vrot.slane %v1000_v62, 1  ;;  %v729_v4 = vrot.slane %v728_v6, 4  ;;  %v602_v26 = vsel %vm600_vm11, %v597_v35, %v2291_v21  ;;  %v606_v34 = vadd.f32 %v601_v36, %v567_v1 }
 0x1c3   : > { %v985_v14 = vadd.f32 %v984_v12, %v983_v47  ;;  %v991_v17 = vadd.f32 %v990_v16, %v2351_v46  ;;  %v607_v52 = vadd.f32 %v602_v26, %v568_v37  ;;  %v642_v21 = vsel %vm507_vm10, %v2277_v45, %v2281_v54 }
 0x1c4   : > { %v1002_v53 = vadd.f32 %v1001_v55, %v1000_v62  ;;  %v730_v40 = vadd.f32 %v729_v4, %v728_v6  ;;  %v627_v58 = vadd.f32 %v2217_v49, %v606_v34  ;;  %v665_v27 = vpop.permute.xlu1 %664  ;;  %v1246_v39 = vrot.slane %v1245_v63, 2 }
 0x1c5   : > { %v986_v19 = vrot.slane %v985_v14, 2  ;;  %v992_v13 = vrot.slane %v991_v17, 2  ;;  %v628_v7 = vadd.f32 %v623_v31, %v607_v52  ;;  %v668_v49 = vsel %vm600_vm11, %v2194_v41, %v665_v27 }
 0x1c6   : > { %v1005_v22 = vmul.f32 0.125, %v1002_v53  ;;  %v731_v43 = vrot.slane %v730_v40, 2  ;;  %v646_v30 = vadd.f32 %v2277_v45, %v627_v58  ;;  %v669_v11 = vsel %vm600_vm11, %v665_v27, %v2325_v32 }
 0x1c7   : > { %v987_v56 = vadd.f32 %v986_v19, %v985_v14  ;;  %v993_v59 = vadd.f32 %v992_v13, %v991_v17  ;;  %v647_v18 = vadd.f32 %v642_v21, %v628_v7  ;;  %v688_v37 = vsel %vm507_vm10, %v2224_v38, %v2251_v25 }
 0x1c8   : > { %v2376_v42 = vsub.f32 %v2308_v51, %v1005_v22  ;;  %v732_v9 = vadd.f32 %v731_v43, %v730_v40  ;;  %v673_v3 = vadd.f32 %v668_v49, %v646_v30  ;;  %v1247_v51 = vadd.f32 %v1246_v39, %v1245_v63  ;;  %v1175_v16 = vpop.permute.xlu1 %1174 }
 0x1c9   : > { %v988_v23 = vrot.slane %v987_v56, 1  ;;  %v994_v54 = vrot.slane %v993_v59, 1  ;;  %v674_v1 = vadd.f32 %v669_v11, %v647_v18  ;;  %v1152_v32 = vadd.f32 %v2266_v5, %v2268_v8 }
 0x1ca   : > { %v1011_v45 = vmul.f32 %v2376_v42, %v2376_v42  ;;  %v733_v62 = vrot.slane %v732_v9, 1  ;;  %v692_v41 = vadd.f32 %v2224_v38, %v673_v3  ;;  %v707_v25 = vsel %vm507_vm10, %v2274_v2, %v2338_v20 }
 0x1cb   : > { %v989_v47 = vadd.f32 %v988_v23, %v987_v56  ;;  %v995_v35 = vadd.f32 %v994_v54, %v993_v59  ;;  %v693_v12 = vadd.f32 %v688_v37, %v674_v1  ;;  %v1148_v38 = vsel %vm537_vm8, %v2266_v5, %v2289_v15 }
 0x1cc   : > { %v1025_v6 = vsel %vm600_vm11, %v1011_v45, 0.0  ;;  %v734_v36 = vadd.f32 %v733_v62, %v732_v9  ;;  %v2395_v26 = vadd.f32 %v2274_v2, %v692_v41  ;;  %v1248_v14 = vrot.slane %v1247_v51, 1  ;;  %v1216_v37 = vpop.permute.xlu1 %1215 }
 0x1cd   : > { %v1026_v55 = vrot.slane %v1025_v6, 4  ;;  %v1003_v4 = vmul.f32 0.125, %v989_v47  ;;  %v1004_v63 = vmul.f32 0.125, %v995_v35  ;;  %v2400_v17 = vadd.f32 %v707_v25, %v693_v12 }
 0x1ce   : > { %v1180_v8 = vsel %vm600_vm11, %v1175_v16, %v2299_v0  ;;  %v715_v2 = vsel %vm714_vm13, %v2395_v26, 0.0  ;;  %v2412_v31 = vpop.permute.xlu0 %779  ;;  %v1153_v15 = vadd.f32 %v1148_v38, %v2294_v28  ;;  %v1185_v40 = vadd.f32 %v1175_v16, %v1152_v32 }
 0x1cf   : > { %v1027_v34 = vadd.f32 %v1026_v55, %v1025_v6  ;;  %v2405_v20 = vsub.f32 %v2349_v24, %v1003_v4  ;;  %v2408_v52 = vsub.f32 %v2351_v46, %v1004_v63  ;;  %v716_v5 = vrot.slane %v715_v2, 4 }
 0x1d0   : > { %v722_v53 = vrot.slane %v2400_v17, 4  ;;  %v738_v46 = vmul.f32 0.125, %v734_v36  ;;  %v1186_v7 = vadd.f32 %v1180_v8, %v1153_v15  ;;  %v1249_v21 = vadd.f32 %v1248_v14, %v1247_v51 }
 0x1d1   : > { %v1028_v19 = vrot.slane %v1027_v34, 2  ;;  %v1009_v0 = vmul.f32 %v2405_v20, %v2405_v20  ;;  %v1010_v24 = vmul.f32 %v2408_v52, %v2408_v52  ;;  %v717_v13 = vadd.f32 %v716_v5, %v715_v2 }
 0x1d2   : > { %v723_v58 = vadd.f32 %v722_v53, %v2400_v17  ;;  %v1201_v39 = vsel %vm507_vm10, %v2234_v33, %v2260_v57  ;;  %v2426_v9 = vsub.f32 %v2354_v29, %v738_v46  ;;  %v1206_v49 = vadd.f32 %v2234_v33, %v1185_v40  ;;  %v2429_v11 = vpop.permute.xlu0 %1337 }
 0x1d3   : > { %v1029_v27 = vadd.f32 %v1028_v19, %v1027_v34  ;;  %v1012_v28 = vsel %vm982_vm12, %v1009_v0, 0.0  ;;  %v1019_v22 = vrot.slane %v1010_v24, 4  ;;  %v718_v56 = vrot.slane %v717_v13, 2 }
 0x1d4   : > { %v1013_v43 = vrot.slane %v1012_v28, 4  ;;  %v724_v59 = vrot.slane %v723_v58, 2  ;;  %v1207_v1 = vadd.f32 %v1201_v39, %v1186_v7  ;;  %v1252_v51 = vmul.f32 0.125, %v1249_v21 }
 0x1d5   : > { %v1030_v30 = vrot.slane %v1029_v27, 1  ;;  %v1020_v18 = vadd.f32 %v1019_v22, %v1010_v24  ;;  %v719_v54 = vadd.f32 %v718_v56, %v717_v13  ;;  %v744_v29 = vmul.f32 %v2426_v9, %v2426_v9 }
 0x1d6   : > { %v1014_v23 = vadd.f32 %v1013_v43, %v1012_v28  ;;  %v725_v3 = vadd.f32 %v724_v59, %v723_v58  ;;  %v1221_v33 = vsel %vm507_vm10, %v1216_v37, %v2317_v61  ;;  %v2435_v25 = vadd.f32 %v1216_v37, %v1206_v49  ;;  %v2440_v4 = vpop.permute.xlu0 %1369 }
 0x1d7   : > { %v1031_v45 = vadd.f32 %v1030_v30, %v1029_v27  ;;  %v1021_v57 = vrot.slane %v1020_v18, 2  ;;  %v720_v47 = vrot.slane %v719_v54, 1  ;;  %v2438_v36 = vsub.f32 %v2335_v50, %v1252_v51 }
 0x1d8   : > { %v1015_v62 = vrot.slane %v1014_v23, 2  ;;  %v726_v35 = vrot.slane %v725_v3, 1  ;;  %v2442_v8 = vadd.f32 %v1221_v33, %v1207_v1  ;;  %v758_v61 = vsel %vm507_vm10, %v744_v29, 0.0 }
 0x1d9   : > { %v1034_v41 = vmul.f32 0.125, %v1031_v45  ;;  %v1022_v12 = vadd.f32 %v1021_v57, %v1020_v18  ;;  %v721_v32 = vadd.f32 %v720_v47, %v719_v54  ;;  %v1349_v5 = vmul.f32 %v1840_v44, %v1912_v60  ;;  %v2571_v47 = vld [vmem:[#allocation4_spill] sm:$0xff] }
 0x1da   : > { %v1016_v16 = vadd.f32 %v1015_v62, %v1014_v23  ;;  %v727_v6 = vadd.f32 %v726_v35, %v725_v3  ;;  %v1230_v19 = vsel %vm1229_vm14, %v2435_v25, 0.0  ;;  %v1258_v0 = vmul.f32 %v2438_v36, %v2438_v36  ;;  %v2466_v28 = vpop.permute.xlu0 %1373  ;;  %v2572_v35 = vld [vmem:[#allocation3_spill] sm:$0xff] }
 0x1db   : > { %v1023_v55 = vrot.slane %v1022_v12, 1  ;;  %v736_v38 = vmul.f32 0.125, %v721_v32  ;;  %v1037_v34 = vadd.f32 1e-06, %v1034_v41  ;;  %v1231_v46 = vrot.slane %v1230_v19, 4  ;;  %v2573_v32 = vld [vmem:[#allocation6_spill] sm:$0xff] }
 0x1dc   : > { %v1017_v63 = vrot.slane %v1016_v16, 1  ;;  %v737_v14 = vmul.f32 0.125, %v727_v6  ;;  %v1350_v13 = vmul.f32 %v1840_v44, %v1922_v10  ;;  %v759_v27 = vrot.slane %v758_v61, 4 }
 0x1dd   : > { %v1024_v2 = vadd.f32 %v1023_v55, %v1022_v12  ;;  %v2445_v15 = vpop.permute.xlu1 %787  ;;  %v2450_v53 = vsub.f32 %v2395_v26, %v736_v38  ;;  %1659 = vrsqrt.f32 %v1037_v34  ;;  %v1232_v21 = vadd.f32 %v1231_v46, %v1230_v19 }
 0x1de   : > { %v1018_v50 = vadd.f32 %v1017_v63, %v1016_v16  ;;  %v2453_v40 = vsub.f32 %v2400_v17, %v737_v14  ;;  %v1237_v17 = vrot.slane %v2442_v8, 4  ;;  %v1272_v56 = vsel %vm537_vm8, %v1258_v0, 0.0  ;;  %v2478_v33 = vpop.permute.xlu0 %1389 }
 0x1df   : > { %v1033_v24 = vmul.f32 0.125, %v1024_v2  ;;  %v742_v60 = vmul.f32 %v2450_v53, %v2450_v53  ;;  %v1233_v30 = vrot.slane %v1232_v21, 2  ;;  %v760_v54 = vadd.f32 %v759_v27, %v758_v61 }
 0x1e0   : > { %v1032_v58 = vmul.f32 0.125, %v1018_v50  ;;  %v743_v26 = vmul.f32 %v2453_v40, %v2453_v40  ;;  %v1238_v10 = vadd.f32 %v1237_v17, %v2442_v8  ;;  %v1355_v41 = vmul.f32 %v2572_v35, %v2571_v47 }
 0x1e1   : > { %v1036_v7 = vadd.f32 1e-06, %v1033_v24  ;;  %v1336_v22 = vpop.permute.xlu1 %1335  ;;  %v745_v43 = vsel %vm714_vm13, %v742_v60, 0.0  ;;  %v1234_v1 = vadd.f32 %v1233_v30, %v1232_v21  ;;  %v1273_v12 = vrot.slane %v1272_v56, 4 }
 0x1e2   : > { %v1035_v39 = vadd.f32 1e-06, %v1032_v58  ;;  %v752_v44 = vrot.slane %v743_v26, 4  ;;  %v746_v59 = vrot.slane %v745_v43, 4  ;;  %v1239_v49 = vrot.slane %v1238_v10, 2 }
 0x1e3   : > { %1661 = vrsqrt.f32 %v1036_v7  ;;  %v1341_v23 = vsel %vm537_vm8, %v1336_v22, %v2429_v11  ;;  %v1235_v29 = vrot.slane %v1234_v1, 1  ;;  %v761_v34 = vrot.slane %v760_v54, 2  ;;  %v1407_v22 = vpop.permute.xlu0 %1406 }
 0x1e4   : > { %1663 = vrsqrt.f32 %v1035_v39  ;;  %v753_v18 = vadd.f32 %v752_v44, %v743_v26  ;;  %v747_v3 = vadd.f32 %v746_v59, %v745_v43  ;;  %v1345_v37 = vadd.f32 %v1341_v23, %v2052_v48  ;;  %v2574_v48 = vld [vmem:[#allocation5_spill] sm:$0xff] }
 0x1e5   : > { %v1340_v45 = vpop.permute.xlu1 %1339  ;;  %v1240_v57 = vadd.f32 %v1239_v49, %v1238_v10  ;;  %v1356_v14 = vmul.f32 %v2572_v35, %v2574_v48  ;;  %v1236_v2 = vadd.f32 %v1235_v29, %v1234_v1  ;;  %v1274_v46 = vadd.f32 %v1273_v12, %v1272_v56 }
 0x1e6   : > { %v754_v51 = vrot.slane %v753_v18, 2  ;;  %v1342_v62 = vsel %vm537_vm8, %v2429_v11, %v1340_v45  ;;  %v1351_v16 = vadd.f32 %v1349_v5, %v1345_v37  ;;  %v748_v55 = vrot.slane %v747_v3, 2 }
 0x1e7   : > { %v1346_v6 = vadd.f32 %v1342_v62, %v2573_v32  ;;  %v1241_v38 = vrot.slane %v1240_v57, 1  ;;  %v1660_v24 = vpop.eup %1659  ;;  %v1250_v58 = vmul.f32 0.125, %v1236_v2  ;;  %v762_v27 = vadd.f32 %v761_v34, %v760_v54 }
 0x1e8   : > { %v755_v63 = vadd.f32 %v754_v51, %v753_v18  ;;  %v1357_v11 = vadd.f32 %v1355_v41, %v1351_v16  ;;  %v749_v5 = vadd.f32 %v748_v55, %v747_v3  ;;  %v1043_v56 = vmul.f32 %v1660_v24, %v2376_v42  ;;  %v1411_v51 = vpop.permute.xlu0 %1410 }
 0x1e9   : > { %v1352_v61 = vadd.f32 %v1350_v13, %v1346_v6  ;;  %v1372_v50 = vpop.permute.xlu1 %1371  ;;  %v1242_v0 = vadd.f32 %v1241_v38, %v1240_v57  ;;  %v2484_v21 = vsub.f32 %v2435_v25, %v1250_v58  ;;  %v1275_v59 = vrot.slane %v1274_v46, 2 }
 0x1ea   : > { %v756_v19 = vrot.slane %v755_v63, 1  ;;  %v750_v49 = vrot.slane %v749_v5, 1  ;;  %v763_v3 = vrot.slane %v762_v27, 1  ;;  %v1046_v47 = vmul.f32 %v1043_v56, %v2412_v31 }
 0x1eb   : > { %v1358_v60 = vadd.f32 %v1356_v14, %v1352_v61  ;;  %v1251_v17 = vmul.f32 0.125, %v1242_v0  ;;  %v1256_v18 = vmul.f32 %v2484_v21, %v2484_v21  ;;  %v1276_v45 = vadd.f32 %v1275_v59, %v1274_v46 }
 0x1ec   : > { %v757_v26 = vadd.f32 %v756_v19, %v755_v63  ;;  %v751_v35 = vadd.f32 %v750_v49, %v749_v5  ;;  %v764_v16 = vadd.f32 %v763_v3, %v762_v27  ;;  %v1376_v48 = vsel %vm537_vm8, %v1372_v50, %v2466_v28  ;;  %v1438_v24 = vpop.permute.xlu0 %1437 }
 0x1ed   : > { %v1662_v7 = vpop.eup %1661  ;;  %v1388_v39 = vpop.permute.xlu1 %1387  ;;  %v2487_v44 = vsub.f32 %v2442_v8, %v1251_v17  ;;  %v1259_v8 = vsel %vm1229_vm14, %v1256_v18, 0.0  ;;  %v1277_v38 = vrot.slane %v1276_v45, 1  ;;  %v1049_v34 = vadd.f32 %v1046_v47, %v2445_v15 }
 0x1ee   : > { %v1664_v43 = vpop.eup %1663  ;;  %v766_v13 = vmul.f32 0.125, %v757_v26  ;;  %v1042_v10 = vmul.f32 %v1662_v7, %v2408_v52  ;;  %v1260_v42 = vrot.slane %v1259_v8, 4  ;;  %v1393_v29 = vsel %vm600_vm11, %v1388_v39, %v2478_v33 }
 0x1ef   : > { %v1041_v30 = vmul.f32 %v1664_v43, %v2405_v20  ;;  %v1257_v23 = vmul.f32 %v2487_v44, %v2487_v44  ;;  %v1375_v20 = vsel %vm537_vm8, %v2440_v4, %v1372_v50  ;;  %v765_v2 = vmul.f32 0.125, %v751_v35 }
 0x1f0   : > { %v769_v25 = vadd.f32 1e-06, %v766_v13  ;;  %v1045_v54 = vmul.f32 %v1042_v10, %v2412_v31  ;;  %v1261_v41 = vadd.f32 %v1260_v42, %v1259_v8  ;;  %v1379_v32 = vadd.f32 %v1375_v20, %v1357_v11 }
 0x1f1   : > { %v1392_v1 = vpop.permute.xlu1 %1391  ;;  %v1044_v52 = vmul.f32 %v1041_v30, %v2412_v31  ;;  %v1266_v37 = vrot.slane %v1257_v23, 4  ;;  %v767_v0 = vmul.f32 0.125, %v764_v16  ;;  %v1380_v46 = vadd.f32 %v1376_v48, %v1358_v60 }
 0x1f2   : > { %1665 = vrsqrt.f32 %v769_v25  ;;  %v1048_v57 = vadd.f32 %v1045_v54, %v2445_v15  ;;  %v1262_v6 = vrot.slane %v1261_v41, 2  ;;  %v1397_v14 = vadd.f32 %v1393_v29, %v1379_v32 }
 0x1f3   : > { %v1047_v62 = vadd.f32 %v1044_v52, %v2445_v15  ;;  %v1267_v12 = vadd.f32 %v1266_v37, %v1257_v23  ;;  %v1394_v11 = vsel %vm600_vm11, %v2478_v33, %v1392_v1  ;;  %v1278_v50 = vadd.f32 %v1277_v38, %v1276_v45 }
 0x1f4   : > { %1055 = vrot.lane.b32.xlu0 %v1048_v57, %s1706_s10  ;;  %v1263_v61 = vadd.f32 %v1262_v6, %v1261_v41  ;;  %v1398_v27 = vadd.f32 %v1394_v11, %v1380_v46  ;;  %v768_v43 = vadd.f32 1e-06, %v765_v2  ;;  %v770_v33 = vadd.f32 1e-06, %v767_v0 }
 0x1f5   : > { %1053 = vrot.lane.b32.xlu1 %v1047_v62, %s1706_s10  ;;  %v1409_v4 = vpop.permute.xlu1 %1408  ;;  %v1268_v55 = vrot.slane %v1267_v12, 2  ;;  %v1281_v23 = vmul.f32 0.125, %v1278_v50 }
 0x1f6   : > { %v1412_v63 = vsel %vm600_vm11, %v1407_v22, %v1409_v4  ;;  %v1264_v26 = vrot.slane %v1263_v61, 1  ;;  %v1413_v7 = vsel %vm600_vm11, %v1409_v4, %v1411_v51  ;;  %1667 = vrsqrt.f32 %v768_v43 }
 0x1f7   : > { %v1269_v19 = vadd.f32 %v1268_v55, %v1267_v12  ;;  %v1416_v58 = vadd.f32 %v1412_v63, %v1397_v14  ;;  %v1417_v56 = vadd.f32 %v1413_v7, %v1398_v27  ;;  %1669 = vrsqrt.f32 %v770_v33 }
 0x1f8   : > { %v1265_v13 = vadd.f32 %v1264_v26, %v1263_v61  ;;  %v1284_v45 = vadd.f32 1e-06, %v1281_v23 }
 0x1f9   : > { %1057 = vrot.lane.b32.xlu1 %v1049_v34, %s1706_s10  ;;  %v1436_v5 = vpop.permute.xlu1 %1435  ;;  %v1270_v17 = vrot.slane %v1269_v19, 1 }
 0x1fa   : > { %v1441_v28 = vsel %vm507_vm10, %v1436_v5, %v1438_v24  ;;  %v1279_v18 = vmul.f32 0.125, %v1265_v13 }
 0x1fb   : > { %v1445_v22 = vadd.f32 %v1441_v28, %v1416_v58  ;;  %v1271_v10 = vadd.f32 %v1270_v17, %v1269_v19 }
 0x1fc   : > { %v1666_v39 = vpop.eup %1665  ;;  %v1282_v1 = vadd.f32 1e-06, %v1279_v18 }
 0x1fd   : > { %v1447_v59 = vrot.slane %v1445_v22, 4  ;;  %v1440_v60 = vpop.permute.xlu1 %1439  ;;  %v775_v30 = vmul.f32 %v1666_v39, %v2453_v40  ;;  %v1280_v49 = vmul.f32 0.125, %v1271_v10 }
 0x1fe   : > { %v1442_v25 = vsel %vm507_vm10, %v1438_v24, %v1440_v60  ;;  %1671 = vrsqrt.f32 %v1282_v1 }
 0x1ff   : > { %v1448_v54 = vadd.f32 %v1447_v59, %v1445_v22  ;;  %v1446_v3 = vadd.f32 %v1442_v25, %v1417_v56  ;;  %v783_v8 = vmul.f32 %v2412_v31, %v775_v30  ;;  %v1283_v52 = vadd.f32 1e-06, %v1280_v49 }
 0x200   : > { %v1668_v29 = vpop.eup %1667 }
 0x201   : > { %v1449_v42 = vrot.slane %v1448_v54, 2  ;;  %v1453_v37 = vrot.slane %v1446_v3, 4  ;;  %v791_v20 = vadd.f32 %v2445_v15, %v783_v8  ;;  %1673 = vrsqrt.f32 %v1283_v52  ;;  %v1670_v16 = vpop.eup %1669 }
 0x202   : > { %1675 = vrsqrt.f32 %v1284_v45  ;;  %v774_v14 = vmul.f32 %v1668_v29, %v2450_v53  ;;  %v776_v11 = vmul.f32 %v1670_v16, %v2426_v9 }
 0x203   : > { %v1450_v40 = vadd.f32 %v1449_v42, %v1448_v54  ;;  %v1454_v51 = vadd.f32 %v1453_v37, %v1446_v3  ;;  %798 = vrot.lane.b32.xlu1 %v791_v20, %s1704_s28 }
 0x204   : > { %v784_v50 = vmul.f32 %v2412_v31, %v776_v11 }
 0x205   : > { %v1451_v57 = vrot.slane %v1450_v40, 1  ;;  %v1455_v62 = vrot.slane %v1454_v51, 2 }
 0x206   : > { %v792_v13 = vadd.f32 %v2445_v15, %v784_v50 }
 0x207   : > { %v1452_v47 = vadd.f32 %v1451_v57, %v1450_v40  ;;  %v1456_v35 = vadd.f32 %v1455_v62, %v1454_v51 }
 0x208   : > { %v1672_v6 = vpop.eup %1671 }
 0x209   : > { %v1459_v41 = vmul.f32 0.125, %v1452_v47  ;;  %v1457_v12 = vrot.slane %v1456_v35, 1  ;;  %v1288_v63 = vmul.f32 %v1672_v6, %v2484_v21  ;;  %v782_v21 = vmul.f32 %v2412_v31, %v774_v14 }
 0x20b   : > { %v1461_v32 = vsub.f32 %v1445_v22, %v1459_v41  ;;  %v1458_v4 = vadd.f32 %v1457_v12, %v1456_v35  ;;  %v1674_v55 = vpop.eup %1673  ;;  %v1291_v19 = vmul.f32 %v1288_v63, %v2412_v31  ;;  %v790_v28 = vadd.f32 %v2445_v15, %v782_v21 }
 0x20c   : > { %v1289_v34 = vmul.f32 %v1674_v55, %v2487_v44  ;;  %v1676_v24 = vpop.eup %1675 }
 0x20d   : > { %v1463_v38 = vmul.f32 %v1461_v32, %v1461_v32  ;;  %v1460_v48 = vmul.f32 0.125, %v1458_v4  ;;  %v1294_v5 = vadd.f32 %v1291_v19, %v2445_v15  ;;  %v1290_v44 = vmul.f32 %v1676_v24, %v2438_v36 }
 0x20e   : > { %v1292_v0 = vmul.f32 %v1289_v34, %v2412_v31 }
 0x20f   : > { %v1465_v2 = vrot.slane %v1463_v38, 4  ;;  %v1462_v61 = vsub.f32 %v1446_v3, %v1460_v48  ;;  %1300 = vrot.lane.b32.xlu0 %v1294_v5, %s1703_s27  ;;  %v1293_v10 = vmul.f32 %v1290_v44, %v2412_v31 }
 0x210   : > { %v1295_v26 = vadd.f32 %v1292_v0, %v2445_v15 }
 0x211   : > { %v1466_v46 = vadd.f32 %v1465_v2, %v1463_v38  ;;  %v1464_v58 = vmul.f32 %v1462_v61, %v1462_v61  ;;  %v1296_v60 = vadd.f32 %v1293_v10, %v2445_v15 }
 0x212   : > { %1302 = vrot.lane.b32.xlu1 %v1295_v26, %s1703_s27 }
 0x213   : > { %v1467_v53 = vrot.slane %v1466_v46, 2  ;;  %v1471_v17 = vrot.slane %v1464_v58, 4  ;;  %796 = vrot.lane.b32.xlu0 %v790_v28, %s1704_s28 }
 0x215   : > { %v1468_v9 = vadd.f32 %v1467_v53, %v1466_v46  ;;  %v1472_v7 = vadd.f32 %v1471_v17, %v1464_v58 }
 0x217   : > { %v1469_v27 = vrot.slane %v1468_v9, 1  ;;  %v1473_v22 = vrot.slane %v1472_v7, 2  ;;  %800 = vrot.lane.b32.xlu0 %v792_v13, %s1704_s28 }
 0x219   : > { %v1470_v39 = vadd.f32 %v1469_v27, %v1468_v9  ;;  %v1474_v43 = vadd.f32 %v1473_v22, %v1472_v7 }
 0x21b   : > { %v1477_v36 = vmul.f32 0.125, %v1470_v39  ;;  %v1475_v33 = vrot.slane %v1474_v43, 1  ;;  %1304 = vrot.lane.b32.xlu0 %v1296_v60, %s1703_s27 }
 0x21d   : > { %v1479_v56 = vadd.f32 1e-06, %v1477_v36  ;;  %v1476_v59 = vadd.f32 %v1475_v33, %v1474_v43 }
 0x21f   : > { %1677 = vrsqrt.f32 %v1479_v56  ;;  %v1478_v30 = vmul.f32 0.125, %v1476_v59 }
 0x221   : > { %v1480_v18 = vadd.f32 1e-06, %v1478_v30 }
 0x223   : > { %1679 = vrsqrt.f32 %v1480_v18 }
 0x229   : > { %v1678_v49 = vpop.eup %1677 }
 0x22a   : > { %v1483_v25 = vmul.f32 %v1678_v49, %v1461_v32 }
 0x22c   : > { %v1485_v23 = vmul.f32 %v1483_v25, %v2412_v31 }
 0x22d   : > { %v1680_v54 = vpop.eup %1679 }
 0x22e   : > { %v1487_v3 = vadd.f32 %v1485_v23, %v2445_v15  ;;  %v1484_v8 = vmul.f32 %v1680_v54, %v1462_v61 }
 0x230   : > { %1568 = vst [vmem:[%s251_s14 + $0x30] sm:$0xff] %v1487_v3  ;;  %v1486_v1 = vmul.f32 %v1484_v8, %v2412_v31 }
 0x232   : > { %v1488_v52 = vadd.f32 %v1486_v1, %v2445_v15 }
 0x234   : > { %1569 = vst [vmem:[%s251_s14 + $0x38] sm:$0xff] %v1488_v52 }
 0x266   : > { %v1056_v42 = vpop.permute.xlu0 %1055 }
 0x267   : > { %v1054_v37 = vpop.permute.xlu1 %1053 }
 0x268   : > { %v1060_v20 = vsel %vm1059_vm15, %v1054_v37, %v1056_v42 }
 0x269   : > { %1564 = vst [vmem:[%s251_s14 + $0x10] sm:$0xff] %v1060_v20 }
 0x26b   : > { %v1058_v45 = vpop.permute.xlu1 %1057 }
 0x26c   : > { %v1061_v40 = vsel %vm1059_vm15, %v1056_v42, %v1058_v45 }
 0x26d   : > { %1565 = vst [vmem:[%s251_s14 + $0x18] sm:$0xff] %v1061_v40 }
 0x275   : > { %v799_v51 = vpop.permute.xlu1 %798 }
 0x281   : > { %v1301_v57 = vpop.permute.xlu0 %1300 }
 0x284   : > { %v1303_v62 = vpop.permute.xlu1 %1302 }
 0x285   : > { %v1306_v47 = vsel %vm903_vm7, %v1301_v57, %v1303_v62  ;;  %v797_v35 = vpop.permute.xlu0 %796 }
 0x286   : > { %1566 = vst [vmem:[%s251_s14 + $0x20] sm:$0xff] %v1306_v47  ;;  %v803_v31 = vsel %vm802_vm9, %v797_v35, %v799_v51 }
 0x287   : > { %807 = vst [vmem:[%s251_s14] sm:$0xff] %v803_v31 }
 0x289   : > { %v801_v15 = vpop.permute.xlu0 %800 }
 0x28a   : > { %v804_v41 = vsel %vm802_vm9, %v799_v51, %v801_v15 }
 0x28b   : > { %808 = vst [vmem:[%s251_s14 + $0x8] sm:$0xff] %v804_v41 }
 0x28d   : > { %v1305_v12 = vpop.permute.xlu0 %1304 }
 0x28e   : > { %v1307_v29 = vsel %vm903_vm7, %v1303_v62, %v1305_v12 }
 0x28f   : > { %1567 = vst [vmem:[%s251_s14 + $0x28] sm:$0xff] %v1307_v29 }
 0x290 PF: > { %s16_s21 = sadd.s32 1, %s1687_s21  }
 0x291   : > { %p13_p4 = scmp.ge.s32.totalorder %s16_s21, 4  }
 0x293   :  { %15 = sbr.rel (!%p13_p4) target bundleno = 1 (0x1), region = 77 }

// kernel: tile.28
= control target key start
LH: loop header
LB: loop body
LE: loop exit
PB: predicated region body
PF: predicated region fallthrough
CT: control target
= control target key end

     0   :  { %s22_s0 = inlined_call_operand.vmem [shape: f32[8], index: 0, kind: input, shape index: {}]   ;;  %s23_s1 = inlined_call_operand.vmem [shape: f32[4,8], index: 1, kind: output, shape index: {}]  }
   0x1   :  { %v4_v0 = vld [vmem:[%s22_s0] ss:$0 sm:$0xff] }
   0x2   :  { %5 = vst [vmem:[%s23_s1] sm:$0xf] %v4_v0 }

// kernel: feature_pyramid.5
= control target key start
LH: loop header
LB: loop body
LE: loop exit
PB: predicated region body
PF: predicated region fallthrough
CT: control target
= control target key end

     0   :  { %s4707_s21 = smov 0   ;;  %s8040_s0 = inlined_call_operand.vmem [shape: f32[2,8,1024], index: 0, kind: input, shape index: {}]   ;;  %s8041_s1 = inlined_call_operand.vmem [shape: f32[32,8], index: 1, kind: input, shape index: {}]   ;;  %s8042_s2 = inlined_call_operand.vmem [shape: f32[32,1], index: 2, kind: input, shape index: {}]   ;;  %s8043_s3 = inlined_call_operand.vmem [shape: f32[8,9], index: 3, kind: input, shape index: {}]   ;;  %s8044_s4 = inlined_call_operand.vmem [shape: f32[8,1], index: 4, kind: input, shape index: {}]   ;;  %s8045_s5 = inlined_call_operand.vmem [shape: f32[8,1], index: 5, kind: input, shape index: {}]   ;;  %s8046_s6 = inlined_call_operand.vmem [shape: f32[2,4,8,1024], index: 6, kind: output, shape index: {}]  }
   0x1 LB: > { %s4286_s22 = sadd.s32 4294967295, %s4652_s21   ;;  %p4290_p0 = scmp.ge.s32.totalorder %s4652_s21, 1  ;;  %s4652_s21 = sphi %s4707_s21, %s16_s21  }
   0x2   : > { %p212_p1 = scmp.lt.s32.totalorder %s4652_s21, 3 }
   0x4   : > { %p213_p2 = pnand %p4290_p0, %p212_p1 }
   0x6   : > { %216 = sbr.rel (%p213_p2) target bundleno = 1065 (0x429), region = 44 }
   0xd   : > { %p242_p3 = scmp.lt.s32.totalorder %s4286_s22, 1  ;;  %v892_v0 = vlaneseq  ;;  %v4654_v1 = vmov 0.0   ;;  %v266_v2 = vld [vmem:[%s8042_s2 + $0x10] sm:$0xff]  ;;  %v4655_v3 = vmov 0   ;;  %v4656_v5 = vmov 5   ;;  %v4746_v10 = vld [vmem:[%s8041_s1] sm:$0xff] }
   0xe   : > { %365 = vmatprep.mubr.f32.mxu0 %v4654_v1  ;;  %454 = vmatprep.mubr.f32.mxu1 %v4654_v1  ;;  %vm288_vm0 = vcmask 64512   ;;  %v267_v24 = vld [vmem:[%s8042_s2 + $0x18] sm:$0xff]  ;;  %v253_v32 = vld [vmem:[%s8041_s1 + $0x8] sm:$0xff]  ;;  %s4657_s11 = smov 95   ;;  %v254_v41 = vld [vmem:[%s8041_s1 + $0x10] sm:$0xff]  ;;  %s4658_s16 = smov 127  }
   0xf   : > { %s8776_s22 = smov (!%p242_p3, %s4286_s22), 1  ;;  %4381 = vset.pattern.permute.xlu1 %v4655_v3  ;;  %v4723_v4 = vand.u32 127, %v892_v0  ;;  %4426 = vset.pattern.permute.xlu0 %v4656_v5  ;;  %v255_v45 = vld [vmem:[%s8041_s1 + $0x18] sm:$0xff]  ;;  %v4659_v46 = vmov 1   ;;  %v889_v47 = vld [vmem:[%s8043_s3] sm:$0xff]  ;;  %v4660_v48 = vmov 2  }
  0x10   : > { %280 = vperm.xlu1 %4381, %v266_v2   ;;  %s4353_s25 = sshll.u32 %s8776_s22, 6  ;;  %v4661_v49 = vmov 6   ;;  %v4662_v50 = vmov 3   ;;  %v4663_v51 = vmov 8   ;;  %v264_v52 = vld [vmem:[%s8042_s2] sm:$0xff]  ;;  %v4664_v53 = vmov 4  }
  0x11   : > { %v4727_v6 = vadd.s32 256, %v4723_v4  ;;  %v4730_v7 = vadd.s32 384, %v4723_v4  ;;  %v4733_v8 = vadd.s32 768, %v4723_v4  ;;  %v4736_v9 = vadd.s32 896, %v4723_v4  ;;  %s4741_s28 = scalar_lea.vmem %s8040_s0, %s4353_s25  ;;  %v265_v54 = vld [vmem:[%s8042_s2 + $0x8] sm:$0xff]  ;;  %v890_v56 = vld [vmem:[%s8044_s4] sm:$0xff] }
  0x12   : > { %v4749_v11 = vadd.s32 128, %v4723_v4  ;;  %v905_v12 = vand.u32 31, %v4723_v4  ;;  %v4753_v13 = vadd.s32 512, %v4723_v4  ;;  %v257_v14 = vld [vmem:[%s4741_s28 + $0x8] sm:$0xff]  ;;  %v259_v15 = vld [vmem:[%s4741_s28 + $0x18] sm:$0xff]  ;;  %v256_v16 = vld [vmem:[%s4741_s28] sm:$0xff] }
  0x13   : > { %v919_v17 = vand.u32 31, %v4727_v6  ;;  %v926_v18 = vand.u32 31, %v4730_v7  ;;  %v947_v19 = vand.u32 31, %v4733_v8  ;;  %301 = vmatprep.subr.mxu0 %v257_v14  ;;  %390 = vmatprep.subr.mxu1 %v259_v15  ;;  %v258_v20 = vld [vmem:[%s4741_s28 + $0x10] sm:$0xff]  ;;  %v954_v21 = vand.u32 31, %v4736_v9  ;;  %v261_v26 = vld [vmem:[%s4741_s28 + $0x28] sm:$0xff] }
  0x14   : > { %v912_v22 = vand.u32 31, %v4749_v11  ;;  %vm997_vm1 = vcmp.ne.s32.totalorder %v905_v12, 0  ;;  %v4767_v23 = vadd.s32 640, %v4723_v4  ;;  %302 = vmatpush1.msra.mxu0 %v256_v16  ;;  %391 = vmatpush1.msra.mxu1 %v258_v20  ;;  %v263_v30 = vld [vmem:[%s4741_s28 + $0x38] sm:$0xff]  ;;  %v933_v35 = vand.u32 31, %v4753_v13  ;;  %v260_v39 = vld [vmem:[%s4741_s28 + $0x20] sm:$0xff] }
  0x15   : > { %vm999_vm2 = vcmp.ne.s32.totalorder %v919_v17, 0  ;;  %vm1000_vm3 = vcmp.ne.s32.totalorder %v926_v18, 0  ;;  %vm1003_vm4 = vcmp.ne.s32.totalorder %v947_v19, 0  ;;  %v4311_v25 = vsel %vm997_vm1, 1.0, %v4654_v1  ;;  %4295 = vmatmul.mubr.msk.f32.vlgmr.msra.gmra.mrb[0].mxu0 %vm288_vm0, %v4746_v10  ;;  %4299 = vmatmul.mubr.msk.f32.vlgmr.msra.gmra.mrb[0].mxu1 %vm288_vm0, %v4746_v10  ;;  %v262_v40 = vld [vmem:[%s4741_s28 + $0x30] sm:$0xff]  ;;  %v891_v59 = vld [vmem:[%s8045_s5] sm:$0xff] }
  0x16   : > { %v4313_v27 = vsel %vm999_vm2, 1.0, %v4654_v1  ;;  %v4314_v28 = vsel %vm1000_vm3, 1.0, %v4654_v1  ;;  %vm1004_vm5 = vcmp.ne.s32.totalorder %v954_v21, 0  ;;  %v4317_v29 = vsel %vm1003_vm4, 1.0, %v4654_v1  ;;  %371 = vmatprep.mubr.f32.mxu0 %v4654_v1  ;;  %460 = vmatprep.mubr.f32.mxu1 %v4654_v1  ;;  %s4666_s29 = smov 97   ;;  %s4667_s30 = smov 1  }
  0x17   : > { %v4790_v31 = vpack.i.bf16 %v4314_v28, %v4313_v27  ;;  %v4318_v33 = vsel %vm1004_vm5, 1.0, %v4654_v1  ;;  %vm998_vm6 = vcmp.ne.s32.totalorder %v912_v22, 0  ;;  %285 = vperm.xlu1 %4381, %v267_v24   ;;  %479 = vmatprep.subr.mxu0 %v261_v26  ;;  %v940_v36 = vand.u32 31, %v4767_v23  ;;  %s4668_s7 = smov 96   ;;  %s4669_s8 = smov 31  }
  0x18   : > { %v4312_v34 = vsel %vm998_vm6, 1.0, %v4654_v1  ;;  %v4805_v37 = vpack.i.bf16 %v4318_v33, %v4317_v29  ;;  %568 = vmatprep.subr.mxu1 %v263_v30  ;;  %vm1001_vm7 = vcmp.ne.s32.totalorder %v933_v35, 0  ;;  %480 = vmatpush1.msra.mxu0 %v260_v39  ;;  %vm1021_vm9 = vcmp.ne.s32.totalorder %v905_v12, 31  ;;  %s4670_s9 = smov 32   ;;  %s4671_s10 = smov 33  }
  0x19   : > { %8321 = vst [vmem:[#allocation3_spill] sm:$0xff] %v4790_v31  ;;  %4388 = vrot.lane.b32.xlu0 %v4790_v31, %s4657_s11  ;;  %v4807_v38 = vpack.i.bf16 %v4312_v34, %v4311_v25  ;;  %4296 = vmatmul.mubr.msk.f32.gmra.mrb[2].mxu0 %vm288_vm0, %v253_v32  ;;  %vm1002_vm8 = vcmp.ne.s32.totalorder %v940_v36, 0  ;;  %v4315_v42 = vsel %vm1001_vm7, 1.0, %v4654_v1  ;;  %vm1022_vm10 = vcmp.ne.s32.totalorder %v912_v22, 31  ;;  %s4354_s12 = sshll.u32 %s8776_s22, 8 }
  0x1a   : > { %8322 = vst [vmem:[#allocation4_spill] sm:$0xff] %v4805_v37  ;;  %4300 = vmatmul.mubr.msk.f32.gmra.mrb[2].mxu1 %vm288_vm0, %v253_v32  ;;  %377 = vmatprep.mubr.f32.mxu0 %v4654_v1  ;;  %v4316_v43 = vsel %vm1002_vm8, 1.0, %v4654_v1  ;;  %v4665_v55 = vmov 7   ;;  %v4319_v57 = vsel %vm1021_vm9, 1.0, %v4654_v1  ;;  %v4320_v58 = vsel %vm1022_vm10, 1.0, %v4654_v1  ;;  %s7351_s22 = scalar_lea.vmem %s8046_s6, %s4354_s12 }
  0x1b   : > { %8323 = vst [vmem:[#allocation5_spill] sm:$0xff] %v4807_v38  ;;  %466 = vmatprep.mubr.f32.mxu1 %v4654_v1  ;;  %4383 = vrot.lane.b32.xlu1 %v4807_v38, %s4657_s11  ;;  %v4826_v44 = vpack.i.bf16 %v4316_v43, %v4315_v42  ;;  %vm1025_vm11 = vcmp.ne.s32.totalorder %v933_v35, 31  ;;  %vm1026_vm12 = vcmp.ne.s32.totalorder %v940_v36, 31  ;;  %vm1023_vm13 = vcmp.ne.s32.totalorder %v919_v17, 31 }
  0x1c   : > { %569 = vmatpush1.msra.mxu1 %v262_v40  ;;  %4397 = vset.pattern.permute.xlu1 %v4659_v46  ;;  %vm1024_vm14 = vcmp.ne.s32.totalorder %v926_v18, 31  ;;  %v4897_v60 = vpack.i.bf16 %v4320_v58, %v4319_v57  ;;  %v4323_v61 = vsel %vm1025_vm11, 1.0, %v4654_v1  ;;  %v4324_v62 = vsel %vm1026_vm12, 1.0, %v4654_v1 }
  0x1d   : > { %8324 = vst [vmem:[#allocation6_spill] sm:$0xff] %v4826_v44  ;;  %4401 = vrot.lane.b32.xlu0 %v4805_v37, %s4657_s11  ;;  %4297 = vmatmul.mubr.msk.f32.gmra.mrb[4].mxu0 %vm288_vm0, %v254_v41  ;;  %v4321_v63 = vsel %vm1023_vm13, 1.0, %v4654_v1  ;;  %v4322_v0 = vsel %vm1024_vm14, 1.0, %v4654_v1  ;;  %vm1027_vm15 = vcmp.ne.s32.totalorder %v947_v19, 31  ;;  %v4911_v4 = vpack.i.bf16 %v4324_v62, %v4323_v61 }
  0x1e   : > { %4301 = vmatmul.mubr.msk.f32.gmra.mrb[4].mxu1 %vm288_vm0, %v254_v41  ;;  %383 = vmatprep.mubr.f32.mxu0 %v4654_v1  ;;  %8325 = vst [vmem:[#allocation7_spill] sm:$0xff] %v4897_v60  ;;  %v4908_v2 = vpack.i.bf16 %v4322_v0, %v4321_v63  ;;  %v4325_v5 = vsel %vm1027_vm15, 1.0, %v4654_v1  ;;  %vm2057_vm1 = vcmask 793600   ;;  %vm2292_vm2 = vcmask 7168  }
  0x1f   : > { %472 = vmatprep.mubr.f32.mxu1 %v4654_v1  ;;  %4393 = vrot.lane.b32.xlu1 %v4826_v44, %s4657_s11  ;;  %8327 = vst [vmem:[#allocation9_spill] sm:$0xff] %v4911_v4  ;;  %vm1176_vm3 = vcmask 1039360   ;;  %vm1092_vm4 = vcmask 777216   ;;  %vm1359_vm5 = vcmask 785408   ;;  %vm1713_vm6 = vcmask 1048312  }
  0x20   : > { %8326 = vst [vmem:[#allocation8_spill] sm:$0xff] %v4908_v2  ;;  %vm2557_vm7 = vcmask 1048320   ;;  %vm3146_vm8 = vcmask 252928   ;;  %vm2778_vm9 = vcmask 261120   ;;  %vm1945_vm10 = vcmask 269312  }
  0x21   : > { %4406 = vrot.lane.b32.xlu0 %v4807_v38, %s4658_s16  ;;  %4298 = vmatmul.mubr.msk.f32.gmra.mrb[6].mxu0 %vm288_vm0, %v255_v45  ;;  %vm3350_vm11 = vcmask 1048568  }
  0x22   : > { %4302 = vmatmul.mubr.msk.f32.gmra.mrb[6].mxu1 %vm288_vm0, %v255_v45  ;;  %543 = vmatprep.mubr.f32.mxu0 %v4654_v1 }
  0x23   : > { %632 = vmatprep.mubr.f32.mxu1 %v4654_v1  ;;  %1137 = vperm.xlu1 %4397, %v889_v47  }
  0x25   : > { %4416 = vrot.lane.b32.xlu0 %v4826_v44, %s4658_s16  ;;  %4303 = vmatmul.mubr.msk.f32.vlgmr.msra.gmra.mrb[8].mxu0 %vm288_vm0, %v4746_v10 }
  0x26   : > { %4307 = vmatmul.mubr.msk.f32.vlgmr.msra.gmra.mrb[8].mxu1 %vm288_vm0, %v4746_v10  ;;  %549 = vmatprep.mubr.f32.mxu0 %v4654_v1 }
  0x27   : > { %638 = vmatprep.mubr.f32.mxu1 %v4654_v1  ;;  %4398 = vset.pattern.permute.xlu1 %v4660_v48 }
  0x28   : > { %1204 = vperm.xlu1 %4398, %v889_v47  }
  0x29   : > { %1456 = vperm.xlu0 %4426, %v889_v47   ;;  %4304 = vmatmul.mubr.msk.f32.gmra.mrb[10].mxu0 %vm288_vm0, %v253_v32 }
  0x2a   : > { %4308 = vmatmul.mubr.msk.f32.gmra.mrb[10].mxu1 %vm288_vm0, %v253_v32  ;;  %555 = vmatprep.mubr.f32.mxu0 %v4654_v1 }
  0x2b   : > { %644 = vmatprep.mubr.f32.mxu1 %v4654_v1 }
  0x2c   : > { %4399 = vset.pattern.permute.xlu1 %v4662_v50 }
  0x2d   : > { %4427 = vset.pattern.permute.xlu0 %v4661_v49  ;;  %4305 = vmatmul.mubr.msk.f32.gmra.mrb[12].mxu0 %vm288_vm0, %v254_v41 }
  0x2e   : > { %1517 = vperm.xlu0 %4427, %v889_v47   ;;  %4309 = vmatmul.mubr.msk.f32.gmra.mrb[12].mxu1 %vm288_vm0, %v254_v41 }
  0x2f   : > { %561 = vmatprep.mubr.f32.mxu0 %v4654_v1  ;;  %650 = vmatprep.mubr.f32.mxu1 %v4654_v1 }
  0x30   : > { %1279 = vperm.xlu1 %4399, %v889_v47  }
  0x31   : > { %4306 = vmatmul.mubr.msk.f32.gmra.mrb[14].mxu0 %vm288_vm0, %v255_v45 }
  0x32   : > { %4429 = vset.pattern.permute.xlu0 %v4663_v51  ;;  %4310 = vmatmul.mubr.msk.f32.gmra.mrb[14].mxu1 %vm288_vm0, %v255_v45  ;;  %vm1028_vm0 = vcmp.ne.s32.totalorder %v954_v21, 31 }
  0x33   : > { %1653 = vperm.xlu0 %4429, %v889_v47   ;;  %v4326_v6 = vsel %vm1028_vm0, 1.0, %v4654_v1 }
  0x34   : > { %4411 = vrot.lane.b32.xlu1 %v4790_v31, %s4658_s16 }
  0x35   : > { %4425 = vset.pattern.permute.xlu1 %v4664_v53 }
  0x37   : > { %4430 = vset.pattern.permute.xlu0 %v4655_v3 }
  0x38   : > { %270 = vperm.xlu0 %4430, %v264_v52   ;;  %4421 = vrot.lane.b32.xlu1 %v4805_v37, %s4658_s16 }
  0x3c   : > { %275 = vperm.xlu0 %4430, %v265_v54   ;;  %1395 = vperm.xlu1 %4425, %v889_v47  }
  0x40   : > { %1056 = vperm.xlu0 %4430, %v889_v47   ;;  %4428 = vset.pattern.permute.xlu1 %v4665_v55 }
  0x41   : > { %1592 = vperm.xlu1 %4428, %v889_v47  }
  0x44   : > { %1892 = vperm.xlu0 %4430, %v890_v56  }
  0x45   : > { %4431 = vset.pattern.permute.xlu1 %v4655_v3  ;;  %v4916_v3 = vpack.i.bf16 %v4326_v6, %v4325_v5 }
  0x46   : > { %1906 = vperm.xlu1 %4431, %v891_v59  }
  0x47   : > { %8328 = vst [vmem:[#allocation10_spill] sm:$0xff] %v4916_v3 }
  0x48   : > { %4433 = vrot.lane.b32.xlu0 %v4897_v60, %s4666_s29 }
  0x4a   : > { %4438 = vrot.lane.b32.xlu1 %v4908_v2, %s4666_s29 }
  0x4c   : > { %4443 = vrot.lane.b32.xlu0 %v4911_v4, %s4666_s29 }
  0x4e   : > { %4448 = vrot.lane.b32.xlu1 %v4916_v3, %s4666_s29 }
  0x50   : > { %4458 = vrot.lane.b32.xlu0 %v4908_v2, %s4667_s30 }
  0x52   : > { %4453 = vrot.lane.b32.xlu1 %v4897_v60, %s4667_s30 }
  0x54   : > { %4468 = vrot.lane.b32.xlu0 %v4916_v3, %s4667_s30 }
  0x56   : > { %4463 = vrot.lane.b32.xlu1 %v4911_v4, %s4667_s30 }
  0x8b   : > { %v4928_v1 = vpop.permute.xlu0 %4388 }
  0x8c   : > { %8329 = vst [vmem:[#allocation11_spill] sm:$0xff] %v4928_v1 }
  0x8f   : > { %v4930_v7 = vpop.permute.xlu1 %280  ;;  %v4932_v8 = vpop.permute.xlu0 %4401 }
  0x90   : > { %8330 = vst [vmem:[#allocation12_spill] sm:$0xff] %v4932_v8 }
  0x93   : > { %v4938_v11 = vpop.permute.xlu0 %4406 }
  0x94   : > { %v4958_v19 = vunpack.i.l.bf16 %v4938_v11 }
  0x96   : > { %v4934_v9 = vpop.permute.xlu1 %285 }
  0x97   : > { %v4942_v13 = vpop.permute.xlu0 %4416 }
  0x9a   : > { %v4936_v10 = vpop.permute.xlu1 %4383 }
  0x9b   : > { %8331 = vst [vmem:[#allocation13_spill] sm:$0xff] %v4936_v10 }
  0x9e   : > { %v4940_v12 = vpop.permute.xlu1 %4393 }
  0x9f   : > { %8332 = vst [vmem:[#allocation14_spill] sm:$0xff] %v4940_v12 }
  0xa2   : > { %v4944_v14 = vpop.permute.xlu1 %1137 }
  0xa3   : > { %8333 = vst [vmem:[#allocation15_spill] sm:$0xff] %v4944_v14  ;;  %v4947_v15 = vmul.f32 0.0, %v4944_v14 }
  0xa5   : > { %8334 = vst [vmem:[#allocation16_spill] sm:$0xff] %v4947_v15  ;;  %1158 = vrot.lane.b32.xlu0 %v4947_v15, %s4658_s16 }
  0xa7   : > { %v4953_v17 = vpop.permute.xlu1 %1204 }
  0xa8   : > { %v4951_v16 = vpop.permute.xlu0 %1456  ;;  %8336 = vst [vmem:[#allocation18_spill] sm:$0xff] %v4953_v17  ;;  %v1207_v18 = vmul.f32 0.0, %v4953_v17 }
  0xa9   : > { %8335 = vst [vmem:[#allocation17_spill] sm:$0xff] %v4951_v16  ;;  %v2275_v47 = vmul.f32 0.0, %v4951_v16 }
  0xaa   : > { %1225 = vrot.lane.b32.xlu0 %v1207_v18, %s4658_s16 }
  0xad   : > { %v4960_v20 = vpop.permute.xlu0 %1517 }
  0xae   : > { %8337 = vst [vmem:[#allocation19_spill] sm:$0xff] %v4960_v20  ;;  %v4963_v21 = vmul.f32 0.0, %v4960_v20 }
  0xaf   : > { %v4965_v22 = vpop.permute.xlu1 %1279 }
  0xb0   : > { %8338 = vst [vmem:[#allocation20_spill] sm:$0xff] %v4963_v21  ;;  %8339 = vst [vmem:[#allocation21_spill] sm:$0xff] %v4965_v22  ;;  %v1529_v23 = vmul.f32 %v4958_v19, %v4963_v21  ;;  %v1282_v24 = vmul.f32 0.0, %v4965_v22 }
  0xb2   : > { %v4970_v25 = vpop.permute.xlu0 %1653  ;;  %1547 = vrot.lane.b32.xlu1 %v1529_v23, %s4668_s7  ;;  %v4974_v26 = vmul.f32 %v4958_v19, %v1282_v24 }
  0xb3   : > { %8340 = vst [vmem:[#allocation22_spill] sm:$0xff] %v4970_v25  ;;  %v5031_v59 = vpop.permute.xlu1 %4411 }
  0xb4   : > { %8341 = vst [vmem:[#allocation23_spill] sm:$0xff] %v4974_v26  ;;  %1341 = vrot.lane.b32.xlu0 %v4974_v26, %s4668_s7 }
  0xb7   : > { %v4978_v27 = vpop.permute.xlu0 %270 }
  0xbb   : > { %v4980_v28 = vpop.permute.xlu0 %275 }
  0xbf   : > { %v4982_v29 = vpop.permute.xlu0 %1056 }
  0xc0   : > { %8342 = vst [vmem:[#allocation24_spill] sm:$0xff] %v4982_v29  ;;  %v4985_v30 = vmul.f32 0.0, %v4982_v29 }
  0xc2   : > { %8343 = vst [vmem:[#allocation25_spill] sm:$0xff] %v4985_v30  ;;  %v4989_v32 = vmul.f32 %v4958_v19, %v4985_v30 }
  0xc3   : > { %v4991_v33 = vpop.permute.xlu0 %1892 }
  0xc4   : > { %8344 = vst [vmem:[#allocation26_spill] sm:$0xff] %v4989_v32  ;;  %8345 = vst [vmem:[#allocation27_spill] sm:$0xff] %v4991_v33 }
  0xc7   : > { %v4993_v34 = vpop.permute.xlu0 %4433 }
  0xc8   : > { %v8048_v35 = vunpack.i.l.bf16 %v4993_v34 }
  0xca   : > { %v2074_v36 = vmul.f32 %v8048_v35, %v1207_v18 }
  0xcb   : > { %v4998_v39 = vpop.permute.xlu0 %4443 }
  0xcc   : > { %v8047_v40 = vunpack.i.h.bf16 %v4998_v39  ;;  %v8049_v41 = vunpack.i.l.bf16 %v4998_v39  ;;  %2092 = vrot.lane.b32.xlu0 %v2074_v36, %s4658_s16 }
  0xce   : > { %v5008_v42 = vsel %vm2057_vm1, %v8049_v41, %v8047_v40 }
  0xcf   : > { %8346 = vst [vmem:[#allocation28_spill] sm:$0xff] %v5008_v42  ;;  %v5010_v43 = vpop.permute.xlu0 %4458 }
  0xd3   : > { %v5012_v45 = vpop.permute.xlu0 %4468 }
  0xd4   : > { %v5015_v46 = vunpack.i.h.bf16 %v5012_v45 }
  0xd6   : > { %v5019_v48 = vmul.f32 %v5015_v46, %v2275_v47  ;;  %v5022_v49 = vmul.f32 %v5015_v46, %v1207_v18  ;;  %v5048_v47 = vpop.permute.xlu1 %4421 }
  0xd7   : > { %8349 = vst [vmem:[#allocation31_spill] sm:$0xff] %v5048_v47 }
  0xd8   : > { %8347 = vst [vmem:[#allocation29_spill] sm:$0xff] %v5019_v48  ;;  %8348 = vst [vmem:[#allocation30_spill] sm:$0xff] %v5022_v49  ;;  %2343 = vrot.lane.b32.xlu1 %v5019_v48, %s4657_s11 }
  0xda   : > { %v5061_v26 = vpop.permute.xlu1 %1395 }
  0xdb   : > { %8350 = vst [vmem:[#allocation32_spill] sm:$0xff] %v5061_v26 }
  0xde   : > { %v5072_v60 = vpop.permute.xlu1 %1592 }
  0xdf   : > { %8351 = vst [vmem:[#allocation33_spill] sm:$0xff] %v5072_v60 }
  0xe2   : > { %v5088_v1 = vpop.permute.xlu1 %1906 }
  0xe3   : > { %8356 = vst [vmem:[#allocation38_spill] sm:$0xff] %v5088_v1 }
  0xe6   : > { %v5102_v1 = vpop.permute.xlu1 %4438 }
  0xe8   : > { %v367_v50 = vpop.f32.mrb[0].mxu0  ;;  %v456_v51 = vpop.f32.mrb[0].mxu1 }
  0xe9   : > { %v369_v52 = vpop.f32.mrb[1].mxu0  ;;  %v458_v53 = vpop.f32.mrb[1].mxu1  ;;  %v368_v54 = vadd.f32 %v367_v50, %v4978_v27  ;;  %v457_v0 = vadd.f32 %v456_v51, %v4978_v27 }
  0xea   : > { %v370_v51 = vadd.f32 %v369_v52, %v4978_v27  ;;  %v459_v3 = vadd.f32 %v458_v53, %v4978_v27 }
  0xeb   : > { %v689_v63 = vmul.f32 0.70710677, %v368_v54  ;;  %v691_v24 = vmul.f32 0.70710677, %v457_v0  ;;  %v657_v53 = vmul.f32 0.5, %v368_v54  ;;  %v659_v10 = vmul.f32 0.5, %v457_v0 }
  0xec   : > { %v373_v55 = vpop.f32.mrb[2].mxu0  ;;  %v690_v32 = vmul.f32 0.70710677, %v370_v51  ;;  %v692_v33 = vmul.f32 0.70710677, %v459_v3 }
  0xed   : > { %v462_v56 = vpop.f32.mrb[2].mxu1  ;;  %v5027_v57 = vpop.f32.mrb[3].mxu0  ;;  %4512 = verf.f32 %v689_v63 }
  0xee   : > { %v5029_v58 = vpop.f32.mrb[3].mxu1  ;;  %4514 = verf.f32 %v691_v24  ;;  %v376_v0 = vadd.f32 %v5027_v57, %v4980_v28  ;;  %v660_v57 = vmul.f32 0.5, %v459_v3 }
  0xef   : > { %4516 = verf.f32 %v690_v32 }
  0xf0   : > { %v5033_v61 = vpop.f32.mrb[4].mxu0  ;;  %4518 = verf.f32 %v692_v33 }
  0xf1   : > { %v5035_v62 = vpop.f32.mrb[4].mxu1  ;;  %v5038_v5 = vpop.f32.mrb[5].mxu0 }
  0xf2   : > { %v5040_v6 = vpop.f32.mrb[5].mxu1 }
  0xf4   : > { %v5042_v18 = vpop.f32.mrb[6].mxu0 }
  0xf5   : > { %v5044_v23 = vpop.f32.mrb[6].mxu1  ;;  %v5046_v36 = vpop.f32.mrb[7].mxu0 }
  0xf6   : > { %v5050_v50 = vpop.f32.mrb[7].mxu1 }
  0xf7   : > { %v4513_v24 = vpop.eup %4512 }
  0xf8   : > { %v5052_v40 = vpop.f32.mrb[8].mxu0  ;;  %v753_v12 = vadd.f32 1.0, %v4513_v24  ;;  %v4515_v44 = vpop.eup %4514  ;;  %v374_v24 = vadd.f32 %v373_v55, %v4980_v28 }
  0xf9   : > { %v5054_v35 = vpop.f32.mrb[8].mxu1  ;;  %v5057_v41 = vpop.f32.mrb[9].mxu0  ;;  %v755_v29 = vadd.f32 1.0, %v4515_v44 }
  0xfa   : > { %v5059_v48 = vpop.f32.mrb[9].mxu1  ;;  %v5090_v32 = vmul.f32 %v753_v12, %v657_v53  ;;  %v4517_v33 = vpop.eup %4516  ;;  %v697_v44 = vmul.f32 0.70710677, %v374_v24 }
  0xfb   : > { %v5095_v42 = vmul.f32 %v755_v29, %v659_v10  ;;  %v754_v12 = vadd.f32 1.0, %v4517_v33  ;;  %v4519_v29 = vpop.eup %4518  ;;  %v698_v33 = vmul.f32 0.70710677, %v376_v0 }
  0xfc   : > { %v5063_v63 = vpop.f32.mrb[10].mxu0  ;;  %8357 = vst [vmem:[#allocation39_spill] sm:$0xff] %v5090_v32  ;;  %v2144_v54 = vmul.f32 %v4965_v22, %v5090_v32  ;;  %4520 = verf.f32 %v697_v44 }
  0xfd   : > { %v5065_v49 = vpop.f32.mrb[10].mxu1  ;;  %v5068_v2 = vpop.f32.mrb[11].mxu0  ;;  %8359 = vst [vmem:[#allocation41_spill] sm:$0xff] %v5095_v42  ;;  %v2146_v10 = vmul.f32 %v4965_v22, %v5095_v42  ;;  %v1400_v53 = vmul.f32 %v5061_v26, %v5095_v42 }
  0xfe   : > { %v5070_v4 = vpop.f32.mrb[11].mxu1  ;;  %2160 = vrot.lane.b32.xlu1 %v2144_v54, %s4668_s7  ;;  %v5113_v54 = vpop.permute.xlu1 %4448 }
  0xff   : > { %8360 = vst [vmem:[#allocation42_spill] sm:$0xff] %v5113_v54 }
 0x100   : > { %v5074_v52 = vpop.f32.mrb[12].mxu0 }
 0x101   : > { %v5076_v21 = vpop.f32.mrb[12].mxu1  ;;  %v5078_v15 = vpop.f32.mrb[13].mxu0 }
 0x102   : > { %v5080_v8 = vpop.f32.mrb[13].mxu1  ;;  %2164 = vrot.lane.b32.xlu1 %v2146_v10, %s4668_s7  ;;  %v4454_v47 = vpop.permute.xlu1 %4453 }
 0x103   : > { %8352 = vst [vmem:[#allocation34_spill] sm:$0xff] %v5080_v8 }
 0x104   : > { %v5082_v38 = vpop.f32.mrb[14].mxu0 }
 0x105   : > { %8353 = vst [vmem:[#allocation35_spill] sm:$0xff] %v5082_v38  ;;  %v5084_v31 = vpop.f32.mrb[14].mxu1  ;;  %v5086_v37 = vpop.f32.mrb[15].mxu0  ;;  %v465_v38 = vadd.f32 %v5029_v58, %v4980_v28  ;;  %v2267_v58 = vmul.f32 %v4951_v16, %v5090_v32 }
 0x106   : > { %8354 = vst [vmem:[#allocation36_spill] sm:$0xff] %v5084_v31  ;;  %8355 = vst [vmem:[#allocation37_spill] sm:$0xff] %v5086_v37  ;;  %v5092_v30 = vpop.f32.mrb[15].mxu1  ;;  %v463_v31 = vadd.f32 %v462_v56, %v4980_v28  ;;  %v1398_v37 = vmul.f32 %v5061_v26, %v5090_v32  ;;  %v658_v56 = vmul.f32 0.5, %v370_v51  ;;  %v665_v32 = vmul.f32 0.5, %v374_v24 }
 0x107   : > { %8358 = vst [vmem:[#allocation40_spill] sm:$0xff] %v5092_v30  ;;  %v700_v10 = vmul.f32 0.70710677, %v465_v38 }
 0x108   : > { %1414 = vrot.lane.b32.xlu0 %v1398_v37, %s4657_s11  ;;  %v699_v55 = vmul.f32 0.70710677, %v463_v31  ;;  %v5115_v30 = vmul.f32 %v754_v12, %v658_v56  ;;  %v756_v37 = vadd.f32 1.0, %v4519_v29  ;;  %v5127_v29 = vunpack.i.l.bf16 %v4454_v47 }
 0x109   : > { %v4456_v56 = vunpack.i.h.bf16 %v4454_v47 }
 0x10a   : > { %8361 = vst [vmem:[#allocation43_spill] sm:$0xff] %v5115_v30  ;;  %4522 = verf.f32 %v699_v55  ;;  %v5120_v51 = vmul.f32 %v756_v37, %v660_v57  ;;  %v1399_v44 = vmul.f32 %v5061_v26, %v5115_v30  ;;  %v2145_v12 = vmul.f32 %v4965_v22, %v5115_v30  ;;  %8363 = vst [vmem:[#allocation45_spill] sm:$0xff] %v5127_v29  ;;  %v4521_v55 = vpop.eup %4520 }
 0x10b   : > { %4524 = verf.f32 %v698_v33  ;;  %v2268_v37 = vmul.f32 %v4951_v16, %v5115_v30  ;;  %v4460_v57 = vunpack.i.l.bf16 %v5010_v43  ;;  %v2309_v47 = vmul.f32 %v5127_v29, %v2267_v58 }
 0x10c   : > { %1418 = vrot.lane.b32.xlu0 %v1400_v53, %s4657_s11  ;;  %8362 = vst [vmem:[#allocation44_spill] sm:$0xff] %v5120_v51  ;;  %1416 = vrot.lane.b32.xlu1 %v1399_v44, %s4657_s11  ;;  %v1401_v3 = vmul.f32 %v5061_v26, %v5120_v51  ;;  %4526 = verf.f32 %v700_v10  ;;  %v2147_v53 = vmul.f32 %v4965_v22, %v5120_v51 }
 0x10d   : > { %v5142_v44 = vsel %vm2292_vm2, %v5127_v29, %v4456_v56  ;;  %v2269_v10 = vmul.f32 %v4951_v16, %v5095_v42  ;;  %v380_v30 = vadd.f32 %v5033_v61, %v4930_v7  ;;  %v5156_v58 = vsel %vm2292_vm2, %v4456_v56, %v4460_v57 }
 0x10e   : > { %8364 = vst [vmem:[#allocation46_spill] sm:$0xff] %v5142_v44  ;;  %v2310_v8 = vmul.f32 %v5142_v44, %v2268_v37  ;;  %8365 = vst [vmem:[#allocation47_spill] sm:$0xff] %v5156_v58  ;;  %v667_v42 = vmul.f32 0.5, %v463_v31 }
 0x10f   : > { %v2311_v61 = vmul.f32 %v5156_v58, %v2269_v10  ;;  %v705_v24 = vmul.f32 0.70710677, %v380_v30 }
 0x110   : > { %2162 = vrot.lane.b32.xlu0 %v2145_v12, %s4668_s7  ;;  %1420 = vrot.lane.b32.xlu1 %v1401_v3, %s4657_s11  ;;  %v761_v12 = vadd.f32 1.0, %v4521_v55  ;;  %v8083_v3 = vunpack.i.h.bf16 %v5010_v43  ;;  %v2270_v55 = vmul.f32 %v4951_v16, %v5120_v51 }
 0x111   : > { %4528 = verf.f32 %v705_v24 }
 0x112   : > { %v5158_v29 = vmul.f32 %v761_v12, %v665_v32  ;;  %v5167_v37 = vsel %vm2292_vm2, %v4460_v57, %v8083_v3  ;;  %v382_v57 = vadd.f32 %v5038_v5, %v4930_v7 }
 0x113   : > { %8367 = vst [vmem:[#allocation49_spill] sm:$0xff] %v5167_v37  ;;  %v2312_v31 = vmul.f32 %v5167_v37, %v2270_v55  ;;  %v668_v55 = vmul.f32 0.5, %v465_v38 }
 0x114   : > { %v4523_v33 = vpop.eup %4522  ;;  %2166 = vrot.lane.b32.xlu0 %v2147_v53, %s4668_s7  ;;  %2327 = vrot.lane.b32.xlu1 %v2309_v47, %s4657_s11  ;;  %8366 = vst [vmem:[#allocation48_spill] sm:$0xff] %v5158_v29  ;;  %v1459_v12 = vmul.f32 %v4951_v16, %v5158_v29 }
 0x115   : > { %v763_v54 = vadd.f32 1.0, %v4523_v33  ;;  %v4525_v53 = vpop.eup %4524  ;;  %v469_v33 = vadd.f32 %v5035_v62, %v4930_v7 }
 0x116   : > { %v762_v56 = vadd.f32 1.0, %v4525_v53  ;;  %v4527_v32 = vpop.eup %4526  ;;  %v706_v53 = vmul.f32 0.70710677, %v382_v57 }
 0x117   : > { %v5169_v47 = vmul.f32 %v763_v54, %v667_v42  ;;  %v707_v62 = vmul.f32 0.70710677, %v469_v33  ;;  %v764_v42 = vadd.f32 1.0, %v4527_v32 }
 0x118   : > { %2329 = vrot.lane.b32.xlu0 %v2310_v8, %s4657_s11  ;;  %2331 = vrot.lane.b32.xlu1 %v2311_v61, %s4657_s11  ;;  %v666_v8 = vmul.f32 0.5, %v376_v0  ;;  %v2209_v0 = vmul.f32 %v5061_v26, %v5158_v29  ;;  %v471_v61 = vadd.f32 %v5040_v6, %v4930_v7 }
 0x119   : > { %8368 = vst [vmem:[#allocation50_spill] sm:$0xff] %v5169_v47  ;;  %v1461_v54 = vmul.f32 %v4951_v16, %v5169_v47  ;;  %4530 = verf.f32 %v707_v62  ;;  %v5188_v5 = vmul.f32 %v764_v42, %v668_v55  ;;  %v2211_v38 = vmul.f32 %v5061_v26, %v5169_v47 }
 0x11a   : > { %v5178_v10 = vmul.f32 %v762_v56, %v666_v8  ;;  %v4409_v56 = vunpack.i.h.bf16 %v4938_v11  ;;  %4532 = verf.f32 %v706_v53  ;;  %v708_v32 = vmul.f32 0.70710677, %v471_v61 }
 0x11b   : > { %8370 = vst [vmem:[#allocation52_spill] sm:$0xff] %v5188_v5  ;;  %v2212_v6 = vmul.f32 %v5061_v26, %v5188_v5  ;;  %v8086_v11 = vunpack.i.l.bf16 %v4942_v13  ;;  %v4414_v42 = vunpack.i.h.bf16 %v5031_v59  ;;  %v1286_v53 = vmul.f32 %v4965_v22, %v5188_v5 }
 0x11c   : > { %2333 = vrot.lane.b32.xlu0 %v2312_v31, %s4657_s11  ;;  %8369 = vst [vmem:[#allocation51_spill] sm:$0xff] %v5178_v10  ;;  %1475 = vrot.lane.b32.xlu1 %v1459_v12, %s4657_s11  ;;  %v2210_v24 = vmul.f32 %v5061_v26, %v5178_v10  ;;  %v4413_v31 = vunpack.i.l.bf16 %v5031_v59  ;;  %v1284_v8 = vmul.f32 %v4965_v22, %v5178_v10  ;;  %v4529_v12 = vpop.eup %4528  ;;  %4534 = verf.f32 %v708_v32 }
 0x11d   : > { %v1460_v62 = vmul.f32 %v4951_v16, %v5178_v10  ;;  %v769_v55 = vadd.f32 1.0, %v4529_v12  ;;  %v1283_v59 = vmul.f32 %v4965_v22, %v5158_v29  ;;  %v475_v32 = vadd.f32 %v5044_v23, %v4934_v9 }
 0x11e   : > { %v5233_v3 = vsel %vm1176_vm3, %v4958_v19, %v4409_v56  ;;  %v8381_v10 = vunpack.i.l.bf16 %v4993_v34 }
 0x11f   : > { %8374 = vst [vmem:[#allocation56_spill] sm:$0xff] %v5233_v3  ;;  %v1324_v23 = vmul.f32 %v5233_v3, %v1283_v59  ;;  %v674_v59 = vmul.f32 0.5, %v382_v57 }
 0x120   : > { %1479 = vrot.lane.b32.xlu0 %v1461_v54, %s4657_s11  ;;  %2225 = vrot.lane.b32.xlu1 %v2209_v0, %s4668_s7  ;;  %v5209_v54 = vsel %vm1176_vm3, %v4409_v56, %v4413_v31  ;;  %v5248_v56 = vadd.f32 %v5042_v18, %v4934_v9 }
 0x121   : > { %8371 = vst [vmem:[#allocation53_spill] sm:$0xff] %v5209_v54  ;;  %v1325_v0 = vmul.f32 %v5209_v54, %v1284_v8  ;;  %v5225_v8 = vsel %vm1176_vm3, %v4414_v42, %v8086_v11  ;;  %v1285_v11 = vmul.f32 %v4965_v22, %v5169_v47 }
 0x122   : > { %8372 = vst [vmem:[#allocation54_spill] sm:$0xff] %v5225_v8  ;;  %v713_v57 = vmul.f32 0.70710677, %v5248_v56 }
 0x124   : > { %2227 = vrot.lane.b32.xlu0 %v2210_v24, %s4668_s7  ;;  %2229 = vrot.lane.b32.xlu1 %v2211_v38, %s4668_s7  ;;  %v4531_v24 = vpop.eup %4530  ;;  %v673_v38 = vmul.f32 0.5, %v380_v30  ;;  %v1327_v30 = vmul.f32 %v5225_v8, %v1286_v53 }
 0x126   : > { %v5227_v12 = vmul.f32 %v769_v55, %v673_v38  ;;  %v715_v55 = vmul.f32 0.70710677, %v475_v32 }
 0x128   : > { %2231 = vrot.lane.b32.xlu0 %v2212_v6, %s4668_s7  ;;  %1477 = vrot.lane.b32.xlu1 %v1460_v62, %s4657_s11  ;;  %v1462_v6 = vmul.f32 %v4951_v16, %v5188_v5  ;;  %8373 = vst [vmem:[#allocation55_spill] sm:$0xff] %v5227_v12  ;;  %v771_v62 = vadd.f32 1.0, %v4531_v24  ;;  %v675_v5 = vmul.f32 0.5, %v469_v33  ;;  %v388_v24 = vadd.f32 %v5046_v36, %v4934_v9 }
 0x129   : > { %v1595_v19 = vmul.f32 %v5072_v60, %v5227_v12  ;;  %4536 = verf.f32 %v715_v55  ;;  %v4436_v55 = vunpack.i.h.bf16 %v4993_v34 }
 0x12a   : > { %v5241_v38 = vmul.f32 %v771_v62, %v675_v5  ;;  %v714_v5 = vmul.f32 0.70710677, %v388_v24  ;;  %v5257_v62 = vadd.f32 %v5050_v50, %v4934_v9  ;;  %v682_v37 = vmul.f32 0.5, %v388_v24 }
 0x12b   : > { %v2058_v29 = vsel %vm2057_vm1, %v8381_v10, %v4436_v55 }
 0x12c   : > { %1345 = vrot.lane.b32.xlu0 %v1325_v0, %s4668_s7  ;;  %1481 = vrot.lane.b32.xlu1 %v1462_v6, %s4657_s11  ;;  %v4533_v0 = vpop.eup %4532  ;;  %8375 = vst [vmem:[#allocation57_spill] sm:$0xff] %v5241_v38  ;;  %v5251_v6 = vsel %vm1176_vm3, %v4413_v31, %v4414_v42  ;;  %v1597_v18 = vmul.f32 %v5072_v60, %v5241_v38  ;;  %v676_v31 = vmul.f32 0.5, %v471_v61  ;;  %4538 = verf.f32 %v714_v5 }
 0x12d   : > { %v770_v53 = vadd.f32 1.0, %v4533_v0  ;;  %v4535_v33 = vpop.eup %4534  ;;  %8376 = vst [vmem:[#allocation58_spill] sm:$0xff] %v5251_v6  ;;  %v1326_v36 = vmul.f32 %v5251_v6, %v1285_v11  ;;  %v1141_v11 = vmul.f32 %v4944_v14, %v5227_v12  ;;  %v716_v50 = vmul.f32 0.70710677, %v5257_v62 }
 0x12e   : > { %v772_v0 = vadd.f32 1.0, %v4535_v33  ;;  %4540 = verf.f32 %v713_v57  ;;  %v1143_v61 = vmul.f32 %v4944_v14, %v5241_v38  ;;  %v4441_v5 = vunpack.i.h.bf16 %v5102_v1 }
 0x12f   : > { %4542 = verf.f32 %v716_v50  ;;  %v2027_v44 = vmul.f32 %v4953_v17, %v5241_v38 }
 0x130   : > { %1349 = vrot.lane.b32.xlu0 %v1327_v30, %s4668_s7  ;;  %1343 = vrot.lane.b32.xlu1 %v1324_v23, %s4668_s7  ;;  %v5259_v30 = vmul.f32 %v770_v53, %v674_v59  ;;  %v5269_v42 = vmul.f32 %v772_v0, %v676_v31  ;;  %v4440_v53 = vunpack.i.l.bf16 %v5102_v1  ;;  %v546_v0 = vadd.f32 %v5052_v40, %v4978_v27 }
 0x131   : > { %v2025_v1 = vmul.f32 %v4953_v17, %v5227_v12 }
 0x132   : > { %8377 = vst [vmem:[#allocation59_spill] sm:$0xff] %v5259_v30  ;;  %8378 = vst [vmem:[#allocation60_spill] sm:$0xff] %v5269_v42  ;;  %v1142_v23 = vmul.f32 %v4944_v14, %v5259_v30  ;;  %v2026_v33 = vmul.f32 %v4953_v17, %v5259_v30 }
 0x133   : > { %v4537_v59 = vpop.eup %4536 }
 0x134   : > { %1611 = vrot.lane.b32.xlu0 %v1595_v19, %s4657_s11  ;;  %1347 = vrot.lane.b32.xlu1 %v1326_v36, %s4668_s7  ;;  %v1144_v19 = vmul.f32 %v4944_v14, %v5269_v42  ;;  %v1596_v36 = vmul.f32 %v5072_v60, %v5259_v30  ;;  %v779_v57 = vadd.f32 1.0, %v4537_v59  ;;  %v635_v59 = vadd.f32 %v5054_v35, %v4978_v27 }
 0x135   : > { %v2075_v35 = vmul.f32 %v2058_v29, %v2025_v1 }
 0x136   : > { %v4539_v50 = vpop.eup %4538 }
 0x138   : > { %1615 = vrot.lane.b32.xlu0 %v1597_v18, %s4657_s11  ;;  %1160 = vrot.lane.b32.xlu1 %v1141_v11, %s4658_s16  ;;  %v2059_v18 = vsel %vm2057_vm1, %v4436_v55, %v4440_v53  ;;  %v2028_v11 = vmul.f32 %v4953_v17, %v5269_v42  ;;  %v4541_v40 = vpop.eup %4540  ;;  %v684_v55 = vmul.f32 0.5, %v5257_v62 }
 0x139   : > { %v2076_v31 = vmul.f32 %v2059_v18, %v2026_v33  ;;  %v8379_v33 = vunpack.i.l.bf16 %v4998_v39  ;;  %v4543_v47 = vpop.eup %4542  ;;  %v777_v51 = vadd.f32 1.0, %v4541_v40 }
 0x13a   : > { %v780_v10 = vadd.f32 1.0, %v4543_v47 }
 0x13c   : > { %1162 = vrot.lane.b32.xlu0 %v1142_v23, %s4658_s16  ;;  %1164 = vrot.lane.b32.xlu1 %v1143_v61, %s4658_s16  ;;  %v683_v23 = vmul.f32 0.5, %v475_v32  ;;  %v1598_v61 = vmul.f32 %v5072_v60, %v5269_v42  ;;  %v778_v32 = vadd.f32 1.0, %v4539_v50  ;;  %v548_v50 = vadd.f32 %v5057_v41, %v4978_v27 }
 0x13e   : > { %v5304_v18 = vmul.f32 %v779_v57, %v683_v23  ;;  %v695_v57 = vmul.f32 0.70710677, %v635_v59  ;;  %v681_v23 = vmul.f32 0.5, %v5248_v56  ;;  %v5317_v34 = vmul.f32 %v778_v32, %v682_v37 }
 0x13f   : > { %v694_v41 = vmul.f32 0.70710677, %v548_v50  ;;  %v637_v56 = vadd.f32 %v5059_v48, %v4978_v27  ;;  %v5328_v37 = vmul.f32 %v780_v10, %v684_v55  ;;  %v552_v32 = vadd.f32 %v5063_v63, %v4980_v28 }
 0x140   : > { %1166 = vrot.lane.b32.xlu0 %v1144_v19, %s4658_s16  ;;  %1613 = vrot.lane.b32.xlu1 %v1596_v36, %s4657_s11  ;;  %v693_v19 = vmul.f32 0.70710677, %v546_v0  ;;  %v2061_v36 = vsel %vm2057_vm1, %v4441_v5, %v8379_v33  ;;  %8380 = vst [vmem:[#allocation61_spill] sm:$0xff] %v5304_v18  ;;  %8382 = vst [vmem:[#allocation62_spill] sm:$0xff] %v5317_v34  ;;  %v1658_v29 = vmul.f32 %v4970_v25, %v5304_v18 }
 0x141   : > { %v5322_v24 = vmul.f32 %v777_v51, %v681_v23  ;;  %8384 = vst [vmem:[#allocation64_spill] sm:$0xff] %v5328_v37  ;;  %v1209_v47 = vmul.f32 %v4953_v17, %v5317_v34  ;;  %v696_v62 = vmul.f32 0.70710677, %v637_v56  ;;  %v1522_v27 = vmul.f32 %v4960_v20, %v5317_v34 }
 0x142   : > { %4544 = verf.f32 %v693_v19  ;;  %v1524_v40 = vmul.f32 %v4960_v20, %v5328_v37  ;;  %v661_v33 = vmul.f32 0.5, %v546_v0  ;;  %v663_v23 = vmul.f32 0.5, %v635_v59 }
 0x143   : > { %8383 = vst [vmem:[#allocation63_spill] sm:$0xff] %v5322_v24  ;;  %4546 = verf.f32 %v695_v57  ;;  %v1208_v51 = vmul.f32 %v4953_v17, %v5322_v24  ;;  %v1531_v1 = vmul.f32 %v1522_v27, %v5209_v54  ;;  %v1657_v0 = vmul.f32 %v4970_v25, %v5317_v34 }
 0x144   : > { %2096 = vrot.lane.b32.xlu0 %v2076_v31, %s4658_s16  ;;  %1617 = vrot.lane.b32.xlu1 %v1598_v61, %s4657_s11  ;;  %v2078_v31 = vmul.f32 %v2061_v36, %v2028_v11  ;;  %v2060_v11 = vsel %vm2057_vm1, %v4440_v53, %v4441_v5  ;;  %4548 = verf.f32 %v694_v41  ;;  %v1210_v53 = vmul.f32 %v4953_v17, %v5304_v18 }
 0x145   : > { %v2077_v61 = vmul.f32 %v2060_v11, %v2027_v44  ;;  %v1211_v44 = vmul.f32 %v4953_v17, %v5328_v37  ;;  %4550 = verf.f32 %v696_v62  ;;  %v1656_v36 = vmul.f32 %v4970_v25, %v5322_v24 }
 0x146   : > { %v1533_v57 = vmul.f32 %v1524_v40, %v5225_v8  ;;  %v701_v10 = vmul.f32 0.70710677, %v552_v32  ;;  %v662_v59 = vmul.f32 0.5, %v548_v50  ;;  %v5377_v62 = vadd.f32 %v5068_v2, %v4980_v28 }
 0x147   : > { %v5393_v40 = vadd.f32 %v5070_v4, %v4980_v28 }
 0x148   : > { %2100 = vrot.lane.b32.xlu0 %v2078_v31, %s4658_s16  ;;  %2094 = vrot.lane.b32.xlu1 %v2075_v35, %s4658_s16  ;;  %4552 = verf.f32 %v701_v10  ;;  %v702_v2 = vmul.f32 0.70710677, %v5377_v62 }
 0x14c   : > { %1676 = vrot.lane.b32.xlu0 %v1658_v29, %s4657_s11  ;;  %2098 = vrot.lane.b32.xlu1 %v2077_v61, %s4658_s16  ;;  %v4545_v48 = vpop.eup %4544  ;;  %v5362_v29 = vadd.f32 %v5065_v49, %v4980_v28  ;;  %v704_v28 = vmul.f32 0.70710677, %v5393_v40 }
 0x14d   : > { %v757_v5 = vadd.f32 1.0, %v4545_v48  ;;  %v4547_v19 = vpop.eup %4546  ;;  %v5381_v48 = vpop.permute.xlu0 %1158 }
 0x14e   : > { %v759_v35 = vadd.f32 1.0, %v4547_v19  ;;  %v4549_v11 = vpop.eup %4548  ;;  %v703_v49 = vmul.f32 0.70710677, %v5362_v29  ;;  %v5395_v19 = vpop.permute.xlu1 %4463 }
 0x14f   : > { %v5353_v31 = vmul.f32 %v757_v5, %v661_v33  ;;  %v758_v55 = vadd.f32 1.0, %v4549_v11  ;;  %v4551_v41 = vpop.eup %4550  ;;  %v4465_v4 = vunpack.i.l.bf16 %v5395_v19 }
 0x150   : > { %1229 = vrot.lane.b32.xlu0 %v1209_v47, %s4658_s16  ;;  %1227 = vrot.lane.b32.xlu1 %v1208_v51, %s4658_s16  ;;  %v5364_v63 = vmul.f32 %v759_v35, %v663_v23  ;;  %v1659_v47 = vmul.f32 %v4970_v25, %v5328_v37  ;;  %v1521_v51 = vmul.f32 %v4960_v20, %v5322_v24  ;;  %v760_v27 = vadd.f32 1.0, %v4551_v41 }
 0x151   : > { %8385 = vst [vmem:[#allocation65_spill] sm:$0xff] %v5353_v31  ;;  %v1402_v61 = vmul.f32 %v5061_v26, %v5353_v31  ;;  %4554 = verf.f32 %v703_v49  ;;  %v4470_v41 = vunpack.i.l.bf16 %v5012_v45 }
 0x152   : > { %8386 = vst [vmem:[#allocation66_spill] sm:$0xff] %v5364_v63  ;;  %v1404_v50 = vmul.f32 %v5061_v26, %v5364_v63  ;;  %v1530_v5 = vmul.f32 %v1521_v51, %v5233_v3  ;;  %4556 = verf.f32 %v702_v2  ;;  %v2150_v45 = vmul.f32 %v4965_v22, %v5364_v63 }
 0x153   : > { %4558 = verf.f32 %v704_v28 }
 0x154   : > { %1233 = vrot.lane.b32.xlu0 %v1211_v44, %s4658_s16  ;;  %1231 = vrot.lane.b32.xlu1 %v1210_v53, %s4658_s16  ;;  %v5379_v44 = vmul.f32 %v758_v55, %v662_v59  ;;  %v664_v53 = vmul.f32 0.5, %v637_v56  ;;  %v5419_v55 = vpop.permute.xlu1 %1547 }
 0x156   : > { %8387 = vst [vmem:[#allocation67_spill] sm:$0xff] %v5379_v44  ;;  %v5397_v33 = vmul.f32 %v760_v27, %v664_v53  ;;  %v2149_v56 = vmul.f32 %v4965_v22, %v5379_v44  ;;  %v2272_v23 = vmul.f32 %v4951_v16, %v5379_v44 }
 0x158   : > { %1551 = vrot.lane.b32.xlu0 %v1531_v1, %s4668_s7  ;;  %1672 = vrot.lane.b32.xlu1 %v1656_v36, %s4657_s11  ;;  %v1523_v1 = vmul.f32 %v4960_v20, %v5304_v18  ;;  %8388 = vst [vmem:[#allocation68_spill] sm:$0xff] %v5397_v33  ;;  %v5402_v36 = vpop.permute.xlu0 %1225  ;;  %v2151_v11 = vmul.f32 %v4965_v22, %v5397_v33  ;;  %v5431_v53 = vpop.permute.xlu1 %2343 }
 0x159   : > { %v2274_v49 = vmul.f32 %v4951_v16, %v5397_v33  ;;  %8390 = vst [vmem:[#allocation70_spill] sm:$0xff] %v5431_v53 }
 0x15a   : > { %v1532_v35 = vmul.f32 %v1523_v1, %v5251_v6  ;;  %v5442_v1 = vsel %vm2292_vm2, %v4470_v41, %v5015_v46 }
 0x15b   : > { %8391 = vst [vmem:[#allocation71_spill] sm:$0xff] %v5442_v1 }
 0x15c   : > { %1555 = vrot.lane.b32.xlu0 %v1533_v57, %s4668_s7  ;;  %1674 = vrot.lane.b32.xlu1 %v1657_v0, %s4657_s11  ;;  %v8099_v57 = vunpack.i.h.bf16 %v5395_v19  ;;  %v4553_v0 = vpop.eup %4552 }
 0x15d   : > { %v765_v59 = vadd.f32 1.0, %v4553_v0  ;;  %v4555_v27 = vpop.eup %4554 }
 0x15e   : > { %v5417_v10 = vsel %vm2292_vm2, %v4465_v4, %v8099_v57  ;;  %v4557_v28 = vpop.eup %4556  ;;  %v672_v57 = vmul.f32 0.5, %v5393_v40 }
 0x15f   : > { %8389 = vst [vmem:[#allocation69_spill] sm:$0xff] %v5417_v10  ;;  %v2314_v51 = vmul.f32 %v5417_v10, %v2272_v23 }
 0x160   : > { %1422 = vrot.lane.b32.xlu0 %v1402_v61, %s4657_s11  ;;  %1678 = vrot.lane.b32.xlu1 %v1659_v47, %s4657_s11  ;;  %v2148_v61 = vmul.f32 %v4965_v22, %v5353_v31  ;;  %v5425_v47 = vpop.permute.xlu0 %1341 }
 0x164   : > { %1426 = vrot.lane.b32.xlu0 %v1404_v50, %s4657_s11  ;;  %1549 = vrot.lane.b32.xlu1 %v1530_v5, %s4668_s7  ;;  %v669_v50 = vmul.f32 0.5, %v552_v32  ;;  %v5438_v5 = vadd.f32 %v5074_v52, %v4930_v7  ;;  %v2316_v32 = vmul.f32 %v5442_v1, %v2274_v49  ;;  %v1403_v52 = vmul.f32 %v5061_v26, %v5379_v44 }
 0x166   : > { %v5444_v2 = vmul.f32 %v765_v59, %v669_v50  ;;  %v709_v0 = vmul.f32 0.70710677, %v5438_v5  ;;  %v670_v50 = vmul.f32 0.5, %v5377_v62  ;;  %v677_v53 = vmul.f32 0.5, %v5438_v5 }
 0x168   : > { %2170 = vrot.lane.b32.xlu0 %v2149_v56, %s4668_s7  ;;  %1553 = vrot.lane.b32.xlu1 %v1532_v35, %s4668_s7  ;;  %8392 = vst [vmem:[#allocation72_spill] sm:$0xff] %v5444_v2  ;;  %v767_v56 = vadd.f32 1.0, %v4555_v27  ;;  %v5446_v35 = vpop.permute.xlu0 %2092  ;;  %v4559_v27 = vpop.eup %4558  ;;  %4560 = verf.f32 %v709_v0 }
 0x169   : > { %8393 = vst [vmem:[#allocation73_spill] sm:$0xff] %v5446_v35 }
 0x16c   : > { %2174 = vrot.lane.b32.xlu0 %v2151_v11, %s4668_s7  ;;  %2168 = vrot.lane.b32.xlu1 %v2148_v61, %s4668_s7  ;;  %v671_v11 = vmul.f32 0.5, %v5362_v29  ;;  %v5459_v61 = vadd.f32 %v5076_v21, %v4930_v7  ;;  %v1463_v29 = vmul.f32 %v4951_v16, %v5444_v2  ;;  %v2271_v21 = vmul.f32 %v4951_v16, %v5353_v31 }
 0x16e   : > { %v5461_v59 = vmul.f32 %v767_v56, %v671_v11  ;;  %v711_v56 = vmul.f32 0.70710677, %v5459_v61  ;;  %v768_v11 = vadd.f32 1.0, %v4559_v27  ;;  %v2273_v27 = vmul.f32 %v4951_v16, %v5364_v63 }
 0x170   : > { %2337 = vrot.lane.b32.xlu0 %v2314_v51, %s4657_s11  ;;  %2172 = vrot.lane.b32.xlu1 %v2150_v45, %s4668_s7  ;;  %v5454_v23 = vpop.permute.xlu1 %2160  ;;  %8395 = vst [vmem:[#allocation75_spill] sm:$0xff] %v5461_v59  ;;  %v766_v51 = vadd.f32 1.0, %v4557_v28  ;;  %v1405_v45 = vmul.f32 %v5061_v26, %v5397_v33  ;;  %v1465_v62 = vmul.f32 %v4951_v16, %v5461_v59  ;;  %4562 = verf.f32 %v711_v56  ;;  %v8438_v33 = vld [vmem:[#allocation28_spill] sm:$0xff] }
 0x171   : > { %8394 = vst [vmem:[#allocation74_spill] sm:$0xff] %v5454_v23 }
 0x172   : > { %v5479_v28 = vmul.f32 %v766_v51, %v670_v50 }
 0x174   : > { %2341 = vrot.lane.b32.xlu0 %v2316_v32, %s4657_s11  ;;  %1424 = vrot.lane.b32.xlu1 %v1403_v52, %s4657_s11  ;;  %v5477_v32 = vadd.f32 %v5078_v15, %v4930_v7  ;;  %8396 = vst [vmem:[#allocation76_spill] sm:$0xff] %v5479_v28  ;;  %v5484_v52 = vpop.permute.xlu1 %2164  ;;  %v2214_v40 = vmul.f32 %v5061_v26, %v5479_v28 }
 0x175   : > { %8397 = vst [vmem:[#allocation77_spill] sm:$0xff] %v5484_v52 }
 0x176   : > { %v710_v50 = vmul.f32 0.70710677, %v5477_v32 }
 0x178   : > { %1483 = vrot.lane.b32.xlu0 %v1463_v29, %s4657_s11  ;;  %1428 = vrot.lane.b32.xlu1 %v1405_v45, %s4657_s11  ;;  %v8398_v29 = vunpack.i.h.bf16 %v5010_v43  ;;  %v8400_v45 = vld [vmem:[#allocation34_spill] sm:$0xff]  ;;  %4564 = verf.f32 %v710_v50  ;;  %v2213_v50 = vmul.f32 %v5061_v26, %v5444_v2 }
 0x179   : > { %v5501_v43 = vadd.f32 %v8400_v45, %v4930_v7  ;;  %v4419_v7 = vunpack.i.h.bf16 %v4942_v13 }
 0x17a   : > { %v5466_v49 = vpop.permute.xlu0 %1414  ;;  %v5489_v0 = vsel %vm2292_vm2, %v8398_v29, %v4465_v4  ;;  %v5503_v4 = vmul.f32 %v768_v11, %v672_v57  ;;  %v8404_v57 = vld [vmem:[#allocation31_spill] sm:$0xff] }
 0x17b   : > { %8399 = vst [vmem:[#allocation78_spill] sm:$0xff] %v5489_v0  ;;  %v2313_v51 = vmul.f32 %v5489_v0, %v2271_v21  ;;  %v8108_v11 = vunpack.i.l.bf16 %v8404_v57  ;;  %v5544_v54 = vunpack.i.h.bf16 %v8404_v57 }
 0x17c   : > { %1487 = vrot.lane.b32.xlu0 %v1465_v62, %s4657_s11  ;;  %8401 = vst [vmem:[#allocation34_spill] sm:$0xff] %v5503_v4  ;;  %v8402_v62 = vunpack.i.h.bf16 %v5395_v19  ;;  %v2216_v19 = vmul.f32 %v5061_v26, %v5503_v4 }
 0x17d   : > { %2335 = vrot.lane.b32.xlu1 %v2313_v51, %s4657_s11  ;;  %v712_v51 = vmul.f32 0.70710677, %v5501_v43  ;;  %8408 = vst [vmem:[#allocation82_spill] sm:$0xff] %v5544_v54 }
 0x17e   : > { %v5493_v15 = vpop.permute.xlu0 %1418  ;;  %v5511_v21 = vsel %vm2292_vm2, %v8402_v62, %v4470_v41  ;;  %v5514_v56 = vpop.permute.xlu1 %1416  ;;  %v1288_v41 = vmul.f32 %v4965_v22, %v5479_v28  ;;  %v5535_v62 = vsel %vm1176_vm3, %v4419_v7, %v8108_v11 }
 0x17f   : > { %8403 = vst [vmem:[#allocation79_spill] sm:$0xff] %v5511_v21  ;;  %v2315_v29 = vmul.f32 %v5511_v21, %v2273_v27  ;;  %8406 = vst [vmem:[#allocation80_spill] sm:$0xff] %v5535_v62  ;;  %4566 = verf.f32 %v712_v51  ;;  %v2215_v51 = vmul.f32 %v5061_v26, %v5461_v59 }
 0x180   : > { %2235 = vrot.lane.b32.xlu0 %v2214_v40, %s4668_s7  ;;  %v4561_v40 = vpop.eup %4560  ;;  %v1329_v8 = vmul.f32 %v5535_v62, %v1288_v41 }
 0x181   : > { %2339 = vrot.lane.b32.xlu1 %v2315_v29, %s4657_s11  ;;  %v773_v29 = vadd.f32 1.0, %v4561_v40  ;;  %v4563_v6 = vpop.eup %4562  ;;  %v8410_v40 = vld [vmem:[#allocation35_spill] sm:$0xff] }
 0x182   : > { %v5520_v45 = vpop.permute.xlu0 %2162  ;;  %v5528_v27 = vpop.permute.xlu1 %1420 }
 0x183   : > { %8405 = vst [vmem:[#allocation31_spill] sm:$0xff] %v5520_v45  ;;  %v5556_v41 = vmul.f32 %v773_v29, %v677_v53  ;;  %v4565_v23 = vpop.eup %4564 }
 0x184   : > { %2239 = vrot.lane.b32.xlu0 %v2216_v19, %s4668_s7  ;;  %v1290_v19 = vmul.f32 %v4965_v22, %v5503_v4 }
 0x185   : > { %2233 = vrot.lane.b32.xlu1 %v2213_v50, %s4668_s7  ;;  %v5554_v50 = vadd.f32 %v8410_v40, %v4934_v9  ;;  %8411 = vst [vmem:[#allocation35_spill] sm:$0xff] %v5556_v41  ;;  %v1464_v40 = vmul.f32 %v4951_v16, %v5479_v28 }
 0x186   : > { %v5537_v3 = vpop.permute.xlu0 %2166  ;;  %v5548_v11 = vpop.permute.xlu1 %2327  ;;  %v1331_v5 = vmul.f32 %v5544_v54, %v1290_v19 }
 0x187   : > { %8407 = vst [vmem:[#allocation81_spill] sm:$0xff] %v5537_v3  ;;  %8409 = vst [vmem:[#allocation83_spill] sm:$0xff] %v5548_v11  ;;  %v775_v3 = vadd.f32 1.0, %v4563_v6  ;;  %v717_v53 = vmul.f32 0.70710677, %v5554_v50  ;;  %v8414_v6 = vld [vmem:[#allocation36_spill] sm:$0xff] }
 0x188   : > { %1353 = vrot.lane.b32.xlu0 %v1329_v8, %s4668_s7  ;;  %v679_v8 = vmul.f32 0.5, %v5459_v61  ;;  %v5571_v29 = vadd.f32 %v8414_v6, %v4934_v9  ;;  %v1599_v61 = vmul.f32 %v5072_v60, %v5556_v41  ;;  %v1466_v6 = vmul.f32 %v4951_v16, %v5503_v4 }
 0x189   : > { %2237 = vrot.lane.b32.xlu1 %v2215_v51, %s4668_s7  ;;  %v774_v51 = vadd.f32 1.0, %v4565_v23  ;;  %4568 = verf.f32 %v717_v53  ;;  %v8420_v16 = vunpack.i.l.bf16 %v4942_v13  ;;  %v680_v53 = vmul.f32 0.5, %v5501_v43 }
 0x18a   : > { %v5558_v52 = vpop.permute.xlu0 %2329  ;;  %v5564_v11 = vpop.permute.xlu1 %2331  ;;  %v719_v23 = vmul.f32 0.70710677, %v5571_v29  ;;  %v685_v26 = vmul.f32 0.5, %v5554_v50 }
 0x18b   : > { %8412 = vst [vmem:[#allocation84_spill] sm:$0xff] %v5558_v52  ;;  %8413 = vst [vmem:[#allocation85_spill] sm:$0xff] %v5564_v11  ;;  %v5573_v52 = vmul.f32 %v775_v3, %v679_v8  ;;  %v678_v11 = vmul.f32 0.5, %v5477_v32  ;;  %v1287_v3 = vmul.f32 %v4965_v22, %v5444_v2  ;;  %v8417_v8 = vld [vmem:[#allocation37_spill] sm:$0xff]  ;;  %v5601_v4 = vsel %vm1176_vm3, %v8420_v16, %v4419_v7 }
 0x18c   : > { %1357 = vrot.lane.b32.xlu0 %v1331_v5, %s4668_s7  ;;  %v4567_v5 = vpop.eup %4566  ;;  %8421 = vst [vmem:[#allocation88_spill] sm:$0xff] %v5601_v4  ;;  %4570 = verf.f32 %v719_v23  ;;  %v8426_v7 = vunpack.i.l.bf16 %v8404_v57 }
 0x18d   : > { %8415 = vst [vmem:[#allocation36_spill] sm:$0xff] %v5573_v52  ;;  %1485 = vrot.lane.b32.xlu1 %v1464_v40, %s4657_s11  ;;  %v566_v40 = vadd.f32 %v8417_v8, %v4934_v9  ;;  %v776_v35 = vadd.f32 1.0, %v4567_v5 }
 0x18e   : > { %v5575_v19 = vpop.permute.xlu0 %2333  ;;  %v5582_v45 = vpop.permute.xlu1 %1475 }
 0x18f   : > { %8416 = vst [vmem:[#allocation86_spill] sm:$0xff] %v5575_v19  ;;  %v5591_v19 = vmul.f32 %v774_v51, %v678_v11  ;;  %v1328_v11 = vmul.f32 %v5601_v4, %v1287_v3  ;;  %v1289_v51 = vmul.f32 %v4965_v22, %v5461_v59  ;;  %v718_v5 = vmul.f32 0.70710677, %v566_v40 }
 0x190   : > { %1619 = vrot.lane.b32.xlu0 %v1599_v61, %s4657_s11  ;;  %v1601_v61 = vmul.f32 %v5072_v60, %v5573_v52  ;;  %v5612_v13 = vmul.f32 %v776_v35, %v680_v53  ;;  %v5623_v3 = vsel %vm1176_vm3, %v8426_v7, %v5544_v54  ;;  %v8429_v35 = vld [vmem:[#allocation42_spill] sm:$0xff] }
 0x191   : > { %8418 = vst [vmem:[#allocation37_spill] sm:$0xff] %v5591_v19  ;;  %1489 = vrot.lane.b32.xlu1 %v1466_v6, %s4657_s11  ;;  %v8423_v6 = vld [vmem:[#allocation40_spill] sm:$0xff]  ;;  %v1146_v43 = vmul.f32 %v4944_v14, %v5591_v19  ;;  %8427 = vst [vmem:[#allocation91_spill] sm:$0xff] %v5623_v3  ;;  %4572 = verf.f32 %v718_v5  ;;  %v8431_v5 = vunpack.i.h.bf16 %v4998_v39 }
 0x192   : > { %v5593_v32 = vpop.permute.xlu0 %1479  ;;  %v5605_v8 = vpop.permute.xlu1 %2225  ;;  %v655_v28 = vadd.f32 %v8423_v6, %v4934_v9  ;;  %8424 = vst [vmem:[#allocation40_spill] sm:$0xff] %v5612_v13  ;;  %v1330_v9 = vmul.f32 %v5623_v3, %v1289_v51  ;;  %v1148_v57 = vmul.f32 %v4944_v14, %v5612_v13  ;;  %v2030_v6 = vmul.f32 %v4953_v17, %v5591_v19 }
 0x193   : > { %8419 = vst [vmem:[#allocation87_spill] sm:$0xff] %v5593_v32  ;;  %8422 = vst [vmem:[#allocation89_spill] sm:$0xff] %v5605_v8  ;;  %v4569_v7 = vpop.eup %4568  ;;  %v1145_v51 = vmul.f32 %v4944_v14, %v5556_v41  ;;  %v2032_v8 = vmul.f32 %v4953_v17, %v5612_v13  ;;  %v2031_v32 = vmul.f32 %v4953_v17, %v5573_v52 }
 0x194   : > { %1623 = vrot.lane.b32.xlu0 %v1601_v61, %s4657_s11  ;;  %v4450_v61 = vunpack.i.l.bf16 %v8429_v35  ;;  %v720_v53 = vmul.f32 0.70710677, %v655_v28 }
 0x195   : > { %1351 = vrot.lane.b32.xlu1 %v1328_v11, %s4668_s7 }
 0x196   : > { %v5614_v16 = vpop.permute.xlu0 %2227  ;;  %v5626_v23 = vpop.permute.xlu1 %2229  ;;  %v2063_v22 = vsel %vm2057_vm1, %v8431_v5, %v4450_v61  ;;  %4574 = verf.f32 %v720_v53  ;;  %v1147_v53 = vmul.f32 %v4944_v14, %v5573_v52 }
 0x197   : > { %8425 = vst [vmem:[#allocation90_spill] sm:$0xff] %v5614_v16  ;;  %8428 = vst [vmem:[#allocation92_spill] sm:$0xff] %v5626_v23  ;;  %v2080_v23 = vmul.f32 %v2063_v22, %v2030_v6  ;;  %v4451_v16 = vunpack.i.h.bf16 %v8429_v35  ;;  %v687_v35 = vmul.f32 0.5, %v5571_v29 }
 0x198   : > { %1170 = vrot.lane.b32.xlu0 %v1146_v43, %s4658_s16 }
 0x199   : > { %1355 = vrot.lane.b32.xlu1 %v1330_v9, %s4668_s7  ;;  %v781_v9 = vadd.f32 1.0, %v4569_v7  ;;  %v2082_v22 = vmul.f32 %v4451_v16, %v2032_v8 }
 0x19a   : > { %v5630_v11 = vpop.permute.xlu0 %2231  ;;  %v5638_v43 = vpop.permute.xlu1 %1477 }
 0x19b   : > { %8430 = vst [vmem:[#allocation42_spill] sm:$0xff] %v5630_v11  ;;  %v5657_v7 = vmul.f32 %v781_v9, %v685_v26 }
 0x19c   : > { %1174 = vrot.lane.b32.xlu0 %v1148_v57, %s4658_s16  ;;  %v4571_v57 = vpop.eup %4570 }
 0x19d   : > { %1168 = vrot.lane.b32.xlu1 %v1145_v51, %s4658_s16  ;;  %8433 = vst [vmem:[#allocation94_spill] sm:$0xff] %v5657_v7  ;;  %v783_v5 = vadd.f32 1.0, %v4571_v57  ;;  %v4573_v6 = vpop.eup %4572  ;;  %v1660_v8 = vmul.f32 %v4970_v25, %v5657_v7 }
 0x19e   : > { %v5645_v11 = vpop.permute.xlu0 %1345  ;;  %v5653_v39 = vpop.permute.xlu1 %1481  ;;  %v782_v26 = vadd.f32 1.0, %v4573_v6 }
 0x19f   : > { %8432 = vst [vmem:[#allocation93_spill] sm:$0xff] %v5653_v39  ;;  %v5668_v59 = vmul.f32 %v783_v5, %v687_v35  ;;  %v2029_v5 = vmul.f32 %v4953_v17, %v5556_v41 }
 0x1a0   : > { %2104 = vrot.lane.b32.xlu0 %v2080_v23, %s4658_s16  ;;  %v1600_v23 = vmul.f32 %v5072_v60, %v5591_v19  ;;  %v4575_v57 = vpop.eup %4574 }
 0x1a1   : > { %1172 = vrot.lane.b32.xlu1 %v1147_v53, %s4658_s16  ;;  %8435 = vst [vmem:[#allocation96_spill] sm:$0xff] %v5668_v59  ;;  %v686_v53 = vmul.f32 0.5, %v566_v40  ;;  %v784_v35 = vadd.f32 1.0, %v4575_v57  ;;  %v1662_v40 = vmul.f32 %v4970_v25, %v5668_v59  ;;  %v2079_v39 = vmul.f32 %v8438_v33, %v2029_v5 }
 0x1a2   : > { %v5659_v51 = vpop.permute.xlu0 %1349  ;;  %v5664_v50 = vpop.permute.xlu1 %1343 }
 0x1a3   : > { %8434 = vst [vmem:[#allocation95_spill] sm:$0xff] %v5659_v51  ;;  %v5682_v6 = vmul.f32 %v782_v26, %v686_v53 }
 0x1a4   : > { %2108 = vrot.lane.b32.xlu0 %v2082_v22, %s4658_s16  ;;  %v1602_v22 = vmul.f32 %v5072_v60, %v5612_v13 }
 0x1a5   : > { %1621 = vrot.lane.b32.xlu1 %v1600_v23, %s4657_s11  ;;  %8436 = vst [vmem:[#allocation97_spill] sm:$0xff] %v5682_v6  ;;  %v688_v23 = vmul.f32 0.5, %v655_v28  ;;  %v1213_v53 = vmul.f32 %v4953_v17, %v5682_v6  ;;  %v2064_v28 = vsel %vm2057_vm1, %v4450_v61, %v4451_v16  ;;  %v1212_v16 = vmul.f32 %v4953_v17, %v5657_v7 }
 0x1a6   : > { %v5670_v9 = vpop.permute.xlu0 %1611  ;;  %v5676_v29 = vpop.permute.xlu1 %1347 }
 0x1a7   : > { %v5695_v26 = vmul.f32 %v784_v35, %v688_v23 }
 0x1a8   : > { %1680 = vrot.lane.b32.xlu0 %v1660_v8, %s4657_s11 }
 0x1a9   : > { %1625 = vrot.lane.b32.xlu1 %v1602_v22, %s4657_s11  ;;  %8439 = vst [vmem:[#allocation28_spill] sm:$0xff] %v5695_v26  ;;  %v1215_v5 = vmul.f32 %v4953_v17, %v5695_v26  ;;  %v1528_v23 = vmul.f32 %v4960_v20, %v5695_v26 }
 0x1aa   : > { %v5684_v2 = vpop.permute.xlu0 %1615  ;;  %v5690_v8 = vpop.permute.xlu1 %1160 }
 0x1ab   : > { %8437 = vst [vmem:[#allocation98_spill] sm:$0xff] %v5684_v2  ;;  %v2376_v2 = vmul.f32 %v4960_v20, %v5591_v19 }
 0x1ac   : > { %1684 = vrot.lane.b32.xlu0 %v1662_v40, %s4657_s11  ;;  %v2081_v40 = vmul.f32 %v2064_v28, %v2031_v32  ;;  %v1214_v28 = vmul.f32 %v4953_v17, %v5668_v59 }
 0x1ad   : > { %2102 = vrot.lane.b32.xlu1 %v2079_v39, %s4658_s16  ;;  %v1526_v39 = vmul.f32 %v4960_v20, %v5682_v6 }
 0x1ae   : > { %v5697_v57 = vpop.permute.xlu0 %1162  ;;  %v5704_v22 = vpop.permute.xlu1 %1164 }
 0x1af   : > { %v1535_v32 = vmul.f32 %v1526_v39, %v5535_v62  ;;  %v1661_v39 = vmul.f32 %v4970_v25, %v5682_v6 }
 0x1b0   : > { %1237 = vrot.lane.b32.xlu0 %v1213_v53, %s4658_s16 }
 0x1b1   : > { %2106 = vrot.lane.b32.xlu1 %v2081_v40, %s4658_s16 }
 0x1b2   : > { %v5706_v33 = vpop.permute.xlu0 %1166  ;;  %v5714_v35 = vpop.permute.xlu1 %1613 }
 0x1b4   : > { %1241 = vrot.lane.b32.xlu0 %v1215_v5, %s4658_s16  ;;  %v1537_v5 = vmul.f32 %v5544_v54, %v1528_v23  ;;  %v1663_v23 = vmul.f32 %v4970_v25, %v5695_v26 }
 0x1b5   : > { %1235 = vrot.lane.b32.xlu1 %v1212_v16, %s4658_s16 }
 0x1b6   : > { %v5718_v61 = vpop.permute.xlu0 %2096  ;;  %v5725_v53 = vpop.permute.xlu1 %1617 }
 0x1b7   : > { %8440 = vst [vmem:[#allocation99_spill] sm:$0xff] %v5718_v61  ;;  %8441 = vst [vmem:[#allocation100_spill] sm:$0xff] %v5725_v53 }
 0x1b8   : > { %1559 = vrot.lane.b32.xlu0 %v1535_v32, %s4668_s7  ;;  %v2371_v32 = vmul.f32 %v4960_v20, %v5227_v12 }
 0x1b9   : > { %1239 = vrot.lane.b32.xlu1 %v1214_v28, %s4658_s16  ;;  %v1525_v28 = vmul.f32 %v4960_v20, %v5657_v7 }
 0x1ba   : > { %v5729_v40 = vpop.permute.xlu0 %2100  ;;  %v5734_v16 = vpop.permute.xlu1 %2094 }
 0x1bb   : > { %8442 = vst [vmem:[#allocation101_spill] sm:$0xff] %v5729_v40  ;;  %8443 = vst [vmem:[#allocation102_spill] sm:$0xff] %v5734_v16  ;;  %v2375_v16 = vmul.f32 %v4960_v20, %v5556_v41 }
 0x1bc   : > { %1563 = vrot.lane.b32.xlu0 %v1537_v5, %s4668_s7 }
 0x1bd   : > { %1682 = vrot.lane.b32.xlu1 %v1661_v39, %s4657_s11  ;;  %v2373_v39 = vmul.f32 %v4960_v20, %v5241_v38 }
 0x1be   : > { %v5738_v62 = vpop.permute.xlu0 %1676  ;;  %v5744_v40 = vpop.permute.xlu1 %2098 }
 0x1bf   : > { %8444 = vst [vmem:[#allocation103_spill] sm:$0xff] %v5738_v62  ;;  %8445 = vst [vmem:[#allocation104_spill] sm:$0xff] %v5744_v40  ;;  %v1527_v40 = vmul.f32 %v4960_v20, %v5668_v59 }
 0x1c0   : > { %2387 = vrot.lane.b32.xlu0 %v2371_v32, %s4668_s7  ;;  %v1534_v32 = vmul.f32 %v1525_v28, %v5601_v4  ;;  %v2377_v28 = vmul.f32 %v4960_v20, %v5573_v52 }
 0x1c1   : > { %1686 = vrot.lane.b32.xlu1 %v1663_v23, %s4657_s11 }
 0x1c2   : > { %v5750_v5 = vpop.permute.xlu0 %1229  ;;  %v5756_v54 = vpop.permute.xlu1 %1227 }
 0x1c4   : > { %2391 = vrot.lane.b32.xlu0 %v2373_v39, %s4668_s7  ;;  %v1536_v39 = vmul.f32 %v1527_v40, %v5623_v3  ;;  %v2428_v40 = vmul.f32 %v5072_v60, %v5322_v24  ;;  %v2430_v3 = vmul.f32 %v5072_v60, %v5304_v18 }
 0x1c5   : > { %1557 = vrot.lane.b32.xlu1 %v1534_v32, %s4668_s7  ;;  %v2372_v32 = vmul.f32 %v4960_v20, %v5259_v30 }
 0x1c6   : > { %v5761_v61 = vpop.permute.xlu0 %1233  ;;  %v5767_v23 = vpop.permute.xlu1 %1231 }
 0x1c8   : > { %2395 = vrot.lane.b32.xlu0 %v2375_v16, %s4668_s7 }
 0x1c9   : > { %1561 = vrot.lane.b32.xlu1 %v1536_v39, %s4668_s7  ;;  %v2374_v39 = vmul.f32 %v4960_v20, %v5269_v42 }
 0x1ca   : > { %v5770_v62 = vpop.permute.xlu0 %1551  ;;  %v5776_v4 = vpop.permute.xlu1 %1672 }
 0x1cc   : > { %2399 = vrot.lane.b32.xlu0 %v2377_v28, %s4668_s7 }
 0x1cd   : > { %2389 = vrot.lane.b32.xlu1 %v2372_v32, %s4668_s7 }
 0x1ce   : > { %v5780_v53 = vpop.permute.xlu0 %1555  ;;  %v5786_v16 = vpop.permute.xlu1 %1674 }
 0x1cf   : > { %8446 = vst [vmem:[#allocation105_spill] sm:$0xff] %v5780_v53  ;;  %8447 = vst [vmem:[#allocation106_spill] sm:$0xff] %v5786_v16  ;;  %v2432_v16 = vmul.f32 %v5072_v60, %v5657_v7 }
 0x1d0   : > { %2444 = vrot.lane.b32.xlu0 %v2428_v40, %s4668_s7 }
 0x1d1   : > { %2393 = vrot.lane.b32.xlu1 %v2374_v39, %s4668_s7 }
 0x1d2   : > { %v5790_v28 = vpop.permute.xlu0 %1422  ;;  %v5796_v32 = vpop.permute.xlu1 %1678 }
 0x1d3   : > { %8448 = vst [vmem:[#allocation107_spill] sm:$0xff] %v5790_v28  ;;  %8449 = vst [vmem:[#allocation108_spill] sm:$0xff] %v5796_v32  ;;  %v2378_v28 = vmul.f32 %v4960_v20, %v5612_v13  ;;  %v2434_v32 = vmul.f32 %v5072_v60, %v5668_v59 }
 0x1d4   : > { %2448 = vrot.lane.b32.xlu0 %v2430_v3, %s4668_s7 }
 0x1d5   : > { %2397 = vrot.lane.b32.xlu1 %v2376_v2, %s4668_s7  ;;  %v2486_v2 = vmul.f32 %v4970_v25, %v5227_v12 }
 0x1d6   : > { %v5800_v40 = vpop.permute.xlu0 %1426  ;;  %v5806_v39 = vpop.permute.xlu1 %1549 }
 0x1d7   : > { %8450 = vst [vmem:[#allocation109_spill] sm:$0xff] %v5800_v40 }
 0x1d8   : > { %2452 = vrot.lane.b32.xlu0 %v2432_v16, %s4668_s7  ;;  %v2429_v16 = vmul.f32 %v5072_v60, %v5317_v34 }
 0x1d9   : > { %2401 = vrot.lane.b32.xlu1 %v2378_v28, %s4668_s7  ;;  %v2488_v28 = vmul.f32 %v4970_v25, %v5241_v38 }
 0x1da   : > { %v5810_v3 = vpop.permute.xlu0 %2170  ;;  %v5818_v40 = vpop.permute.xlu1 %1553 }
 0x1db   : > { %8451 = vst [vmem:[#allocation110_spill] sm:$0xff] %v5810_v3  ;;  %v8453_v3 = vld [vmem:[#allocation45_spill] sm:$0xff] }
 0x1dc   : > { %2456 = vrot.lane.b32.xlu0 %v2434_v32, %s4668_s7  ;;  %v2495_v20 = vmul.f32 %v8453_v3, %v2486_v2  ;;  %v2431_v32 = vmul.f32 %v5072_v60, %v5328_v37  ;;  %v8456_v2 = vld [vmem:[#allocation13_spill] sm:$0xff] }
 0x1dd   : > { %2446 = vrot.lane.b32.xlu1 %v2429_v16, %s4668_s7  ;;  %v2490_v16 = vmul.f32 %v4970_v25, %v5556_v41  ;;  %v4385_v3 = vunpack.i.l.bf16 %v8456_v2 }
 0x1de   : > { %v5822_v7 = vpop.permute.xlu0 %2174  ;;  %v5829_v59 = vpop.permute.xlu1 %2168 }
 0x1df   : > { %8452 = vst [vmem:[#allocation111_spill] sm:$0xff] %v5822_v7  ;;  %8454 = vst [vmem:[#allocation112_spill] sm:$0xff] %v5829_v59  ;;  %v2497_v7 = vmul.f32 %v2488_v28, %v5156_v58  ;;  %v2492_v28 = vmul.f32 %v4970_v25, %v5573_v52  ;;  %v1177_v58 = vsel %vm1176_vm3, %v5381_v48, %v5690_v8 }
 0x1e0   : > { %2513 = vrot.lane.b32.xlu0 %v2495_v20, %s4657_s11  ;;  %v2433_v20 = vmul.f32 %v5072_v60, %v5682_v6  ;;  %v1243_v48 = vsel %vm1176_vm3, %v5402_v36, %v5756_v54  ;;  %v8465_v36 = vld [vmem:[#allocation46_spill] sm:$0xff] }
 0x1e1   : > { %2450 = vrot.lane.b32.xlu1 %v2431_v32, %s4668_s7  ;;  %v2499_v32 = vmul.f32 %v2490_v16, %v5489_v0  ;;  %v2487_v16 = vmul.f32 %v4970_v25, %v5259_v30  ;;  %v4386_v0 = vunpack.i.h.bf16 %v8456_v2  ;;  %v1178_v2 = vsel %vm1176_vm3, %v5690_v8, %v5697_v57 }
 0x1e2   : > { %v5833_v12 = vpop.permute.xlu0 %2337  ;;  %v5841_v38 = vpop.permute.xlu1 %2172  ;;  %v1360_v8 = vsel %vm1359_vm5, %v5425_v47, %v5664_v50 }
 0x1e3   : > { %8455 = vst [vmem:[#allocation113_spill] sm:$0xff] %v5833_v12  ;;  %8457 = vst [vmem:[#allocation13_spill] sm:$0xff] %v5841_v38  ;;  %v8459_v12 = vld [vmem:[#allocation25_spill] sm:$0xff]  ;;  %v8460_v38 = vld [vmem:[#allocation24_spill] sm:$0xff] }
 0x1e4   : > { %2517 = vrot.lane.b32.xlu0 %v2497_v7, %s4657_s11  ;;  %v1109_v7 = vmul.f32 %v4385_v3, %v8459_v12  ;;  %v1060_v41 = vmul.f32 %v8460_v38, %v5322_v24 }
 0x1e5   : > { %2454 = vrot.lane.b32.xlu1 %v2433_v20, %s4668_s7  ;;  %v2435_v20 = vmul.f32 %v5072_v60, %v5695_v26  ;;  %v1093_v60 = vsel %vm1092_vm4, %v4385_v3, %v4386_v0  ;;  %v1244_v3 = vsel %vm1176_vm3, %v5756_v54, %v5750_v5 }
 0x1e6   : > { %v5845_v59 = vpop.permute.xlu0 %2341  ;;  %v5858_v6 = vpop.permute.xlu1 %1424  ;;  %v1110_v37 = vmul.f32 %v1093_v60, %v1060_v41 }
 0x1e7   : > { %8458 = vst [vmem:[#allocation114_spill] sm:$0xff] %v5845_v59  ;;  %8461 = vst [vmem:[#allocation25_spill] sm:$0xff] %v5858_v6  ;;  %v1194_v59 = vadd.f32 %v1177_v58, %v1109_v7  ;;  %v5873_v6 = vmul.f32 0.0, %v4970_v25  ;;  %v2496_v7 = vmul.f32 %v2487_v16, %v8465_v36  ;;  %v2491_v16 = vmul.f32 %v4970_v25, %v5591_v19 }
 0x1e8   : > { %2521 = vrot.lane.b32.xlu0 %v2499_v32, %s4657_s11  ;;  %v2501_v32 = vmul.f32 %v2492_v28, %v5511_v21  ;;  %v2489_v28 = vmul.f32 %v4970_v25, %v5269_v42  ;;  %v1195_v60 = vadd.f32 %v1178_v2, %v1110_v37  ;;  %v8469_v37 = vld [vmem:[#allocation49_spill] sm:$0xff] }
 0x1e9   : > { %2458 = vrot.lane.b32.xlu1 %v2435_v20, %s4668_s7  ;;  %8463 = vst [vmem:[#allocation116_spill] sm:$0xff] %v5873_v6  ;;  %v1260_v26 = vadd.f32 %v1243_v48, %v1194_v59  ;;  %v8466_v20 = vld [vmem:[#allocation11_spill] sm:$0xff]  ;;  %v2503_v41 = vmul.f32 %v5015_v46, %v5873_v6  ;;  %v1062_v46 = vmul.f32 %v8460_v38, %v5304_v18 }
 0x1ea   : > { %v5868_v52 = vpop.permute.xlu0 %1483  ;;  %v5880_v58 = vpop.permute.xlu1 %1428  ;;  %v8194_v21 = vunpack.i.h.bf16 %v8466_v20  ;;  %v1261_v48 = vadd.f32 %v1244_v3, %v1195_v60  ;;  %v2498_v2 = vmul.f32 %v2489_v28, %v8469_v37  ;;  %v1361_v28 = vsel %vm1359_vm5, %v5664_v50, %v5645_v11 }
 0x1eb   : > { %8462 = vst [vmem:[#allocation115_spill] sm:$0xff] %v5868_v52  ;;  %8464 = vst [vmem:[#allocation117_spill] sm:$0xff] %v5880_v58  ;;  %v4390_v52 = vunpack.i.l.bf16 %v8466_v20  ;;  %v1377_v54 = vadd.f32 %v1360_v8, %v1260_v26  ;;  %v8471_v26 = vld [vmem:[#allocation39_spill] sm:$0xff]  ;;  %v2493_v8 = vmul.f32 %v4970_v25, %v5612_v13 }
 0x1ec   : > { %2525 = vrot.lane.b32.xlu0 %v2501_v32, %s4657_s11  ;;  %v2848_v3 = vmul.f32 %v4944_v14, %v8471_v26  ;;  %v1378_v37 = vadd.f32 %v1361_v28, %v1261_v48  ;;  %v8506_v26 = vld [vmem:[#allocation12_spill] sm:$0xff] }
 0x1ed   : > { %2515 = vrot.lane.b32.xlu1 %v2496_v7, %s4657_s11  ;;  %v1061_v7 = vmul.f32 %v8460_v38, %v5317_v34  ;;  %v1095_v47 = vsel %vm1092_vm4, %v4390_v52, %v8194_v21  ;;  %v1094_v60 = vsel %vm1092_vm4, %v4386_v0, %v4390_v52  ;;  %v1179_v21 = vsel %vm1176_vm3, %v5697_v57, %v5704_v22 }
 0x1ee   : > { %v5890_v59 = vpop.permute.xlu0 %1487  ;;  %v1446_v6 = vadd.f32 %v5466_v49, %v1377_v54  ;;  %v1112_v0 = vmul.f32 %v1095_v47, %v1062_v46  ;;  %v1246_v57 = vsel %vm1176_vm3, %v5767_v23, %v5761_v61  ;;  %v1430_v54 = vsel %vm1092_vm4, %v5466_v49, %v5514_v56 }
 0x1ef   : > { %8467 = vst [vmem:[#allocation11_spill] sm:$0xff] %v5890_v59  ;;  %v5901_v32 = vpop.permute.xlu1 %2335  ;;  %v1111_v52 = vmul.f32 %v1094_v60, %v1061_v7  ;;  %v1447_v47 = vadd.f32 %v1430_v54, %v1378_v37  ;;  %v2502_v28 = vmul.f32 %v2493_v8, %v5442_v1  ;;  %v2852_v49 = vmul.f32 %v4944_v14, %v5353_v31  ;;  %v8497_v1 = vld [vmem:[#allocation103_spill] sm:$0xff]  ;;  %v8498_v31 = vld [vmem:[#allocation108_spill] sm:$0xff] }
 0x1f0   : > { %2529 = vrot.lane.b32.xlu0 %v2503_v41, %s4657_s11  ;;  %8468 = vst [vmem:[#allocation118_spill] sm:$0xff] %v5901_v32  ;;  %v2500_v41 = vmul.f32 %v2491_v16, %v5417_v10  ;;  %v1245_v16 = vsel %vm1176_vm3, %v5750_v5, %v5767_v23  ;;  %v1565_v5 = vsel %vm1359_vm5, %v5419_v55, %v5806_v39 }
 0x1f1   : > { %2519 = vrot.lane.b32.xlu1 %v2498_v2, %s4657_s11  ;;  %v1180_v2 = vsel %vm1176_vm3, %v5704_v22, %v5706_v33  ;;  %v8474_v22 = vld [vmem:[#allocation41_spill] sm:$0xff]  ;;  %v1196_v7 = vadd.f32 %v1179_v21, %v1111_v52  ;;  %v1507_v23 = vadd.f32 %v5582_v45, %v1446_v6  ;;  %v1491_v55 = vsel %vm1092_vm4, %v5582_v45, %v5638_v43  ;;  %v8478_v52 = vld [vmem:[#allocation43_spill] sm:$0xff] }
 0x1f2   : > { %v5911_v36 = vpop.permute.xlu0 %2235  ;;  %v2850_v48 = vmul.f32 %v4944_v14, %v8474_v22  ;;  %v1197_v46 = vadd.f32 %v1180_v2, %v1112_v0  ;;  %v1566_v21 = vsel %vm1359_vm5, %v5806_v39, %v5770_v62  ;;  %v1362_v6 = vsel %vm1359_vm5, %v5645_v11, %v5676_v29 }
 0x1f3   : > { %8470 = vst [vmem:[#allocation119_spill] sm:$0xff] %v5911_v36  ;;  %v5931_v50 = vpop.permute.xlu1 %2339  ;;  %v1262_v60 = vadd.f32 %v1245_v16, %v1196_v7  ;;  %v1582_v25 = vadd.f32 %v1565_v5, %v1507_v23  ;;  %v1363_v37 = vsel %vm1359_vm5, %v5676_v29, %v5659_v51  ;;  %v1508_v8 = vadd.f32 %v1491_v55, %v1447_v47  ;;  %v8483_v55 = vld [vmem:[#allocation87_spill] sm:$0xff]  ;;  %v8525_v51 = vld [vmem:[#allocation96_spill] sm:$0xff] }
 0x1f4   : > { %2864 = vrot.lane.b32.xlu0 %v2848_v3, %s4658_s16  ;;  %8472 = vst [vmem:[#allocation120_spill] sm:$0xff] %v5931_v50  ;;  %v2849_v45 = vmul.f32 %v4944_v14, %v8478_v52  ;;  %v2854_v11 = vmul.f32 %v4944_v14, %v5364_v63  ;;  %v1431_v29 = vsel %vm1092_vm4, %v5514_v56, %v5493_v15  ;;  %v8505_v52 = vld [vmem:[#allocation75_spill] sm:$0xff]  ;;  %v8524_v50 = vld [vmem:[#allocation97_spill] sm:$0xff] }
 0x1f5   : > { %2523 = vrot.lane.b32.xlu1 %v2500_v41, %s4657_s11  ;;  %v1263_v41 = vadd.f32 %v1246_v57, %v1197_v46  ;;  %v1379_v0 = vadd.f32 %v1362_v6, %v1262_v60  ;;  %v1583_v57 = vadd.f32 %v1566_v21, %v1508_v8  ;;  %v1643_v39 = vadd.f32 %v5670_v9, %v1582_v25  ;;  %v8480_v25 = vld [vmem:[#allocation44_spill] sm:$0xff]  ;;  %v8484_v21 = vld [vmem:[#allocation93_spill] sm:$0xff] }
 0x1f6   : > { %v5939_v10 = vpop.permute.xlu0 %2239  ;;  %v1432_v54 = vsel %vm1092_vm4, %v5493_v15, %v5528_v27  ;;  %v2851_v46 = vmul.f32 %v4944_v14, %v8480_v25  ;;  %v1627_v5 = vsel %vm1092_vm4, %v5670_v9, %v5714_v35  ;;  %v8482_v15 = vld [vmem:[#allocation48_spill] sm:$0xff]  ;;  %v1492_v9 = vsel %vm1092_vm4, %v5638_v43, %v8483_v55  ;;  %v8504_v25 = vld [vmem:[#allocation6_spill] sm:$0xff] }
 0x1f7   : > { %8473 = vst [vmem:[#allocation121_spill] sm:$0xff] %v5939_v10  ;;  %v5952_v3 = vpop.permute.xlu1 %2233  ;;  %v1380_v16 = vadd.f32 %v1363_v37, %v1263_v41  ;;  %v1448_v47 = vadd.f32 %v1431_v29, %v1379_v0  ;;  %v5998_v56 = vadd.f32 %v5776_v4, %v1643_v39  ;;  %v2905_v41 = vmul.f32 %v4953_v17, %v8482_v15  ;;  %v8486_v0 = vld [vmem:[#allocation106_spill] sm:$0xff]  ;;  %v8516_v10 = vld [vmem:[#allocation16_spill] sm:$0xff] }
 0x1f8   : > { %2868 = vrot.lane.b32.xlu0 %v2850_v48, %s4658_s16  ;;  %8475 = vst [vmem:[#allocation122_spill] sm:$0xff] %v5952_v3  ;;  %v1493_v6 = vsel %vm1092_vm4, %v8483_v55, %v8484_v21  ;;  %v1567_v37 = vsel %vm1359_vm5, %v5770_v62, %v5818_v40  ;;  %v1568_v8 = vsel %vm1359_vm5, %v5818_v40, %v5780_v53  ;;  %v8520_v3 = vld [vmem:[#allocation64_spill] sm:$0xff] }
 0x1f9   : > { %2527 = vrot.lane.b32.xlu1 %v2502_v28, %s4657_s11  ;;  %v1449_v23 = vadd.f32 %v1432_v54, %v1380_v16  ;;  %v1644_v28 = vadd.f32 %v1627_v5, %v1583_v57  ;;  %v1688_v43 = vsel %vm1092_vm4, %v5776_v4, %v8486_v0  ;;  %v1509_v16 = vadd.f32 %v1492_v9, %v1448_v47  ;;  %v8488_v54 = vld [vmem:[#allocation4_spill] sm:$0xff] }
 0x1fa   : > { %v5955_v22 = vpop.permute.xlu0 %1353  ;;  %v8490_v4 = vld [vmem:[#allocation68_spill] sm:$0xff]  ;;  %v1689_v63 = vsel %vm1092_vm4, %v8486_v0, %v8497_v1  ;;  %v1987_v21 = vmul.f32 %v8460_v38, %v5612_v13 }
 0x1fb   : > { %8476 = vst [vmem:[#allocation123_spill] sm:$0xff] %v5955_v22  ;;  %v5973_v2 = vpop.permute.xlu1 %2237  ;;  %v1510_v57 = vadd.f32 %v1493_v6, %v1449_v23  ;;  %v6025_v39 = vadd.f32 %v1688_v43, %v1644_v28  ;;  %v1584_v40 = vadd.f32 %v1567_v37, %v1509_v16  ;;  %v2855_v5 = vmul.f32 %v4944_v14, %v8490_v4  ;;  %v8491_v23 = vld [vmem:[#allocation98_spill] sm:$0xff]  ;;  %v8495_v16 = vld [vmem:[#allocation51_spill] sm:$0xff] }
 0x1fc   : > { %2872 = vrot.lane.b32.xlu0 %v2852_v49, %s4658_s16  ;;  %8477 = vst [vmem:[#allocation124_spill] sm:$0xff] %v5973_v2  ;;  %v2853_v49 = vmul.f32 %v4944_v14, %v5379_v44  ;;  %v1628_v28 = vsel %vm1092_vm4, %v5714_v35, %v8491_v23  ;;  %v2906_v35 = vmul.f32 %v4953_v17, %v8495_v16  ;;  %v4404_v4 = vunpack.i.h.bf16 %v8506_v26  ;;  %v8523_v22 = vld [vmem:[#allocation34_spill] sm:$0xff] }
 0x1fd   : > { %2866 = vrot.lane.b32.xlu1 %v2849_v45, %s4658_s16  ;;  %v1585_v29 = vadd.f32 %v1568_v8, %v1510_v57  ;;  %v1721_v55 = vrot.slane %v6025_v39, 4  ;;  %v1645_v6 = vadd.f32 %v1628_v28, %v1584_v40  ;;  %v8493_v8 = vld [vmem:[#allocation3_spill] sm:$0xff]  ;;  %v1690_v40 = vsel %vm1092_vm4, %v8497_v1, %v8498_v31  ;;  %v8500_v1 = vld [vmem:[#allocation5_spill] sm:$0xff]  ;;  %v8507_v31 = vld [vmem:[#allocation14_spill] sm:$0xff] }
 0x1fe   : > { %v5978_v48 = vpop.permute.xlu0 %1357  ;;  %v4396_v59 = vunpack.i.h.bf16 %v8507_v31  ;;  %v6121_v2 = vadd.f32 %v8516_v10, %v8459_v12  ;;  %v2009_v12 = vmul.f32 %v4944_v14, %v5304_v18 }
 0x1ff   : > { %v5990_v7 = vpop.permute.xlu1 %1485  ;;  %v6066_v28 = vadd.f32 %v1689_v63, %v1645_v6 }
 0x200   : > { %2876 = vrot.lane.b32.xlu0 %v2854_v11, %s4658_s16  ;;  %8479 = vst [vmem:[#allocation125_spill] sm:$0xff] %v5990_v7  ;;  %v1714_v11 = vsel %vm1713_vm6, %v5998_v56, 0.0 }
 0x201   : > { %2870 = vrot.lane.b32.xlu1 %v2851_v46, %s4658_s16  ;;  %v1715_v47 = vrot.slane %v1714_v11, 4 }
 0x202   : > { %v6000_v60 = vpop.permute.xlu0 %1619 }
 0x203   : > { %8481 = vst [vmem:[#allocation126_spill] sm:$0xff] %v6000_v60  ;;  %v6020_v45 = vpop.permute.xlu1 %1489  ;;  %v1716_v57 = vadd.f32 %v1715_v47, %v1714_v11 }
 0x204   : > { %2921 = vrot.lane.b32.xlu0 %v2905_v41, %s4658_s16  ;;  %8485 = vst [vmem:[#allocation87_spill] sm:$0xff] %v6020_v45  ;;  %v8492_v41 = vld [vmem:[#allocation100_spill] sm:$0xff] }
 0x205   : > { %2874 = vrot.lane.b32.xlu1 %v2853_v49, %s4658_s16  ;;  %v1629_v49 = vsel %vm1092_vm4, %v8491_v23, %v8492_v41 }
 0x206   : > { %v6029_v62 = vpop.permute.xlu0 %1623  ;;  %v1646_v37 = vadd.f32 %v1629_v49, %v1585_v29  ;;  %v1722_v29 = vadd.f32 %v1721_v55, %v6025_v39  ;;  %v1717_v49 = vrot.slane %v1716_v57, 2  ;;  %v8501_v55 = vld [vmem:[#allocation72_spill] sm:$0xff] }
 0x207   : > { %8487 = vst [vmem:[#allocation106_spill] sm:$0xff] %v6029_v62  ;;  %v6034_v46 = vpop.permute.xlu1 %1351  ;;  %v2909_v44 = vmul.f32 %v4953_v17, %v8501_v55  ;;  %v4403_v55 = vunpack.i.l.bf16 %v8506_v26  ;;  %v8511_v26 = vld [vmem:[#allocation55_spill] sm:$0xff] }
 0x208   : > { %4473 = vrot.lane.b32.xlu0 %v8488_v54, %s4669_s8  ;;  %8489 = vst [vmem:[#allocation4_spill] sm:$0xff] %v6034_v46  ;;  %v8496_v54 = vld [vmem:[#allocation50_spill] sm:$0xff]  ;;  %v6068_v11 = vadd.f32 %v1690_v40, %v1646_v37  ;;  %v1723_v0 = vrot.slane %v1722_v29, 2  ;;  %v1718_v37 = vadd.f32 %v1717_v49, %v1716_v57  ;;  %v4395_v57 = vunpack.i.l.bf16 %v8507_v31 }
 0x209   : > { %2878 = vrot.lane.b32.xlu1 %v2855_v5, %s4658_s16  ;;  %v2907_v23 = vmul.f32 %v4953_v17, %v8496_v54  ;;  %v1099_v31 = vsel %vm1092_vm4, %v4403_v55, %v4404_v4  ;;  %v1098_v7 = vsel %vm1092_vm4, %v4396_v59, %v4403_v55  ;;  %v1981_v55 = vmul.f32 %v8460_v38, %v5259_v30 }
 0x20a   : > { %v6045_v9 = vpop.permute.xlu0 %1170  ;;  %v1733_v63 = vrot.slane %v6068_v11, 4  ;;  %v1066_v46 = vmul.f32 %v8460_v38, %v8525_v51 }
 0x20b   : > { %v6050_v43 = vpop.permute.xlu1 %1355 }
 0x20c   : > { %4483 = vrot.lane.b32.xlu0 %v8493_v8, %s4669_s8  ;;  %8494 = vst [vmem:[#allocation98_spill] sm:$0xff] %v6050_v43 }
 0x20d   : > { %2923 = vrot.lane.b32.xlu1 %v2906_v35, %s4658_s16  ;;  %v1727_v35 = vrot.slane %v6066_v28, 4 }
 0x20e   : > { %v6063_v5 = vpop.permute.xlu0 %1174 }
 0x20f   : > { %v6071_v47 = vpop.permute.xlu1 %1168  ;;  %v1728_v62 = vadd.f32 %v1727_v35, %v6066_v28  ;;  %v8512_v35 = vld [vmem:[#allocation32_spill] sm:$0xff] }
 0x210   : > { %2925 = vrot.lane.b32.xlu0 %v2907_v23, %s4658_s16  ;;  %v1724_v23 = vadd.f32 %v1723_v0, %v1722_v29  ;;  %v1719_v0 = vrot.slane %v1718_v37, 1 }
 0x211   : > { %4478 = vrot.lane.b32.xlu1 %v8500_v1, %s4669_s8  ;;  %v2911_v1 = vmul.f32 %v4953_v17, %v8505_v52  ;;  %v1729_v60 = vrot.slane %v1728_v62, 2 }
 0x212   : > { %v6073_v8 = vpop.permute.xlu0 %2104  ;;  %v1725_v52 = vrot.slane %v1724_v23, 1 }
 0x213   : > { %8499 = vst [vmem:[#allocation3_spill] sm:$0xff] %v6073_v8  ;;  %v6082_v6 = vpop.permute.xlu1 %1172  ;;  %v2007_v8 = vmul.f32 %v4944_v14, %v5322_v24  ;;  %v1730_v10 = vadd.f32 %v1729_v60, %v1728_v62  ;;  %v2912_v60 = vmul.f32 %v4953_v17, %v8523_v22 }
 0x214   : > { %2929 = vrot.lane.b32.xlu0 %v2909_v44, %s4658_s16  ;;  %8502 = vst [vmem:[#allocation103_spill] sm:$0xff] %v6082_v6  ;;  %v1734_v44 = vadd.f32 %v1733_v63, %v6068_v11  ;;  %v3006_v63 = vmul.f32 %v8512_v35, %v8511_v26 }
 0x215   : > { %4488 = vrot.lane.b32.xlu1 %v8504_v25, %s4669_s8  ;;  %v8509_v25 = vld [vmem:[#allocation52_spill] sm:$0xff] }
 0x216   : > { %v6084_v40 = vpop.permute.xlu0 %2108  ;;  %v2908_v49 = vmul.f32 %v4953_v17, %v8509_v25  ;;  %v1735_v43 = vrot.slane %v1734_v44, 2 }
 0x217   : > { %8503 = vst [vmem:[#allocation5_spill] sm:$0xff] %v6084_v40  ;;  %v6097_v29 = vpop.permute.xlu1 %1621  ;;  %v1097_v40 = vsel %vm1092_vm4, %v4395_v57, %v4396_v59  ;;  %v1980_v59 = vmul.f32 %v8460_v38, %v8511_v26 }
 0x218   : > { %2933 = vrot.lane.b32.xlu0 %v2911_v1, %s4658_s16  ;;  %8508 = vst [vmem:[#allocation6_spill] sm:$0xff] %v6097_v29  ;;  %v8513_v1 = vunpack.i.h.bf16 %v8466_v20  ;;  %v2008_v20 = vmul.f32 %v4944_v14, %v5317_v34  ;;  %v1736_v6 = vadd.f32 %v1735_v43, %v1734_v44 }
 0x219   : > { %2927 = vrot.lane.b32.xlu1 %v2908_v49, %s4658_s16  ;;  %v8515_v49 = vld [vmem:[#allocation76_spill] sm:$0xff]  ;;  %v6149_v62 = vadd.f32 %v2007_v8, %v1980_v59  ;;  %v1731_v59 = vrot.slane %v1730_v10, 1 }
 0x21a   : > { %v6101_v41 = vpop.permute.xlu0 %1680  ;;  %v1096_v29 = vsel %vm1092_vm4, %v8513_v1, %v4395_v57  ;;  %v2910_v53 = vmul.f32 %v4953_v17, %v8515_v49  ;;  %v1720_v57 = vadd.f32 %v1719_v0, %v1718_v37  ;;  %v8519_v37 = vld [vmem:[#allocation28_spill] sm:$0xff]  ;;  %v6151_v43 = vadd.f32 %v2008_v20, %v1981_v55  ;;  %v8526_v17 = vld [vmem:[#allocation35_spill] sm:$0xff] }
 0x21b   : > { %8510 = vst [vmem:[#allocation12_spill] sm:$0xff] %v6101_v41  ;;  %v6113_v41 = vpop.permute.xlu1 %1625  ;;  %v1067_v0 = vmul.f32 %v8460_v38, %v8519_v37  ;;  %v3010_v8 = vmul.f32 %v8512_v35, %v8526_v17 }
 0x21c   : > { %3022 = vrot.lane.b32.xlu0 %v3006_v63, %s4658_s16  ;;  %8514 = vst [vmem:[#allocation14_spill] sm:$0xff] %v6113_v41  ;;  %v1726_v63 = vadd.f32 %v1725_v52, %v1724_v23  ;;  %v8518_v41 = vld [vmem:[#allocation57_spill] sm:$0xff]  ;;  %v1063_v52 = vmul.f32 %v8460_v38, %v8520_v3  ;;  %v8521_v23 = vld [vmem:[#allocation94_spill] sm:$0xff]  ;;  %v1771_v44 = vmul.f32 0.125, %v1720_v57  ;;  %v1737_v57 = vrot.slane %v1736_v6, 1 }
 0x21d   : > { %2931 = vrot.lane.b32.xlu1 %v2910_v53, %s4658_s16  ;;  %v3008_v36 = vmul.f32 %v8512_v35, %v8518_v41  ;;  %v1982_v26 = vmul.f32 %v8460_v38, %v8518_v41  ;;  %v1064_v53 = vmul.f32 %v8460_v38, %v8521_v23  ;;  %v1065_v41 = vmul.f32 %v8460_v38, %v8524_v50 }
 0x21e   : > { %v6129_v1 = vpop.permute.xlu0 %1684  ;;  %v1772_v45 = vmul.f32 0.125, %v1726_v63  ;;  %v6164_v55 = vmul.f32 %v4404_v4, %v1067_v0  ;;  %v2010_v4 = vmul.f32 %v4944_v14, %v8520_v3  ;;  %v6189_v0 = vmul.f32 %v1099_v31, %v1066_v46 }
 0x21f   : > { %8517 = vst [vmem:[#allocation16_spill] sm:$0xff] %v6129_v1  ;;  %v6145_v1 = vpop.permute.xlu1 %2102  ;;  %v2018_v20 = vadd.f32 %v2009_v12, %v1982_v26  ;;  %v6168_v63 = vmul.f32 %v1097_v40, %v1064_v53  ;;  %v6178_v26 = vsub.f32 %v5998_v56, %v1771_v44  ;;  %v6180_v12 = vmul.f32 %v1098_v7, %v1065_v41  ;;  %v8530_v56 = vld [vmem:[#allocation36_spill] sm:$0xff] }
 0x220   : > { %3026 = vrot.lane.b32.xlu0 %v3008_v36, %s4658_s16  ;;  %8522 = vst [vmem:[#allocation127_spill] sm:$0xff] %v6145_v1  ;;  %v2014_v36 = vmul.f32 %v4944_v14, %v8519_v37  ;;  %v6166_v1 = vmul.f32 %v1096_v29, %v1063_v52  ;;  %v2011_v40 = vmul.f32 %v4944_v14, %v8521_v23 }
 0x221   : > { %2935 = vrot.lane.b32.xlu1 %v2912_v60, %s4658_s16  ;;  %v3007_v60 = vmul.f32 %v8512_v35, %v5259_v30  ;;  %8528 = vst [vmem:[#allocation129_spill] sm:$0xff] %v6178_v26  ;;  %v6187_v29 = vsub.f32 %v6025_v39, %v1772_v45  ;;  %v3012_v7 = vmul.f32 %v8512_v35, %v8530_v56 }
 0x222   : > { %v6159_v32 = vpop.permute.xlu0 %1237  ;;  %v6191_v52 = vadd.f32 %v2014_v36, %v1987_v21  ;;  %v1732_v41 = vadd.f32 %v1731_v59, %v1730_v10  ;;  %v1738_v44 = vadd.f32 %v1737_v57, %v1736_v6  ;;  %v1984_v45 = vmul.f32 %v8460_v38, %v8526_v17  ;;  %v8533_v17 = vld [vmem:[#allocation73_spill] sm:$0xff] }
 0x223   : > { %v6173_v58 = vpop.permute.xlu1 %2106  ;;  %8529 = vst [vmem:[#allocation130_spill] sm:$0xff] %v6187_v29  ;;  %v1985_v39 = vmul.f32 %v8460_v38, %v5591_v19  ;;  %v2012_v21 = vmul.f32 %v4944_v14, %v8524_v50  ;;  %v2013_v46 = vmul.f32 %v4944_v14, %v8525_v51  ;;  %v3009_v6 = vmul.f32 %v8512_v35, %v5269_v42 }
 0x224   : > { %3030 = vrot.lane.b32.xlu0 %v3010_v8, %s4658_s16  ;;  %8527 = vst [vmem:[#allocation128_spill] sm:$0xff] %v6173_v58  ;;  %v1983_v8 = vmul.f32 %v8460_v38, %v5269_v42  ;;  %v1789_v10 = vmul.f32 %v6178_v26, %v6178_v26  ;;  %v6217_v59 = vadd.f32 %v2011_v40, %v1984_v45 }
 0x225   : > { %3024 = vrot.lane.b32.xlu1 %v3007_v60, %s4658_s16  ;;  %v1986_v57 = vmul.f32 %v8460_v38, %v8530_v56  ;;  %v8532_v60 = vld [vmem:[#allocation102_spill] sm:$0xff]  ;;  %v1790_v42 = vmul.f32 %v6187_v29, %v6187_v29  ;;  %v8537_v56 = vld [vmem:[#allocation101_spill] sm:$0xff]  ;;  %v1773_v38 = vmul.f32 0.125, %v1732_v41  ;;  %v6240_v26 = vadd.f32 %v2012_v21, %v1985_v39 }
 0x226   : > { %v6193_v53 = vpop.permute.xlu0 %1241  ;;  %v6215_v36 = vadd.f32 %v2010_v4, %v1983_v8  ;;  %8531 = vst [vmem:[#allocation131_spill] sm:$0xff] %v6217_v59  ;;  %v2110_v14 = vsel %vm1176_vm3, %v8533_v17, %v8532_v60  ;;  %v8535_v4 = vld [vmem:[#allocation17_spill] sm:$0xff]  ;;  %v8536_v8 = vld [vmem:[#allocation104_spill] sm:$0xff]  ;;  %v3013_v41 = vmul.f32 %v8512_v35, %v5612_v13 }
 0x227   : > { %v6209_v31 = vpop.permute.xlu1 %1235  ;;  %v3063_v40 = vmul.f32 %v8535_v4, %v5322_v24  ;;  %v2113_v17 = vsel %vm1176_vm3, %v8536_v8, %v8537_v56  ;;  %v6242_v29 = vadd.f32 %v2013_v46, %v1986_v57  ;;  %v3011_v24 = vmul.f32 %v8512_v35, %v5591_v19 }
 0x228   : > { %3034 = vrot.lane.b32.xlu0 %v3012_v7, %s4658_s16  ;;  %v8534_v7 = vld [vmem:[#allocation99_spill] sm:$0xff]  ;;  %v2127_v59 = vadd.f32 %v2110_v14, %v6121_v2  ;;  %v2130_v46 = vadd.f32 %v2113_v17, %v2018_v20  ;;  %v1805_v57 = vrot.slane %v1790_v42, 4  ;;  %v6263_v14 = vsub.f32 %v6066_v28, %v1773_v38  ;;  %v8541_v20 = vld [vmem:[#allocation74_spill] sm:$0xff]  ;;  %v8542_v17 = vld [vmem:[#allocation77_spill] sm:$0xff] }
 0x229   : > { %v2111_v30 = vsel %vm1176_vm3, %v8532_v60, %v8534_v7  ;;  %3028 = vrot.lane.b32.xlu1 %v3009_v6, %s4658_s16  ;;  %v2112_v45 = vsel %vm1176_vm3, %v8534_v7, %v8536_v8  ;;  %v1774_v60 = vmul.f32 0.125, %v1738_v44  ;;  %v3065_v7 = vmul.f32 %v8535_v4, %v5304_v18 }
 0x22a   : > { %v6229_v58 = vpop.permute.xlu0 %1559  ;;  %v1798_v8 = vsel %vm1713_vm6, %v1789_v10, 0.0  ;;  %v3067_v44 = vmul.f32 %v8535_v4, %v8521_v23  ;;  %v2128_v39 = vadd.f32 %v2111_v30, %v6149_v62  ;;  %v2129_v21 = vadd.f32 %v2112_v45, %v6151_v43  ;;  %8538 = vst [vmem:[#allocation102_spill] sm:$0xff] %v6263_v14 }
 0x22b   : > { %v6245_v6 = vpop.permute.xlu1 %1239  ;;  %v6266_v2 = vsub.f32 %v6068_v11, %v1774_v60  ;;  %v3064_v10 = vmul.f32 %v8535_v4, %v5317_v34  ;;  %v3069_v30 = vmul.f32 %v8535_v4, %v8525_v51  ;;  %v1799_v62 = vrot.slane %v1798_v8, 4  ;;  %v8540_v11 = vld [vmem:[#allocation31_spill] sm:$0xff] }
 0x22c   : > { %3079 = vrot.lane.b32.xlu0 %v3063_v40, %s4658_s16  ;;  %v6279_v38 = vmul.f32 %v8535_v4, %v8524_v50  ;;  %v6283_v28 = vmul.f32 %v8535_v4, %v8519_v37  ;;  %v2176_v45 = vsel %vm1359_vm5, %v8541_v20, %v8540_v11  ;;  %v2177_v60 = vsel %vm1359_vm5, %v8540_v11, %v8542_v17 }
 0x22d   : > { %3032 = vrot.lane.b32.xlu1 %v3011_v24, %s4658_s16  ;;  %8539 = vst [vmem:[#allocation73_spill] sm:$0xff] %v6266_v2  ;;  %v3066_v24 = vmul.f32 %v8535_v4, %v8520_v3  ;;  %v2192_v13 = vadd.f32 %v8541_v20, %v2127_v59  ;;  %v2193_v19 = vadd.f32 %v2176_v45, %v2128_v39  ;;  %v8546_v39 = vld [vmem:[#allocation90_spill] sm:$0xff] }
 0x22e   : > { %v6259_v40 = vpop.permute.xlu0 %1563  ;;  %v2194_v51 = vadd.f32 %v2177_v60, %v2129_v21  ;;  %v1806_v23 = vadd.f32 %v1805_v57, %v1790_v42  ;;  %v1791_v4 = vmul.f32 %v6263_v14, %v6263_v14  ;;  %v1792_v11 = vmul.f32 %v6266_v2, %v6266_v2  ;;  %v8550_v57 = vld [vmem:[#allocation92_spill] sm:$0xff]  ;;  %v8551_v45 = vld [vmem:[#allocation42_spill] sm:$0xff]  ;;  %v8556_v14 = vld [vmem:[#allocation85_spill] sm:$0xff] }
 0x22f   : > { %v6273_v43 = vpop.permute.xlu1 %1682  ;;  %v1202_v3 = vadd.f32 %v6063_v5, %v6164_v55  ;;  %v1800_v21 = vadd.f32 %v1799_v62, %v1798_v8  ;;  %v2242_v20 = vsel %vm1359_vm5, %v8546_v39, %v8550_v57  ;;  %v2243_v8 = vsel %vm1359_vm5, %v8550_v57, %v8551_v45 }
 0x230   : > { %3083 = vrot.lane.b32.xlu0 %v3065_v7, %s4658_s16  ;;  %v8543_v7 = vld [vmem:[#allocation81_spill] sm:$0xff]  ;;  %v1807_v60 = vrot.slane %v1806_v23, 2  ;;  %v1817_v2 = vrot.slane %v1792_v11, 4 }
 0x231   : > { %v2178_v35 = vsel %vm1359_vm5, %v8542_v17, %v8543_v7  ;;  %3036 = vrot.lane.b32.xlu1 %v3013_v41, %s4658_s16  ;;  %v8544_v17 = vld [vmem:[#allocation19_spill] sm:$0xff] }
 0x232   : > { %v2195_v50 = vadd.f32 %v2178_v35, %v2130_v46  ;;  %v6295_v37 = vpop.permute.xlu0 %2387  ;;  %v6306_v59 = vmul.f32 %v8544_v17, %v8523_v22  ;;  %v8547_v35 = vld [vmem:[#allocation89_spill] sm:$0xff]  ;;  %v6316_v46 = vmul.f32 %v8544_v17, %v8482_v15  ;;  %v6320_v55 = vmul.f32 %v8544_v17, %v8495_v16 }
 0x233   : > { %v2241_v42 = vsel %vm1359_vm5, %v8547_v35, %v8546_v39  ;;  %v6312_v41 = vpop.permute.xlu1 %1686  ;;  %v2257_v62 = vadd.f32 %v8547_v35, %v2192_v13  ;;  %v2259_v16 = vadd.f32 %v2242_v20, %v2194_v51  ;;  %v1811_v22 = vrot.slane %v1791_v4, 4  ;;  %v8555_v13 = vld [vmem:[#allocation83_spill] sm:$0xff] }
 0x234   : > { %8545 = vst [vmem:[#allocation99_spill] sm:$0xff] %v6306_v59  ;;  %3087 = vrot.lane.b32.xlu0 %v3067_v44, %s4658_s16  ;;  %8548 = vst [vmem:[#allocation104_spill] sm:$0xff] %v6316_v46  ;;  %v1268_v44 = vadd.f32 %v6193_v53, %v1202_v3  ;;  %v2258_v34 = vadd.f32 %v2241_v42, %v2193_v19  ;;  %v2260_v15 = vadd.f32 %v2243_v8, %v2195_v50  ;;  %v8554_v3 = vld [vmem:[#allocation84_spill] sm:$0xff]  ;;  %v8558_v42 = vld [vmem:[#allocation86_spill] sm:$0xff] }
 0x235   : > { %8549 = vst [vmem:[#allocation101_spill] sm:$0xff] %v6320_v55  ;;  %3081 = vrot.lane.b32.xlu1 %v3064_v10, %s4658_s16  ;;  %v6335_v39 = vmul.f32 %v8544_v17, %v8509_v25  ;;  %v6339_v57 = vmul.f32 %v8544_v17, %v8496_v54  ;;  %v2345_v35 = vsel %vm1092_vm4, %v8555_v13, %v8554_v3  ;;  %v1801_v51 = vrot.slane %v1800_v21, 2  ;;  %v8576_v46 = vld [vmem:[#allocation118_spill] sm:$0xff]  ;;  %v8577_v59 = vld [vmem:[#allocation4_spill] sm:$0xff] }
 0x236   : > { %v6330_v18 = vpop.permute.xlu0 %2391  ;;  %v2346_v19 = vsel %vm1092_vm4, %v8554_v3, %v8556_v14  ;;  %v6352_v10 = vmul.f32 %v8544_v17, %v8515_v49  ;;  %v2347_v20 = vsel %vm1092_vm4, %v8556_v14, %v8558_v42  ;;  %v1181_v8 = vsel %vm1176_vm3, %v5706_v33, %v6071_v47 }
 0x237   : > { %8552 = vst [vmem:[#allocation31_spill] sm:$0xff] %v6335_v39  ;;  %8553 = vst [vmem:[#allocation74_spill] sm:$0xff] %v6339_v57  ;;  %v6348_v50 = vpop.permute.xlu1 %1557  ;;  %v1385_v25 = vadd.f32 %v5978_v48, %v1268_v44  ;;  %v6362_v3 = vadd.f32 %v8555_v13, %v2257_v62  ;;  %v6367_v49 = vadd.f32 %v2345_v35, %v2258_v34  ;;  %v8563_v44 = vld [vmem:[#allocation107_spill] sm:$0xff]  ;;  %v8564_v62 = vld [vmem:[#allocation112_spill] sm:$0xff] }
 0x238   : > { %3091 = vrot.lane.b32.xlu0 %v3069_v30, %s4658_s16  ;;  %8557 = vst [vmem:[#allocation77_spill] sm:$0xff] %v6352_v10  ;;  %v1808_v30 = vadd.f32 %v1807_v60, %v1806_v23  ;;  %v6369_v17 = vadd.f32 %v2346_v19, %v2259_v16  ;;  %v6371_v10 = vadd.f32 %v2347_v20, %v2260_v15  ;;  %v8573_v39 = vld [vmem:[#allocation109_spill] sm:$0xff] }
 0x239   : > { %3085 = vrot.lane.b32.xlu1 %v3066_v24, %s4658_s16  ;;  %8560 = vst [vmem:[#allocation90_spill] sm:$0xff] %v6367_v49  ;;  %v1812_v14 = vadd.f32 %v1811_v22, %v1791_v4  ;;  %v1818_v57 = vadd.f32 %v1817_v2, %v1792_v11  ;;  %v1182_v33 = vsel %vm1176_vm3, %v6071_v47, %v6045_v9  ;;  %v8565_v4 = vld [vmem:[#allocation110_spill] sm:$0xff] }
 0x23a   : > { %v6364_v54 = vpop.permute.xlu0 %2395  ;;  %8561 = vst [vmem:[#allocation89_spill] sm:$0xff] %v6369_v17  ;;  %8562 = vst [vmem:[#allocation92_spill] sm:$0xff] %v6371_v10  ;;  %v1247_v23 = vsel %vm1176_vm3, %v5761_v61, %v6209_v31  ;;  %v1433_v24 = vsel %vm1092_vm4, %v5528_v27, %v8563_v44  ;;  %v1802_v34 = vadd.f32 %v1801_v51, %v1800_v21  ;;  %v8566_v61 = vld [vmem:[#allocation13_spill] sm:$0xff]  ;;  %v1809_v21 = vrot.slane %v1808_v30, 1  ;;  %v8579_v10 = vld [vmem:[#allocation87_spill] sm:$0xff] }
 0x23b   : > { %8559 = vst [vmem:[#allocation81_spill] sm:$0xff] %v6364_v54  ;;  %v6385_v15 = vsel %vm1359_vm5, %v8543_v7, %v8564_v62  ;;  %v1198_v22 = vadd.f32 %v1181_v8, %v6166_v1  ;;  %v6388_v16 = vpop.permute.xlu1 %1561  ;;  %v6393_v47 = vsel %vm1359_vm5, %v8564_v62, %v8565_v4  ;;  %v6398_v2 = vsel %vm1359_vm5, %v8565_v4, %v8566_v61  ;;  %v8567_v7 = vld [vmem:[#allocation117_spill] sm:$0xff]  ;;  %v8568_v1 = vld [vmem:[#allocation111_spill] sm:$0xff]  ;;  %v8570_v8 = vld [vmem:[#allocation70_spill] sm:$0xff] }
 0x23c   : > { %v1248_v27 = vsel %vm1176_vm3, %v6209_v31, %v6159_v32  ;;  %v1454_v11 = vadd.f32 %v8567_v7, %v1385_v25  ;;  %v6407_v60 = vsel %vm1359_vm5, %v8566_v61, %v8568_v1  ;;  %v1199_v13 = vadd.f32 %v1182_v33, %v6168_v63  ;;  %v8571_v31 = vld [vmem:[#allocation114_spill] sm:$0xff]  ;;  %v8572_v62 = vld [vmem:[#allocation25_spill] sm:$0xff]  ;;  %v8574_v33 = vld [vmem:[#allocation115_spill] sm:$0xff] }
 0x23d   : > { %v1264_v35 = vadd.f32 %v1247_v23, %v1198_v22  ;;  %3089 = vrot.lane.b32.xlu1 %v6279_v38, %s4658_s16  ;;  %v1813_v51 = vrot.slane %v1812_v14, 2  ;;  %v1819_v20 = vrot.slane %v1818_v57, 2  ;;  %v6417_v25 = vsel %vm1092_vm4, %v8571_v31, %v8570_v8  ;;  %v8575_v23 = vld [vmem:[#allocation93_spill] sm:$0xff]  ;;  %v8581_v17 = vld [vmem:[#allocation120_spill] sm:$0xff] }
 0x23e   : > { %v6410_v19 = vpop.permute.xlu0 %2399  ;;  %v1434_v4 = vsel %vm1092_vm4, %v8563_v44, %v8572_v62  ;;  %v1803_v61 = vrot.slane %v1802_v34, 1  ;;  %v6425_v63 = vsel %vm1092_vm4, %v8572_v62, %v8573_v39  ;;  %v1494_v38 = vsel %vm1092_vm4, %v8575_v23, %v8574_v33  ;;  %v8578_v62 = vld [vmem:[#allocation95_spill] sm:$0xff] }
 0x23f   : > { %8569 = vst [vmem:[#allocation42_spill] sm:$0xff] %v6410_v19  ;;  %v1265_v22 = vadd.f32 %v1248_v27, %v1199_v13  ;;  %v6430_v55 = vpop.permute.xlu1 %2389  ;;  %v6435_v8 = vsel %vm1092_vm4, %v8573_v39, %v8567_v7  ;;  %v6440_v44 = vsel %vm1092_vm4, %v8558_v42, %v8576_v46  ;;  %v1364_v19 = vsel %vm1359_vm5, %v8578_v62, %v8577_v59  ;;  %v8580_v27 = vld [vmem:[#allocation113_spill] sm:$0xff] }
 0x240   : > { %v1515_v54 = vadd.f32 %v8579_v10, %v1454_v11  ;;  %v1810_v23 = vadd.f32 %v1809_v21, %v1808_v30  ;;  %v6449_v13 = vsel %vm1092_vm4, %v8576_v46, %v8580_v27  ;;  %v6454_v39 = vsel %vm1092_vm4, %v8580_v27, %v8581_v17  ;;  %v8582_v30 = vld [vmem:[#allocation123_spill] sm:$0xff] }
 0x241   : > { %v1381_v7 = vadd.f32 %v1364_v19, %v1264_v35  ;;  %3093 = vrot.lane.b32.xlu1 %v6283_v28, %s4658_s16  ;;  %v6460_v62 = vadd.f32 %v1813_v51, %v1812_v14  ;;  %v6462_v11 = vadd.f32 %v1819_v20, %v1818_v57  ;;  %v6467_v46 = vsel %vm1092_vm4, %v8581_v17, %v8571_v31  ;;  %v8583_v35 = vld [vmem:[#allocation122_spill] sm:$0xff]  ;;  %v8584_v28 = vld [vmem:[#allocation103_spill] sm:$0xff]  ;;  %v8587_v31 = vld [vmem:[#allocation124_spill] sm:$0xff] }
 0x242   : > { %v6456_v42 = vpop.permute.xlu0 %2444  ;;  %v1365_v21 = vsel %vm1359_vm5, %v8577_v59, %v8582_v30  ;;  %v1804_v27 = vadd.f32 %v1803_v61, %v1802_v34  ;;  %v6475_v19 = vsel %vm1359_vm5, %v8551_v45, %v8583_v35  ;;  %v1183_v57 = vsel %vm1176_vm3, %v6045_v9, %v8584_v28  ;;  %v8586_v20 = vld [vmem:[#allocation119_spill] sm:$0xff]  ;;  %v8588_v61 = vld [vmem:[#allocation121_spill] sm:$0xff] }
 0x243   : > { %v1382_v14 = vadd.f32 %v1365_v21, %v1265_v22  ;;  %v6480_v51 = vpop.permute.xlu1 %2393  ;;  %v6485_v17 = vsel %vm1359_vm5, %v8583_v35, %v8586_v20  ;;  %v6490_v59 = vsel %vm1359_vm5, %v8586_v20, %v8587_v31  ;;  %v1184_v45 = vsel %vm1176_vm3, %v8584_v28, %v6063_v5  ;;  %v8592_v20 = vld [vmem:[#allocation3_spill] sm:$0xff] }
 0x244   : > { %8585 = vst [vmem:[#allocation84_spill] sm:$0xff] %v6480_v51  ;;  %v1590_v34 = vadd.f32 %v6259_v40, %v1515_v54  ;;  %v1855_v9 = vmul.f32 0.125, %v1810_v23  ;;  %v6499_v22 = vsel %vm1359_vm5, %v8587_v31, %v8588_v61  ;;  %v1249_v21 = vsel %vm1176_vm3, %v6159_v32, %v6245_v6  ;;  %v8590_v31 = vld [vmem:[#allocation127_spill] sm:$0xff] }
 0x245   : > { %v1450_v35 = vadd.f32 %v1433_v24, %v1381_v7  ;;  %v1200_v5 = vadd.f32 %v1183_v57, %v6180_v12  ;;  %v1250_v54 = vsel %vm1176_vm3, %v6245_v6, %v6193_v53  ;;  %v6512_v23 = vmul.f32 0.125, %v1804_v27  ;;  %v8593_v57 = vld [vmem:[#allocation14_spill] sm:$0xff]  ;;  %v8594_v53 = vld [vmem:[#allocation105_spill] sm:$0xff] }
 0x246   : > { %v6504_v51 = vpop.permute.xlu0 %2448  ;;  %v1201_v28 = vadd.f32 %v1184_v45, %v6189_v0  ;;  %v2114_v32 = vsel %vm1176_vm3, %v8537_v56, %v8590_v31  ;;  %v1451_v24 = vadd.f32 %v1434_v4, %v1382_v14  ;;  %v2115_v49 = vsel %vm1176_vm3, %v8590_v31, %v8592_v20  ;;  %v8595_v27 = vld [vmem:[#allocation125_spill] sm:$0xff]  ;;  %v8598_v31 = vld [vmem:[#allocation98_spill] sm:$0xff] }
 0x247   : > { %8589 = vst [vmem:[#allocation83_spill] sm:$0xff] %v6504_v51  ;;  %v6518_v7 = vpop.permute.xlu1 %2397  ;;  %v1266_v12 = vadd.f32 %v1249_v21, %v1200_v5  ;;  %v1651_v51 = vadd.f32 %v8593_v57, %v1590_v34  ;;  %v1569_v6 = vsel %vm1359_vm5, %v8594_v53, %v6348_v50  ;;  %v1495_v0 = vsel %vm1092_vm4, %v8574_v33, %v8595_v27  ;;  %v8596_v56 = vld [vmem:[#allocation5_spill] sm:$0xff]  ;;  %v8599_v53 = vld [vmem:[#allocation131_spill] sm:$0xff] }
 0x248   : > { %8591 = vst [vmem:[#allocation85_spill] sm:$0xff] %v6518_v7  ;;  %v2135_v4 = vadd.f32 %v8596_v56, %v6191_v52  ;;  %v1267_v14 = vadd.f32 %v1250_v54, %v1201_v28  ;;  %v1511_v45 = vadd.f32 %v1494_v38, %v1450_v35  ;;  %v1366_v34 = vsel %vm1359_vm5, %v8582_v30, %v8598_v31  ;;  %v8600_v54 = vld [vmem:[#allocation128_spill] sm:$0xff] }
 0x249   : > { %v2131_v21 = vadd.f32 %v2114_v32, %v6215_v36  ;;  %v6539_v5 = vadd.f32 %v6312_v41, %v1651_v51  ;;  %v1570_v33 = vsel %vm1359_vm5, %v6348_v50, %v6229_v58  ;;  %v2132_v52 = vadd.f32 %v2115_v49, %v8599_v53  ;;  %v8601_v49 = vld [vmem:[#allocation126_spill] sm:$0xff]  ;;  %v8602_v32 = vld [vmem:[#allocation100_spill] sm:$0xff] }
 0x24a   : > { %v6532_v7 = vpop.permute.xlu0 %2452  ;;  %v2116_v38 = vsel %vm1176_vm3, %v8592_v20, %v8600_v54  ;;  %v1512_v35 = vadd.f32 %v1495_v0, %v1451_v24  ;;  %v1586_v28 = vadd.f32 %v1569_v6, %v1511_v45  ;;  %v6550_v30 = vadd.f32 1e-06, %v1855_v9 }
 0x24b   : > { %8597 = vst [vmem:[#allocation86_spill] sm:$0xff] %v6532_v7  ;;  %v6548_v7 = vpop.permute.xlu1 %2401  ;;  %v1367_v36 = vsel %vm1359_vm5, %v8598_v31, %v5978_v48  ;;  %v2117_v50 = vsel %vm1176_vm3, %v8600_v54, %v8596_v56  ;;  %v1383_v51 = vadd.f32 %v1366_v34, %v1266_v12  ;;  %v1630_v53 = vsel %vm1092_vm4, %v8602_v32, %v8601_v49  ;;  %v8603_v56 = vld [vmem:[#allocation11_spill] sm:$0xff]  ;;  %v8605_v54 = vld [vmem:[#allocation12_spill] sm:$0xff] }
 0x24c   : > { %v2200_v20 = vadd.f32 %v8568_v1, %v2135_v4  ;;  %v1384_v24 = vadd.f32 %v1367_v36, %v1267_v14  ;;  %v1587_v6 = vadd.f32 %v1570_v33, %v1512_v35  ;;  %v2196_v9 = vadd.f32 %v6385_v15, %v2131_v21  ;;  %v8604_v15 = vld [vmem:[#allocation6_spill] sm:$0xff] }
 0x24d   : > { %v2133_v45 = vadd.f32 %v2116_v38, %v6240_v26  ;;  %v2419_v48 = vadd.f32 %v6295_v37, %v6362_v3  ;;  %v1763_v12 = vsel %vm1092_vm4, %v6539_v5, 0.0  ;;  %v1496_v31 = vsel %vm1092_vm4, %v8595_v27, %v8603_v56  ;;  %v8606_v27 = vld [vmem:[#allocation108_spill] sm:$0xff] }
 0x24e   : > { %v6562_v0 = vpop.permute.xlu0 %2456  ;;  %v2197_v1 = vadd.f32 %v6393_v47, %v2132_v52  ;;  %v2134_v4 = vadd.f32 %v2117_v50, %v6242_v29  ;;  %v1647_v14 = vadd.f32 %v1630_v53, %v1586_v28  ;;  %v1497_v26 = vsel %vm1092_vm4, %v8603_v56, %v8579_v10 }
 0x24f   : > { %v2447_v34 = vpop.permute.xlu1 %2446  ;;  %v1631_v3 = vsel %vm1092_vm4, %v8601_v49, %v8604_v15  ;;  %v1452_v21 = vadd.f32 %v6425_v63, %v1383_v51  ;;  %v2476_v33 = vadd.f32 %v6456_v42, %v2419_v48  ;;  %v1691_v47 = vsel %vm1092_vm4, %v8606_v27, %v8605_v54 }
 0x250   : > { %v1764_v52 = vrot.slane %v1763_v12, 4  ;;  %v1648_v29 = vadd.f32 %v1631_v3, %v1587_v6  ;;  %v1453_v38 = vadd.f32 %v6435_v8, %v1384_v24  ;;  %v2198_v10 = vadd.f32 %v6398_v2, %v2133_v45 }
 0x251   : > { %v2261_v28 = vadd.f32 %v6475_v19, %v2196_v9  ;;  %v2265_v36 = vadd.f32 %v8588_v61, %v2200_v20  ;;  %v2199_v50 = vadd.f32 %v6407_v60, %v2134_v4  ;;  %v6596_v51 = vadd.f32 %v1691_v47, %v1647_v14 }
 0x252   : > { %v6587_v35 = vpop.permute.xlu0 %2513  ;;  %v1571_v49 = vsel %vm1359_vm5, %v6229_v58, %v6388_v16  ;;  %v2262_v8 = vadd.f32 %v6485_v17, %v2197_v1  ;;  %v1692_v2 = vsel %vm1092_vm4, %v8605_v54, %v6273_v43  ;;  %v1513_v19 = vadd.f32 %v1496_v31, %v1452_v21 }
 0x253   : > { %v6593_v63 = vadd.f32 %v6587_v35, %v2476_v33  ;;  %v2451_v32 = vpop.permute.xlu1 %2450  ;;  %v1572_v61 = vsel %vm1359_vm5, %v6388_v16, %v6259_v40  ;;  %v1765_v53 = vadd.f32 %v1764_v52, %v1763_v12  ;;  %v6610_v20 = vadd.f32 %v1692_v2, %v1648_v29  ;;  %v8610_v29 = vld [vmem:[#allocation16_spill] sm:$0xff] }
 0x254   : > { %v1514_v24 = vadd.f32 %v1497_v26, %v1453_v38  ;;  %v8607_v17 = vrot.slane %v6460_v62, 1  ;;  %v8608_v45 = vrot.slane %v6462_v11, 1  ;;  %v1588_v40 = vadd.f32 %v1571_v49, %v1513_v19  ;;  %v8613_v49 = vld [vmem:[#allocation89_spill] sm:$0xff]  ;;  %v8614_v2 = vld [vmem:[#allocation84_spill] sm:$0xff] }
 0x255   : > { %v2558_v60 = vsel %vm2557_vm7, %v6593_v63, 0.0  ;;  %v2263_v16 = vadd.f32 %v6490_v59, %v2198_v10  ;;  %v1739_v12 = vrot.slane %v6596_v51, 4  ;;  %v2264_v31 = vadd.f32 %v6499_v22, %v2199_v50  ;;  %v8611_v10 = vld [vmem:[#allocation83_spill] sm:$0xff]  ;;  %v8615_v19 = vld [vmem:[#allocation81_spill] sm:$0xff] }
 0x256   : > { %v2559_v58 = vrot.slane %v2558_v60, 4  ;;  %v6612_v6 = vpop.permute.xlu0 %2517  ;;  %v6617_v9 = vadd.f32 %v8607_v17, %v6460_v62  ;;  %v6622_v48 = vadd.f32 %v8608_v45, %v6462_v11  ;;  %v1589_v56 = vadd.f32 %v1572_v61, %v1514_v24  ;;  %v8609_v62 = vld [vmem:[#allocation106_spill] sm:$0xff] }
 0x257   : > { %v2455_v4 = vpop.permute.xlu1 %2454  ;;  %v6628_v14 = vadd.f32 1e-06, %v6512_v23  ;;  %v1632_v26 = vsel %vm1092_vm4, %v8604_v15, %v8609_v62  ;;  %v1633_v11 = vsel %vm1092_vm4, %v8609_v62, %v8593_v57  ;;  %v6637_v59 = vadd.f32 %v6417_v25, %v2265_v36  ;;  %v8612_v36 = vld [vmem:[#allocation90_spill] sm:$0xff] }
 0x258   : > { %v2560_v1 = vadd.f32 %v2559_v58, %v2558_v60  ;;  %v1766_v3 = vrot.slane %v1765_v53, 2  ;;  %v1745_v21 = vrot.slane %v6610_v20, 4  ;;  %v2366_v22 = vadd.f32 %v6440_v44, %v2261_v28  ;;  %v8616_v45 = vld [vmem:[#allocation86_spill] sm:$0xff] }
 0x259   : > { %v2367_v33 = vadd.f32 %v6449_v13, %v2262_v8  ;;  %v1649_v23 = vadd.f32 %v1632_v26, %v1588_v40  ;;  %v2403_v54 = vsel %vm1359_vm5, %v6295_v37, %v6430_v55  ;;  %v2404_v15 = vsel %vm1359_vm5, %v6430_v55, %v6330_v18 }
 0x25a   : > { %v2561_v57 = vrot.slane %v2560_v1, 2  ;;  %v6649_v25 = vadd.f32 %v1739_v12, %v6596_v51  ;;  %v1650_v27 = vadd.f32 %v1633_v11, %v1589_v56  ;;  %v2368_v47 = vadd.f32 %v6454_v39, %v2263_v16  ;;  %v2522_v13 = vpop.permute.xlu0 %2521  ;;  %v8617_v12 = vld [vmem:[#allocation92_spill] sm:$0xff] }
 0x25b   : > { %v6653_v44 = vadd.f32 %v6467_v46, %v2264_v31  ;;  %v6655_v52 = vpop.permute.xlu1 %2458  ;;  %v1693_v37 = vsel %vm1092_vm4, %v6273_v43, %v8610_v29  ;;  %v1694_v55 = vsel %vm1092_vm4, %v8610_v29, %v6312_v41  ;;  %v2460_v38 = vsel %vm1359_vm5, %v6456_v42, %v2447_v34 }
 0x25c   : > { %v2461_v39 = vsel %vm1359_vm5, %v2447_v34, %v8611_v10  ;;  %v6667_v28 = vadd.f32 %v1766_v3, %v1765_v53  ;;  %v6670_v46 = vadd.f32 %v1745_v21, %v6610_v20  ;;  %v2420_v50 = vadd.f32 %v2403_v54, %v8612_v36  ;;  %v8618_v3 = vld [vmem:[#allocation85_spill] sm:$0xff]  ;;  %v8619_v21 = vld [vmem:[#allocation42_spill] sm:$0xff] }
 0x25d   : > { %v2421_v8 = vadd.f32 %v2404_v15, %v8613_v49  ;;  %v6674_v43 = vadd.f32 %v1693_v37, %v1649_v23  ;;  %v2405_v41 = vsel %vm1359_vm5, %v6330_v18, %v8614_v2  ;;  %v2406_v42 = vsel %vm1359_vm5, %v8614_v2, %v8615_v19 }
 0x25e   : > { %v2562_v34 = vadd.f32 %v2561_v57, %v2560_v1  ;;  %v1741_v61 = vrot.slane %v6649_v25, 2  ;;  %v6683_v60 = vadd.f32 %v1694_v55, %v1650_v27  ;;  %v2477_v53 = vadd.f32 %v2460_v38, %v2420_v50  ;;  %v2526_v1 = vpop.permute.xlu0 %2525 }
 0x25f   : > { %v2478_v24 = vadd.f32 %v2461_v39, %v2421_v8  ;;  %v2516_v58 = vpop.permute.xlu1 %2515  ;;  %v2462_v17 = vsel %vm1359_vm5, %v8611_v10, %v2451_v32  ;;  %v2463_v40 = vsel %vm1359_vm5, %v2451_v32, %v8616_v45  ;;  %v2422_v56 = vadd.f32 %v2405_v41, %v8617_v12 }
 0x260   : > { %v2531_v18 = vsel %vm1092_vm4, %v6587_v35, %v2516_v58  ;;  %v2532_v16 = vsel %vm1092_vm4, %v2516_v58, %v6612_v6  ;;  %v2423_v31 = vadd.f32 %v2406_v42, %v2366_v22  ;;  %v1747_v11 = vrot.slane %v6670_v46, 2 }
 0x261   : > { %v6694_v62 = vadd.f32 %v2531_v18, %v2477_v53  ;;  %v6696_v26 = vadd.f32 %v2532_v16, %v2478_v24  ;;  %v2407_v32 = vsel %vm1359_vm5, %v8615_v19, %v8618_v3  ;;  %v2408_v35 = vsel %vm1359_vm5, %v8618_v3, %v8619_v21 }
 0x262   : > { %v2563_v23 = vrot.slane %v2562_v34, 1  ;;  %v2479_v54 = vadd.f32 %v2462_v17, %v2422_v56  ;;  %v2480_v15 = vadd.f32 %v2463_v40, %v2423_v31  ;;  %v2464_v29 = vsel %vm1359_vm5, %v8616_v45, %v2455_v4  ;;  %v2530_v53 = vpop.permute.xlu0 %2529 }
 0x263   : > { %v2565_v22 = vrot.slane %v6694_v62, 4  ;;  %v2571_v57 = vrot.slane %v6696_v26, 4  ;;  %v2520_v27 = vpop.permute.xlu1 %2519  ;;  %v2465_v37 = vsel %vm1359_vm5, %v2455_v4, %v6562_v0  ;;  %v2424_v10 = vadd.f32 %v2407_v32, %v2367_v33 }
 0x264   : > { %v2533_v55 = vsel %vm1092_vm4, %v6612_v6, %v2520_v27  ;;  %v2534_v38 = vsel %vm1092_vm4, %v2520_v27, %v2522_v13  ;;  %v2425_v39 = vadd.f32 %v2408_v35, %v2368_v47  ;;  %v2409_v49 = vsel %vm1359_vm5, %v8619_v21, %v6548_v7 }
 0x265   : > { %v2566_v36 = vadd.f32 %v2565_v22, %v6694_v62  ;;  %v2572_v50 = vadd.f32 %v2571_v57, %v6696_v26  ;;  %v2564_v8 = vadd.f32 %v2563_v23, %v2562_v34  ;;  %v6719_v2 = vadd.f32 %v2533_v55, %v2479_v54 }
 0x266   : > { %v6721_v41 = vadd.f32 %v2534_v38, %v2480_v15  ;;  %v2481_v4 = vadd.f32 %v2464_v29, %v2424_v10  ;;  %v2482_v19 = vadd.f32 %v2465_v37, %v2425_v39  ;;  %v2466_v47 = vsel %vm1359_vm5, %v6562_v0, %v6655_v52  ;;  %v6740_v29 = vpop.permute.xlu0 %2864 }
 0x267   : > { %v2567_v6 = vrot.slane %v2566_v36, 2  ;;  %v2573_v42 = vrot.slane %v2572_v50, 2  ;;  %v2524_v33 = vpop.permute.xlu1 %2523  ;;  %v2577_v24 = vrot.slane %v6719_v2, 4  ;;  %v2614_v16 = vmul.f32 0.125, %v2564_v8  ;;  %8620 = vst [vmem:[#allocation107_spill] sm:$0xff] %v6740_v29 }
 0x268   : > { %v2583_v58 = vrot.slane %v6721_v41, 4  ;;  %v2535_v34 = vsel %vm1092_vm4, %v2522_v13, %v2524_v33  ;;  %v2536_v40 = vsel %vm1092_vm4, %v2524_v33, %v2526_v1  ;;  %v2426_v0 = vadd.f32 %v2409_v49, %v6653_v44 }
 0x269   : > { %v2568_v17 = vadd.f32 %v2567_v6, %v2566_v36  ;;  %v2574_v45 = vadd.f32 %v2573_v42, %v2572_v50  ;;  %v6730_v18 = vadd.f32 %v2535_v34, %v2481_v4  ;;  %v2578_v12 = vadd.f32 %v2577_v24, %v6719_v2 }
 0x26a   : > { %v2584_v56 = vadd.f32 %v2583_v58, %v6721_v41  ;;  %v6734_v31 = vadd.f32 %v2536_v40, %v2482_v19  ;;  %v1757_v35 = vrot.slane %v6683_v60, 4  ;;  %v2483_v22 = vadd.f32 %v2466_v47, %v2426_v0  ;;  %v6769_v34 = vpop.permute.xlu0 %2868 }
 0x26b   : > { %v2569_v3 = vrot.slane %v2568_v17, 1  ;;  %v2575_v32 = vrot.slane %v2574_v45, 1  ;;  %v2589_v21 = vrot.slane %v6730_v18, 4  ;;  %v2528_v13 = vpop.permute.xlu1 %2527  ;;  %v2579_v23 = vrot.slane %v2578_v12, 2 }
 0x26c   : > { %v2585_v54 = vrot.slane %v2584_v56, 2  ;;  %v2595_v15 = vrot.slane %v6734_v31, 4  ;;  %v6744_v44 = vsub.f32 %v6593_v63, %v2614_v16  ;;  %v2537_v10 = vsel %vm1092_vm4, %v2526_v1, %v2528_v13 }
 0x26d   : > { %v2570_v57 = vadd.f32 %v2569_v3, %v2568_v17  ;;  %v2576_v27 = vadd.f32 %v2575_v32, %v2574_v45  ;;  %v2590_v37 = vadd.f32 %v2589_v21, %v6730_v18  ;;  %v2580_v55 = vadd.f32 %v2579_v23, %v2578_v12 }
 0x26e   : > { %v2596_v38 = vadd.f32 %v2595_v15, %v6734_v31  ;;  %v2586_v50 = vadd.f32 %v2585_v54, %v2584_v56  ;;  %v1751_v8 = vrot.slane %v6674_v43, 4  ;;  %v2427_v4 = vadd.f32 %v6548_v7, %v6637_v59 }
 0x26f   : > { %v2615_v39 = vmul.f32 0.125, %v2570_v57  ;;  %v2616_v36 = vmul.f32 0.125, %v2576_v27  ;;  %v2591_v49 = vrot.slane %v2590_v37, 2  ;;  %v2581_v19 = vrot.slane %v2580_v55, 1  ;;  %v6772_v45 = vpop.permute.xlu1 %2866 }
 0x270   : > { %v2597_v6 = vrot.slane %v2596_v38, 2  ;;  %v6757_v47 = vadd.f32 %v2537_v10, %v2483_v22  ;;  %v1742_v1 = vadd.f32 %v1741_v61, %v6649_v25  ;;  %v1748_v24 = vadd.f32 %v1747_v11, %v6670_v46  ;;  %8621 = vst [vmem:[#allocation112_spill] sm:$0xff] %v6772_v45 }
 0x271   : > { %v6752_v42 = vsub.f32 %v6694_v62, %v2615_v39  ;;  %v6755_v63 = vsub.f32 %v6696_v26, %v2616_v36  ;;  %v2592_v33 = vadd.f32 %v2591_v49, %v2590_v37  ;;  %v1758_v7 = vadd.f32 %v1757_v35, %v6683_v60 }
 0x272   : > { %v2582_v59 = vadd.f32 %v2581_v19, %v2580_v55  ;;  %v2632_v62 = vmul.f32 %v6744_v44, %v6744_v44  ;;  %v2484_v26 = vadd.f32 %v6655_v52, %v2427_v4  ;;  %v2587_v58 = vrot.slane %v2586_v50, 1  ;;  %v6793_v55 = vpop.permute.xlu0 %2872 }
 0x273   : > { %v2538_v17 = vsel %vm1092_vm4, %v2528_v13, %v2530_v53  ;;  %v2633_v25 = vmul.f32 %v6752_v42, %v6752_v42  ;;  %v2634_v46 = vmul.f32 %v6755_v63, %v6755_v63  ;;  %v2598_v11 = vadd.f32 %v2597_v6, %v2596_v38  ;;  %8622 = vst [vmem:[#allocation110_spill] sm:$0xff] %v6793_v55  ;;  %v6795_v38 = vpop.permute.xlu1 %2870 }
 0x274   : > { %v2617_v61 = vmul.f32 0.125, %v2582_v59  ;;  %v1768_v40 = vrot.slane %v6667_v28, 1  ;;  %v1752_v16 = vadd.f32 %v1751_v8, %v6674_v43  ;;  %v2593_v52 = vrot.slane %v2592_v33, 1 }
 0x275   : > { %v2601_v12 = vrot.slane %v6757_v47, 4  ;;  %v1743_v56 = vrot.slane %v1742_v1, 1  ;;  %v1749_v0 = vrot.slane %v1748_v24, 1  ;;  %v6784_v3 = vadd.f32 %v2538_v17, %v2484_v26 }
 0x276   : > { %v6782_v53 = vsub.f32 %v6719_v2, %v2617_v61  ;;  %v6787_v32 = vmul.f32 0.125, %v6617_v9  ;;  %v1759_v21 = vrot.slane %v1758_v7, 2  ;;  %v2588_v13 = vadd.f32 %v2587_v58, %v2586_v50 }
 0x277   : > { %v2602_v35 = vadd.f32 %v2601_v12, %v6757_v47  ;;  %v2641_v23 = vsel %vm2557_vm7, %v2632_v62, 0.0  ;;  %v2648_v54 = vrot.slane %v2633_v25, 4  ;;  %v2654_v15 = vrot.slane %v2634_v46, 4 }
 0x278   : > { %v2599_v22 = vrot.slane %v2598_v11, 1  ;;  %v1753_v57 = vrot.slane %v1752_v16, 2  ;;  %v2635_v27 = vmul.f32 %v6782_v53, %v6782_v53  ;;  %v2594_v2 = vadd.f32 %v2593_v52, %v2592_v33 }
 0x279   : > { %v2603_v37 = vrot.slane %v2602_v35, 2  ;;  %v1769_v9 = vadd.f32 %v1768_v40, %v6667_v28  ;;  %v1744_v10 = vadd.f32 %v1743_v56, %v1742_v1  ;;  %v1750_v39 = vadd.f32 %v1749_v0, %v1748_v24  ;;  %v6803_v56 = vpop.permute.xlu0 %2876 }
 0x27a   : > { %v2607_v36 = vsel %vm1359_vm5, %v6784_v3, 0.0  ;;  %v1760_v50 = vadd.f32 %v1759_v21, %v1758_v7  ;;  %v2642_v49 = vrot.slane %v2641_v23, 4  ;;  %v2618_v8 = vmul.f32 0.125, %v2588_v13  ;;  %8623 = vst [vmem:[#allocation13_spill] sm:$0xff] %v6803_v56 }
 0x27b   : > { %v2604_v4 = vadd.f32 %v2603_v37, %v2602_v35  ;;  %v2649_v19 = vadd.f32 %v2648_v54, %v2633_v25  ;;  %v2655_v6 = vadd.f32 %v2654_v15, %v2634_v46  ;;  %v2600_v59 = vadd.f32 %v2599_v22, %v2598_v11  ;;  %v6805_v25 = vpop.permute.xlu1 %2874 }
 0x27c   : > { %v2608_v33 = vrot.slane %v2607_v36, 4  ;;  %v1754_v62 = vadd.f32 %v1753_v57, %v1752_v16  ;;  %v2660_v26 = vrot.slane %v2635_v27, 4  ;;  %v2619_v58 = vmul.f32 0.125, %v2594_v2  ;;  %8624 = vst [vmem:[#allocation117_spill] sm:$0xff] %v6805_v25 }
 0x27d   : > { %v2605_v17 = vrot.slane %v2604_v4, 1  ;;  %v1779_v61 = vmul.f32 0.125, %v1769_v9  ;;  %v1775_v52 = vmul.f32 0.125, %v1744_v10  ;;  %v1776_v28 = vmul.f32 0.125, %v1750_v39 }
 0x27e   : > { %v2609_v1 = vadd.f32 %v2608_v33, %v2607_v36  ;;  %v1761_v24 = vrot.slane %v1760_v50, 1  ;;  %v2643_v40 = vadd.f32 %v2642_v49, %v2641_v23  ;;  %v6801_v12 = vsub.f32 %v6721_v41, %v2618_v8  ;;  %v6829_v36 = vpop.permute.xlu0 %2921 }
 0x27f   : > { %v2606_v7 = vadd.f32 %v2605_v17, %v2604_v4  ;;  %v2650_v46 = vrot.slane %v2649_v19, 2  ;;  %v2656_v11 = vrot.slane %v2655_v6, 2  ;;  %v2620_v16 = vmul.f32 0.125, %v2600_v59  ;;  %8625 = vst [vmem:[#allocation111_spill] sm:$0xff] %v6829_v36 }
 0x280   : > { %v2610_v0 = vrot.slane %v2609_v1, 2  ;;  %v6808_v21 = vmul.f32 0.125, %v6622_v48  ;;  %v1755_v13 = vrot.slane %v1754_v62, 1  ;;  %v2661_v35 = vadd.f32 %v2660_v26, %v2635_v27 }
 0x281   : > { %v6811_v54 = vsub.f32 %v6730_v18, %v2619_v58  ;;  %v6814_v41 = vsub.f32 %v6596_v51, %v1775_v52  ;;  %v6817_v23 = vsub.f32 %v6610_v20, %v1776_v28  ;;  %v2621_v22 = vmul.f32 0.125, %v2606_v7 }
 0x282   : > { %v2611_v15 = vadd.f32 %v2610_v0, %v2609_v1  ;;  %v6820_v57 = vsub.f32 %v6539_v5, %v1779_v61  ;;  %v1762_v2 = vadd.f32 %v1761_v24, %v1760_v50  ;;  %v2644_v37 = vrot.slane %v2643_v40, 2  ;;  %v6831_v5 = vpop.permute.xlu1 %2878 }
 0x283   : > { %v2636_v48 = vmul.f32 %v6801_v12, %v6801_v12  ;;  %v2651_v27 = vadd.f32 %v2650_v46, %v2649_v19  ;;  %v2657_v9 = vadd.f32 %v2656_v11, %v2655_v6  ;;  %v6825_v18 = vsub.f32 %v6734_v31, %v2620_v16  ;;  %8626 = vst [vmem:[#allocation70_spill] sm:$0xff] %v6831_v5  ;;  %v6856_v46 = vpop.permute.xlu0 %4473 }
 0x284   : > { %v2612_v51 = vrot.slane %v2611_v15, 1  ;;  %v1756_v10 = vadd.f32 %v1755_v13, %v1754_v62  ;;  %v2662_v39 = vrot.slane %v2661_v35, 2  ;;  %v2637_v20 = vmul.f32 %v6811_v54, %v6811_v54 }
 0x285   : > { %4576 = vrsqrt.f32 %v6550_v30  ;;  %v6835_v50 = vadd.f32 1e-06, %v6787_v32  ;;  %v1793_v49 = vmul.f32 %v6814_v41, %v6814_v41  ;;  %v1794_v31 = vmul.f32 %v6817_v23, %v6817_v23 }
 0x286   : > { %v6842_v8 = vsub.f32 %v6757_v47, %v2621_v22  ;;  %v1778_v4 = vmul.f32 0.125, %v1762_v2  ;;  %v2645_v19 = vadd.f32 %v2644_v37, %v2643_v40  ;;  %v2666_v6 = vrot.slane %v2636_v48, 4  ;;  %v6858_v11 = vpop.permute.xlu1 %2923 }
 0x287   : > { %v2613_v59 = vadd.f32 %v2612_v51, %v2611_v15  ;;  %v1797_v33 = vmul.f32 %v6820_v57, %v6820_v57  ;;  %v2652_v30 = vrot.slane %v2651_v27, 1  ;;  %v2658_v62 = vrot.slane %v2657_v9, 1  ;;  %8627 = vst [vmem:[#allocation114_spill] sm:$0xff] %v6858_v11 }
 0x288   : > { %v2638_v32 = vmul.f32 %v6825_v18, %v6825_v18  ;;  %v1777_v26 = vmul.f32 0.125, %v1756_v10  ;;  %v2663_v58 = vadd.f32 %v2662_v39, %v2661_v35  ;;  %v2672_v17 = vrot.slane %v2637_v20, 4 }
 0x289   : > { %v2622_v61 = vmul.f32 0.125, %v2613_v59  ;;  %v1823_v52 = vrot.slane %v1793_v49, 4  ;;  %v1829_v28 = vrot.slane %v1794_v31, 4  ;;  %v2639_v47 = vmul.f32 %v6842_v8, %v6842_v8 }
 0x28a   : > { %v6851_v1 = vsub.f32 %v6683_v60, %v1778_v4  ;;  %v2646_v24 = vrot.slane %v2645_v19, 1  ;;  %v2667_v40 = vadd.f32 %v2666_v6, %v2636_v48  ;;  %v6861_v16 = vsel %vm1092_vm4, %v1797_v33, 0.0 }
 0x28b   : > { %v6854_v7 = vsub.f32 %v6784_v3, %v2622_v61  ;;  %v2653_v0 = vadd.f32 %v2652_v30, %v2651_v27  ;;  %v2659_v13 = vadd.f32 %v2658_v62, %v2657_v9  ;;  %v2678_v35 = vrot.slane %v2638_v32, 4  ;;  %v4479_v62 = vpop.permute.xlu1 %4478 }
 0x28c   : > { %v6864_v15 = vsub.f32 %v6674_v43, %v1777_v26  ;;  %v2664_v60 = vrot.slane %v2663_v58, 1  ;;  %v2673_v22 = vadd.f32 %v2672_v17, %v2637_v20  ;;  %v1824_v3 = vadd.f32 %v1823_v52, %v1793_v49 }
 0x28d   : > { %v2640_v2 = vmul.f32 %v6854_v7, %v6854_v7  ;;  %v6868_v37 = vadd.f32 %v1829_v28, %v1794_v31  ;;  %v2684_v48 = vrot.slane %v2639_v47, 4  ;;  %v4476_v51 = vunpack.i.h.bf16 %v6856_v46 }
 0x28e   : > { %v1796_v27 = vmul.f32 %v6851_v1, %v6851_v1  ;;  %v2647_v9 = vadd.f32 %v2646_v24, %v2645_v19  ;;  %v2668_v39 = vrot.slane %v2667_v40, 2  ;;  %v8282_v43 = vunpack.i.l.bf16 %v6856_v46 }
 0x28f   : > { %v6871_v10 = vpop.eup %4576  ;;  %v2698_v4 = vmul.f32 0.125, %v2653_v0  ;;  %v2699_v6 = vmul.f32 0.125, %v2659_v13  ;;  %v2679_v59 = vadd.f32 %v2678_v35, %v2638_v32  ;;  %v2665_v49 = vadd.f32 %v2664_v60, %v2663_v58  ;;  %v4484_v32 = vpop.permute.xlu0 %4483  ;;  %v8628_v58 = vld [vmem:[#allocation99_spill] sm:$0xff] }
 0x290   : > { %v2674_v31 = vrot.slane %v2673_v22, 2  ;;  %v2690_v33 = vsel %vm1359_vm5, %v2640_v2, 0.0  ;;  %v3153_v30 = vsel %vm3146_vm8, %v8282_v43, %v4476_v51  ;;  %v1825_v26 = vrot.slane %v1824_v3, 2 }
 0x291   : > { %v1831_v19 = vrot.slane %v6868_v37, 2  ;;  %v1795_v17 = vmul.f32 %v6864_v15, %v6864_v15  ;;  %v2685_v61 = vadd.f32 %v2684_v48, %v2639_v47  ;;  %v1841_v52 = vrot.slane %v1796_v27, 4 }
 0x292   : > { %v2697_v28 = vmul.f32 0.125, %v2647_v9  ;;  %v2669_v24 = vadd.f32 %v2668_v39, %v2667_v40  ;;  %v3170_v0 = vmul.f32 %v3153_v30, %v8628_v58  ;;  %v2707_v13 = vadd.f32 1e-06, %v2698_v4  ;;  %v8629_v39 = vld [vmem:[#allocation104_spill] sm:$0xff]  ;;  %v4489_v4 = vpop.permute.xlu1 %4488 }
 0x293   : > { %v2708_v35 = vadd.f32 1e-06, %v2699_v6  ;;  %v2680_v60 = vrot.slane %v2679_v59, 2  ;;  %v2691_v2 = vrot.slane %v2690_v33, 4  ;;  %v2700_v20 = vmul.f32 0.125, %v2665_v49 }
 0x294   : > { %v2675_v43 = vadd.f32 %v2674_v31, %v2673_v22  ;;  %3195 = vrot.lane.b32.xlu1 %v3170_v0, %s4668_s7  ;;  %v4481_v5 = vunpack.i.h.bf16 %v4479_v62  ;;  %v4480_v56 = vunpack.i.l.bf16 %v4479_v62  ;;  %v1835_v36 = vrot.slane %v1795_v17, 4  ;;  %v8630_v62 = vld [vmem:[#allocation101_spill] sm:$0xff] }
 0x295   : > { %v2686_v29 = vrot.slane %v2685_v61, 2  ;;  %v4486_v25 = vunpack.i.h.bf16 %v4484_v32  ;;  %v4485_v47 = vunpack.i.l.bf16 %v4484_v32  ;;  %v1842_v48 = vadd.f32 %v1841_v52, %v1796_v27 }
 0x296   : > { %v2706_v9 = vadd.f32 1e-06, %v2697_v28  ;;  %v3147_v40 = vsel %vm3146_vm8, %v4480_v56, %v4481_v5  ;;  %v3163_v30 = vmul.f32 %v4480_v56, %v8629_v39  ;;  %4578 = vrsqrt.f32 %v2708_v35  ;;  %v8631_v56 = vld [vmem:[#allocation20_spill] sm:$0xff]  ;;  %v8635_v39 = vld [vmem:[#allocation77_spill] sm:$0xff] }
 0x297   : > { %v2670_v6 = vrot.slane %v2669_v24, 1  ;;  %v2681_v58 = vadd.f32 %v2680_v60, %v2679_v59  ;;  %v2692_v49 = vadd.f32 %v2691_v2, %v2690_v33  ;;  %4580 = vrsqrt.f32 %v2707_v13 }
 0x298   : > { %v2709_v22 = vadd.f32 1e-06, %v2700_v20  ;;  %v2676_v31 = vrot.slane %v2675_v43, 1  ;;  %3181 = vrot.lane.b32.xlu0 %v3163_v30, %s4668_s7  ;;  %v3164_v0 = vmul.f32 %v3147_v40, %v8630_v62  ;;  %v2687_v55 = vadd.f32 %v2686_v29, %v2685_v61  ;;  %v8632_v29 = vld [vmem:[#allocation31_spill] sm:$0xff] }
 0x299   : > { %v3149_v27 = vsel %vm3146_vm8, %v4485_v47, %v4486_v25  ;;  %v4491_v52 = vunpack.i.h.bf16 %v4489_v4  ;;  %v4490_v28 = vunpack.i.l.bf16 %v4489_v4  ;;  %v1826_v32 = vadd.f32 %v1825_v26, %v1824_v3  ;;  %v8637_v4 = vld [vmem:[#allocation19_spill] sm:$0xff] }
 0x29a   : > { %v1836_v11 = vadd.f32 %v1835_v36, %v1795_v17  ;;  %4582 = vrsqrt.f32 %v2706_v9  ;;  %v3171_v35 = vmul.f32 %v4476_v51, %v8631_v56  ;;  %3183 = vrot.lane.b32.xlu1 %v3164_v0, %s4668_s7  ;;  %v2671_v59 = vadd.f32 %v2670_v6, %v2669_v24 }
 0x29b   : > { %v2682_v33 = vrot.slane %v2681_v58, 1  ;;  %v2693_v20 = vrot.slane %v2692_v49, 2  ;;  %v3148_v13 = vsel %vm3146_vm8, %v4481_v5, %v4485_v47  ;;  %v1832_v60 = vadd.f32 %v1831_v19, %v6868_v37  ;;  %v8634_v37 = vld [vmem:[#allocation74_spill] sm:$0xff] }
 0x29c   : > { %v1843_v2 = vrot.slane %v1842_v48, 2  ;;  %3197 = vrot.lane.b32.xlu0 %v3171_v35, %s4668_s7  ;;  %v3166_v61 = vmul.f32 %v3149_v27, %v8632_v29  ;;  %4584 = vrsqrt.f32 %v6835_v50  ;;  %v2677_v36 = vadd.f32 %v2676_v31, %v2675_v43 }
 0x29d   : > { %4586 = vrsqrt.f32 %v2709_v22  ;;  %v2688_v3 = vrot.slane %v2687_v55, 1  ;;  %v3151_v51 = vsel %vm3146_vm8, %v4490_v28, %v4491_v52  ;;  %v8633_v26 = vrot.slane %v6861_v16, 4 }
 0x29e   : > { %v1827_v24 = vrot.slane %v1826_v32, 1  ;;  %v1837_v5 = vrot.slane %v1836_v11, 2  ;;  %3187 = vrot.lane.b32.xlu1 %v3166_v61, %s4668_s7  ;;  %v3165_v19 = vmul.f32 %v3148_v13, %v8634_v37  ;;  %v2701_v47 = vmul.f32 0.125, %v2671_v59 }
 0x29f   : > { %v1849_v17 = vadd.f32 %v8633_v26, %v6861_v16  ;;  %v2683_v9 = vadd.f32 %v2682_v33, %v2681_v58  ;;  %v2694_v40 = vadd.f32 %v2693_v20, %v2692_v49  ;;  %v3150_v50 = vsel %vm3146_vm8, %v4486_v25, %v4490_v28  ;;  %v8636_v16 = vld [vmem:[#allocation72_spill] sm:$0xff] }
 0x2a0   : > { %4588 = vrsqrt.f32 %v6628_v14  ;;  %v1866_v43 = vadd.f32 1e-06, %v6808_v21  ;;  %3185 = vrot.lane.b32.xlu0 %v3165_v19, %s4668_s7  ;;  %v3168_v30 = vmul.f32 %v3151_v51, %v8635_v39  ;;  %v3125_v6 = vmul.f32 %v8637_v4, %v8636_v16  ;;  %v4579_v22 = vpop.eup %4578 }
 0x2a1   : > { %v1833_v31 = vrot.slane %v1832_v60, 1  ;;  %v1844_v62 = vadd.f32 %v1843_v2, %v1842_v48  ;;  %v2702_v0 = vmul.f32 0.125, %v2677_v36  ;;  %v2689_v27 = vadd.f32 %v2688_v3, %v2687_v55  ;;  %v4581_v58 = vpop.eup %4580  ;;  %v8639_v55 = vld [vmem:[#allocation68_spill] sm:$0xff]  ;;  %v8640_v48 = vld [vmem:[#allocation33_spill] sm:$0xff] }
 0x2a2   : > { %v1850_v49 = vrot.slane %v1849_v17, 2  ;;  %v1828_v35 = vadd.f32 %v1827_v24, %v1826_v32  ;;  %v1838_v25 = vadd.f32 %v1837_v5, %v1836_v11  ;;  %3191 = vrot.lane.b32.xlu1 %v3168_v30, %s4668_s7  ;;  %v3167_v14 = vmul.f32 %v3150_v50, %v3125_v6  ;;  %v8641_v32 = vld [vmem:[#allocation75_spill] sm:$0xff] }
 0x2a3   : > { %v2710_v21 = vadd.f32 1e-06, %v2701_v47  ;;  %v2703_v28 = vmul.f32 0.125, %v2683_v9  ;;  %v2695_v59 = vrot.slane %v2694_v40, 1  ;;  %v8638_v33 = vunpack.i.l.bf16 %v6856_v46 }
 0x2a4   : > { %v4583_v13 = vpop.eup %4582  ;;  %v2726_v29 = vmul.f32 %v4579_v22, %v6755_v63  ;;  %3189 = vrot.lane.b32.xlu0 %v3167_v14, %s4668_s7  ;;  %v3233_v2 = vmul.f32 %v8640_v48, %v8639_v55  ;;  %v3127_v11 = vmul.f32 %v8637_v4, %v8641_v32  ;;  %4590 = vrsqrt.f32 %v1866_v43  ;;  %v8643_v43 = vld [vmem:[#allocation27_spill] sm:$0xff]  ;;  %v8646_v14 = vld [vmem:[#allocation102_spill] sm:$0xff] }
 0x2a5   : > { %v3152_v20 = vsel %vm3146_vm8, %v4491_v52, %v8638_v33  ;;  %v1834_v61 = vadd.f32 %v1833_v31, %v1832_v60  ;;  %v1845_v36 = vrot.slane %v1844_v62, 1  ;;  %v2711_v3 = vadd.f32 1e-06, %v2702_v0  ;;  %v8642_v60 = vld [vmem:[#allocation39_spill] sm:$0xff] }
 0x2a6   : > { %v2704_v51 = vmul.f32 0.125, %v2689_v27  ;;  %v4585_v26 = vpop.eup %4584  ;;  %v1851_v46 = vadd.f32 %v1850_v49, %v1849_v17  ;;  %v1858_v24 = vmul.f32 0.125, %v1828_v35  ;;  %v2725_v52 = vmul.f32 %v4581_v58, %v6752_v42  ;;  %3258 = vrot.lane.b32.xlu1 %v3233_v2, %s4657_s11 }
 0x2a7   : > { %v3169_v63 = vmul.f32 %v3152_v20, %v3127_v11  ;;  %v4587_v5 = vpop.eup %4586  ;;  %v1839_v37 = vrot.slane %v1838_v25, 1  ;;  %4592 = vrsqrt.f32 %v2710_v21  ;;  %v2712_v19 = vadd.f32 1e-06, %v2703_v28  ;;  %v8647_v20 = vld [vmem:[#allocation130_spill] sm:$0xff] }
 0x2a8   : > { %v2696_v47 = vadd.f32 %v2695_v59, %v2694_v40  ;;  %v2724_v9 = vmul.f32 %v4583_v13, %v6744_v44  ;;  %v3226_v50 = vmul.f32 %v8640_v48, %v8642_v60  ;;  %v2735_v17 = vmul.f32 %v2726_v29, %v8643_v43 }
 0x2a9   : > { %3193 = vrot.lane.b32.xlu0 %v3169_v63, %s4668_s7  ;;  %v1859_v39 = vmul.f32 0.125, %v1834_v61  ;;  %v1846_v30 = vadd.f32 %v1845_v36, %v1844_v62  ;;  %4594 = vrsqrt.f32 %v2711_v3  ;;  %v2713_v42 = vadd.f32 1e-06, %v2704_v51  ;;  %v8645_v62 = vld [vmem:[#allocation38_spill] sm:$0xff]  ;;  %v8648_v3 = vld [vmem:[#allocation129_spill] sm:$0xff] }
 0x2aa   : > { %v4589_v6 = vpop.eup %4588  ;;  %v1852_v22 = vrot.slane %v1851_v46, 1  ;;  %v2727_v31 = vmul.f32 %v4587_v5, %v6782_v53  ;;  %3244 = vrot.lane.b32.xlu1 %v3226_v50, %s4657_s11  ;;  %v6931_v40 = vmul.f32 0.0, %v8640_v48  ;;  %v2734_v44 = vmul.f32 %v2725_v52, %v8643_v43 }
 0x2ab   : > { %v1867_v0 = vadd.f32 1e-06, %v1858_v24  ;;  %v1840_v27 = vadd.f32 %v1839_v37, %v1838_v25  ;;  %4596 = vrsqrt.f32 %v2712_v19  ;;  %v2705_v58 = vmul.f32 0.125, %v2696_v47 }
 0x2ac   : > { %8644 = vst [vmem:[#allocation25_spill] sm:$0xff] %v6931_v40  ;;  %v2744_v49 = vadd.f32 %v2735_v17, %v8645_v62  ;;  %v2733_v35 = vmul.f32 %v2724_v9, %v8643_v43  ;;  %v1883_v53 = vmul.f32 %v4585_v26, %v8646_v14  ;;  %v1868_v21 = vadd.f32 1e-06, %v1859_v39 }
 0x2ad   : > { %3260 = vrot.lane.b32.xlu0 %v6931_v40, %s4657_s11  ;;  %v1861_v28 = vmul.f32 0.125, %v1846_v30  ;;  %4598 = vrsqrt.f32 %v2713_v42  ;;  %v2743_v25 = vadd.f32 %v2734_v44, %v8645_v62  ;;  %v2736_v33 = vmul.f32 %v2727_v31, %v8643_v43  ;;  %v8678_v40 = vld [vmem:[#allocation64_spill] sm:$0xff] }
 0x2ae   : > { %v4591_v59 = vpop.eup %4590  ;;  %2764 = vrot.lane.b32.xlu1 %v2744_v49, %s4670_s9  ;;  %v1882_v13 = vmul.f32 %v6871_v10, %v8647_v20  ;;  %v1853_v29 = vadd.f32 %v1852_v22, %v1851_v46  ;;  %v1860_v2 = vmul.f32 0.125, %v1840_v27  ;;  %v2714_v11 = vadd.f32 1e-06, %v2705_v58  ;;  %v8649_v46 = vld [vmem:[#allocation73_spill] sm:$0xff] }
 0x2af   : > { %4600 = vrsqrt.f32 %v1867_v0  ;;  %v2742_v61 = vadd.f32 %v2733_v35, %v8645_v62  ;;  %v1897_v36 = vmul.f32 %v8643_v43, %v1883_v53  ;;  %v1881_v51 = vmul.f32 %v4589_v6, %v8648_v3 }
 0x2b0   : > { %v1870_v24 = vadd.f32 1e-06, %v1861_v28  ;;  %4602 = vrsqrt.f32 %v1868_v21  ;;  %v2745_v52 = vadd.f32 %v2736_v33, %v8645_v62  ;;  %v1896_v10 = vmul.f32 %v8643_v43, %v1882_v13 }
 0x2b1   : > { %2762 = vrot.lane.b32.xlu0 %v2743_v25, %s4670_s9  ;;  %v4593_v26 = vpop.eup %4592  ;;  %v1884_v63 = vmul.f32 %v4591_v59, %v8649_v46  ;;  %v1862_v37 = vmul.f32 0.125, %v1853_v29  ;;  %v1869_v19 = vadd.f32 1e-06, %v1860_v2  ;;  %4604 = vrsqrt.f32 %v2714_v11 }
 0x2b2   : > { %2760 = vrot.lane.b32.xlu1 %v2742_v61, %s4670_s9  ;;  %v2728_v47 = vmul.f32 %v4593_v26, %v6801_v12  ;;  %v1911_v9 = vadd.f32 %v8645_v62, %v1897_v36  ;;  %v1895_v50 = vmul.f32 %v8643_v43, %v1881_v51  ;;  %4606 = vrsqrt.f32 %v1870_v24  ;;  %v6992_v26 = vpop.permute.xlu1 %2927 }
 0x2b3   : > { %v4595_v5 = vpop.eup %4594  ;;  %v1910_v30 = vadd.f32 %v8645_v62, %v1896_v10  ;;  %v1898_v42 = vmul.f32 %v8643_v43, %v1884_v63  ;;  %v1871_v22 = vadd.f32 1e-06, %v1862_v37  ;;  %4608 = vrsqrt.f32 %v1869_v19  ;;  %v8650_v63 = vld [vmem:[#allocation43_spill] sm:$0xff] }
 0x2b4   : > { %v2729_v39 = vmul.f32 %v4595_v5, %v6811_v54  ;;  %v1909_v31 = vadd.f32 %v8645_v62, %v1895_v50  ;;  %v2737_v44 = vmul.f32 %v2728_v47, %v8643_v43  ;;  %v3227_v5 = vmul.f32 %v8640_v48, %v8650_v63  ;;  %v8651_v47 = vld [vmem:[#allocation44_spill] sm:$0xff] }
 0x2b5   : > { %2766 = vrot.lane.b32.xlu0 %v2745_v52, %s4670_s9  ;;  %v4597_v17 = vpop.eup %4596  ;;  %v1912_v27 = vadd.f32 %v8645_v62, %v1898_v42  ;;  %4610 = vrsqrt.f32 %v1871_v22  ;;  %v6997_v52 = vpop.permute.xlu0 %2925  ;;  %v8653_v42 = vld [vmem:[#allocation67_spill] sm:$0xff]  ;;  %v8654_v22 = vld [vmem:[#allocation65_spill] sm:$0xff] }
 0x2b6   : > { %1931 = vrot.lane.b32.xlu1 %v1911_v9, %s4671_s10  ;;  %v2730_v12 = vmul.f32 %v4597_v17, %v6825_v18  ;;  %v2738_v58 = vmul.f32 %v2729_v39, %v8643_v43  ;;  %v2746_v18 = vadd.f32 %v2737_v44, %v8645_v62  ;;  %v7004_v46 = vpop.permute.xlu1 %2931  ;;  %v3229_v9 = vmul.f32 %v8640_v48, %v8651_v47  ;;  %v8652_v17 = vld [vmem:[#allocation41_spill] sm:$0xff]  ;;  %v8655_v44 = vld [vmem:[#allocation34_spill] sm:$0xff] }
 0x2b7   : > { %v4599_v6 = vpop.eup %4598  ;;  %v3228_v39 = vmul.f32 %v8640_v48, %v8652_v17 }
 0x2b8   : > { %v2731_v54 = vmul.f32 %v4599_v6, %v6842_v8  ;;  %v2739_v35 = vmul.f32 %v2730_v12, %v8643_v43  ;;  %v2747_v8 = vadd.f32 %v2738_v58, %v8645_v62  ;;  %v3231_v6 = vmul.f32 %v8640_v48, %v8653_v42  ;;  %v8657_v58 = vld [vmem:[#allocation66_spill] sm:$0xff] }
 0x2b9   : > { %1929 = vrot.lane.b32.xlu0 %v1910_v30, %s4671_s10  ;;  %v4601_v0 = vpop.eup %4600  ;;  %v7009_v37 = vpop.permute.xlu0 %2929  ;;  %v3230_v12 = vmul.f32 %v8640_v48, %v8654_v22 }
 0x2ba   : > { %1927 = vrot.lane.b32.xlu1 %v1909_v31, %s4671_s10  ;;  %v4603_v49 = vpop.eup %4602  ;;  %v1885_v14 = vmul.f32 %v4601_v0, %v6814_v41  ;;  %v2740_v21 = vmul.f32 %v2731_v54, %v8643_v43  ;;  %v2748_v33 = vadd.f32 %v2739_v35, %v8645_v62  ;;  %v7016_v50 = vpop.permute.xlu1 %2935  ;;  %v8656_v0 = vld [vmem:[#allocation22_spill] sm:$0xff]  ;;  %v8658_v35 = vld [vmem:[#allocation7_spill] sm:$0xff] }
 0x2bb   : > { %v4605_v53 = vpop.eup %4604  ;;  %v1886_v28 = vmul.f32 %v4603_v49, %v6817_v23  ;;  %v3295_v54 = vmul.f32 %v8656_v0, %v8655_v44  ;;  %v3232_v49 = vmul.f32 %v8640_v48, %v8657_v58 }
 0x2bc   : > { %v4607_v59 = vpop.eup %4606  ;;  %v2732_v25 = vmul.f32 %v4605_v53, %v6854_v7  ;;  %v1899_v20 = vmul.f32 %v8643_v43, %v1885_v14  ;;  %v2749_v41 = vadd.f32 %v2740_v21, %v8645_v62  ;;  %v8659_v53 = vld [vmem:[#allocation116_spill] sm:$0xff] }
 0x2bd   : > { %1933 = vrot.lane.b32.xlu0 %v1912_v27, %s4671_s10  ;;  %v4609_v13 = vpop.eup %4608  ;;  %v1900_v29 = vmul.f32 %v8643_v43, %v1886_v28  ;;  %v1888_v2 = vmul.f32 %v4607_v59, %v6851_v1  ;;  %v7021_v30 = vpop.permute.xlu0 %2933  ;;  %v8661_v28 = vld [vmem:[#allocation8_spill] sm:$0xff] }
 0x2be   : > { %2768 = vrot.lane.b32.xlu1 %v2746_v18, %s4670_s9  ;;  %v1913_v23 = vadd.f32 %v8645_v62, %v1899_v20  ;;  %v2741_v7 = vmul.f32 %v2732_v25, %v8643_v43  ;;  %v1887_v11 = vmul.f32 %v4609_v13, %v6864_v15  ;;  %v7029_v31 = vpop.permute.xlu1 %3024  ;;  %v8662_v59 = vld [vmem:[#allocation48_spill] sm:$0xff]  ;;  %v8663_v20 = vld [vmem:[#allocation10_spill] sm:$0xff] }
 0x2bf   : > { %v4611_v61 = vpop.eup %4610  ;;  %v1914_v36 = vadd.f32 %v8645_v62, %v1900_v29  ;;  %v1902_v3 = vmul.f32 %v8643_v43, %v1888_v2  ;;  %v3288_v25 = vmul.f32 %v8656_v0, %v8662_v59  ;;  %v8664_v13 = vld [vmem:[#allocation50_spill] sm:$0xff]  ;;  %v8665_v2 = vld [vmem:[#allocation51_spill] sm:$0xff]  ;;  %v8684_v59 = vld [vmem:[#allocation88_spill] sm:$0xff] }
 0x2c0   : > { %v1889_v51 = vmul.f32 %v4611_v61, %v6820_v57  ;;  %v2750_v1 = vadd.f32 %v2741_v7, %v8645_v62  ;;  %v1901_v24 = vmul.f32 %v8643_v43, %v1887_v11  ;;  %v3292_v11 = vmul.f32 %v8656_v0, %v8636_v16  ;;  %v8666_v61 = vld [vmem:[#allocation52_spill] sm:$0xff] }
 0x2c1   : > { %2770 = vrot.lane.b32.xlu0 %v2747_v8, %s4670_s9  ;;  %v1916_v15 = vadd.f32 %v8645_v62, %v1902_v3  ;;  %v7034_v27 = vpop.permute.xlu0 %3022  ;;  %v8660_v8 = vld [vmem:[#allocation9_spill] sm:$0xff] }
 0x2c2   : > { %2772 = vrot.lane.b32.xlu1 %v2748_v33, %s4670_s9  ;;  %v1915_v10 = vadd.f32 %v8645_v62, %v1901_v24  ;;  %v1903_v57 = vmul.f32 %v8643_v43, %v1889_v51  ;;  %v7040_v18 = vpop.permute.xlu1 %3028  ;;  %v3294_v51 = vmul.f32 %v8656_v0, %v8641_v32  ;;  %v8676_v43 = vld [vmem:[#allocation21_spill] sm:$0xff] }
 0x2c4   : > { %v1917_v19 = vadd.f32 %v8645_v62, %v1903_v57  ;;  %v8675_v62 = vld [vmem:[#allocation62_spill] sm:$0xff] }
 0x2c5   : > { %2774 = vrot.lane.b32.xlu0 %v2749_v41, %s4670_s9  ;;  %v7044_v14 = vpop.permute.xlu0 %3026  ;;  %v3290_v41 = vmul.f32 %v8656_v0, %v8664_v13 }
 0x2c6   : > { %1935 = vrot.lane.b32.xlu1 %v1913_v23, %s4671_s10  ;;  %v7050_v21 = vpop.permute.xlu1 %3032  ;;  %v3289_v23 = vmul.f32 %v8656_v0, %v8665_v2 }
 0x2c9   : > { %1937 = vrot.lane.b32.xlu0 %v1914_v36, %s4671_s10  ;;  %v7056_v33 = vpop.permute.xlu0 %3030  ;;  %v3291_v36 = vmul.f32 %v8656_v0, %v8666_v61 }
 0x2ca   : > { %2776 = vrot.lane.b32.xlu1 %v2750_v1, %s4670_s9  ;;  %v7063_v29 = vpop.permute.xlu1 %3036  ;;  %v8667_v1 = vld [vmem:[#allocation18_spill] sm:$0xff] }
 0x2cb   : > { %v3646_v24 = vmul.f32 %v8667_v1, %v8650_v63 }
 0x2cd   : > { %1941 = vrot.lane.b32.xlu0 %v1916_v15, %s4671_s10  ;;  %v7068_v7 = vpop.permute.xlu0 %3034 }
 0x2ce   : > { %1939 = vrot.lane.b32.xlu1 %v1915_v10, %s4671_s10  ;;  %v7076_v3 = vpop.permute.xlu1 %3081  ;;  %v8668_v10 = vld [vmem:[#allocation76_spill] sm:$0xff] }
 0x2cf   : > { %v3293_v57 = vmul.f32 %v8656_v0, %v8668_v10  ;;  %v8677_v0 = vld [vmem:[#allocation61_spill] sm:$0xff] }
 0x2d0   : > { %v2974_v44 = vmul.f32 %v8676_v43, %v8677_v0  ;;  %v8683_v0 = vld [vmem:[#allocation54_spill] sm:$0xff] }
 0x2d1   : > { %3246 = vrot.lane.b32.xlu0 %v3227_v5, %s4657_s11  ;;  %v7083_v15 = vpop.permute.xlu0 %3079  ;;  %v3645_v5 = vmul.f32 %v8667_v1, %v8642_v60 }
 0x2d2   : > { %1943 = vrot.lane.b32.xlu1 %v1917_v19, %s4671_s10  ;;  %v8669_v19 = vld [vmem:[#allocation46_spill] sm:$0xff] }
 0x2d5   : > { %3250 = vrot.lane.b32.xlu0 %v3229_v9, %s4657_s11  ;;  %v3655_v9 = vmul.f32 %v3646_v24, %v8669_v19 }
 0x2d6   : > { %3248 = vrot.lane.b32.xlu1 %v3228_v39, %s4657_s11  ;;  %v3648_v39 = vmul.f32 %v8667_v1, %v8651_v47 }
 0x2d9   : > { %3254 = vrot.lane.b32.xlu0 %v3231_v6, %s4657_s11  ;;  %v7094_v6 = vpop.permute.xlu1 %3085 }
 0x2da   : > { %3252 = vrot.lane.b32.xlu1 %v3230_v12, %s4657_s11  ;;  %v8670_v12 = vld [vmem:[#allocation45_spill] sm:$0xff] }
 0x2dd   : > { %3320 = vrot.lane.b32.xlu0 %v3295_v54, %s4657_s11  ;;  %v3654_v54 = vmul.f32 %v8670_v12, %v3645_v5  ;;  %v7118_v5 = vpop.permute.xlu1 %3089 }
 0x2de   : > { %3256 = vrot.lane.b32.xlu1 %v3232_v49, %s4657_s11  ;;  %v3647_v49 = vmul.f32 %v8667_v1, %v8652_v17  ;;  %v8688_v17 = vld [vmem:[#allocation55_spill] sm:$0xff] }
 0x2e1   : > { %4493 = vrot.lane.b32.xlu0 %v8658_v35, %s4671_s10  ;;  %v7100_v35 = vpop.permute.xlu0 %3083 }
 0x2e2   : > { %3322 = vrot.lane.b32.xlu1 %v8659_v53, %s4657_s11  ;;  %v2973_v53 = vmul.f32 %v8676_v43, %v8675_v62 }
 0x2e5   : > { %4503 = vrot.lane.b32.xlu0 %v8660_v8, %s4671_s10  ;;  %v8671_v8 = vld [vmem:[#allocation49_spill] sm:$0xff] }
 0x2e6   : > { %4498 = vrot.lane.b32.xlu1 %v8661_v28, %s4671_s10  ;;  %v3657_v28 = vmul.f32 %v3648_v39, %v8671_v8 }
 0x2e9   : > { %3306 = vrot.lane.b32.xlu0 %v3288_v25, %s4657_s11  ;;  %v3650_v25 = vmul.f32 %v8667_v1, %v8653_v42 }
 0x2ea   : > { %4508 = vrot.lane.b32.xlu1 %v8663_v20, %s4671_s10  ;;  %v8672_v20 = vld [vmem:[#allocation47_spill] sm:$0xff] }
 0x2ed   : > { %3310 = vrot.lane.b32.xlu0 %v3290_v41, %s4657_s11  ;;  %v3656_v41 = vmul.f32 %v3647_v49, %v8672_v20 }
 0x2ee   : > { %3308 = vrot.lane.b32.xlu1 %v3289_v23, %s4657_s11  ;;  %v3649_v23 = vmul.f32 %v8667_v1, %v8654_v22  ;;  %v8686_v22 = vld [vmem:[#allocation96_spill] sm:$0xff] }
 0x2ef   : > { %v2978_v42 = vmul.f32 %v8676_v43, %v8686_v22 }
 0x2f1   : > { %3314 = vrot.lane.b32.xlu0 %v3292_v11, %s4657_s11  ;;  %v8673_v11 = vld [vmem:[#allocation24_spill] sm:$0xff] }
 0x2f2   : > { %3312 = vrot.lane.b32.xlu1 %v3291_v36, %s4657_s11  ;;  %v2815_v36 = vmul.f32 %v8673_v11, %v8665_v2  ;;  %v2817_v24 = vmul.f32 %v8673_v11, %v8666_v61  ;;  %v2819_v49 = vmul.f32 %v8673_v11, %v8668_v10  ;;  %v8679_v61 = vld [vmem:[#allocation94_spill] sm:$0xff] }
 0x2f3   : > { %v8680_v10 = vld [vmem:[#allocation78_spill] sm:$0xff] }
 0x2f4   : > { %v3658_v2 = vmul.f32 %v3649_v23, %v8680_v10  ;;  %v2826_v48 = vmul.f32 %v2817_v24, %v8683_v0  ;;  %v8687_v23 = vld [vmem:[#allocation71_spill] sm:$0xff] }
 0x2f5   : > { %3318 = vrot.lane.b32.xlu0 %v3294_v51, %s4657_s11  ;;  %v2816_v51 = vmul.f32 %v8673_v11, %v8664_v13  ;;  %v8682_v13 = vld [vmem:[#allocation58_spill] sm:$0xff] }
 0x2f6   : > { %3316 = vrot.lane.b32.xlu1 %v3293_v57, %s4657_s11  ;;  %v2818_v57 = vmul.f32 %v8673_v11, %v8636_v16  ;;  %v7136_v16 = vpop.permute.xlu0 %3087 }
 0x2f7   : > { %v2825_v56 = vmul.f32 %v2816_v51, %v8682_v13  ;;  %v8691_v51 = vld [vmem:[#allocation91_spill] sm:$0xff] }
 0x2f9   : > { %3674 = vrot.lane.b32.xlu0 %v3655_v9, %s4658_s16  ;;  %v8674_v9 = vld [vmem:[#allocation69_spill] sm:$0xff] }
 0x2fa   : > { %3672 = vrot.lane.b32.xlu1 %v3654_v54, %s4658_s16  ;;  %v3659_v39 = vmul.f32 %v3650_v25, %v8674_v9  ;;  %v3652_v54 = vmul.f32 %v8667_v1, %v8639_v55  ;;  %v2976_v25 = vmul.f32 %v8676_v43, %v8679_v61  ;;  %v8685_v55 = vld [vmem:[#allocation97_spill] sm:$0xff] }
 0x2fb   : > { %v2977_v61 = vmul.f32 %v8676_v43, %v8685_v55 }
 0x2fc   : > { %v7162_v22 = vmul.f32 %v2976_v25, %v8684_v59 }
 0x2fd   : > { %3678 = vrot.lane.b32.xlu0 %v3657_v28, %s4658_s16  ;;  %v2820_v28 = vmul.f32 %v8673_v11, %v8641_v32  ;;  %v3651_v32 = vmul.f32 %v8667_v1, %v8657_v58  ;;  %v8681_v11 = vld [vmem:[#allocation53_spill] sm:$0xff] }
 0x2fe   : > { %3676 = vrot.lane.b32.xlu1 %v3656_v41, %s4658_s16  ;;  %v2975_v41 = vmul.f32 %v8676_v43, %v8678_v40  ;;  %v2824_v62 = vmul.f32 %v2815_v36, %v8681_v11  ;;  %v2827_v40 = vmul.f32 %v2818_v57, %v8684_v59  ;;  %v8689_v1 = vld [vmem:[#allocation17_spill] sm:$0xff]  ;;  %v8690_v36 = vld [vmem:[#allocation80_spill] sm:$0xff]  ;;  %v2982_v24 = vmul.f32 %v2973_v53, %v8681_v11 }
 0x2ff   : > { %v3763_v58 = vmul.f32 %v8689_v1, %v8688_v17  ;;  %v2828_v47 = vmul.f32 %v2819_v49, %v8690_v36  ;;  %v2829_v60 = vmul.f32 %v2820_v28, %v8691_v51  ;;  %v2983_v57 = vmul.f32 %v2974_v44, %v8682_v13  ;;  %v8693_v43 = vld [vmem:[#allocation57_spill] sm:$0xff]  ;;  %v8695_v13 = vld [vmem:[#allocation35_spill] sm:$0xff] }
 0x300   : > { %v7159_v55 = vmul.f32 %v2975_v41, %v8683_v0  ;;  %v3765_v49 = vmul.f32 %v8689_v1, %v8693_v43  ;;  %v2881_v53 = vsel %vm1176_vm3, %v6772_v45, %v6769_v34  ;;  %v2882_v44 = vsel %vm1176_vm3, %v6769_v34, %v6795_v38  ;;  %v8694_v0 = vld [vmem:[#allocation59_spill] sm:$0xff]  ;;  %v7186_v41 = vpop.permute.xlu0 %3091  ;;  %v8697_v43 = vld [vmem:[#allocation114_spill] sm:$0xff] }
 0x301   : > { %3682 = vrot.lane.b32.xlu0 %v3659_v39, %s4658_s16  ;;  %v3661_v39 = vmul.f32 %v3652_v54, %v8687_v23  ;;  %v8692_v54 = vld [vmem:[#allocation79_spill] sm:$0xff]  ;;  %v3764_v59 = vmul.f32 %v8689_v1, %v8694_v0  ;;  %v3767_v11 = vmul.f32 %v8689_v1, %v8695_v13  ;;  %v7181_v28 = vmul.f32 %v2977_v61, %v8690_v36  ;;  %v8698_v36 = vld [vmem:[#allocation36_spill] sm:$0xff]  ;;  %v8700_v45 = vld [vmem:[#allocation110_spill] sm:$0xff] }
 0x302   : > { %3680 = vrot.lane.b32.xlu1 %v3658_v2, %s4658_s16  ;;  %v7164_v2 = vpop.permute.xlu1 %3093  ;;  %v3660_v17 = vmul.f32 %v3651_v32, %v8692_v54  ;;  %v7184_v32 = vmul.f32 %v2978_v42, %v8691_v51  ;;  %v3772_v25 = vmul.f32 %v8670_v12, %v3763_v58  ;;  %v2938_v0 = vsel %vm1176_vm3, %v8697_v43, %v6997_v52  ;;  %v8699_v51 = vld [vmem:[#allocation37_spill] sm:$0xff]  ;;  %v8702_v43 = vld [vmem:[#allocation40_spill] sm:$0xff] }
 0x303   : > { %v2939_v61 = vsel %vm1176_vm3, %v6997_v52, %v6992_v26  ;;  %v3769_v42 = vmul.f32 %v8689_v1, %v8698_v36  ;;  %v3768_v13 = vmul.f32 %v8689_v1, %v8699_v51  ;;  %v2883_v58 = vsel %vm1176_vm3, %v6795_v38, %v8700_v45  ;;  %v8703_v52 = vld [vmem:[#allocation117_spill] sm:$0xff]  ;;  %v8704_v38 = vld [vmem:[#allocation26_spill] sm:$0xff] }
 0x304   : > { %v2899_v12 = vadd.f32 %v2882_v44, %v2825_v56  ;;  %v7210_v4 = vmul.f32 %v8689_v1, %v8702_v43  ;;  %v2884_v36 = vsel %vm1176_vm3, %v8700_v45, %v8703_v52  ;;  %v3774_v51 = vmul.f32 %v3765_v49, %v8672_v20  ;;  %v8705_v56 = vld [vmem:[#allocation107_spill] sm:$0xff]  ;;  %v8706_v43 = vld [vmem:[#allocation30_spill] sm:$0xff] }
 0x305   : > { %3686 = vrot.lane.b32.xlu0 %v3661_v39, %s4658_s16  ;;  %v8696_v39 = vld [vmem:[#allocation60_spill] sm:$0xff]  ;;  %v2896_v44 = vadd.f32 %v8705_v56, %v8704_v38  ;;  %v2900_v45 = vadd.f32 %v2883_v58, %v2826_v48  ;;  %v3778_v20 = vmul.f32 %v3769_v42, %v8692_v54  ;;  %v8707_v49 = vld [vmem:[#allocation111_spill] sm:$0xff]  ;;  %v3039_v54 = vsel %vm1176_vm3, %v7029_v31, %v7044_v14 }
 0x306   : > { %3684 = vrot.lane.b32.xlu1 %v3660_v17, %s4658_s16  ;;  %v3766_v34 = vmul.f32 %v8689_v1, %v8696_v39  ;;  %v2898_v17 = vadd.f32 %v2881_v53, %v2824_v62  ;;  %v7205_v39 = vpop.permute.xlu1 %3195  ;;  %v3773_v62 = vmul.f32 %v3764_v59, %v8669_v19  ;;  %v3776_v53 = vmul.f32 %v3767_v11, %v8680_v10  ;;  %v8708_v59 = vld [vmem:[#allocation13_spill] sm:$0xff] }
 0x307   : > { %8701 = vst [vmem:[#allocation109_spill] sm:$0xff] %v7205_v39  ;;  %v2956_v1 = vadd.f32 %v2939_v61, %v2899_v12  ;;  %v2941_v19 = vsel %vm1176_vm3, %v7009_v37, %v7004_v46  ;;  %v2901_v11 = vadd.f32 %v2884_v36, %v2827_v40  ;;  %v8709_v61 = vld [vmem:[#allocation70_spill] sm:$0xff]  ;;  %v3040_v40 = vsel %vm1176_vm3, %v7044_v14, %v7040_v18 }
 0x308   : > { %v2955_v39 = vadd.f32 %v2938_v0, %v2898_v17  ;;  %v3775_v10 = vmul.f32 %v3766_v34, %v8671_v8  ;;  %v2953_v0 = vadd.f32 %v8707_v49, %v2896_v44  ;;  %v2942_v8 = vsel %vm1176_vm3, %v7004_v46, %v7021_v30 }
 0x309   : > { %3790 = vrot.lane.b32.xlu0 %v3772_v25, %s4658_s16  ;;  %v2940_v25 = vsel %vm1176_vm3, %v6992_v26, %v7009_v37  ;;  %v2885_v26 = vsel %vm1176_vm3, %v8703_v52, %v8708_v59  ;;  %v2958_v34 = vadd.f32 %v2941_v19, %v2901_v11  ;;  %v2943_v36 = vsel %vm1176_vm3, %v7021_v30, %v7016_v50  ;;  %v8710_v52 = vld [vmem:[#allocation23_spill] sm:$0xff] }
 0x30a   : > { %3688 = vrot.lane.b32.xlu1 %v8706_v43, %s4658_s16  ;;  %v7225_v63 = vpop.permute.xlu0 %3181  ;;  %v2886_v43 = vsel %vm1176_vm3, %v8708_v59, %v8709_v61  ;;  %v2957_v37 = vadd.f32 %v2940_v25, %v2900_v45  ;;  %v2991_v42 = vadd.f32 %v2982_v24, %v2955_v39  ;;  %v2902_v46 = vadd.f32 %v2885_v26, %v2828_v47 }
 0x30b   : > { %v2903_v58 = vadd.f32 %v2886_v43, %v2829_v60  ;;  %v3096_v12 = vsel %vm1176_vm3, %v7076_v3, %v7100_v35  ;;  %v3097_v14 = vsel %vm1176_vm3, %v7100_v35, %v7094_v6  ;;  %v2989_v38 = vadd.f32 %v2953_v0, %v8710_v52 }
 0x30c   : > { %v7239_v48 = vpop.permute.xlu1 %3183  ;;  %v3056_v44 = vadd.f32 %v3039_v54, %v2991_v42  ;;  %v2959_v39 = vadd.f32 %v2942_v8, %v2902_v46  ;;  %v3041_v60 = vsel %vm1176_vm3, %v7040_v18, %v7056_v33  ;;  %v2993_v35 = vadd.f32 %v7159_v55, %v2957_v37  ;;  %v8712_v46 = vld [vmem:[#allocation43_spill] sm:$0xff] }
 0x30d   : > { %3794 = vrot.lane.b32.xlu0 %v3774_v51, %s4658_s16  ;;  %v2992_v51 = vadd.f32 %v2983_v57, %v2956_v1  ;;  %v3777_v57 = vmul.f32 %v3768_v13, %v8674_v9  ;;  %v2960_v47 = vadd.f32 %v2943_v36, %v2903_v58  ;;  %v2994_v25 = vadd.f32 %v7162_v22, %v2958_v34  ;;  %v8711_v36 = vld [vmem:[#allocation29_spill] sm:$0xff]  ;;  %v8713_v58 = vld [vmem:[#allocation19_spill] sm:$0xff] }
 0x30e   : > { %3792 = vrot.lane.b32.xlu1 %v3773_v62, %s4658_s16  ;;  %v7255_v17 = vpop.permute.xlu0 %3197  ;;  %v3042_v62 = vsel %vm1176_vm3, %v7056_v33, %v7050_v21  ;;  %v3113_v1 = vadd.f32 %v3096_v12, %v3056_v44  ;;  %v3098_v9 = vsel %vm1176_vm3, %v7094_v6, %v7136_v16  ;;  %v3099_v18 = vsel %vm1176_vm3, %v7136_v16, %v7118_v5 }
 0x30f   : > { %v3057_v30 = vadd.f32 %v3040_v40, %v2992_v51  ;;  %v3058_v13 = vadd.f32 %v3041_v60, %v2993_v35  ;;  %v3059_v22 = vadd.f32 %v3042_v62, %v2994_v25  ;;  %v3054_v6 = vadd.f32 %v7034_v27, %v2989_v38  ;;  %v8714_v38 = vld [vmem:[#allocation109_spill] sm:$0xff]  ;;  %v8716_v35 = vld [vmem:[#allocation44_spill] sm:$0xff] }
 0x310   : > { %v3188_v24 = vpop.permute.xlu1 %3187  ;;  %v3043_v16 = vsel %vm1176_vm3, %v7050_v21, %v7068_v7  ;;  %v3044_v59 = vsel %vm1176_vm3, %v7068_v7, %v7063_v29  ;;  %v3779_v26 = vmul.f32 %v7210_v4, %v8687_v23  ;;  %v2995_v11 = vadd.f32 %v7181_v28, %v2959_v39  ;;  %v8715_v39 = vld [vmem:[#allocation39_spill] sm:$0xff] }
 0x311   : > { %3798 = vrot.lane.b32.xlu0 %v3776_v53, %s4658_s16  ;;  %v3114_v45 = vadd.f32 %v3097_v14, %v3057_v30  ;;  %v2996_v43 = vadd.f32 %v7184_v32, %v2960_v47  ;;  %v3115_v37 = vadd.f32 %v3098_v9, %v3058_v13  ;;  %v3116_v8 = vadd.f32 %v3099_v18, %v3059_v22 }
 0x312   : > { %3796 = vrot.lane.b32.xlu1 %v3775_v10, %s4658_s16  ;;  %v3186_v53 = vpop.permute.xlu0 %3185  ;;  %v3100_v21 = vsel %vm1176_vm3, %v7118_v5, %v7186_v41  ;;  %v3101_v7 = vsel %vm1176_vm3, %v7186_v41, %v7164_v2  ;;  %v3060_v23 = vadd.f32 %v3043_v16, %v2995_v11  ;;  %v3111_v5 = vadd.f32 %v7083_v15, %v3054_v6 }
 0x313   : > { %v3200_v33 = vsel %vm1359_vm5, %v7239_v48, %v3186_v53  ;;  %v3201_v55 = vsel %vm1359_vm5, %v3186_v53, %v3188_v24  ;;  %v3061_v28 = vadd.f32 %v3044_v59, %v2996_v43  ;;  %v3833_v12 = vmul.f32 %v8713_v58, %v8712_v46  ;;  %v8717_v53 = vld [vmem:[#allocation41_spill] sm:$0xff] }
 0x314   : > { %v7284_v19 = vadd.f32 %v3200_v33, %v3113_v1  ;;  %v7286_v0 = vadd.f32 %v3201_v55, %v3114_v45  ;;  %v3192_v10 = vpop.permute.xlu1 %3191  ;;  %v3117_v42 = vadd.f32 %v3100_v21, %v3060_v23  ;;  %v3216_v14 = vadd.f32 %v7225_v63, %v3111_v5  ;;  %v8718_v33 = vld [vmem:[#allocation67_spill] sm:$0xff]  ;;  %v8724_v5 = vld [vmem:[#allocation20_spill] sm:$0xff] }
 0x315   : > { %3802 = vrot.lane.b32.xlu0 %v3778_v20, %s4658_s16  ;;  %v3118_v41 = vadd.f32 %v3101_v7, %v3061_v28  ;;  %v3832_v47 = vmul.f32 %v8713_v58, %v8715_v39  ;;  %v3835_v25 = vmul.f32 %v8713_v58, %v8716_v35  ;;  %v3834_v9 = vmul.f32 %v8713_v58, %v8717_v53  ;;  %v8722_v7 = vld [vmem:[#allocation48_spill] sm:$0xff] }
 0x316   : > { %3800 = vrot.lane.b32.xlu1 %v3777_v57, %s4658_s16  ;;  %v3190_v20 = vpop.permute.xlu0 %3189  ;;  %v3837_v55 = vmul.f32 %v8713_v58, %v8718_v33 }
 0x317   : > { %v3202_v54 = vsel %vm1359_vm5, %v3188_v24, %v3190_v20  ;;  %v3203_v4 = vsel %vm1359_vm5, %v3190_v20, %v3192_v10 }
 0x318   : > { %v7309_v32 = vadd.f32 %v3202_v54, %v3115_v37  ;;  %v7311_v40 = vadd.f32 %v3203_v4, %v3116_v8  ;;  %v7313_v34 = vpop.permute.xlu1 %3258  ;;  %v8721_v8 = vld [vmem:[#allocation66_spill] sm:$0xff]  ;;  %v8723_v54 = vld [vmem:[#allocation33_spill] sm:$0xff] }
 0x319   : > { %3806 = vrot.lane.b32.xlu0 %v8711_v36, %s4658_s16  ;;  %v3838_v20 = vmul.f32 %v8713_v58, %v8721_v8  ;;  %v3893_v4 = vmul.f32 %v8723_v54, %v8722_v7 }
 0x31a   : > { %3804 = vrot.lane.b32.xlu1 %v3779_v26, %s4658_s16  ;;  %v8720_v26 = vld [vmem:[#allocation68_spill] sm:$0xff] }
 0x31b   : > { %v3194_v51 = vpop.permute.xlu0 %3193  ;;  %v3839_v11 = vmul.f32 %v8713_v58, %v8720_v26 }
 0x31c   : > { %v3204_v52 = vsel %vm1359_vm5, %v3192_v10, %v3194_v51  ;;  %v3205_v44 = vsel %vm1359_vm5, %v3194_v51, %v8714_v38  ;;  %v7329_v57 = vpop.permute.xlu1 %3244  ;;  %v8719_v10 = vld [vmem:[#allocation65_spill] sm:$0xff] }
 0x31d   : > { %v7325_v30 = vadd.f32 %v3204_v52, %v3117_v42  ;;  %v7327_v24 = vadd.f32 %v3205_v44, %v3118_v41  ;;  %3852 = vrot.lane.b32.xlu0 %v3833_v12, %s4668_s7  ;;  %v7335_v60 = vadd.f32 %v7329_v57, %v3216_v14  ;;  %v3836_v6 = vmul.f32 %v8713_v58, %v8719_v10  ;;  %v8725_v41 = vld [vmem:[#allocation50_spill] sm:$0xff]  ;;  %v8726_v12 = vld [vmem:[#allocation24_spill] sm:$0xff]  ;;  %v8727_v44 = vld [vmem:[#allocation51_spill] sm:$0xff] }
 0x31e   : > { %3850 = vrot.lane.b32.xlu1 %v3832_v47, %s4668_s7  ;;  %v3895_v51 = vmul.f32 %v8723_v54, %v8725_v41  ;;  %v2814_v14 = vmul.f32 %v8726_v12, %v8722_v7  ;;  %v3894_v47 = vmul.f32 %v8723_v54, %v8727_v44 }
 0x31f   : > { %v3261_v62 = vpop.permute.xlu0 %3260 }
 0x320   : > { %v7343_v1 = vsel %vm1092_vm4, %v7313_v34, %v3261_v62  ;;  %v2765_v45 = vpop.permute.xlu1 %2764 }
 0x321   : > { %3856 = vrot.lane.b32.xlu0 %v3835_v25, %s4668_s7 }
 0x322   : > { %3854 = vrot.lane.b32.xlu1 %v3834_v9, %s4668_s7 }
 0x323   : > { %v2763_v18 = vpop.permute.xlu0 %2762 }
 0x324   : > { %v2780_v13 = vsel %vm2778_vm9, %v2763_v18, %v2765_v45  ;;  %v2761_v22 = vpop.permute.xlu1 %2760 }
 0x325   : > { %4328 = vst [vmem:[%s7351_s22 + $0x48] sm:$0xff] %v2780_v13  ;;  %3860 = vrot.lane.b32.xlu0 %v3837_v55, %s4668_s7  ;;  %v2779_v16 = vsel %vm2778_vm9, %v2761_v22, %v2763_v18  ;;  %v8729_v18 = vld [vmem:[#allocation112_spill] sm:$0xff] }
 0x326   : > { %4327 = vst [vmem:[%s7351_s22 + $0x40] sm:$0xff] %v2779_v16  ;;  %3858 = vrot.lane.b32.xlu1 %v3836_v6, %s4668_s7  ;;  %v2880_v55 = vsel %vm1176_vm3, %v8705_v56, %v8729_v18  ;;  %v8730_v22 = vld [vmem:[#allocation56_spill] sm:$0xff] }
 0x327   : > { %v2767_v59 = vpop.permute.xlu0 %2766  ;;  %v2823_v6 = vmul.f32 %v2814_v14, %v8730_v22  ;;  %v8736_v14 = vld [vmem:[#allocation76_spill] sm:$0xff] }
 0x328   : > { %v2781_v43 = vsel %vm2778_vm9, %v2765_v45, %v2767_v59  ;;  %v1932_v37 = vpop.permute.xlu1 %1931  ;;  %v8728_v45 = vld [vmem:[#allocation72_spill] sm:$0xff] }
 0x329   : > { %4329 = vst [vmem:[%s7351_s22 + $0x50] sm:$0xff] %v2781_v43  ;;  %3864 = vrot.lane.b32.xlu0 %v3839_v11, %s4668_s7  ;;  %v3897_v9 = vmul.f32 %v8723_v54, %v8728_v45  ;;  %v8732_v43 = vld [vmem:[#allocation114_spill] sm:$0xff]  ;;  %v2897_v56 = vadd.f32 %v2880_v55, %v2823_v6  ;;  %v8737_v6 = vld [vmem:[#allocation25_spill] sm:$0xff] }
 0x32a   : > { %3862 = vrot.lane.b32.xlu1 %v3838_v20, %s4668_s7 }
 0x32b   : > { %v1930_v21 = vpop.permute.xlu0 %1929 }
 0x32c   : > { %v1947_v23 = vsel %vm1945_vm10, %v1930_v21, %v1932_v37  ;;  %v1928_v28 = vpop.permute.xlu1 %1927 }
 0x32d   : > { %1963 = vst [vmem:[%s7351_s22 + $0x8] sm:$0xff] %v1947_v23  ;;  %3911 = vrot.lane.b32.xlu0 %v3893_v4, %s4668_s7  ;;  %v1946_v36 = vsel %vm1945_vm10, %v1928_v28, %v1930_v21  ;;  %v8733_v21 = vld [vmem:[#allocation63_spill] sm:$0xff]  ;;  %v8734_v4 = vld [vmem:[#allocation21_spill] sm:$0xff] }
 0x32e   : > { %1962 = vst [vmem:[%s7351_s22] sm:$0xff] %v1946_v36  ;;  %3866 = vrot.lane.b32.xlu1 %v8724_v5, %s4668_s7  ;;  %v2972_v23 = vmul.f32 %v8734_v4, %v8733_v21  ;;  %v8735_v36 = vld [vmem:[#allocation75_spill] sm:$0xff] }
 0x32f   : > { %v1934_v42 = vpop.permute.xlu0 %1933  ;;  %v3899_v5 = vmul.f32 %v8723_v54, %v8735_v36 }
 0x330   : > { %v1948_v58 = vsel %vm1945_vm10, %v1932_v37, %v1934_v42  ;;  %v2769_v52 = vpop.permute.xlu1 %2768  ;;  %v2937_v37 = vsel %vm1176_vm3, %v8707_v49, %v8732_v43  ;;  %v3199_v43 = vsel %vm1359_vm5, %v7225_v63, %v7239_v48 }
 0x331   : > { %1964 = vst [vmem:[%s7351_s22 + $0x10] sm:$0xff] %v1948_v58  ;;  %3915 = vrot.lane.b32.xlu0 %v3895_v51, %s4668_s7  ;;  %v2782_v62 = vsel %vm2778_vm9, %v2767_v59, %v2769_v52  ;;  %v8731_v59 = vld [vmem:[#allocation52_spill] sm:$0xff]  ;;  %v2954_v58 = vadd.f32 %v2937_v37, %v2897_v56 }
 0x332   : > { %4330 = vst [vmem:[%s7351_s22 + $0x58] sm:$0xff] %v2782_v62  ;;  %3913 = vrot.lane.b32.xlu1 %v3894_v47, %s4668_s7  ;;  %v3896_v11 = vmul.f32 %v8723_v54, %v8731_v59  ;;  %v2981_v62 = vmul.f32 %v2972_v23, %v8730_v22 }
 0x333   : > { %v2771_v25 = vpop.permute.xlu0 %2770 }
 0x334   : > { %v2783_v13 = vsel %vm2778_vm9, %v2769_v52, %v2771_v25  ;;  %v2773_v16 = vpop.permute.xlu1 %2772  ;;  %v3898_v52 = vmul.f32 %v8723_v54, %v8736_v14  ;;  %v2990_v55 = vadd.f32 %v2981_v62, %v2954_v58 }
 0x335   : > { %4331 = vst [vmem:[%s7351_s22 + $0x60] sm:$0xff] %v2783_v13  ;;  %3919 = vrot.lane.b32.xlu0 %v3897_v9, %s4668_s7  ;;  %v2784_v20 = vsel %vm2778_vm9, %v2771_v25, %v2773_v16  ;;  %v3038_v9 = vsel %vm1176_vm3, %v7034_v27, %v7029_v31 }
 0x336   : > { %4332 = vst [vmem:[%s7351_s22 + $0x68] sm:$0xff] %v2784_v20  ;;  %3917 = vrot.lane.b32.xlu1 %v3896_v11, %s4668_s7  ;;  %v3055_v31 = vadd.f32 %v3038_v9, %v2990_v55 }
 0x337   : > { %v2775_v28 = vpop.permute.xlu0 %2774 }
 0x338   : > { %v2785_v51 = vsel %vm2778_vm9, %v2773_v16, %v2775_v28  ;;  %v1936_v49 = vpop.permute.xlu1 %1935  ;;  %v3095_v16 = vsel %vm1176_vm3, %v7083_v15, %v7076_v3 }
 0x339   : > { %4333 = vst [vmem:[%s7351_s22 + $0x70] sm:$0xff] %v2785_v51  ;;  %3923 = vrot.lane.b32.xlu0 %v3899_v5, %s4668_s7  ;;  %v1949_v47 = vsel %vm1945_vm10, %v1934_v42, %v1936_v49  ;;  %v8738_v42 = vld [vmem:[#allocation34_spill] sm:$0xff] }
 0x33a   : > { %1965 = vst [vmem:[%s7351_s22 + $0x18] sm:$0xff] %v1949_v47  ;;  %3921 = vrot.lane.b32.xlu1 %v3898_v52, %s4668_s7  ;;  %v3900_v22 = vmul.f32 %v8723_v54, %v8738_v42  ;;  %v2821_v37 = vmul.f32 %v8726_v12, %v8738_v42  ;;  %v3112_v54 = vadd.f32 %v3095_v16, %v3055_v31  ;;  %v8739_v5 = vld [vmem:[#allocation82_spill] sm:$0xff]  ;;  %v8740_v52 = vld [vmem:[#allocation28_spill] sm:$0xff] }
 0x33b   : > { %v1938_v25 = vpop.permute.xlu0 %1937  ;;  %v2979_v47 = vmul.f32 %v8734_v4, %v8740_v52 }
 0x33c   : > { %v1950_v18 = vsel %vm1945_vm10, %v1936_v49, %v1938_v25  ;;  %v2777_v13 = vpop.permute.xlu1 %2776  ;;  %v3217_v15 = vadd.f32 %v3199_v43, %v3112_v54  ;;  %v2830_v51 = vmul.f32 %v8739_v5, %v2821_v37 }
 0x33d   : > { %1966 = vst [vmem:[%s7351_s22 + $0x20] sm:$0xff] %v1950_v18  ;;  %3927 = vrot.lane.b32.xlu0 %v8737_v6, %s4668_s7  ;;  %v2786_v11 = vsel %vm2778_vm9, %v2775_v28, %v2777_v13 }
 0x33e   : > { %4334 = vst [vmem:[%s7351_s22 + $0x78] sm:$0xff] %v2786_v11  ;;  %3925 = vrot.lane.b32.xlu1 %v3900_v22, %s4668_s7  ;;  %v2904_v49 = vadd.f32 %v8709_v61, %v2830_v51  ;;  %v3206_v22 = vsel %vm1359_vm5, %v8714_v38, %v7255_v17 }
 0x33f   : > { %v1942_v27 = vpop.permute.xlu0 %1941 }
 0x340   : > { %v1940_v20 = vpop.permute.xlu1 %1939 }
 0x341   : > { %v1951_v56 = vsel %vm1945_vm10, %v1938_v25, %v1940_v20  ;;  %v1952_v3 = vsel %vm1945_vm10, %v1940_v20, %v1942_v27  ;;  %v2961_v25 = vadd.f32 %v7016_v50, %v2904_v49 }
 0x342   : > { %1967 = vst [vmem:[%s7351_s22 + $0x28] sm:$0xff] %v1951_v56  ;;  %1968 = vst [vmem:[%s7351_s22 + $0x30] sm:$0xff] %v1952_v3 }
 0x343   : > { %v3247_v23 = vpop.permute.xlu0 %3246 }
 0x344   : > { %v3262_v28 = vsel %vm1092_vm4, %v7329_v57, %v3247_v23  ;;  %v1944_v48 = vpop.permute.xlu1 %1943  ;;  %v2988_v57 = vmul.f32 %v8739_v5, %v2979_v47 }
 0x345   : > { %v7450_v63 = vadd.f32 %v3262_v28, %v3217_v15  ;;  %v1953_v58 = vsel %vm1945_vm10, %v1942_v27, %v1944_v48 }
 0x346   : > { %1969 = vst [vmem:[%s7351_s22 + $0x38] sm:$0xff] %v1953_v58  ;;  %v2997_v55 = vadd.f32 %v2988_v57, %v2961_v25 }
 0x347   : > { %v7457_v62 = vpop.permute.xlu0 %3250 }
 0x348   : > { %v7460_v9 = vpop.permute.xlu1 %3248  ;;  %v3062_v6 = vadd.f32 %v7063_v29, %v2997_v55  ;;  %v8741_v29 = vld [vmem:[#allocation22_spill] sm:$0xff] }
 0x349   : > { %v3953_v37 = vmul.f32 %v8741_v29, %v8715_v39  ;;  %v3955_v25 = vmul.f32 %v8741_v29, %v8717_v53  ;;  %v3956_v57 = vmul.f32 %v8741_v29, %v8716_v35 }
 0x34a   : > { %v3119_v16 = vadd.f32 %v7164_v2, %v3062_v6  ;;  %v3954_v2 = vmul.f32 %v8741_v29, %v8712_v46  ;;  %v3263_v6 = vsel %vm1092_vm4, %v3247_v23, %v7460_v9  ;;  %v3958_v23 = vmul.f32 %v8741_v29, %v8718_v33 }
 0x34b   : > { %v7463_v18 = vpop.permute.xlu0 %3254 }
 0x34c   : > { %v7465_v13 = vpop.permute.xlu1 %3252  ;;  %v3224_v31 = vadd.f32 %v3206_v22, %v3119_v16 }
 0x34e   : > { %v3287_v17 = vadd.f32 %v7343_v1, %v3224_v31 }
 0x34f   : > { %v7468_v61 = vpop.permute.xlu0 %3320 }
 0x350   : > { %v7474_v50 = vpop.permute.xlu1 %3256 }
 0x351   : > { %v3268_v11 = vsel %vm1092_vm4, %v7474_v50, %v7313_v34 }
 0x352   : > { %v7480_v27 = vadd.f32 %v3268_v11, %v7327_v24 }
 0x353   : > { %v4494_v43 = vpop.permute.xlu0 %4493 }
 0x354   : > { %v4496_v54 = vunpack.i.h.bf16 %v4494_v43  ;;  %v4495_v20 = vunpack.i.l.bf16 %v4494_v43  ;;  %v3323_v38 = vpop.permute.xlu1 %3322 }
 0x355   : > { %v3331_v34 = vsel %vm1092_vm4, %v7468_v61, %v3323_v38 }
 0x356   : > { %v3978_v56 = vsel %vm1945_vm10, %v4495_v20, %v4496_v54  ;;  %v3994_v3 = vmul.f32 %v4495_v20, %v3953_v37  ;;  %v7490_v15 = vadd.f32 %v3331_v34, %v3287_v17 }
 0x357   : > { %v3995_v24 = vmul.f32 %v3978_v56, %v3954_v2  ;;  %v4504_v28 = vpop.permute.xlu0 %4503 }
 0x358   : > { %4012 = vrot.lane.b32.xlu1 %v3994_v3, %s4657_s11  ;;  %v3400_v5 = vsel %vm1176_vm3, %v7490_v15, 0.0  ;;  %v4506_v1 = vunpack.i.h.bf16 %v4504_v28  ;;  %v4505_v51 = vunpack.i.l.bf16 %v4504_v28  ;;  %v4499_v48 = vpop.permute.xlu1 %4498 }
 0x359   : > { %4014 = vrot.lane.b32.xlu0 %v3995_v24, %s4657_s11  ;;  %v3401_v58 = vrot.slane %v3400_v5, 4  ;;  %v4501_v49 = vunpack.i.h.bf16 %v4499_v48  ;;  %v4500_v47 = vunpack.i.l.bf16 %v4499_v48  ;;  %v3264_v48 = vsel %vm1092_vm4, %v7460_v9, %v7457_v62 }
 0x35a   : > { %v3982_v31 = vsel %vm1945_vm10, %v4505_v51, %v4506_v1 }
 0x35b   : > { %v3307_v55 = vpop.permute.xlu0 %3306  ;;  %v3402_v22 = vadd.f32 %v3401_v58, %v3400_v5  ;;  %v3979_v16 = vsel %vm1945_vm10, %v4496_v54, %v4500_v47  ;;  %v3980_v11 = vsel %vm1945_vm10, %v4500_v47, %v4501_v49  ;;  %v3981_v38 = vsel %vm1945_vm10, %v4501_v49, %v4505_v51 }
 0x35c   : > { %v3996_v43 = vmul.f32 %v3979_v16, %v3955_v25  ;;  %v3997_v37 = vmul.f32 %v3980_v11, %v3956_v57  ;;  %v7506_v20 = vadd.f32 %v3307_v55, %v7335_v60  ;;  %v4509_v17 = vpop.permute.xlu1 %4508  ;;  %v3957_v54 = vmul.f32 %v8741_v29, %v8719_v10 }
 0x35d   : > { %v3403_v2 = vrot.slane %v3402_v22, 2  ;;  %v4511_v56 = vunpack.i.h.bf16 %v4509_v17  ;;  %v4510_v3 = vunpack.i.l.bf16 %v4509_v17  ;;  %v3959_v5 = vmul.f32 %v8741_v29, %v8721_v8 }
 0x35e   : > { %v3351_v34 = vsel %vm3350_vm11, %v7506_v20, 0.0  ;;  %4016 = vrot.lane.b32.xlu1 %v3996_v43, %s4657_s11  ;;  %4018 = vrot.lane.b32.xlu0 %v3997_v37, %s4657_s11  ;;  %v3960_v51 = vmul.f32 %v8741_v29, %v8720_v26  ;;  %v3281_v58 = vadd.f32 %v3263_v6, %v7284_v19  ;;  %v3999_v49 = vmul.f32 %v3982_v31, %v3958_v23 }
 0x35f   : > { %v3311_v60 = vpop.permute.xlu0 %3310  ;;  %v3404_v24 = vadd.f32 %v3403_v2, %v3402_v22  ;;  %v3352_v28 = vrot.slane %v3351_v34, 4  ;;  %v3998_v47 = vmul.f32 %v3981_v38, %v3957_v54  ;;  %v3983_v16 = vsel %vm1945_vm10, %v4506_v1, %v4510_v3 }
 0x360   : > { %v3309_v25 = vpop.permute.xlu1 %3308  ;;  %v3984_v22 = vsel %vm1945_vm10, %v4510_v3, %v4511_v56  ;;  %v3265_v29 = vsel %vm1092_vm4, %v7457_v62, %v7465_v13  ;;  %v4000_v37 = vmul.f32 %v3983_v16, %v3959_v5 }
 0x361   : > { %v3353_v57 = vadd.f32 %v3352_v28, %v3351_v34  ;;  %v3324_v11 = vsel %vm1092_vm4, %v3307_v55, %v3309_v25  ;;  %v3325_v43 = vsel %vm1092_vm4, %v3309_v25, %v3311_v60  ;;  %v3405_v6 = vrot.slane %v3404_v24, 1 }
 0x362   : > { %v7533_v9 = vadd.f32 %v3324_v11, %v7450_v63  ;;  %4020 = vrot.lane.b32.xlu1 %v3998_v47, %s4657_s11  ;;  %4022 = vrot.lane.b32.xlu0 %v3999_v49, %s4657_s11  ;;  %v7537_v31 = vadd.f32 %v3325_v43, %v3281_v58  ;;  %v3282_v55 = vadd.f32 %v3264_v48, %v7286_v0  ;;  %v8742_v58 = vld [vmem:[#allocation116_spill] sm:$0xff] }
 0x363   : > { %v3315_v19 = vpop.permute.xlu0 %3314  ;;  %v3354_v1 = vrot.slane %v3353_v57, 2  ;;  %v4001_v17 = vmul.f32 %v3984_v22, %v3960_v51  ;;  %v3283_v38 = vadd.f32 %v3265_v29, %v7309_v32  ;;  %v3406_v5 = vadd.f32 %v3405_v6, %v3404_v24 }
 0x364   : > { %v3358_v62 = vrot.slane %v7533_v9, 4  ;;  %v3313_v2 = vpop.permute.xlu1 %3312  ;;  %v3364_v3 = vrot.slane %v7537_v31, 4  ;;  %v3266_v24 = vsel %vm1092_vm4, %v7465_v13, %v7463_v18 }
 0x365   : > { %v3355_v63 = vadd.f32 %v3354_v1, %v3353_v57  ;;  %v3326_v23 = vsel %vm1092_vm4, %v3311_v60, %v3313_v2  ;;  %v3327_v34 = vsel %vm1092_vm4, %v3313_v2, %v3315_v19  ;;  %v4002_v60 = vmul.f32 %v4511_v56, %v8742_v58 }
 0x366   : > { %v3359_v54 = vadd.f32 %v3358_v62, %v7533_v9  ;;  %v7546_v28 = vadd.f32 %v3326_v23, %v3282_v55  ;;  %4024 = vrot.lane.b32.xlu1 %v4000_v37, %s4657_s11  ;;  %4026 = vrot.lane.b32.xlu0 %v4001_v17, %s4657_s11  ;;  %v3365_v32 = vadd.f32 %v3364_v3, %v7537_v31 }
 0x367   : > { %v7550_v0 = vpop.permute.xlu0 %3318  ;;  %v3356_v51 = vrot.slane %v3355_v63, 1  ;;  %v7553_v48 = vadd.f32 %v3327_v34, %v3283_v38 }
 0x368   : > { %v3360_v49 = vrot.slane %v3359_v54, 2  ;;  %v3370_v47 = vrot.slane %v7546_v28, 4  ;;  %v3330_v25 = vsel %vm1092_vm4, %v7550_v0, %v7468_v61  ;;  %v3317_v57 = vpop.permute.xlu1 %3316  ;;  %v3366_v22 = vrot.slane %v3365_v32, 2 }
 0x369   : > { %v3357_v16 = vadd.f32 %v3356_v51, %v3355_v63  ;;  %v3376_v11 = vrot.slane %v7553_v48, 4  ;;  %v7566_v56 = vadd.f32 %v3330_v25, %v7480_v27  ;;  %v3415_v61 = vmul.f32 0.125, %v3406_v5 }
 0x36a   : > { %v3361_v29 = vadd.f32 %v3360_v49, %v3359_v54  ;;  %v3371_v43 = vadd.f32 %v3370_v47, %v7546_v28  ;;  %4028 = vrot.lane.b32.xlu1 %v4002_v60, %s4657_s11  ;;  %v3367_v55 = vadd.f32 %v3366_v22, %v3365_v32  ;;  %v3328_v13 = vsel %vm1092_vm4, %v3315_v19, %v3317_v57 }
 0x36b   : > { %v7569_v6 = vpop.permute.xlu0 %3674  ;;  %v3407_v1 = vmul.f32 0.125, %v3357_v16  ;;  %v3377_v37 = vadd.f32 %v3376_v11, %v7553_v48  ;;  %v3394_v2 = vrot.slane %v7566_v56, 4  ;;  %v3284_v27 = vadd.f32 %v3266_v24, %v7311_v40 }
 0x36c   : > { %v3362_v17 = vrot.slane %v3361_v29, 1  ;;  %v3372_v62 = vrot.slane %v3371_v43, 2  ;;  %v7574_v38 = vpop.permute.xlu1 %3672  ;;  %v3368_v3 = vrot.slane %v3367_v55, 1  ;;  %v3267_v54 = vsel %vm1092_vm4, %v7463_v18, %v7474_v50 }
 0x36d   : > { %v7578_v63 = vsub.f32 %v7506_v20, %v3407_v1  ;;  %v3378_v23 = vrot.slane %v3377_v37, 2  ;;  %v3395_v51 = vadd.f32 %v3394_v2, %v7566_v56  ;;  %v7588_v60 = vadd.f32 %v3328_v13, %v3284_v27 }
 0x36e   : > { %v3363_v34 = vadd.f32 %v3362_v17, %v3361_v29  ;;  %v3373_v5 = vadd.f32 %v3372_v62, %v3371_v43  ;;  %v3369_v58 = vadd.f32 %v3368_v3, %v3367_v55  ;;  %v7591_v20 = vsub.f32 %v7490_v15, %v3415_v61 }
 0x36f   : > { %v7584_v32 = vpop.permute.xlu0 %3678  ;;  %v3425_v19 = vmul.f32 %v7578_v63, %v7578_v63  ;;  %v3379_v40 = vadd.f32 %v3378_v23, %v3377_v37  ;;  %v3396_v25 = vrot.slane %v3395_v51, 2  ;;  %v3285_v11 = vadd.f32 %v3267_v54, %v7325_v30 }
 0x370   : > { %v3408_v49 = vmul.f32 0.125, %v3363_v34  ;;  %v3374_v47 = vrot.slane %v3373_v5, 1  ;;  %v7593_v18 = vpop.permute.xlu1 %3676  ;;  %v3409_v16 = vmul.f32 0.125, %v3369_v58  ;;  %v3382_v37 = vrot.slane %v7588_v60, 4 }
 0x371   : > { %v3434_v50 = vsel %vm3350_vm11, %v3425_v19, 0.0  ;;  %v3380_v22 = vrot.slane %v3379_v40, 1  ;;  %v3397_v55 = vadd.f32 %v3396_v25, %v3395_v51  ;;  %v3433_v17 = vmul.f32 %v7591_v20, %v7591_v20 }
 0x372   : > { %v3435_v24 = vrot.slane %v3434_v50, 4  ;;  %v7598_v29 = vsub.f32 %v7533_v9, %v3408_v49  ;;  %v3375_v43 = vadd.f32 %v3374_v47, %v3373_v5  ;;  %v7603_v15 = vsub.f32 %v7537_v31, %v3409_v16 }
 0x373   : > { %v7600_v1 = vpop.permute.xlu0 %3682  ;;  %v3381_v61 = vadd.f32 %v3380_v22, %v3379_v40  ;;  %v3398_v31 = vrot.slane %v3397_v55, 1  ;;  %v3383_v3 = vadd.f32 %v3382_v37, %v7588_v60  ;;  %v3329_v5 = vsel %vm1092_vm4, %v3317_v57, %v7550_v0 }
 0x374   : > { %8743 = vst [vmem:[#allocation115_spill] sm:$0xff] %v7600_v1  ;;  %v3436_v62 = vadd.f32 %v3435_v24, %v3434_v50  ;;  %v3426_v30 = vmul.f32 %v7598_v29, %v7598_v29  ;;  %v3410_v2 = vmul.f32 0.125, %v3375_v43  ;;  %v7610_v9 = vpop.permute.xlu1 %3680  ;;  %v3427_v13 = vmul.f32 %v7603_v15, %v7603_v15 }
 0x375   : > { %v3411_v27 = vmul.f32 0.125, %v3381_v61  ;;  %v3399_v40 = vadd.f32 %v3398_v31, %v3397_v55  ;;  %v3384_v49 = vrot.slane %v3383_v3, 2  ;;  %v3483_v47 = vsel %vm1176_vm3, %v3433_v17, 0.0 }
 0x376   : > { %v3437_v23 = vrot.slane %v3436_v62, 2  ;;  %v3441_v54 = vrot.slane %v3426_v30, 4  ;;  %v7616_v34 = vsub.f32 %v7546_v28, %v3410_v2  ;;  %v3447_v19 = vrot.slane %v3427_v13, 4 }
 0x377   : > { %v7620_v51 = vpop.permute.xlu0 %3686  ;;  %v7623_v58 = vsub.f32 %v7553_v48, %v3411_v27  ;;  %v3414_v57 = vmul.f32 0.125, %v3399_v40  ;;  %v3385_v24 = vadd.f32 %v3384_v49, %v3383_v3  ;;  %v7632_v55 = vadd.f32 %v3329_v5, %v3285_v11 }
 0x378   : > { %v3438_v25 = vadd.f32 %v3437_v23, %v3436_v62  ;;  %v3442_v50 = vadd.f32 %v3441_v54, %v3426_v30  ;;  %v3428_v16 = vmul.f32 %v7616_v34, %v7616_v34  ;;  %v7628_v28 = vpop.permute.xlu1 %3684  ;;  %v3448_v22 = vadd.f32 %v3447_v19, %v3427_v13 }
 0x379   : > { %v3429_v0 = vmul.f32 %v7623_v58, %v7623_v58  ;;  %v7637_v30 = vsub.f32 %v7566_v56, %v3414_v57  ;;  %v3386_v2 = vrot.slane %v3385_v24, 1  ;;  %v3484_v27 = vrot.slane %v3483_v47, 4 }
 0x37a   : > { %v3439_v43 = vrot.slane %v3438_v25, 1  ;;  %v3443_v48 = vrot.slane %v3442_v50, 2  ;;  %v3453_v61 = vrot.slane %v3428_v16, 4  ;;  %v3449_v17 = vrot.slane %v3448_v22, 2 }
 0x37b   : > { %v7634_v37 = vpop.permute.xlu0 %3790  ;;  %v3459_v62 = vrot.slane %v3429_v0, 4  ;;  %v3432_v11 = vmul.f32 %v7637_v30, %v7637_v30  ;;  %v3387_v5 = vadd.f32 %v3386_v2, %v3385_v24 }
 0x37c   : > { %8744 = vst [vmem:[#allocation93_spill] sm:$0xff] %v7634_v37  ;;  %v3440_v13 = vadd.f32 %v3439_v43, %v3438_v25  ;;  %v3444_v31 = vadd.f32 %v3443_v48, %v3442_v50  ;;  %v3454_v23 = vadd.f32 %v3453_v61, %v3428_v16  ;;  %v7639_v54 = vpop.permute.xlu1 %3688  ;;  %v3450_v3 = vadd.f32 %v3449_v17, %v3448_v22 }
 0x37d   : > { %v3460_v19 = vadd.f32 %v3459_v62, %v3429_v0  ;;  %v3388_v37 = vrot.slane %v7632_v55, 4  ;;  %v3477_v25 = vrot.slane %v3432_v11, 4  ;;  %v3412_v50 = vmul.f32 0.125, %v3387_v5 }
 0x37e   : > { %v3490_v40 = vmul.f32 0.125, %v3440_v13  ;;  %v3445_v49 = vrot.slane %v3444_v31, 1  ;;  %v3455_v52 = vrot.slane %v3454_v23, 2  ;;  %v3451_v57 = vrot.slane %v3450_v3, 1 }
 0x37f   : > { %v7644_v56 = vpop.permute.xlu0 %3794  ;;  %v3461_v21 = vrot.slane %v3460_v19, 2  ;;  %v3389_v22 = vadd.f32 %v3388_v37, %v7632_v55  ;;  %v3478_v24 = vadd.f32 %v3477_v25, %v3432_v11  ;;  %v7650_v17 = vsub.f32 %v7588_v60, %v3412_v50 }
 0x380   : > { %8745 = vst [vmem:[#allocation118_spill] sm:$0xff] %v7644_v56  ;;  %v3446_v16 = vadd.f32 %v3445_v49, %v3444_v31  ;;  %v3456_v43 = vadd.f32 %v3455_v52, %v3454_v23  ;;  %v7647_v0 = vpop.permute.xlu1 %3792  ;;  %v3452_v48 = vadd.f32 %v3451_v57, %v3450_v3  ;;  %v3485_v62 = vadd.f32 %v3484_v27, %v3483_v47 }
 0x381   : > { %v3462_v61 = vadd.f32 %v3461_v21, %v3460_v19  ;;  %v3499_v2 = vadd.f32 1e-06, %v3490_v40  ;;  %v3390_v56 = vrot.slane %v3389_v22, 2  ;;  %v3479_v42 = vrot.slane %v3478_v24, 2 }
 0x382   : > { %v3457_v13 = vrot.slane %v3456_v43, 1  ;;  %v3491_v26 = vmul.f32 0.125, %v3446_v16  ;;  %v3430_v52 = vmul.f32 %v7650_v17, %v7650_v17  ;;  %v3492_v31 = vmul.f32 0.125, %v3452_v48 }
 0x383   : > { %v3463_v1 = vrot.slane %v3462_v61, 1  ;;  %v3391_v23 = vadd.f32 %v3390_v56, %v3389_v22  ;;  %v7654_v5 = vpop.permute.xlu0 %3798  ;;  %v3480_v60 = vadd.f32 %v3479_v42, %v3478_v24  ;;  %v3486_v47 = vrot.slane %v3485_v62, 2 }
 0x384   : > { %v3458_v37 = vadd.f32 %v3457_v13, %v3456_v43  ;;  %8746 = vst [vmem:[#allocation4_spill] sm:$0xff] %v7654_v5  ;;  %v7656_v21 = vpop.permute.xlu1 %3796  ;;  %v3465_v19 = vrot.slane %v3430_v52, 4  ;;  %4612 = vrsqrt.f32 %v3499_v2  ;;  %v3500_v40 = vadd.f32 1e-06, %v3491_v26 }
 0x385   : > { %v3464_v3 = vadd.f32 %v3463_v1, %v3462_v61  ;;  %v3392_v11 = vrot.slane %v3391_v23, 1  ;;  %v3481_v57 = vrot.slane %v3480_v60, 1  ;;  %v3501_v25 = vadd.f32 1e-06, %v3492_v31 }
 0x386   : > { %v3493_v27 = vmul.f32 0.125, %v3458_v37  ;;  %v3466_v16 = vadd.f32 %v3465_v19, %v3430_v52  ;;  %v3487_v56 = vadd.f32 %v3486_v47, %v3485_v62  ;;  %4614 = vrsqrt.f32 %v3500_v40 }
 0x387   : > { %v3494_v49 = vmul.f32 0.125, %v3464_v3  ;;  %v3393_v50 = vadd.f32 %v3392_v11, %v3391_v23  ;;  %v3482_v48 = vadd.f32 %v3481_v57, %v3480_v60  ;;  %v7660_v1 = vpop.permute.xlu0 %3802  ;;  %4616 = vrsqrt.f32 %v3501_v25 }
 0x388   : > { %v7658_v43 = vpop.permute.xlu1 %3800  ;;  %v3502_v22 = vadd.f32 1e-06, %v3493_v27  ;;  %v3467_v5 = vrot.slane %v3466_v16, 2  ;;  %v3488_v2 = vrot.slane %v3487_v56, 1  ;;  %v7670_v62 = vsel %vm1176_vm3, %v7628_v28, %v7620_v51 }
 0x389   : > { %v3413_v13 = vmul.f32 0.125, %v3393_v50  ;;  %v3503_v42 = vadd.f32 1e-06, %v3494_v49  ;;  %v3497_v24 = vmul.f32 0.125, %v3482_v48  ;;  %v7679_v19 = vsel %vm1176_vm3, %v7620_v51, %v7639_v54 }
 0x38a   : > { %v3468_v26 = vadd.f32 %v3467_v5, %v3466_v16  ;;  %4618 = vrsqrt.f32 %v3502_v22  ;;  %v3489_v47 = vadd.f32 %v3488_v2, %v3487_v56 }
 0x38b   : > { %v7663_v61 = vsub.f32 %v7632_v55, %v3413_v13  ;;  %4620 = vrsqrt.f32 %v3503_v42  ;;  %v7674_v60 = vpop.permute.xlu0 %3806  ;;  %v3506_v5 = vadd.f32 1e-06, %v3497_v24  ;;  %v8747_v42 = vld [vmem:[#allocation27_spill] sm:$0xff] }
 0x38c   : > { %v3469_v31 = vrot.slane %v3468_v26, 1  ;;  %v7672_v37 = vpop.permute.xlu1 %3804  ;;  %v3498_v48 = vmul.f32 0.125, %v3489_v47 }
 0x38d   : > { %v3431_v52 = vmul.f32 %v7663_v61, %v7663_v61  ;;  %4622 = vrsqrt.f32 %v3506_v5 }
 0x38e   : > { %v4613_v23 = vpop.eup %4612  ;;  %v3470_v3 = vadd.f32 %v3469_v31, %v3468_v26  ;;  %v3507_v2 = vadd.f32 1e-06, %v3498_v48  ;;  %v8748_v31 = vld [vmem:[#allocation38_spill] sm:$0xff] }
 0x38f   : > { %v3471_v55 = vrot.slane %v3431_v52, 4  ;;  %v3517_v40 = vmul.f32 %v4613_v23, %v7578_v63  ;;  %v7684_v13 = vpop.permute.xlu0 %3852 }
 0x390   : > { %v3495_v11 = vmul.f32 0.125, %v3470_v3  ;;  %v4615_v25 = vpop.eup %4614  ;;  %v7682_v50 = vpop.permute.xlu1 %3850 }
 0x391   : > { %v3472_v27 = vadd.f32 %v3471_v55, %v3431_v52  ;;  %v4617_v16 = vpop.eup %4616  ;;  %v3526_v51 = vmul.f32 %v3517_v40, %v8747_v42  ;;  %v3518_v24 = vmul.f32 %v4615_v25, %v7598_v29 }
 0x392   : > { %v3504_v57 = vadd.f32 1e-06, %v3495_v11  ;;  %v3519_v63 = vmul.f32 %v4617_v16, %v7603_v15 }
 0x393   : > { %v3473_v49 = vrot.slane %v3472_v27, 2  ;;  %v3535_v23 = vadd.f32 %v3526_v51, %v8748_v31  ;;  %v3527_v11 = vmul.f32 %v3518_v24, %v8747_v42 }
 0x394   : > { %4624 = vrsqrt.f32 %v3504_v57  ;;  %v4619_v54 = vpop.eup %4618  ;;  %v7690_v3 = vpop.permute.xlu1 %3854  ;;  %v3528_v29 = vmul.f32 %v3519_v63, %v8747_v42 }
 0x395   : > { %v3474_v22 = vadd.f32 %v3473_v49, %v3472_v27  ;;  %v4621_v26 = vpop.eup %4620  ;;  %v3520_v55 = vmul.f32 %v4619_v54, %v7616_v34  ;;  %v7694_v27 = vpop.permute.xlu0 %3856  ;;  %3553 = vrot.lane.b32.xlu0 %v3535_v23, %s4667_s30  ;;  %4626 = vrsqrt.f32 %v3507_v2  ;;  %v3536_v49 = vadd.f32 %v3527_v11, %v8748_v31 }
 0x396   : > { %v3521_v5 = vmul.f32 %v4621_v26, %v7623_v58  ;;  %v3537_v57 = vadd.f32 %v3528_v29, %v8748_v31 }
 0x397   : > { %v3475_v56 = vrot.slane %v3474_v22, 1  ;;  %v4623_v40 = vpop.eup %4622  ;;  %v3529_v34 = vmul.f32 %v3520_v55, %v8747_v42  ;;  %3555 = vrot.lane.b32.xlu1 %v3536_v49, %s4667_s30 }
 0x398   : > { %v3530_v58 = vmul.f32 %v3521_v5, %v8747_v42  ;;  %v7706_v48 = vpop.permute.xlu1 %3858 }
 0x399   : > { %v3476_v52 = vadd.f32 %v3475_v56, %v3474_v22  ;;  %3557 = vrot.lane.b32.xlu0 %v3537_v57, %s4667_s30  ;;  %v7708_v22 = vpop.permute.xlu0 %3860  ;;  %v3538_v51 = vadd.f32 %v3529_v34, %v8748_v31  ;;  %v3524_v56 = vmul.f32 %v4623_v40, %v7637_v30  ;;  %v3604_v34 = vmul.f32 %v8726_v12, %v8715_v39  ;;  %v8752_v39 = vld [vmem:[#allocation57_spill] sm:$0xff] }
 0x39a   : > { %v3539_v54 = vadd.f32 %v3530_v58, %v8748_v31 }
 0x39b   : > { %v3496_v47 = vmul.f32 0.125, %v3476_v52  ;;  %3559 = vrot.lane.b32.xlu1 %v3538_v51, %s4667_s30  ;;  %v3533_v63 = vmul.f32 %v3524_v56, %v8747_v42  ;;  %v8750_v51 = vld [vmem:[#allocation55_spill] sm:$0xff]  ;;  %v3605_v56 = vmul.f32 %v8726_v12, %v8712_v46  ;;  %v3607_v46 = vmul.f32 %v8726_v12, %v8716_v35 }
 0x39c   : > { %v7717_v24 = vpop.permute.xlu1 %3862  ;;  %v3609_v35 = vmul.f32 %v8726_v12, %v8718_v33 }
 0x39d   : > { %v3505_v15 = vadd.f32 1e-06, %v3496_v47  ;;  %3561 = vrot.lane.b32.xlu0 %v3539_v54, %s4667_s30  ;;  %v7720_v52 = vpop.permute.xlu0 %3864  ;;  %v3542_v5 = vadd.f32 %v3533_v63, %v8748_v31  ;;  %v3722_v54 = vmul.f32 %v8734_v4, %v8750_v51  ;;  %v8755_v51 = vld [vmem:[#allocation37_spill] sm:$0xff] }
 0x39e   : > { %v4625_v25 = vpop.eup %4624 }
 0x39f   : > { %4628 = vrsqrt.f32 %v3505_v15  ;;  %v3522_v16 = vmul.f32 %v4625_v25, %v7650_v17  ;;  %v4627_v2 = vpop.eup %4626 }
 0x3a0   : > { %v3525_v30 = vmul.f32 %v4627_v2, %v7591_v20  ;;  %v7727_v11 = vpop.permute.xlu1 %3866  ;;  %v3724_v2 = vmul.f32 %v8734_v4, %v8752_v39  ;;  %v8759_v39 = vld [vmem:[#allocation68_spill] sm:$0xff] }
 0x3a1   : > { %v3531_v26 = vmul.f32 %v3522_v16, %v8747_v42  ;;  %v7730_v29 = vpop.permute.xlu0 %3911 }
 0x3a2   : > { %v3534_v15 = vmul.f32 %v3525_v30, %v8747_v42 }
 0x3a3   : > { %v3540_v17 = vadd.f32 %v3531_v26, %v8748_v31 }
 0x3a4   : > { %v3543_v20 = vadd.f32 %v3534_v15, %v8748_v31  ;;  %v7736_v49 = vpop.permute.xlu1 %3913  ;;  %v8754_v15 = vld [vmem:[#allocation35_spill] sm:$0xff] }
 0x3a5   : > { %3563 = vrot.lane.b32.xlu1 %v3540_v17, %s4667_s30  ;;  %v7740_v25 = vpop.permute.xlu0 %3915  ;;  %v8751_v17 = vld [vmem:[#allocation59_spill] sm:$0xff] }
 0x3a6   : > { %v3723_v63 = vmul.f32 %v8734_v4, %v8751_v17 }
 0x3a8   : > { %v7770_v30 = vpop.permute.xlu1 %3917 }
 0x3a9   : > { %v4629_v23 = vpop.eup %4628  ;;  %3567 = vrot.lane.b32.xlu1 %v3542_v5, %s4667_s30 }
 0x3aa   : > { %v3523_v55 = vmul.f32 %v4629_v23, %v7663_v61  ;;  %v8749_v61 = vld [vmem:[#allocation15_spill] sm:$0xff] }
 0x3ab   : > { %v3628_v57 = vmul.f32 %v8749_v61, %v8722_v7  ;;  %v3629_v58 = vmul.f32 %v8749_v61, %v8727_v44  ;;  %v3630_v16 = vmul.f32 %v8749_v61, %v8725_v41  ;;  %v3606_v7 = vmul.f32 %v8726_v12, %v8717_v53 }
 0x3ac   : > { %v3532_v47 = vmul.f32 %v3523_v55, %v8747_v42  ;;  %v3631_v44 = vmul.f32 %v8749_v61, %v8731_v59  ;;  %v3690_v41 = vsel %vm1176_vm3, %v7574_v38, %v7569_v6  ;;  %v3608_v53 = vmul.f32 %v8726_v12, %v8719_v10  ;;  %v7776_v38 = vpop.permute.xlu0 %3919 }
 0x3ad   : > { %v3636_v26 = vadd.f32 %v3628_v57, %v3604_v34  ;;  %v3632_v23 = vmul.f32 %v8749_v61, %v8728_v45  ;;  %v3637_v55 = vadd.f32 %v3629_v58, %v3605_v56  ;;  %v3638_v5 = vadd.f32 %v3630_v16, %v3606_v7  ;;  %v8756_v56 = vld [vmem:[#allocation34_spill] sm:$0xff]  ;;  %v8757_v7 = vld [vmem:[#allocation115_spill] sm:$0xff] }
 0x3ae   : > { %v3541_v40 = vadd.f32 %v3532_v47, %v8748_v31  ;;  %v8753_v47 = vld [vmem:[#allocation60_spill] sm:$0xff]  ;;  %v3610_v10 = vmul.f32 %v8726_v12, %v8721_v8  ;;  %v3633_v45 = vmul.f32 %v8749_v61, %v8736_v14  ;;  %v3691_v34 = vsel %vm1176_vm3, %v7569_v6, %v7593_v18 }
 0x3af   : > { %v3725_v59 = vmul.f32 %v8734_v4, %v8753_v47  ;;  %v3706_v57 = vadd.f32 %v3690_v41, %v3636_v26  ;;  %v3692_v58 = vsel %vm1176_vm3, %v7593_v18, %v7584_v32  ;;  %v3639_v16 = vadd.f32 %v3631_v44, %v3607_v46  ;;  %v8758_v26 = vld [vmem:[#allocation36_spill] sm:$0xff] }
 0x3b0   : > { %3565 = vrot.lane.b32.xlu0 %v3541_v40, %s4667_s30  ;;  %v3726_v40 = vmul.f32 %v8734_v4, %v8754_v15  ;;  %v3640_v33 = vadd.f32 %v3632_v23, %v3608_v53  ;;  %v3693_v8 = vsel %vm1176_vm3, %v7584_v32, %v7610_v9  ;;  %v3727_v14 = vmul.f32 %v8734_v4, %v8755_v51  ;;  %v7809_v23 = vpop.permute.xlu1 %3921  ;;  %v8760_v15 = vld [vmem:[#allocation40_spill] sm:$0xff]  ;;  %v8761_v51 = vld [vmem:[#allocation63_spill] sm:$0xff]  ;;  %v7815_v31 = vpop.permute.xlu0 %3923 }
 0x3b1   : > { %v3694_v6 = vsel %vm1176_vm3, %v7610_v9, %v8757_v7  ;;  %v3728_v17 = vmul.f32 %v8734_v4, %v8758_v26  ;;  %v3695_v18 = vsel %vm1176_vm3, %v8757_v7, %v7628_v28  ;;  %v3611_v32 = vmul.f32 %v8726_v12, %v8759_v39  ;;  %v8763_v12 = vld [vmem:[#allocation62_spill] sm:$0xff] }
 0x3b2   : > { %v3707_v44 = vadd.f32 %v3691_v34, %v3637_v55  ;;  %v3708_v41 = vadd.f32 %v3692_v58, %v3638_v5  ;;  %v3641_v46 = vadd.f32 %v3633_v45, %v3609_v35  ;;  %v3709_v47 = vadd.f32 %v3693_v8, %v3639_v16  ;;  %v8764_v35 = vld [vmem:[#allocation61_spill] sm:$0xff] }
 0x3b3   : > { %v3729_v9 = vmul.f32 %v8734_v4, %v8760_v15  ;;  %v3710_v28 = vadd.f32 %v3694_v6, %v3640_v33  ;;  %v8766_v4 = vld [vmem:[#allocation94_spill] sm:$0xff]  ;;  %v8767_v58 = vld [vmem:[#allocation93_spill] sm:$0xff] }
 0x3b4   : > { %3569 = vrot.lane.b32.xlu0 %v3543_v20, %s4667_s30  ;;  %v3634_v20 = vmul.f32 %v8749_v61, %v8735_v36  ;;  %v3635_v36 = vmul.f32 %v8749_v61, %v8756_v56  ;;  %v3730_v61 = vadd.f32 %v3722_v54, %v3706_v57  ;;  %v8762_v56 = vld [vmem:[#allocation32_spill] sm:$0xff]  ;;  %v3711_v7 = vadd.f32 %v3695_v18, %v3641_v46  ;;  %v8768_v33 = vld [vmem:[#allocation97_spill] sm:$0xff]  ;;  %v8771_v15 = vld [vmem:[#allocation118_spill] sm:$0xff] }
 0x3b5   : > { %v3746_v26 = vmul.f32 %v8762_v56, %v8761_v51  ;;  %v3747_v55 = vmul.f32 %v8762_v56, %v8763_v12  ;;  %v3748_v54 = vmul.f32 %v8762_v56, %v8764_v35  ;;  %v3731_v57 = vadd.f32 %v3723_v63, %v3707_v44  ;;  %v8769_v18 = vld [vmem:[#allocation96_spill] sm:$0xff]  ;;  %v7839_v44 = vpop.permute.xlu1 %3925 }
 0x3b6   : > { %v3642_v53 = vadd.f32 %v3634_v20, %v3610_v10  ;;  %v3643_v42 = vadd.f32 %v3635_v36, %v3611_v32  ;;  %v8765_v10 = vld [vmem:[#allocation64_spill] sm:$0xff]  ;;  %v3750_v20 = vmul.f32 %v8762_v56, %v8766_v4  ;;  %v3732_v34 = vadd.f32 %v3724_v2, %v3708_v41 }
 0x3b7   : > { %v3749_v45 = vmul.f32 %v8762_v56, %v8765_v10  ;;  %v3808_v16 = vsel %vm1176_vm3, %v8767_v58, %v7647_v0  ;;  %v3751_v8 = vmul.f32 %v8762_v56, %v8768_v33  ;;  %v3733_v36 = vadd.f32 %v3725_v59, %v3709_v47  ;;  %v8772_v47 = vld [vmem:[#allocation4_spill] sm:$0xff] }
 0x3b8   : > { %v3712_v5 = vadd.f32 %v7670_v62, %v3642_v53  ;;  %v3713_v62 = vadd.f32 %v7679_v19, %v3643_v42  ;;  %v3754_v6 = vadd.f32 %v3746_v26, %v3730_v61  ;;  %v3752_v39 = vmul.f32 %v8762_v56, %v8769_v18  ;;  %v8770_v53 = vld [vmem:[#allocation28_spill] sm:$0xff] }
 0x3b9   : > { %v3734_v32 = vadd.f32 %v3726_v40, %v3710_v28  ;;  %v3735_v46 = vadd.f32 %v3727_v14, %v3711_v7  ;;  %v3753_v63 = vmul.f32 %v8762_v56, %v8770_v53  ;;  %v3868_v2 = vsel %vm1359_vm5, %v7682_v50, %v7684_v13  ;;  %v7847_v40 = vpop.permute.xlu0 %3927 }
 0x3ba   : > { %v3736_v41 = vadd.f32 %v3728_v17, %v3712_v5  ;;  %v3809_v19 = vsel %vm1176_vm3, %v7647_v0, %v8771_v15  ;;  %v3824_v42 = vadd.f32 %v3808_v16, %v3754_v6  ;;  %v3810_v59 = vsel %vm1176_vm3, %v8771_v15, %v7656_v21 }
 0x3bb   : > { %v3755_v14 = vadd.f32 %v3747_v55, %v3731_v57  ;;  %v3756_v61 = vadd.f32 %v3748_v54, %v3732_v34  ;;  %v3811_v50 = vsel %vm1176_vm3, %v7656_v21, %v8772_v47  ;;  %v3929_v17 = vsel %vm1359_vm5, %v7730_v29, %v7736_v49 }
 0x3bc   : > { %v3737_v51 = vadd.f32 %v3729_v9, %v3713_v62  ;;  %v3757_v56 = vadd.f32 %v3749_v45, %v3733_v36  ;;  %v3812_v0 = vsel %vm1176_vm3, %v8772_v47, %v7658_v43  ;;  %v3884_v26 = vadd.f32 %v3868_v2, %v3824_v42 }
 0x3bd   : > { %v3825_v28 = vadd.f32 %v3809_v19, %v3755_v14  ;;  %v3826_v7 = vadd.f32 %v3810_v59, %v3756_v61  ;;  %v3758_v12 = vadd.f32 %v3750_v20, %v3734_v32  ;;  %v3813_v55 = vsel %vm1176_vm3, %v7658_v43, %v7660_v1 }
 0x3be   : > { %v3827_v21 = vadd.f32 %v3811_v50, %v3757_v56  ;;  %v3759_v35 = vadd.f32 %v3751_v8, %v3735_v46  ;;  %v3869_v29 = vsel %vm1359_vm5, %v7684_v13, %v7690_v3  ;;  %v3945_v9 = vadd.f32 %v3929_v17, %v3884_v26 }
 0x3bf   : > { %v3828_v10 = vadd.f32 %v3812_v0, %v3758_v12  ;;  %v3760_v45 = vadd.f32 %v3752_v39, %v3736_v41  ;;  %v3870_v4 = vsel %vm1359_vm5, %v7690_v3, %v7694_v27  ;;  %v3814_v43 = vsel %vm1176_vm3, %v7660_v1, %v7672_v37 }
 0x3c0   : > { %v3829_v57 = vadd.f32 %v3813_v55, %v3759_v35  ;;  %v3815_v34 = vsel %vm1176_vm3, %v7672_v37, %v7674_v60  ;;  %v3761_v58 = vadd.f32 %v3753_v63, %v3737_v51  ;;  %v3885_v16 = vadd.f32 %v3869_v29, %v3825_v28 }
 0x3c1   : > { %v3930_v33 = vsel %vm1359_vm5, %v7736_v49, %v7740_v25  ;;  %v3931_v3 = vsel %vm1359_vm5, %v7740_v25, %v7770_v30  ;;  %v3886_v8 = vadd.f32 %v3870_v4, %v3826_v7  ;;  %v3871_v1 = vsel %vm1359_vm5, %v7694_v27, %v7706_v48 }
 0x3c2   : > { %v3872_v37 = vsel %vm1359_vm5, %v7706_v48, %v7708_v22  ;;  %v3830_v36 = vadd.f32 %v3814_v43, %v3760_v45  ;;  %v3831_v62 = vadd.f32 %v3815_v34, %v3761_v58  ;;  %v3873_v49 = vsel %vm1359_vm5, %v7708_v22, %v7717_v24 }
 0x3c3   : > { %v3874_v25 = vsel %vm1359_vm5, %v7717_v24, %v7720_v52  ;;  %v3946_v6 = vadd.f32 %v3930_v33, %v3885_v16  ;;  %v3932_v27 = vsel %vm1359_vm5, %v7770_v30, %v7776_v38  ;;  %v3947_v18 = vadd.f32 %v3931_v3, %v3886_v8 }
 0x3c4   : > { %v3887_v46 = vadd.f32 %v3871_v1, %v3827_v21  ;;  %v3888_v53 = vadd.f32 %v3872_v37, %v3828_v10  ;;  %v3933_v24 = vsel %vm1359_vm5, %v7776_v38, %v7809_v23  ;;  %v3889_v30 = vadd.f32 %v3873_v49, %v3829_v57 }
 0x3c5   : > { %v3890_v19 = vadd.f32 %v3874_v25, %v3830_v36  ;;  %v3875_v42 = vsel %vm1359_vm5, %v7720_v52, %v7727_v11  ;;  %v3934_v14 = vsel %vm1359_vm5, %v7809_v23, %v7815_v31  ;;  %v3935_v56 = vsel %vm1359_vm5, %v7815_v31, %v7839_v44 }
 0x3c6   : > { %v3948_v59 = vadd.f32 %v3932_v27, %v3887_v46  ;;  %v3949_v51 = vadd.f32 %v3933_v24, %v3888_v53  ;;  %v3891_v7 = vadd.f32 %v3875_v42, %v3831_v62  ;;  %v3950_v12 = vadd.f32 %v3934_v14, %v3889_v30 }
 0x3c7   : > { %v3936_v55 = vsel %vm1359_vm5, %v7839_v44, %v7847_v40  ;;  %v3951_v10 = vadd.f32 %v3935_v56, %v3890_v19 }
 0x3c8   : > { %v3952_v40 = vadd.f32 %v3936_v55, %v3891_v7 }
 0x3ca   : > { %v4013_v5 = vpop.permute.xlu1 %4012 }
 0x3cb   : > { %v4015_v54 = vpop.permute.xlu0 %4014 }
 0x3cc   : > { %v4030_v20 = vsel %vm1092_vm4, %v4013_v5, %v4015_v54 }
 0x3cd   : > { %v7874_v13 = vadd.f32 %v4030_v20, %v3945_v9 }
 0x3cf   : > { %v4054_v60 = vrot.slane %v7874_v13, 4 }
 0x3d0   : > { %v4017_v39 = vpop.permute.xlu1 %4016  ;;  %v4019_v32 = vpop.permute.xlu0 %4018 }
 0x3d1   : > { %v4055_v48 = vadd.f32 %v4054_v60, %v7874_v13  ;;  %v4031_v63 = vsel %vm1092_vm4, %v4015_v54, %v4017_v39  ;;  %v4032_v22 = vsel %vm1092_vm4, %v4017_v39, %v4019_v32 }
 0x3d2   : > { %v7904_v41 = vadd.f32 %v4031_v63, %v3946_v6  ;;  %v7906_v15 = vadd.f32 %v4032_v22, %v3947_v18 }
 0x3d3   : > { %v4056_v2 = vrot.slane %v4055_v48, 2 }
 0x3d4   : > { %v4060_v47 = vrot.slane %v7904_v41, 4  ;;  %v4066_v38 = vrot.slane %v7906_v15, 4  ;;  %v4021_v50 = vpop.permute.xlu1 %4020  ;;  %v4023_v17 = vpop.permute.xlu0 %4022 }
 0x3d5   : > { %v4057_v61 = vadd.f32 %v4056_v2, %v4055_v48  ;;  %v4033_v0 = vsel %vm1092_vm4, %v4019_v32, %v4021_v50  ;;  %v4034_v52 = vsel %vm1092_vm4, %v4021_v50, %v4023_v17 }
 0x3d6   : > { %v4061_v26 = vadd.f32 %v4060_v47, %v7904_v41  ;;  %v4067_v23 = vadd.f32 %v4066_v38, %v7906_v15  ;;  %v7923_v28 = vadd.f32 %v4033_v0, %v3948_v59  ;;  %v7928_v5 = vadd.f32 %v4034_v52, %v3949_v51 }
 0x3d7   : > { %v4058_v11 = vrot.slane %v4057_v61, 1 }
 0x3d8   : > { %v4062_v21 = vrot.slane %v4061_v26, 2  ;;  %v4068_v35 = vrot.slane %v4067_v23, 2  ;;  %v4072_v29 = vrot.slane %v7923_v28, 4  ;;  %v4025_v9 = vpop.permute.xlu1 %4024  ;;  %v4027_v54 = vpop.permute.xlu0 %4026  ;;  %v4078_v45 = vrot.slane %v7928_v5, 4 }
 0x3d9   : > { %v4059_v31 = vadd.f32 %v4058_v11, %v4057_v61  ;;  %v4035_v4 = vsel %vm1092_vm4, %v4023_v17, %v4025_v9  ;;  %v4036_v20 = vsel %vm1092_vm4, %v4025_v9, %v4027_v54 }
 0x3da   : > { %v4063_v43 = vadd.f32 %v4062_v21, %v4061_v26  ;;  %v4069_v34 = vadd.f32 %v4068_v35, %v4067_v23  ;;  %v4073_v44 = vadd.f32 %v4072_v29, %v7923_v28  ;;  %v4079_v58 = vadd.f32 %v4078_v45, %v7928_v5 }
 0x3db   : > { %v4102_v57 = vmul.f32 0.125, %v4059_v31  ;;  %v7936_v16 = vadd.f32 %v4035_v4, %v3950_v12  ;;  %v7938_v33 = vadd.f32 %v4036_v20, %v3951_v10 }
 0x3dc   : > { %v4064_v8 = vrot.slane %v4063_v43, 1  ;;  %v4070_v1 = vrot.slane %v4069_v34, 1  ;;  %v4074_v37 = vrot.slane %v4073_v44, 2  ;;  %v4029_v60 = vpop.permute.xlu1 %4028  ;;  %v4080_v36 = vrot.slane %v4079_v58, 2 }
 0x3dd   : > { %v7941_v3 = vsub.f32 %v7874_v13, %v4102_v57  ;;  %v4084_v62 = vrot.slane %v7936_v16, 4  ;;  %v4090_v49 = vrot.slane %v7938_v33, 4  ;;  %v4037_v25 = vsel %vm1092_vm4, %v4027_v54, %v4029_v60 }
 0x3de   : > { %v4065_v27 = vadd.f32 %v4064_v8, %v4063_v43  ;;  %v4071_v18 = vadd.f32 %v4070_v1, %v4069_v34  ;;  %v4075_v48 = vadd.f32 %v4074_v37, %v4073_v44  ;;  %v4081_v39 = vadd.f32 %v4080_v36, %v4079_v58 }
 0x3df   : > { %v4118_v6 = vmul.f32 %v7941_v3, %v7941_v3  ;;  %v4085_v13 = vadd.f32 %v4084_v62, %v7936_v16  ;;  %v4091_v32 = vadd.f32 %v4090_v49, %v7938_v33  ;;  %v7950_v46 = vadd.f32 %v4037_v25, %v3952_v40 }
 0x3e0   : > { %v4103_v63 = vmul.f32 0.125, %v4065_v27  ;;  %v4104_v22 = vmul.f32 0.125, %v4071_v18  ;;  %v4076_v24 = vrot.slane %v4075_v48, 1  ;;  %v4082_v2 = vrot.slane %v4081_v39, 1 }
 0x3e1   : > { %v4126_v53 = vrot.slane %v4118_v6, 4  ;;  %v4086_v30 = vrot.slane %v4085_v13, 2  ;;  %v4092_v19 = vrot.slane %v4091_v32, 2  ;;  %v4096_v42 = vrot.slane %v7950_v46, 4 }
 0x3e2   : > { %v7954_v14 = vsub.f32 %v7904_v41, %v4103_v63  ;;  %v7957_v61 = vsub.f32 %v7906_v15, %v4104_v22  ;;  %v4077_v47 = vadd.f32 %v4076_v24, %v4075_v48  ;;  %v4083_v38 = vadd.f32 %v4082_v2, %v4081_v39 }
 0x3e3   : > { %v4127_v59 = vadd.f32 %v4126_v53, %v4118_v6  ;;  %v4087_v50 = vadd.f32 %v4086_v30, %v4085_v13  ;;  %v4093_v17 = vadd.f32 %v4092_v19, %v4091_v32  ;;  %v4097_v51 = vadd.f32 %v4096_v42, %v7950_v46 }
 0x3e4   : > { %v4119_v0 = vmul.f32 %v7954_v14, %v7954_v14  ;;  %v4120_v52 = vmul.f32 %v7957_v61, %v7957_v61  ;;  %v4105_v11 = vmul.f32 0.125, %v4077_v47  ;;  %v4106_v26 = vmul.f32 0.125, %v4083_v38 }
 0x3e5   : > { %v4128_v56 = vrot.slane %v4127_v59, 2  ;;  %v4088_v41 = vrot.slane %v4087_v50, 1  ;;  %v4094_v23 = vrot.slane %v4093_v17, 1  ;;  %v4098_v7 = vrot.slane %v4097_v51, 2 }
 0x3e6   : > { %v4132_v12 = vrot.slane %v4119_v0, 4  ;;  %v4138_v55 = vrot.slane %v4120_v52, 4  ;;  %v7965_v31 = vsub.f32 %v7923_v28, %v4105_v11  ;;  %v7968_v21 = vsub.f32 %v7928_v5, %v4106_v26 }
 0x3e7   : > { %v4129_v15 = vadd.f32 %v4128_v56, %v4127_v59  ;;  %v4089_v35 = vadd.f32 %v4088_v41, %v4087_v50  ;;  %v4095_v29 = vadd.f32 %v4094_v23, %v4093_v17  ;;  %v4099_v9 = vadd.f32 %v4098_v7, %v4097_v51 }
 0x3e8   : > { %v4133_v10 = vadd.f32 %v4132_v12, %v4119_v0  ;;  %v4139_v45 = vadd.f32 %v4138_v55, %v4120_v52  ;;  %v4121_v4 = vmul.f32 %v7965_v31, %v7965_v31  ;;  %v4122_v20 = vmul.f32 %v7968_v21, %v7968_v21 }
 0x3e9   : > { %v4130_v54 = vrot.slane %v4129_v15, 1  ;;  %v4107_v57 = vmul.f32 0.125, %v4089_v35  ;;  %v4108_v43 = vmul.f32 0.125, %v4095_v29  ;;  %v4100_v34 = vrot.slane %v4099_v9, 1 }
 0x3ea   : > { %v4134_v44 = vrot.slane %v4133_v10, 2  ;;  %v4140_v40 = vrot.slane %v4139_v45, 2  ;;  %v4144_v5 = vrot.slane %v4121_v4, 4  ;;  %v4150_v58 = vrot.slane %v4122_v20, 4 }
 0x3eb   : > { %v4131_v28 = vadd.f32 %v4130_v54, %v4129_v15  ;;  %v7975_v8 = vsub.f32 %v7936_v16, %v4107_v57  ;;  %v7978_v1 = vsub.f32 %v7938_v33, %v4108_v43  ;;  %v4101_v37 = vadd.f32 %v4100_v34, %v4099_v9 }
 0x3ec   : > { %v4135_v36 = vadd.f32 %v4134_v44, %v4133_v10  ;;  %v4141_v62 = vadd.f32 %v4140_v40, %v4139_v45  ;;  %v4145_v49 = vadd.f32 %v4144_v5, %v4121_v4  ;;  %v4151_v25 = vadd.f32 %v4150_v58, %v4122_v20  ;;  %v8773_v44 = vld [vmem:[#allocation27_spill] sm:$0xff] }
 0x3ed   : > { %v4174_v60 = vmul.f32 0.125, %v4131_v28  ;;  %v4123_v6 = vmul.f32 %v7975_v8, %v7975_v8  ;;  %v4124_v27 = vmul.f32 %v7978_v1, %v7978_v1  ;;  %v4109_v18 = vmul.f32 0.125, %v4101_v37 }
 0x3ee   : > { %v4136_v39 = vrot.slane %v4135_v36, 1  ;;  %v4142_v16 = vrot.slane %v4141_v62, 1  ;;  %v4146_v13 = vrot.slane %v4145_v49, 2  ;;  %v4152_v32 = vrot.slane %v4151_v25, 2 }
 0x3ef   : > { %v4182_v48 = vadd.f32 1e-06, %v4174_v60  ;;  %v4156_v33 = vrot.slane %v4123_v6, 4  ;;  %v4162_v53 = vrot.slane %v4124_v27, 4  ;;  %v7985_v63 = vsub.f32 %v7950_v46, %v4109_v18  ;;  %v8774_v60 = vld [vmem:[#allocation38_spill] sm:$0xff] }
 0x3f0   : > { %v4137_v22 = vadd.f32 %v4136_v39, %v4135_v36  ;;  %v4143_v24 = vadd.f32 %v4142_v16, %v4141_v62  ;;  %v4147_v2 = vadd.f32 %v4146_v13, %v4145_v49  ;;  %v4153_v30 = vadd.f32 %v4152_v32, %v4151_v25 }
 0x3f1   : > { %4630 = vrsqrt.f32 %v4182_v48  ;;  %v4157_v19 = vadd.f32 %v4156_v33, %v4123_v6  ;;  %v4163_v42 = vadd.f32 %v4162_v53, %v4124_v27  ;;  %v4125_v59 = vmul.f32 %v7985_v63, %v7985_v63 }
 0x3f2   : > { %v4175_v47 = vmul.f32 0.125, %v4137_v22  ;;  %v4176_v38 = vmul.f32 0.125, %v4143_v24  ;;  %v4148_v50 = vrot.slane %v4147_v2, 1  ;;  %v4154_v17 = vrot.slane %v4153_v30, 1 }
 0x3f3   : > { %v4158_v51 = vrot.slane %v4157_v19, 2  ;;  %v4164_v56 = vrot.slane %v4163_v42, 2  ;;  %v4168_v0 = vrot.slane %v4125_v59, 4 }
 0x3f4   : > { %v4183_v52 = vadd.f32 1e-06, %v4175_v47  ;;  %v4184_v46 = vadd.f32 1e-06, %v4176_v38  ;;  %v4149_v11 = vadd.f32 %v4148_v50, %v4147_v2  ;;  %v4155_v26 = vadd.f32 %v4154_v17, %v4153_v30 }
 0x3f5   : > { %v4159_v41 = vadd.f32 %v4158_v51, %v4157_v19  ;;  %v4165_v23 = vadd.f32 %v4164_v56, %v4163_v42  ;;  %v4169_v7 = vadd.f32 %v4168_v0, %v4125_v59 }
 0x3f6   : > { %4632 = vrsqrt.f32 %v4183_v52  ;;  %v4177_v15 = vmul.f32 0.125, %v4149_v11  ;;  %v4178_v12 = vmul.f32 0.125, %v4155_v26 }
 0x3f7   : > { %4634 = vrsqrt.f32 %v4184_v46  ;;  %v4160_v55 = vrot.slane %v4159_v41, 1  ;;  %v4166_v35 = vrot.slane %v4165_v23, 1  ;;  %v4170_v9 = vrot.slane %v4169_v7, 2 }
 0x3f8   : > { %v4185_v29 = vadd.f32 1e-06, %v4177_v15  ;;  %v4186_v54 = vadd.f32 1e-06, %v4178_v12 }
 0x3f9   : > { %v4161_v10 = vadd.f32 %v4160_v55, %v4159_v41  ;;  %v4167_v45 = vadd.f32 %v4166_v35, %v4165_v23  ;;  %v4171_v20 = vadd.f32 %v4170_v9, %v4169_v7 }
 0x3fa   : > { %4636 = vrsqrt.f32 %v4185_v29 }
 0x3fb   : > { %v4631_v4 = vpop.eup %4630  ;;  %4638 = vrsqrt.f32 %v4186_v54  ;;  %v4179_v43 = vmul.f32 0.125, %v4161_v10  ;;  %v4180_v34 = vmul.f32 0.125, %v4167_v45  ;;  %v4172_v28 = vrot.slane %v4171_v20, 1 }
 0x3fc   : > { %v4198_v57 = vmul.f32 %v4631_v4, %v7941_v3 }
 0x3fd   : > { %v4187_v5 = vadd.f32 1e-06, %v4179_v43  ;;  %v4188_v58 = vadd.f32 1e-06, %v4180_v34  ;;  %v4173_v37 = vadd.f32 %v4172_v28, %v4171_v20 }
 0x3fe   : > { %v4206_v40 = vmul.f32 %v4198_v57, %v8773_v44 }
 0x3ff   : > { %4640 = vrsqrt.f32 %v4187_v5  ;;  %v4181_v49 = vmul.f32 0.125, %v4173_v37 }
 0x400   : > { %v4214_v36 = vadd.f32 %v4206_v40, %v8774_v60  ;;  %v4633_v62 = vpop.eup %4632  ;;  %4642 = vrsqrt.f32 %v4188_v58 }
 0x401   : > { %v4635_v25 = vpop.eup %4634  ;;  %v4199_v3 = vmul.f32 %v4633_v62, %v7954_v14  ;;  %v4189_v27 = vadd.f32 1e-06, %v4181_v49 }
 0x402   : > { %4343 = vst [vmem:[%s7351_s22 + $0xc0] sm:$0xff] %v4214_v36  ;;  %v4200_v6 = vmul.f32 %v4635_v25, %v7957_v61 }
 0x403   : > { %v4207_v18 = vmul.f32 %v4199_v3, %v8773_v44  ;;  %4644 = vrsqrt.f32 %v4189_v27 }
 0x404   : > { %v4637_v48 = vpop.eup %4636  ;;  %v4208_v39 = vmul.f32 %v4200_v6, %v8773_v44 }
 0x405   : > { %v4639_v16 = vpop.eup %4638  ;;  %v4215_v13 = vadd.f32 %v4207_v18, %v8774_v60  ;;  %v4201_v32 = vmul.f32 %v4637_v48, %v7965_v31 }
 0x406   : > { %v4216_v33 = vadd.f32 %v4208_v39, %v8774_v60  ;;  %v4202_v14 = vmul.f32 %v4639_v16, %v7968_v21 }
 0x407   : > { %4344 = vst [vmem:[%s7351_s22 + $0xc8] sm:$0xff] %v4215_v13  ;;  %v4209_v61 = vmul.f32 %v4201_v32, %v8773_v44  ;;  %v3554_v17 = vpop.permute.xlu0 %3553 }
 0x408   : > { %4345 = vst [vmem:[%s7351_s22 + $0xd0] sm:$0xff] %v4216_v33  ;;  %v4210_v53 = vmul.f32 %v4202_v14, %v8773_v44 }
 0x409   : > { %v4641_v22 = vpop.eup %4640  ;;  %v4217_v24 = vadd.f32 %v4209_v61, %v8774_v60  ;;  %v3556_v51 = vpop.permute.xlu1 %3555 }
 0x40a   : > { %v4643_v2 = vpop.eup %4642  ;;  %v4218_v30 = vadd.f32 %v4210_v53, %v8774_v60  ;;  %v4203_v31 = vmul.f32 %v4641_v22, %v7975_v8  ;;  %v3571_v0 = vsel %vm2292_vm2, %v3554_v17, %v3556_v51 }
 0x40b   : > { %4346 = vst [vmem:[%s7351_s22 + $0xd8] sm:$0xff] %v4217_v24  ;;  %v4204_v19 = vmul.f32 %v4643_v2, %v7978_v1  ;;  %v3558_v56 = vpop.permute.xlu0 %3557  ;;  %4335 = vst [vmem:[%s7351_s22 + $0x80] sm:$0xff] %v3571_v0 }
 0x40c   : > { %4347 = vst [vmem:[%s7351_s22 + $0xe0] sm:$0xff] %v4218_v30  ;;  %v4211_v21 = vmul.f32 %v4203_v31, %v8773_v44  ;;  %v3572_v52 = vsel %vm2292_vm2, %v3556_v51, %v3558_v56 }
 0x40d   : > { %v4212_v42 = vmul.f32 %v4204_v19, %v8773_v44  ;;  %v4645_v59 = vpop.eup %4644  ;;  %4336 = vst [vmem:[%s7351_s22 + $0x88] sm:$0xff] %v3572_v52 }
 0x40e   : > { %v4219_v47 = vadd.f32 %v4211_v21, %v8774_v60  ;;  %v4205_v50 = vmul.f32 %v4645_v59, %v7985_v63  ;;  %v3560_v63 = vpop.permute.xlu1 %3559 }
 0x40f   : > { %v4220_v38 = vadd.f32 %v4212_v42, %v8774_v60  ;;  %v3562_v46 = vpop.permute.xlu0 %3561  ;;  %v3573_v11 = vsel %vm2292_vm2, %v3558_v56, %v3560_v63 }
 0x410   : > { %4348 = vst [vmem:[%s7351_s22 + $0xe8] sm:$0xff] %v4219_v47  ;;  %v4213_v8 = vmul.f32 %v4205_v50, %v8773_v44  ;;  %v3574_v26 = vsel %vm2292_vm2, %v3560_v63, %v3562_v46  ;;  %4337 = vst [vmem:[%s7351_s22 + $0x90] sm:$0xff] %v3573_v11 }
 0x411   : > { %4349 = vst [vmem:[%s7351_s22 + $0xf0] sm:$0xff] %v4220_v38  ;;  %4338 = vst [vmem:[%s7351_s22 + $0x98] sm:$0xff] %v3574_v26 }
 0x412   : > { %v4221_v1 = vadd.f32 %v4213_v8, %v8774_v60 }
 0x414   : > { %4350 = vst [vmem:[%s7351_s22 + $0xf8] sm:$0xff] %v4221_v1 }
 0x417   : > { %v3564_v41 = vpop.permute.xlu1 %3563 }
 0x418   : > { %v3575_v23 = vsel %vm2292_vm2, %v3562_v46, %v3564_v41 }
 0x419   : > { %4339 = vst [vmem:[%s7351_s22 + $0xa0] sm:$0xff] %v3575_v23 }
 0x41b   : > { %v3568_v7 = vpop.permute.xlu1 %3567 }
 0x422   : > { %v3566_v15 = vpop.permute.xlu0 %3565 }
 0x423   : > { %v3576_v12 = vsel %vm2292_vm2, %v3564_v41, %v3566_v15  ;;  %v3577_v55 = vsel %vm2292_vm2, %v3566_v15, %v3568_v7 }
 0x424   : > { %4340 = vst [vmem:[%s7351_s22 + $0xa8] sm:$0xff] %v3576_v12  ;;  %4341 = vst [vmem:[%s7351_s22 + $0xb0] sm:$0xff] %v3577_v55 }
 0x426   : > { %v3570_v35 = vpop.permute.xlu0 %3569 }
 0x427   : > { %v3578_v29 = vsel %vm2292_vm2, %v3568_v7, %v3570_v35 }
 0x428   : > { %4342 = vst [vmem:[%s7351_s22 + $0xb8] sm:$0xff] %v3578_v29 }
 0x429 PF: > { %s16_s21 = sadd.s32 1, %s4652_s21  }
 0x42a   : > { %p13_p4 = scmp.ge.s32.totalorder %s16_s21, 4  }
 0x42c   :  { %15 = sbr.rel (!%p13_p4) target bundleno = 1 (0x1), region = 77 }

// kernel: feature_pyramid.7
= control target key start
LH: loop header
LB: loop body
LE: loop exit
PB: predicated region body
PF: predicated region fallthrough
CT: control target
= control target key end

     0   :  { %s627_s15 = smov 0   ;;  %s682_s0 = inlined_call_operand.vmem [shape: f32[2,4,8,64], index: 0, kind: input, shape index: {}]   ;;  %s683_s1 = inlined_call_operand.vmem [shape: f32[8,9], index: 1, kind: input, shape index: {}]   ;;  %s684_s2 = inlined_call_operand.vmem [shape: f32[8,1], index: 2, kind: input, shape index: {}]   ;;  %s685_s3 = inlined_call_operand.vmem [shape: f32[8,1], index: 3, kind: input, shape index: {}]   ;;  %s686_s4 = inlined_call_operand.vmem [shape: f32[2,8,64], index: 4, kind: output, shape index: {}]  }
   0x1 LB: > { %s510_s16 = sadd.s32 4294967295, %s578_s15   ;;  %p514_p0 = scmp.ge.s32.totalorder %s578_s15, 1  ;;  %s578_s15 = sphi %s627_s15, %s14_s15  }
   0x2   : > { %p162_p1 = scmp.lt.s32.totalorder %s578_s15, 3 }
   0x4   : > { %p163_p2 = pnand %p514_p0, %p162_p1 }
   0x5   : > { %v638_v0 = vld [vmem:[%s683_s1] sm:$0xff] (!%p163_p2)  ;;  %v580_v1 = vmov (!%p163_p2), 3   ;;  %v581_v2 = vmov (!%p163_p2), 1   ;;  %vm213_vm0 = vcmask (!%p163_p2), 523264   ;;  %p187_p3 = scmp.lt.s32.totalorder (!%p163_p2), %s510_s16, 1  ;;  %v219_v3 = vlaneseq (!%p163_p2)  ;;  %s586_s23 = smov (!%p163_p2), 121  }
   0x6   : > { %166 = sbr.rel (%p163_p2) target bundleno = 457 (0x1c9), region = 36  ;;  %558 = vset.pattern.permute.xlu1 (!%p163_p2), %v580_v1  ;;  %556 = vset.pattern.permute.xlu0 (!%p163_p2), %v581_v2  ;;  %v582_v4 = vmov (!%p163_p2), 0.0   ;;  %v583_v6 = vmov (!%p163_p2), 4   ;;  %v584_v7 = vmov (!%p163_p2), 2   ;;  %v585_v16 = vmov (!%p163_p2), 5   ;;  %s588_s24 = smov (!%p163_p2), 127  }
   0x7   : > { %299 = vperm.xlu1 (!%p163_p2), %558, %v638_v0   ;;  %257 = vperm.xlu0 (!%p163_p2), %556, %v638_v0   ;;  %212 = vst [vmem:[#allocation2 + $0x8] sm:$0xff] (!%p163_p2), %v582_v4  ;;  %v220_v5 = vand.u32 (!%p163_p2), 127, %v219_v3  ;;  %v587_v19 = vmov (!%p163_p2), 8   ;;  %v589_v21 = vmov (!%p163_p2), 6   ;;  %v590_v22 = vmov (!%p163_p2), 7   ;;  %s591_s25 = smov (!%p163_p2), 9  }
   0x8   : > { %v592_v24 = vmov (!%p163_p2), 0   ;;  %s593_s26 = smov (!%p163_p2), 1   ;;  %s594_s27 = smov (!%p163_p2), 119   ;;  %v217_v59 = vld [vmem:[%s684_s2] sm:$0xff] (!%p163_p2)  ;;  %vm268_vm3 = vcmask (!%p163_p2), 1039360   ;;  %vm292_vm4 = vcmask (!%p163_p2), 1031168  }
   0x9   : > { %v225_v8 = vand.u32 (!%p163_p2), 7, %v220_v5  ;;  %s595_s28 = smov (!%p163_p2), 7   ;;  %s596_s29 = smov (!%p163_p2), 126   ;;  %v218_v61 = vld [vmem:[%s685_s3] sm:$0xff] (!%p163_p2)  ;;  %vm315_vm5 = vcmask (!%p163_p2), 982016   ;;  %vm388_vm6 = vcmask (!%p163_p2), 1048504  }
   0xa   : > { %s597_s30 = smov (!%p163_p2), 120   ;;  %s598_s5 = smov (!%p163_p2), 118   ;;  %vm396_vm7 = vcmask (!%p163_p2), 449536   ;;  %vm453_vm8 = vcmask (!%p163_p2), 72704  }
   0xb   : > { %559 = vset.pattern.permute.xlu1 (!%p163_p2), %v583_v6  ;;  %557 = vset.pattern.permute.xlu0 (!%p163_p2), %v584_v7  ;;  %vm236_vm1 = vcmp.ne.s32.totalorder (!%p163_p2), %v225_v8, 7  ;;  %vm233_vm2 = vcmp.ne.s32.totalorder (!%p163_p2), %v225_v8, 0  ;;  %s599_s6 = smov (!%p163_p2), 112   ;;  %s600_s7 = smov (!%p163_p2), 111  }
   0xc   : > { %322 = vperm.xlu1 (!%p163_p2), %559, %v638_v0   ;;  %275 = vperm.xlu0 (!%p163_p2), %557, %v638_v0   ;;  %v522_v14 = vsel (!%p163_p2), %vm236_vm1, 1.0, %v582_v4  ;;  %v521_v18 = vsel (!%p163_p2), %vm233_vm2, 1.0, %v582_v4  ;;  %s601_s10 = smov (!%p163_p2), 110  }
   0xd   : > { %s688_s16 = smov (!%p187_p3, %s510_s16), 1 }
   0xe   : > { %s525_s19 = sshll.u32 %s688_s16, 5  ;;  %s517_s13 = sshll.u32 %s688_s16, 3 }
   0xf   : > { %s191_s22 = scalar_lea.vmem %s682_s0, %s525_s19  ;;  %s195_s18 = scalar_lea.vmem %s686_s4, %s517_s13 }
  0x10   : > { %v196_v9 = vld [vmem:[%s191_s22] sm:$0xff]  ;;  %v518_v10 = vld [vmem:[%s191_s22 + $0x8] sm:$0xff]  ;;  %v519_v11 = vld [vmem:[%s191_s22 + $0x10] sm:$0xff]  ;;  %560 = vset.pattern.permute.xlu1 %v585_v16  ;;  %281 = vrot.lane.b32.xlu0 %v522_v14, %s586_s23 }
  0x11   : > { %v199_v12 = vmax.f32 %v196_v9, %v518_v10  ;;  %v520_v13 = vld [vmem:[%s191_s22 + $0x18] sm:$0xff]  ;;  %333 = vperm.xlu1 %560, %v638_v0   ;;  %563 = vset.pattern.permute.xlu0 %v587_v19 }
  0x12   : > { %v204_v15 = vmax.f32 %v519_v11, %v520_v13 }
  0x14   : > { %v205_v17 = vmax.f32 %v199_v12, %v204_v15  ;;  %304 = vrot.lane.b32.xlu0 %v521_v18, %s588_s24 }
  0x15   : > { %561 = vset.pattern.permute.xlu1 %v589_v21 }
  0x16   : > { %v207_v20 = vmul.f32 0.70710677, %v205_v17  ;;  %348 = vperm.xlu1 %561, %v638_v0   ;;  %v206_v23 = vmul.f32 0.5, %v205_v17 }
  0x18   : > { %566 = verf.f32 %v207_v20  ;;  %374 = vperm.xlu0 %563, %v638_v0  }
  0x1a   : > { %562 = vset.pattern.permute.xlu1 %v590_v22 }
  0x1b   : > { %363 = vperm.xlu1 %562, %v638_v0  }
  0x1c   : > { %378 = vrot.lane.b32.xlu0 %v522_v14, %s591_s25 }
  0x1d   : > { %565 = vset.pattern.permute.xlu0 %v592_v24 }
  0x1f   : > { %337 = vrot.lane.b32.xlu1 %v522_v14, %s593_s26 }
  0x20   : > { %564 = vset.pattern.permute.xlu1 %v592_v24  ;;  %249 = vrot.lane.b32.xlu0 %v521_v18, %s594_s27 }
  0x22   : > { %v567_v25 = vpop.eup %566 }
  0x23   : > { %v209_v26 = vadd.f32 1.0, %v567_v25  ;;  %352 = vrot.lane.b32.xlu1 %v521_v18, %s595_s28 }
  0x25   : > { %v210_v27 = vmul.f32 %v209_v26, %v206_v23 }
  0x27   : > { %215 = vst.msk [vmem:[#allocation2 + $0x8] sm:$0xff] %vm213_vm0, %v210_v27  ;;  %243 = vperm.xlu1 %564, %v638_v0  }
  0x2e   : > { %v240_v29 = vld [vmem:[#allocation2 + $0x8] sm:$0xff] }
  0x86   : > { %v300_v28 = vpop.permute.xlu1 %299  ;;  %v258_v30 = vpop.permute.xlu0 %257 }
  0x87   : > { %v260_v31 = vmul.f32 0.0, %v258_v30  ;;  %v261_v32 = vmul.f32 %v258_v30, %v240_v29  ;;  %v302_v41 = vmul.f32 0.0, %v300_v28  ;;  %v303_v42 = vmul.f32 %v300_v28, %v240_v29 }
  0x89   : > { %264 = vrot.lane.b32.xlu1 %v260_v31, %s588_s24  ;;  %266 = vrot.lane.b32.xlu0 %v261_v32, %s588_s24 }
  0x8b   : > { %v323_v33 = vpop.permute.xlu1 %322  ;;  %v276_v34 = vpop.permute.xlu0 %275 }
  0x8c   : > { %v278_v35 = vmul.f32 0.0, %v276_v34  ;;  %v279_v36 = vmul.f32 %v276_v34, %v240_v29  ;;  %v325_v47 = vmul.f32 %v323_v33, %v240_v29 }
  0x8f   : > { %v282_v37 = vpop.permute.xlu0 %281 }
  0x90   : > { %v284_v38 = vmul.f32 %v282_v37, %v278_v35  ;;  %v285_v39 = vmul.f32 %v282_v37, %v279_v36  ;;  %v334_v40 = vpop.permute.xlu1 %333 }
  0x91   : > { %v336_v49 = vmul.f32 %v334_v40, %v240_v29 }
  0x92   : > { %288 = vrot.lane.b32.xlu1 %v284_v38, %s596_s29  ;;  %290 = vrot.lane.b32.xlu0 %v285_v39, %s596_s29 }
  0x93   : > { %v305_v43 = vpop.permute.xlu0 %304 }
  0x94   : > { %v307_v44 = vmul.f32 %v305_v43, %v302_v41  ;;  %v308_v45 = vmul.f32 %v305_v43, %v303_v42 }
  0x95   : > { %v349_v46 = vpop.permute.xlu1 %348 }
  0x96   : > { %311 = vrot.lane.b32.xlu1 %v307_v44, %s597_s30  ;;  %313 = vrot.lane.b32.xlu0 %v308_v45, %s597_s30  ;;  %v351_v53 = vmul.f32 %v349_v46, %v240_v29 }
  0x97   : > { %v375_v51 = vpop.permute.xlu0 %374 }
  0x98   : > { %v377_v56 = vmul.f32 %v375_v51, %v240_v29 }
  0x9a   : > { %v364_v48 = vpop.permute.xlu1 %363  ;;  %327 = vrot.lane.b32.xlu1 %v325_v47, %s594_s27 }
  0x9b   : > { %v366_v55 = vmul.f32 %v364_v48, %v240_v29  ;;  %v379_v58 = vpop.permute.xlu0 %378 }
  0x9c   : > { %v381_v60 = vmul.f32 %v379_v58, %v377_v56 }
  0x9e   : > { %v338_v50 = vpop.permute.xlu1 %337 }
  0x9f   : > { %v340_v52 = vmul.f32 %v338_v50, %v336_v49  ;;  %v250_v63 = vpop.permute.xlu0 %249 }
  0xa1   : > { %342 = vrot.lane.b32.xlu0 %v340_v52, %s598_s5 }
  0xa2   : > { %v353_v54 = vpop.permute.xlu1 %352 }
  0xa3   : > { %v355_v57 = vmul.f32 %v353_v54, %v351_v53 }
  0xa5   : > { %357 = vrot.lane.b32.xlu1 %v355_v57, %s599_s6  ;;  %368 = vrot.lane.b32.xlu0 %v366_v55, %s600_s7 }
  0xa6   : > { %v244_v62 = vpop.permute.xlu1 %243 }
  0xa7   : > { %v246_v2 = vmul.f32 0.0, %v244_v62  ;;  %v247_v3 = vmul.f32 %v244_v62, %v240_v29 }
  0xa9   : > { %383 = vrot.lane.b32.xlu1 %v381_v60, %s601_s10  ;;  %435 = vperm.xlu0 %565, %v217_v59   ;;  %v252_v6 = vmul.f32 %v250_v63, %v246_v2  ;;  %v253_v8 = vmul.f32 %v250_v63, %v247_v3 }
  0xad   : > { %442 = vperm.xlu1 %564, %v218_v61  }
  0xfb   : > { %v265_v0 = vpop.permute.xlu1 %264  ;;  %v267_v1 = vpop.permute.xlu0 %266 }
  0xfc   : > { %v269_v7 = vsel %vm268_vm3, %v265_v0, %v267_v1  ;;  %v273_v13 = vadd.f32 %v267_v1, %v253_v8 }
  0xfd   : > { %v272_v9 = vadd.f32 %v269_v7, %v252_v6 }
 0x104   : > { %v289_v4 = vpop.permute.xlu1 %288  ;;  %v291_v5 = vpop.permute.xlu0 %290 }
 0x105   : > { %v293_v12 = vsel %vm292_vm4, %v289_v4, %v291_v5  ;;  %v297_v16 = vadd.f32 %v291_v5, %v273_v13 }
 0x106   : > { %v296_v15 = vadd.f32 %v293_v12, %v272_v9 }
 0x108   : > { %v312_v10 = vpop.permute.xlu1 %311  ;;  %v314_v11 = vpop.permute.xlu0 %313 }
 0x109   : > { %v316_v14 = vsel %vm315_vm5, %v312_v10, %v314_v11  ;;  %v320_v19 = vadd.f32 %v314_v11, %v297_v16 }
 0x10a   : > { %v319_v17 = vadd.f32 %v316_v14, %v296_v15 }
 0x10c   : > { %v328_v18 = vpop.permute.xlu1 %327 }
 0x10d   : > { %v330_v21 = vadd.f32 %v328_v18, %v319_v17  ;;  %v331_v22 = vadd.f32 %v328_v18, %v320_v19 }
 0x113   : > { %v343_v20 = vpop.permute.xlu0 %342 }
 0x114   : > { %v345_v23 = vadd.f32 %v343_v20, %v330_v21  ;;  %v346_v24 = vadd.f32 %v343_v20, %v331_v22 }
 0x117   : > { %v358_v25 = vpop.permute.xlu1 %357  ;;  %v369_v28 = vpop.permute.xlu0 %368 }
 0x118   : > { %v360_v26 = vadd.f32 %v358_v25, %v345_v23  ;;  %v361_v27 = vadd.f32 %v358_v25, %v346_v24 }
 0x11a   : > { %v371_v29 = vadd.f32 %v369_v28, %v360_v26  ;;  %v372_v30 = vadd.f32 %v369_v28, %v361_v27 }
 0x11b   : > { %v384_v31 = vpop.permute.xlu1 %383 }
 0x11c   : > { %v386_v32 = vadd.f32 %v384_v31, %v371_v29  ;;  %v387_v33 = vadd.f32 %v384_v31, %v372_v30 }
 0x11e   : > { %v389_v34 = vsel %vm388_vm6, %v386_v32, 0.0  ;;  %v397_v35 = vsel %vm396_vm7, %v387_v33, 0.0 }
 0x11f   : > { %v390_v36 = vrot.slane %v389_v34, 4  ;;  %v398_v37 = vrot.slane %v397_v35, 4 }
 0x121   : > { %v391_v38 = vadd.f32 %v390_v36, %v389_v34  ;;  %v399_v39 = vadd.f32 %v398_v37, %v397_v35 }
 0x123   : > { %v392_v40 = vrot.slane %v391_v38, 2  ;;  %v400_v41 = vrot.slane %v399_v39, 2 }
 0x125   : > { %v393_v42 = vadd.f32 %v392_v40, %v391_v38  ;;  %v401_v43 = vadd.f32 %v400_v41, %v399_v39 }
 0x127   : > { %v394_v44 = vrot.slane %v393_v42, 1  ;;  %v402_v45 = vrot.slane %v401_v43, 1 }
 0x128   : > { %v436_v9 = vpop.permute.xlu0 %435 }
 0x129   : > { %v395_v46 = vadd.f32 %v394_v44, %v393_v42  ;;  %v403_v47 = vadd.f32 %v402_v45, %v401_v43 }
 0x12b   : > { %v405_v48 = vmul.f32 0.125, %v395_v46  ;;  %v406_v49 = vmul.f32 0.125, %v403_v47 }
 0x12c   : > { %v443_v14 = vpop.permute.xlu1 %442 }
 0x12d   : > { %v407_v50 = vsub.f32 %v386_v32, %v405_v48  ;;  %v408_v51 = vsub.f32 %v387_v33, %v406_v49 }
 0x12f   : > { %v409_v52 = vmul.f32 %v407_v50, %v407_v50  ;;  %v410_v53 = vmul.f32 %v408_v51, %v408_v51 }
 0x131   : > { %v411_v54 = vsel %vm388_vm6, %v409_v52, 0.0  ;;  %v418_v55 = vsel %vm396_vm7, %v410_v53, 0.0 }
 0x132   : > { %v412_v56 = vrot.slane %v411_v54, 4  ;;  %v419_v57 = vrot.slane %v418_v55, 4 }
 0x134   : > { %v413_v58 = vadd.f32 %v412_v56, %v411_v54  ;;  %v420_v59 = vadd.f32 %v419_v57, %v418_v55 }
 0x136   : > { %v414_v60 = vrot.slane %v413_v58, 2  ;;  %v421_v61 = vrot.slane %v420_v59, 2 }
 0x138   : > { %v415_v62 = vadd.f32 %v414_v60, %v413_v58  ;;  %v422_v63 = vadd.f32 %v421_v61, %v420_v59 }
 0x13a   : > { %v416_v0 = vrot.slane %v415_v62, 1  ;;  %v423_v1 = vrot.slane %v422_v63, 1 }
 0x13c   : > { %v417_v2 = vadd.f32 %v416_v0, %v415_v62  ;;  %v424_v3 = vadd.f32 %v423_v1, %v422_v63 }
 0x13e   : > { %v425_v4 = vmul.f32 0.125, %v417_v2  ;;  %v426_v5 = vmul.f32 0.125, %v424_v3 }
 0x140   : > { %v427_v6 = vadd.f32 1e-06, %v425_v4  ;;  %v428_v7 = vadd.f32 1e-06, %v426_v5 }
 0x142   : > { %568 = vrsqrt.f32 %v427_v6 }
 0x143   : > { %570 = vrsqrt.f32 %v428_v7 }
 0x14c   : > { %v569_v8 = vpop.eup %568 }
 0x14d   : > { %v571_v10 = vpop.eup %570  ;;  %v431_v11 = vmul.f32 %v569_v8, %v407_v50 }
 0x14e   : > { %v432_v12 = vmul.f32 %v571_v10, %v408_v51 }
 0x14f   : > { %v438_v13 = vmul.f32 %v436_v9, %v431_v11 }
 0x150   : > { %v439_v15 = vmul.f32 %v436_v9, %v432_v12 }
 0x151   : > { %v445_v16 = vadd.f32 %v443_v14, %v438_v13 }
 0x152   : > { %v446_v17 = vadd.f32 %v443_v14, %v439_v15 }
 0x153   : > { %449 = vrot.lane.b32.xlu1 %v445_v16, %s591_s25 }
 0x154   : > { %451 = vrot.lane.b32.xlu0 %v446_v17, %s591_s25 }
 0x1c5   : > { %v450_v18 = vpop.permute.xlu1 %449 }
 0x1c6   : > { %v452_v19 = vpop.permute.xlu0 %451 }
 0x1c7   : > { %v454_v20 = vsel %vm453_vm8, %v450_v18, %v452_v19 }
 0x1c8   : > { %456 = vst.msk [vmem:[%s195_s18] sm:$0xff] %vm213_vm0, %v454_v20 }
 0x1c9 PF: > { %s14_s15 = sadd.s32 1, %s578_s15  }
 0x1ca   : > { %p11_p4 = scmp.ge.s32.totalorder %s14_s15, 4  }
 0x1cc   :  { %13 = sbr.rel (!%p11_p4) target bundleno = 1 (0x1), region = 69 }

</bundles_post_ra>
